<compile_context>
chip_gen: v7x
topology: tpu7x:2x2x1
jax: 0.10.0
libtpu: 0.0.40
codegen_flags: <defaults>
</compile_context>

<pallas_src>
import functools

import jax
import jax.numpy as jnp
from jax.experimental import pallas as pl
from jax.experimental.pallas import tpu as pltpu


# ------------------------------ Pallas kernel ------------------------------- #

def gb_fused_kernel(x_ref, mask_ref, stem_w_ref, stem_b_ref,
                    w1_ref, b1_ref, w2_ref, b2_ref,
                    out_ref, xpad, apad,
                    *, H, W, C, num_blocks, base):
    Wp = W + 2
    L = H * Wp                         # rows of the padded-pitch activation matrix
    R = apad.shape[0]                  # scratch rows (>= base + L + Wp + 1)
    act_dt = apad.dtype                # bf16: MXU-operand precision for taps

    # ---- halo-only zeroing --------------------------------------------------
    # Interior rows [base, base+L) are fully overwritten every layer; the pitch
    # columns inside the interior are kept zero by `mask` on every store.  Only
    # the strips above/below the interior must be recleared each grid step
    # (scratch persists across steps; with "parallel" semantics a core may never
    # run step 0, so this cannot be gated on program_id == 0).
    apad[0:base, :] = jnp.zeros((base, C), act_dt)
    apad[base + L:R, :] = jnp.zeros((R - base - L, C), act_dt)
    # Stem scratch has only a handful of channels -> clearing it whole is cheap.
    xpad[...] = jnp.zeros_like(xpad)

    mask = mask_ref[...]               # (L, C) f32: 1.0 on real pixels, 0.0 on pitch cols

    # ---- scatter the input image into the zero-haloed flat scratch ----------
    for y in range(H):                 # static unroll: H small row stores (stem only)
        s = base + y * Wp
        xpad[s:s + W, :] = x_ref[0, y].astype(xpad.dtype)

    def conv3x3(src, get_w, bias):
        """3x3 'same' conv: 9 contiguous flat-row taps, 9 accumulated MXU dots."""
        acc = jnp.zeros((L, C), jnp.float32)
        for ky in range(3):
            for kx in range(3):
                s = base + (ky - 1) * Wp + (kx - 1)
                tap = src[s:s + L, :]                         # contiguous bf16 slice
                acc = acc + jnp.dot(tap, get_w(ky * 3 + kx),
                                    preferred_element_type=jnp.float32)
        return acc + bias

    # ---- stem: relu(conv3x3(x)) ---------------------------------------------
    a = jnp.maximum(conv3x3(xpad, lambda t: stem_w_ref[t], stem_b_ref[...]), 0.0) * mask
    apad[base:base + L, :] = a.astype(act_dt)

    # ---- residual blocks: relu(x + conv2(relu(conv1(x)))) --------------------
    # Weights indexed dynamically (streamed); residual carried as an f32 value;
    # apad is reused for the inner activation h.
    def block(i, a_val):
        h = jnp.maximum(conv3x3(apad, lambda t: w1_ref[i, t], b1_ref[i]), 0.0) * mask
        apad[base:base + L, :] = h.astype(act_dt)
        y = conv3x3(apad, lambda t: w2_ref[i, t], b2_ref[i])
        a_new = jnp.maximum(a_val + y, 0.0) * mask
        apad[base:base + L, :] = a_new.astype(act_dt)         # feeds next block's conv1
        return a_new

    a = jax.lax.fori_loop(0, num_blocks, block, a)

    out_ref[0] = a.astype(out_ref.dtype)                      # (L, C); pitch cols are 0


# --------------------------- module forward (Pallas) ------------------------ #

def gb_feature_extractor_forward(x_nchw, params):
    """Fused Pallas forward.  Input/output NCHW to match the PyTorch module."""
    N, Cin, H, W = x_nchw.shape
    C = params["stem_w"].shape[-1]
    blocks = params["blocks"]
    num_blocks = len(blocks)

    Wp = W + 2
    L = H * Wp
    base = ((Wp + 1 + 15) // 16) * 16        # 16-aligned first interior row
    R = base + L + base                      # scratch rows: covers every tap window
    Cinp = ((Cin + 7) // 8) * 8              # pad input channels to a full sublane

    x = jnp.transpose(x_nchw, (0, 2, 3, 1))  # NCHW -> NHWC
    if Cinp != Cin:
        x = jnp.pad(x, ((0, 0), (0, 0), (0, 0), (0, Cinp - Cin)))

    # One-time weight prep (tiny): HWIO (3,3,ci,co) -> per-tap (9, ci, co) bf16
    # MXU operands; biases stay f32.
    stem_w = params["stem_w"]
    if Cinp != Cin:
        stem_w = jnp.pad(stem_w, ((0, 0), (0, 0), (0, Cinp - Cin), (0, 0)))
    stem_w = stem_w.reshape(9, Cinp, C).astype(jnp.bfloat16)
    stem_b = params["stem_b"].reshape(1, C).astype(jnp.float32)
    if num_blocks > 0:
        w1s = jnp.stack([b["w1"].reshape(9, C, C) for b in blocks]).astype(jnp.bfloat16)
        b1s = jnp.stack([b["b1"].reshape(1, C) for b in blocks]).astype(jnp.float32)
        w2s = jnp.stack([b["w2"].reshape(9, C, C) for b in blocks]).astype(jnp.bfloat16)
        b2s = jnp.stack([b["b2"].reshape(1, C) for b in blocks]).astype(jnp.float32)
    else:                                    # dummies, never read (fori_loop is empty)
        w1s = w2s = jnp.zeros((1, 9, C, C), jnp.bfloat16)
        b1s = b2s = jnp.zeros((1, 1, C), jnp.float32)

    # Pitch-column mask: row r of the (L, C) activation matrix is a real pixel
    # iff (r mod Wp) < W.  Precomputed (grid-invariant input) so the kernel needs
    # no in-kernel iota/mod/reshape.
    mask = (jnp.arange(Wp) < W).astype(jnp.float32)
    mask = jnp.broadcast_to(mask[None, :, None], (H, Wp, C)).reshape(L, C)

    kernel = functools.partial(gb_fused_kernel, H=H, W=W, C=C,
                               num_blocks=num_blocks, base=base)

    out = pl.pallas_call(
        kernel,
        out_shape=jax.ShapeDtypeStruct((N, L, C), x_nchw.dtype),
        grid=(N,),
        in_specs=[
            pl.BlockSpec((1, H, W, Cinp), lambda n: (n, 0, 0, 0)),
            pl.BlockSpec((L, C), lambda n: (0, 0)),
            pl.BlockSpec((9, Cinp, C), lambda n: (0, 0, 0)),
            pl.BlockSpec((1, C), lambda n: (0, 0)),
            pl.BlockSpec(w1s.shape, lambda n: (0, 0, 0, 0)),
            pl.BlockSpec(b1s.shape, lambda n: (0, 0, 0)),
            pl.BlockSpec(w2s.shape, lambda n: (0, 0, 0, 0)),
            pl.BlockSpec(b2s.shape, lambda n: (0, 0, 0)),
        ],
        out_specs=pl.BlockSpec((1, L, C), lambda n: (n, 0, 0)),
        scratch_shapes=[
            pltpu.VMEM((R, Cinp), jnp.bfloat16),   # flat zero-haloed stem input
            pltpu.VMEM((R, C), jnp.bfloat16),      # flat zero-haloed running activation
        ],
        compiler_params=pltpu.CompilerParams(
            dimension_semantics=("parallel",)),    # v7x: batch split over 2 TCs
    )(x, mask, stem_w, stem_b, w1s, b1s, w2s, b2s)

    out = out.reshape(N, H, Wp, C)[:, :, :W, :]    # drop the 2 pitch columns per row
    return jnp.transpose(out, (0, 3, 1, 2))        # NHWC -> NCHW


# ------------------------------ pure-JAX reference --------------------------- #

def _conv3x3_ref(x_nhwc, w, b):
    y = jax.lax.conv_general_dilated(
        x_nhwc, w, window_strides=(1, 1), padding="SAME",
        dimension_numbers=("NHWC", "HWIO", "NHWC"))
    return y + b


def gb_feature_extractor_ref(x_nchw, params):
    x = jnp.transpose(x_nchw, (0, 2, 3, 1))
    x = jax.nn.relu(_conv3x3_ref(x, params["stem_w"], params["stem_b"]))
    for blk in params["blocks"]:
        h = jax.nn.relu(_conv3x3_ref(x, blk["w1"], blk["b1"]))
        x = jax.nn.relu(x + _conv3x3_ref(h, blk["w2"], blk["b2"]))
    return jnp.transpose(x, (0, 3, 1, 2))


# ------------------------------ param construction --------------------------- #

def init_params(key, in_channels, num_layers, layer_size):
    def conv_init(k, cin, cout):
        kw, kb = jax.random.split(k)
        bound = 1.0 / jnp.sqrt(cin * 9.0)                        # PyTorch Conv2d default
        w = jax.random.uniform(kw, (3, 3, cin, cout), jnp.float32, -bound, bound)
        b = jax.random.uniform(kb, (cout,), jnp.float32, -bound, bound)
        return w, b

    keys = jax.random.split(key, num_layers)
    stem_w, stem_b = conv_init(keys[0], in_channels, layer_size)
    blocks = []
    for i in range(num_layers - 1):
        k1, k2 = jax.random.split(keys[i + 1])
        w1, b1 = conv_init(k1, layer_size, layer_size)
        w2, b2 = conv_init(k2, layer_size, layer_size)
        blocks.append({"w1": w1, "b1": b1, "w2": w2, "b2": b2})
    return {"stem_w": stem_w, "stem_b": stem_b, "blocks": blocks}


# ----------------------------------- main ------------------------------------ #

if __name__ == "__main__":
    N, C_IN, H, W = 2, 4, 16, 16
    NUM_LAYERS, LAYER_SIZE = 3, 32

    key = jax.random.PRNGKey(0)
    kx, kp = jax.random.split(key)
    x = jax.random.normal(kx, (N, C_IN, H, W), jnp.float32)      # NCHW input
    params = init_params(kp, C_IN, NUM_LAYERS, LAYER_SIZE)

    out = jax.jit(gb_feature_extractor_forward)(x, params)
    out = jax.block_until_ready(out)

    ref = gb_feature_extractor_ref(x, params)
    assert out.shape == (N, LAYER_SIZE, H, W), out.shape
    # bf16 MXU operands (f32 accumulation) -> tolerance relaxed vs. pure f32.
    err = float(jnp.max(jnp.abs(out - ref)))
    assert jnp.allclose(out, ref, atol=5e-2, rtol=5e-2), err

    print("KERNEL_OK")
</pallas_src>

<mosaic_0001>
module attributes {stable_mosaic.version = 11 : i64} {
  func.func @gb_fused_kernel(%arg0: i32, %arg1: memref<1x16x16x8xf32, #tpu.memory_space<vmem>>, %arg2: memref<288x32xf32, #tpu.memory_space<vmem>>, %arg3: memref<9x8x32xbf16, #tpu.memory_space<vmem>>, %arg4: memref<1x32xf32, #tpu.memory_space<vmem>>, %arg5: memref<2x9x32x32xbf16, #tpu.memory_space<vmem>>, %arg6: memref<2x1x32xf32, #tpu.memory_space<vmem>>, %arg7: memref<2x9x32x32xbf16, #tpu.memory_space<vmem>>, %arg8: memref<2x1x32xf32, #tpu.memory_space<vmem>>, %arg9: memref<1x288x32xf32, #tpu.memory_space<vmem>>, %arg10: memref<352x8xbf16, #tpu.memory_space<vmem>>, %arg11: memref<352x32xbf16, #tpu.memory_space<vmem>>) attributes {dimension_semantics = [#tpu.dimension_semantics<parallel>], iteration_bounds = array<i64: 2>, scalar_prefetch = 0 : i64, scratch_operands = 2 : i64, tpu.core_type = #tpu.core_type<tc>, window_params = [{transform_indices = @transform_0, window_bounds = array<i64: 1, 16, 16, 8>}, {pipeline_mode = #tpu.pipeline_mode<synchronous>, transform_indices = @transform_1, window_bounds = array<i64: 288, 32>}, {pipeline_mode = #tpu.pipeline_mode<synchronous>, transform_indices = @transform_2, window_bounds = array<i64: 9, 8, 32>}, {pipeline_mode = #tpu.pipeline_mode<synchronous>, transform_indices = @transform_3, window_bounds = array<i64: 1, 32>}, {pipeline_mode = #tpu.pipeline_mode<synchronous>, transform_indices = @transform_4, window_bounds = array<i64: 2, 9, 32, 32>}, {pipeline_mode = #tpu.pipeline_mode<synchronous>, transform_indices = @transform_5, window_bounds = array<i64: 2, 1, 32>}, {pipeline_mode = #tpu.pipeline_mode<synchronous>, transform_indices = @transform_6, window_bounds = array<i64: 2, 9, 32, 32>}, {pipeline_mode = #tpu.pipeline_mode<synchronous>, transform_indices = @transform_7, window_bounds = array<i64: 2, 1, 32>}, {transform_indices = @transform_8, window_bounds = array<i64: 1, 288, 32>}]} {
    %cst = arith.constant 0.000000e+00 : bf16
    %0 = vector.broadcast %cst : bf16 to vector<32x32xbf16>
    %c0 = arith.constant 0 : index
    %c0_0 = arith.constant 0 : index
    %1 = vector.load %arg11[%c0, %c0_0] : memref<352x32xbf16, #tpu.memory_space<vmem>>, vector<32x32xbf16>
    tpu.vector_store %arg11[%c0, %c0_0], %0 {strides = array<i32>} : memref<352x32xbf16, #tpu.memory_space<vmem>>, vector<32x32xbf16>,
    %cst_1 = arith.constant 0.000000e+00 : bf16
    %2 = vector.broadcast %cst_1 : bf16 to vector<32x32xbf16>
    %c320 = arith.constant 320 : index
    %c0_2 = arith.constant 0 : index
    %3 = vector.load %arg11[%c320, %c0_2] : memref<352x32xbf16, #tpu.memory_space<vmem>>, vector<32x32xbf16>
    tpu.vector_store %arg11[%c320, %c0_2], %2 {strides = array<i32>} : memref<352x32xbf16, #tpu.memory_space<vmem>>, vector<32x32xbf16>,
    %cst_3 = arith.constant 0.000000e+00 : bf16
    %4 = vector.broadcast %cst_3 : bf16 to vector<352x8xbf16>
    %c0_4 = arith.constant 0 : index
    %c0_5 = arith.constant 0 : index
    %5 = vector.load %arg10[%c0_4, %c0_5] : memref<352x8xbf16, #tpu.memory_space<vmem>>, vector<352x8xbf16>
    tpu.vector_store %arg10[%c0_4, %c0_5], %4 {strides = array<i32>} : memref<352x8xbf16, #tpu.memory_space<vmem>>, vector<352x8xbf16>,
    %c0_6 = arith.constant 0 : index
    %c0_7 = arith.constant 0 : index
    %6 = vector.load %arg2[%c0_6, %c0_7] : memref<288x32xf32, #tpu.memory_space<vmem>>, vector<288x32xf32>
    %c0_8 = arith.constant 0 : index
    %c0_9 = arith.constant 0 : index
    %c0_10 = arith.constant 0 : index
    %c0_11 = arith.constant 0 : index
    %7 = vector.load %arg1[%c0_8, %c0_9, %c0_10, %c0_11] : memref<1x16x16x8xf32, #tpu.memory_space<vmem>>, vector<1x1x16x8xf32>
    %8 = vector.shape_cast %7 : vector<1x1x16x8xf32> to vector<16x8xf32>
    %9 = arith.truncf %8 : vector<16x8xf32> to vector<16x8xbf16>
    %c32 = arith.constant 32 : index
    %c0_12 = arith.constant 0 : index
    %10 = vector.load %arg10[%c32, %c0_12] : memref<352x8xbf16, #tpu.memory_space<vmem>>, vector<16x8xbf16>
    tpu.vector_store %arg10[%c32, %c0_12], %9 {strides = array<i32>} : memref<352x8xbf16, #tpu.memory_space<vmem>>, vector<16x8xbf16>,
    %c0_13 = arith.constant 0 : index
    %c1 = arith.constant 1 : index
    %c0_14 = arith.constant 0 : index
    %c0_15 = arith.constant 0 : index
    %11 = vector.load %arg1[%c0_13, %c1, %c0_14, %c0_15] : memref<1x16x16x8xf32, #tpu.memory_space<vmem>>, vector<1x1x16x8xf32>
    %12 = vector.shape_cast %11 : vector<1x1x16x8xf32> to vector<16x8xf32>
    %13 = arith.truncf %12 : vector<16x8xf32> to vector<16x8xbf16>
    %c50 = arith.constant 50 : index
    %c0_16 = arith.constant 0 : index
    %14 = vector.load %arg10[%c50, %c0_16] : memref<352x8xbf16, #tpu.memory_space<vmem>>, vector<16x8xbf16>
    tpu.vector_store %arg10[%c50, %c0_16], %13 {strides = array<i32>} : memref<352x8xbf16, #tpu.memory_space<vmem>>, vector<16x8xbf16>,
    %c0_17 = arith.constant 0 : index
    %c2 = arith.constant 2 : index
    %c0_18 = arith.constant 0 : index
    %c0_19 = arith.constant 0 : index
    %15 = vector.load %arg1[%c0_17, %c2, %c0_18, %c0_19] : memref<1x16x16x8xf32, #tpu.memory_space<vmem>>, vector<1x1x16x8xf32>
    %16 = vector.shape_cast %15 : vector<1x1x16x8xf32> to vector<16x8xf32>
    %17 = arith.truncf %16 : vector<16x8xf32> to vector<16x8xbf16>
    %c68 = arith.constant 68 : index
    %c0_20 = arith.constant 0 : index
    %18 = vector.load %arg10[%c68, %c0_20] : memref<352x8xbf16, #tpu.memory_space<vmem>>, vector<16x8xbf16>
    tpu.vector_store %arg10[%c68, %c0_20], %17 {strides = array<i32>} : memref<352x8xbf16, #tpu.memory_space<vmem>>, vector<16x8xbf16>,
    %c0_21 = arith.constant 0 : index
    %c3 = arith.constant 3 : index
    %c0_22 = arith.constant 0 : index
    %c0_23 = arith.constant 0 : index
    %19 = vector.load %arg1[%c0_21, %c3, %c0_22, %c0_23] : memref<1x16x16x8xf32, #tpu.memory_space<vmem>>, vector<1x1x16x8xf32>
    %20 = vector.shape_cast %19 : vector<1x1x16x8xf32> to vector<16x8xf32>
    %21 = arith.truncf %20 : vector<16x8xf32> to vector<16x8xbf16>
    %c86 = arith.constant 86 : index
    %c0_24 = arith.constant 0 : index
    %22 = vector.load %arg10[%c86, %c0_24] : memref<352x8xbf16, #tpu.memory_space<vmem>>, vector<16x8xbf16>
    tpu.vector_store %arg10[%c86, %c0_24], %21 {strides = array<i32>} : memref<352x8xbf16, #tpu.memory_space<vmem>>, vector<16x8xbf16>,
    %c0_25 = arith.constant 0 : index
    %c4 = arith.constant 4 : index
    %c0_26 = arith.constant 0 : index
    %c0_27 = arith.constant 0 : index
    %23 = vector.load %arg1[%c0_25, %c4, %c0_26, %c0_27] : memref<1x16x16x8xf32, #tpu.memory_space<vmem>>, vector<1x1x16x8xf32>
    %24 = vector.shape_cast %23 : vector<1x1x16x8xf32> to vector<16x8xf32>
    %25 = arith.truncf %24 : vector<16x8xf32> to vector<16x8xbf16>
    %c104 = arith.constant 104 : index
    %c0_28 = arith.constant 0 : index
    %26 = vector.load %arg10[%c104, %c0_28] : memref<352x8xbf16, #tpu.memory_space<vmem>>, vector<16x8xbf16>
    tpu.vector_store %arg10[%c104, %c0_28], %25 {strides = array<i32>} : memref<352x8xbf16, #tpu.memory_space<vmem>>, vector<16x8xbf16>,
    %c0_29 = arith.constant 0 : index
    %c5 = arith.constant 5 : index
    %c0_30 = arith.constant 0 : index
    %c0_31 = arith.constant 0 : index
    %27 = vector.load %arg1[%c0_29, %c5, %c0_30, %c0_31] : memref<1x16x16x8xf32, #tpu.memory_space<vmem>>, vector<1x1x16x8xf32>
    %28 = vector.shape_cast %27 : vector<1x1x16x8xf32> to vector<16x8xf32>
    %29 = arith.truncf %28 : vector<16x8xf32> to vector<16x8xbf16>
    %c122 = arith.constant 122 : index
    %c0_32 = arith.constant 0 : index
    %30 = vector.load %arg10[%c122, %c0_32] : memref<352x8xbf16, #tpu.memory_space<vmem>>, vector<16x8xbf16>
    tpu.vector_store %arg10[%c122, %c0_32], %29 {strides = array<i32>} : memref<352x8xbf16, #tpu.memory_space<vmem>>, vector<16x8xbf16>,
    %c0_33 = arith.constant 0 : index
    %c6 = arith.constant 6 : index
    %c0_34 = arith.constant 0 : index
    %c0_35 = arith.constant 0 : index
    %31 = vector.load %arg1[%c0_33, %c6, %c0_34, %c0_35] : memref<1x16x16x8xf32, #tpu.memory_space<vmem>>, vector<1x1x16x8xf32>
    %32 = vector.shape_cast %31 : vector<1x1x16x8xf32> to vector<16x8xf32>
    %33 = arith.truncf %32 : vector<16x8xf32> to vector<16x8xbf16>
    %c140 = arith.constant 140 : index
    %c0_36 = arith.constant 0 : index
    %34 = vector.load %arg10[%c140, %c0_36] : memref<352x8xbf16, #tpu.memory_space<vmem>>, vector<16x8xbf16>
    tpu.vector_store %arg10[%c140, %c0_36], %33 {strides = array<i32>} : memref<352x8xbf16, #tpu.memory_space<vmem>>, vector<16x8xbf16>,
    %c0_37 = arith.constant 0 : index
    %c7 = arith.constant 7 : index
    %c0_38 = arith.constant 0 : index
    %c0_39 = arith.constant 0 : index
    %35 = vector.load %arg1[%c0_37, %c7, %c0_38, %c0_39] : memref<1x16x16x8xf32, #tpu.memory_space<vmem>>, vector<1x1x16x8xf32>
    %36 = vector.shape_cast %35 : vector<1x1x16x8xf32> to vector<16x8xf32>
    %37 = arith.truncf %36 : vector<16x8xf32> to vector<16x8xbf16>
    %c158 = arith.constant 158 : index
    %c0_40 = arith.constant 0 : index
    %38 = vector.load %arg10[%c158, %c0_40] : memref<352x8xbf16, #tpu.memory_space<vmem>>, vector<16x8xbf16>
    tpu.vector_store %arg10[%c158, %c0_40], %37 {strides = array<i32>} : memref<352x8xbf16, #tpu.memory_space<vmem>>, vector<16x8xbf16>,
    %c0_41 = arith.constant 0 : index
    %c8 = arith.constant 8 : index
    %c0_42 = arith.constant 0 : index
    %c0_43 = arith.constant 0 : index
    %39 = vector.load %arg1[%c0_41, %c8, %c0_42, %c0_43] : memref<1x16x16x8xf32, #tpu.memory_space<vmem>>, vector<1x1x16x8xf32>
    %40 = vector.shape_cast %39 : vector<1x1x16x8xf32> to vector<16x8xf32>
    %41 = arith.truncf %40 : vector<16x8xf32> to vector<16x8xbf16>
    %c176 = arith.constant 176 : index
    %c0_44 = arith.constant 0 : index
    %42 = vector.load %arg10[%c176, %c0_44] : memref<352x8xbf16, #tpu.memory_space<vmem>>, vector<16x8xbf16>
    tpu.vector_store %arg10[%c176, %c0_44], %41 {strides = array<i32>} : memref<352x8xbf16, #tpu.memory_space<vmem>>, vector<16x8xbf16>,
    %c0_45 = arith.constant 0 : index
    %c9 = arith.constant 9 : index
    %c0_46 = arith.constant 0 : index
    %c0_47 = arith.constant 0 : index
    %43 = vector.load %arg1[%c0_45, %c9, %c0_46, %c0_47] : memref<1x16x16x8xf32, #tpu.memory_space<vmem>>, vector<1x1x16x8xf32>
    %44 = vector.shape_cast %43 : vector<1x1x16x8xf32> to vector<16x8xf32>
    %45 = arith.truncf %44 : vector<16x8xf32> to vector<16x8xbf16>
    %c194 = arith.constant 194 : index
    %c0_48 = arith.constant 0 : index
    %46 = vector.load %arg10[%c194, %c0_48] : memref<352x8xbf16, #tpu.memory_space<vmem>>, vector<16x8xbf16>
    tpu.vector_store %arg10[%c194, %c0_48], %45 {strides = array<i32>} : memref<352x8xbf16, #tpu.memory_space<vmem>>, vector<16x8xbf16>,
    %c0_49 = arith.constant 0 : index
    %c10 = arith.constant 10 : index
    %c0_50 = arith.constant 0 : index
    %c0_51 = arith.constant 0 : index
    %47 = vector.load %arg1[%c0_49, %c10, %c0_50, %c0_51] : memref<1x16x16x8xf32, #tpu.memory_space<vmem>>, vector<1x1x16x8xf32>
    %48 = vector.shape_cast %47 : vector<1x1x16x8xf32> to vector<16x8xf32>
    %49 = arith.truncf %48 : vector<16x8xf32> to vector<16x8xbf16>
    %c212 = arith.constant 212 : index
    %c0_52 = arith.constant 0 : index
    %50 = vector.load %arg10[%c212, %c0_52] : memref<352x8xbf16, #tpu.memory_space<vmem>>, vector<16x8xbf16>
    tpu.vector_store %arg10[%c212, %c0_52], %49 {strides = array<i32>} : memref<352x8xbf16, #tpu.memory_space<vmem>>, vector<16x8xbf16>,
    %c0_53 = arith.constant 0 : index
    %c11 = arith.constant 11 : index
    %c0_54 = arith.constant 0 : index
    %c0_55 = arith.constant 0 : index
    %51 = vector.load %arg1[%c0_53, %c11, %c0_54, %c0_55] : memref<1x16x16x8xf32, #tpu.memory_space<vmem>>, vector<1x1x16x8xf32>
    %52 = vector.shape_cast %51 : vector<1x1x16x8xf32> to vector<16x8xf32>
    %53 = arith.truncf %52 : vector<16x8xf32> to vector<16x8xbf16>
    %c230 = arith.constant 230 : index
    %c0_56 = arith.constant 0 : index
    %54 = vector.load %arg10[%c230, %c0_56] : memref<352x8xbf16, #tpu.memory_space<vmem>>, vector<16x8xbf16>
    tpu.vector_store %arg10[%c230, %c0_56], %53 {strides = array<i32>} : memref<352x8xbf16, #tpu.memory_space<vmem>>, vector<16x8xbf16>,
    %c0_57 = arith.constant 0 : index
    %c12 = arith.constant 12 : index
    %c0_58 = arith.constant 0 : index
    %c0_59 = arith.constant 0 : index
    %55 = vector.load %arg1[%c0_57, %c12, %c0_58, %c0_59] : memref<1x16x16x8xf32, #tpu.memory_space<vmem>>, vector<1x1x16x8xf32>
    %56 = vector.shape_cast %55 : vector<1x1x16x8xf32> to vector<16x8xf32>
    %57 = arith.truncf %56 : vector<16x8xf32> to vector<16x8xbf16>
    %c248 = arith.constant 248 : index
    %c0_60 = arith.constant 0 : index
    %58 = vector.load %arg10[%c248, %c0_60] : memref<352x8xbf16, #tpu.memory_space<vmem>>, vector<16x8xbf16>
    tpu.vector_store %arg10[%c248, %c0_60], %57 {strides = array<i32>} : memref<352x8xbf16, #tpu.memory_space<vmem>>, vector<16x8xbf16>,
    %c0_61 = arith.constant 0 : index
    %c13 = arith.constant 13 : index
    %c0_62 = arith.constant 0 : index
    %c0_63 = arith.constant 0 : index
    %59 = vector.load %arg1[%c0_61, %c13, %c0_62, %c0_63] : memref<1x16x16x8xf32, #tpu.memory_space<vmem>>, vector<1x1x16x8xf32>
    %60 = vector.shape_cast %59 : vector<1x1x16x8xf32> to vector<16x8xf32>
    %61 = arith.truncf %60 : vector<16x8xf32> to vector<16x8xbf16>
    %c266 = arith.constant 266 : index
    %c0_64 = arith.constant 0 : index
    %62 = vector.load %arg10[%c266, %c0_64] : memref<352x8xbf16, #tpu.memory_space<vmem>>, vector<16x8xbf16>
    tpu.vector_store %arg10[%c266, %c0_64], %61 {strides = array<i32>} : memref<352x8xbf16, #tpu.memory_space<vmem>>, vector<16x8xbf16>,
    %c0_65 = arith.constant 0 : index
    %c14 = arith.constant 14 : index
    %c0_66 = arith.constant 0 : index
    %c0_67 = arith.constant 0 : index
    %63 = vector.load %arg1[%c0_65, %c14, %c0_66, %c0_67] : memref<1x16x16x8xf32, #tpu.memory_space<vmem>>, vector<1x1x16x8xf32>
    %64 = vector.shape_cast %63 : vector<1x1x16x8xf32> to vector<16x8xf32>
    %65 = arith.truncf %64 : vector<16x8xf32> to vector<16x8xbf16>
    %c284 = arith.constant 284 : index
    %c0_68 = arith.constant 0 : index
    %66 = vector.load %arg10[%c284, %c0_68] : memref<352x8xbf16, #tpu.memory_space<vmem>>, vector<16x8xbf16>
    tpu.vector_store %arg10[%c284, %c0_68], %65 {strides = array<i32>} : memref<352x8xbf16, #tpu.memory_space<vmem>>, vector<16x8xbf16>,
    %c0_69 = arith.constant 0 : index
    %c15 = arith.constant 15 : index
    %c0_70 = arith.constant 0 : index
    %c0_71 = arith.constant 0 : index
    %67 = vector.load %arg1[%c0_69, %c15, %c0_70, %c0_71] : memref<1x16x16x8xf32, #tpu.memory_space<vmem>>, vector<1x1x16x8xf32>
    %68 = vector.shape_cast %67 : vector<1x1x16x8xf32> to vector<16x8xf32>
    %69 = arith.truncf %68 : vector<16x8xf32> to vector<16x8xbf16>
    %c302 = arith.constant 302 : index
    %c0_72 = arith.constant 0 : index
    %70 = vector.load %arg10[%c302, %c0_72] : memref<352x8xbf16, #tpu.memory_space<vmem>>, vector<16x8xbf16>
    tpu.vector_store %arg10[%c302, %c0_72], %69 {strides = array<i32>} : memref<352x8xbf16, #tpu.memory_space<vmem>>, vector<16x8xbf16>,
    %c0_73 = arith.constant 0 : index
    %c0_74 = arith.constant 0 : index
    %71 = vector.load %arg4[%c0_73, %c0_74] : memref<1x32xf32, #tpu.memory_space<vmem>>, vector<1x32xf32>
    %cst_75 = arith.constant 0.000000e+00 : f32
    %72 = vector.broadcast %cst_75 : f32 to vector<288x32xf32>
    %c13_76 = arith.constant 13 : index
    %c0_77 = arith.constant 0 : index
    %73 = vector.load %arg10[%c13_76, %c0_77] : memref<352x8xbf16, #tpu.memory_space<vmem>>, vector<288x8xbf16>
    %c0_78 = arith.constant 0 : index
    %c0_79 = arith.constant 0 : index
    %c0_80 = arith.constant 0 : index
    %74 = vector.load %arg3[%c0_78, %c0_79, %c0_80] : memref<9x8x32xbf16, #tpu.memory_space<vmem>>, vector<1x8x32xbf16>
    %75 = vector.shape_cast %74 : vector<1x8x32xbf16> to vector<8x32xbf16>
    %cst_81 = arith.constant dense<0.000000e+00> : vector<288x32xf32>
    %76 = tpu.matmul %73, %75, %cst_81 {dimension_numbers = #tpu.dot_dimension_numbers<[1], [0], [0], [1], [0, 0, 1, 1], [], []>} : vector<288x8xbf16>, vector<8x32xbf16>, vector<288x32xf32> -> vector<288x32xf32>
    %77 = arith.addf %72, %76 : vector<288x32xf32>
    %c14_82 = arith.constant 14 : index
    %c0_83 = arith.constant 0 : index
    %78 = vector.load %arg10[%c14_82, %c0_83] : memref<352x8xbf16, #tpu.memory_space<vmem>>, vector<288x8xbf16>
    %c1_84 = arith.constant 1 : index
    %c0_85 = arith.constant 0 : index
    %c0_86 = arith.constant 0 : index
    %79 = vector.load %arg3[%c1_84, %c0_85, %c0_86] : memref<9x8x32xbf16, #tpu.memory_space<vmem>>, vector<1x8x32xbf16>
    %80 = vector.shape_cast %79 : vector<1x8x32xbf16> to vector<8x32xbf16>
    %cst_87 = arith.constant dense<0.000000e+00> : vector<288x32xf32>
    %81 = tpu.matmul %78, %80, %cst_87 {dimension_numbers = #tpu.dot_dimension_numbers<[1], [0], [0], [1], [0, 0, 1, 1], [], []>} : vector<288x8xbf16>, vector<8x32xbf16>, vector<288x32xf32> -> vector<288x32xf32>
    %82 = arith.addf %77, %81 : vector<288x32xf32>
    %c15_88 = arith.constant 15 : index
    %c0_89 = arith.constant 0 : index
    %83 = vector.load %arg10[%c15_88, %c0_89] : memref<352x8xbf16, #tpu.memory_space<vmem>>, vector<288x8xbf16>
    %c2_90 = arith.constant 2 : index
    %c0_91 = arith.constant 0 : index
    %c0_92 = arith.constant 0 : index
    %84 = vector.load %arg3[%c2_90, %c0_91, %c0_92] : memref<9x8x32xbf16, #tpu.memory_space<vmem>>, vector<1x8x32xbf16>
    %85 = vector.shape_cast %84 : vector<1x8x32xbf16> to vector<8x32xbf16>
    %cst_93 = arith.constant dense<0.000000e+00> : vector<288x32xf32>
    %86 = tpu.matmul %83, %85, %cst_93 {dimension_numbers = #tpu.dot_dimension_numbers<[1], [0], [0], [1], [0, 0, 1, 1], [], []>} : vector<288x8xbf16>, vector<8x32xbf16>, vector<288x32xf32> -> vector<288x32xf32>
    %87 = arith.addf %82, %86 : vector<288x32xf32>
    %c31 = arith.constant 31 : index
    %c0_94 = arith.constant 0 : index
    %88 = vector.load %arg10[%c31, %c0_94] : memref<352x8xbf16, #tpu.memory_space<vmem>>, vector<288x8xbf16>
    %c3_95 = arith.constant 3 : index
    %c0_96 = arith.constant 0 : index
    %c0_97 = arith.constant 0 : index
    %89 = vector.load %arg3[%c3_95, %c0_96, %c0_97] : memref<9x8x32xbf16, #tpu.memory_space<vmem>>, vector<1x8x32xbf16>
    %90 = vector.shape_cast %89 : vector<1x8x32xbf16> to vector<8x32xbf16>
    %cst_98 = arith.constant dense<0.000000e+00> : vector<288x32xf32>
    %91 = tpu.matmul %88, %90, %cst_98 {dimension_numbers = #tpu.dot_dimension_numbers<[1], [0], [0], [1], [0, 0, 1, 1], [], []>} : vector<288x8xbf16>, vector<8x32xbf16>, vector<288x32xf32> -> vector<288x32xf32>
    %92 = arith.addf %87, %91 : vector<288x32xf32>
    %c32_99 = arith.constant 32 : index
    %c0_100 = arith.constant 0 : index
    %93 = vector.load %arg10[%c32_99, %c0_100] : memref<352x8xbf16, #tpu.memory_space<vmem>>, vector<288x8xbf16>
    %c4_101 = arith.constant 4 : index
    %c0_102 = arith.constant 0 : index
    %c0_103 = arith.constant 0 : index
    %94 = vector.load %arg3[%c4_101, %c0_102, %c0_103] : memref<9x8x32xbf16, #tpu.memory_space<vmem>>, vector<1x8x32xbf16>
    %95 = vector.shape_cast %94 : vector<1x8x32xbf16> to vector<8x32xbf16>
    %cst_104 = arith.constant dense<0.000000e+00> : vector<288x32xf32>
    %96 = tpu.matmul %93, %95, %cst_104 {dimension_numbers = #tpu.dot_dimension_numbers<[1], [0], [0], [1], [0, 0, 1, 1], [], []>} : vector<288x8xbf16>, vector<8x32xbf16>, vector<288x32xf32> -> vector<288x32xf32>
    %97 = arith.addf %92, %96 : vector<288x32xf32>
    %c33 = arith.constant 33 : index
    %c0_105 = arith.constant 0 : index
    %98 = vector.load %arg10[%c33, %c0_105] : memref<352x8xbf16, #tpu.memory_space<vmem>>, vector<288x8xbf16>
    %c5_106 = arith.constant 5 : index
    %c0_107 = arith.constant 0 : index
    %c0_108 = arith.constant 0 : index
    %99 = vector.load %arg3[%c5_106, %c0_107, %c0_108] : memref<9x8x32xbf16, #tpu.memory_space<vmem>>, vector<1x8x32xbf16>
    %100 = vector.shape_cast %99 : vector<1x8x32xbf16> to vector<8x32xbf16>
    %cst_109 = arith.constant dense<0.000000e+00> : vector<288x32xf32>
    %101 = tpu.matmul %98, %100, %cst_109 {dimension_numbers = #tpu.dot_dimension_numbers<[1], [0], [0], [1], [0, 0, 1, 1], [], []>} : vector<288x8xbf16>, vector<8x32xbf16>, vector<288x32xf32> -> vector<288x32xf32>
    %102 = arith.addf %97, %101 : vector<288x32xf32>
    %c49 = arith.constant 49 : index
    %c0_110 = arith.constant 0 : index
    %103 = vector.load %arg10[%c49, %c0_110] : memref<352x8xbf16, #tpu.memory_space<vmem>>, vector<288x8xbf16>
    %c6_111 = arith.constant 6 : index
    %c0_112 = arith.constant 0 : index
    %c0_113 = arith.constant 0 : index
    %104 = vector.load %arg3[%c6_111, %c0_112, %c0_113] : memref<9x8x32xbf16, #tpu.memory_space<vmem>>, vector<1x8x32xbf16>
    %105 = vector.shape_cast %104 : vector<1x8x32xbf16> to vector<8x32xbf16>
    %cst_114 = arith.constant dense<0.000000e+00> : vector<288x32xf32>
    %106 = tpu.matmul %103, %105, %cst_114 {dimension_numbers = #tpu.dot_dimension_numbers<[1], [0], [0], [1], [0, 0, 1, 1], [], []>} : vector<288x8xbf16>, vector<8x32xbf16>, vector<288x32xf32> -> vector<288x32xf32>
    %107 = arith.addf %102, %106 : vector<288x32xf32>
    %c50_115 = arith.constant 50 : index
    %c0_116 = arith.constant 0 : index
    %108 = vector.load %arg10[%c50_115, %c0_116] : memref<352x8xbf16, #tpu.memory_space<vmem>>, vector<288x8xbf16>
    %c7_117 = arith.constant 7 : index
    %c0_118 = arith.constant 0 : index
    %c0_119 = arith.constant 0 : index
    %109 = vector.load %arg3[%c7_117, %c0_118, %c0_119] : memref<9x8x32xbf16, #tpu.memory_space<vmem>>, vector<1x8x32xbf16>
    %110 = vector.shape_cast %109 : vector<1x8x32xbf16> to vector<8x32xbf16>
    %cst_120 = arith.constant dense<0.000000e+00> : vector<288x32xf32>
    %111 = tpu.matmul %108, %110, %cst_120 {dimension_numbers = #tpu.dot_dimension_numbers<[1], [0], [0], [1], [0, 0, 1, 1], [], []>} : vector<288x8xbf16>, vector<8x32xbf16>, vector<288x32xf32> -> vector<288x32xf32>
    %112 = arith.addf %107, %111 : vector<288x32xf32>
    %c51 = arith.constant 51 : index
    %c0_121 = arith.constant 0 : index
    %113 = vector.load %arg10[%c51, %c0_121] : memref<352x8xbf16, #tpu.memory_space<vmem>>, vector<288x8xbf16>
    %c8_122 = arith.constant 8 : index
    %c0_123 = arith.constant 0 : index
    %c0_124 = arith.constant 0 : index
    %114 = vector.load %arg3[%c8_122, %c0_123, %c0_124] : memref<9x8x32xbf16, #tpu.memory_space<vmem>>, vector<1x8x32xbf16>
    %115 = vector.shape_cast %114 : vector<1x8x32xbf16> to vector<8x32xbf16>
    %cst_125 = arith.constant dense<0.000000e+00> : vector<288x32xf32>
    %116 = tpu.matmul %113, %115, %cst_125 {dimension_numbers = #tpu.dot_dimension_numbers<[1], [0], [0], [1], [0, 0, 1, 1], [], []>} : vector<288x8xbf16>, vector<8x32xbf16>, vector<288x32xf32> -> vector<288x32xf32>
    %117 = arith.addf %112, %116 : vector<288x32xf32>
    %118 = vector.broadcast %71 : vector<1x32xf32> to vector<288x32xf32>
    %119 = arith.addf %117, %118 : vector<288x32xf32>
    %cst_126 = arith.constant 0.000000e+00 : f32
    %120 = vector.broadcast %cst_126 : f32 to vector<288x32xf32>
    %121 = arith.maximumf %119, %120 : vector<288x32xf32>
    %122 = arith.mulf %121, %6 : vector<288x32xf32>
    %123 = arith.truncf %122 : vector<288x32xf32> to vector<288x32xbf16>
    %c32_127 = arith.constant 32 : index
    %c0_128 = arith.constant 0 : index
    %124 = vector.load %arg11[%c32_127, %c0_128] : memref<352x32xbf16, #tpu.memory_space<vmem>>, vector<288x32xbf16>
    tpu.vector_store %arg11[%c32_127, %c0_128], %123 {strides = array<i32>} : memref<352x32xbf16, #tpu.memory_space<vmem>>, vector<288x32xbf16>,
    %c0_i32 = arith.constant 0 : i32
    %c2_i32 = arith.constant 2 : i32
    %125 = arith.addi %c0_i32, %c2_i32 : i32
    %c1_i32 = arith.constant 1 : i32
    %126 = scf.for %arg12 = %c0_i32 to %125 step %c1_i32 iter_args(%arg13 = %122) -> (vector<288x32xf32>)  : i32 {
      %130 = arith.index_cast %arg12 : i32 to index
      %c0_133 = arith.constant 0 : index
      %c0_134 = arith.constant 0 : index
      %131 = vector.load %arg6[%130, %c0_133, %c0_134] : memref<2x1x32xf32, #tpu.memory_space<vmem>>, vector<1x1x32xf32>
      %132 = vector.shape_cast %131 : vector<1x1x32xf32> to vector<1x32xf32>
      %cst_135 = arith.constant 0.000000e+00 : f32
      %133 = vector.broadcast %cst_135 : f32 to vector<288x32xf32>
      %c13_136 = arith.constant 13 : index
      %c0_137 = arith.constant 0 : index
      %134 = vector.load %arg11[%c13_136, %c0_137] : memref<352x32xbf16, #tpu.memory_space<vmem>>, vector<288x32xbf16>
      %135 = arith.index_cast %arg12 : i32 to index
      %c0_138 = arith.constant 0 : index
      %c0_139 = arith.constant 0 : index
      %c0_140 = arith.constant 0 : index
      %136 = vector.load %arg5[%135, %c0_138, %c0_139, %c0_140] : memref<2x9x32x32xbf16, #tpu.memory_space<vmem>>, vector<1x1x32x32xbf16>
      %137 = vector.shape_cast %136 : vector<1x1x32x32xbf16> to vector<32x32xbf16>
      %cst_141 = arith.constant dense<0.000000e+00> : vector<288x32xf32>
      %138 = tpu.matmul %134, %137, %cst_141 {dimension_numbers = #tpu.dot_dimension_numbers<[1], [0], [0], [1], [0, 0, 1, 1], [], []>} : vector<288x32xbf16>, vector<32x32xbf16>, vector<288x32xf32> -> vector<288x32xf32>
      %139 = arith.addf %133, %138 : vector<288x32xf32>
      %c14_142 = arith.constant 14 : index
      %c0_143 = arith.constant 0 : index
      %140 = vector.load %arg11[%c14_142, %c0_143] : memref<352x32xbf16, #tpu.memory_space<vmem>>, vector<288x32xbf16>
      %141 = arith.index_cast %arg12 : i32 to index
      %c1_144 = arith.constant 1 : index
      %c0_145 = arith.constant 0 : index
      %c0_146 = arith.constant 0 : index
      %142 = vector.load %arg5[%141, %c1_144, %c0_145, %c0_146] : memref<2x9x32x32xbf16, #tpu.memory_space<vmem>>, vector<1x1x32x32xbf16>
      %143 = vector.shape_cast %142 : vector<1x1x32x32xbf16> to vector<32x32xbf16>
      %cst_147 = arith.constant dense<0.000000e+00> : vector<288x32xf32>
      %144 = tpu.matmul %140, %143, %cst_147 {dimension_numbers = #tpu.dot_dimension_numbers<[1], [0], [0], [1], [0, 0, 1, 1], [], []>} : vector<288x32xbf16>, vector<32x32xbf16>, vector<288x32xf32> -> vector<288x32xf32>
      %145 = arith.addf %139, %144 : vector<288x32xf32>
      %c15_148 = arith.constant 15 : index
      %c0_149 = arith.constant 0 : index
      %146 = vector.load %arg11[%c15_148, %c0_149] : memref<352x32xbf16, #tpu.memory_space<vmem>>, vector<288x32xbf16>
      %147 = arith.index_cast %arg12 : i32 to index
      %c2_150 = arith.constant 2 : index
      %c0_151 = arith.constant 0 : index
      %c0_152 = arith.constant 0 : index
      %148 = vector.load %arg5[%147, %c2_150, %c0_151, %c0_152] : memref<2x9x32x32xbf16, #tpu.memory_space<vmem>>, vector<1x1x32x32xbf16>
      %149 = vector.shape_cast %148 : vector<1x1x32x32xbf16> to vector<32x32xbf16>
      %cst_153 = arith.constant dense<0.000000e+00> : vector<288x32xf32>
      %150 = tpu.matmul %146, %149, %cst_153 {dimension_numbers = #tpu.dot_dimension_numbers<[1], [0], [0], [1], [0, 0, 1, 1], [], []>} : vector<288x32xbf16>, vector<32x32xbf16>, vector<288x32xf32> -> vector<288x32xf32>
      %151 = arith.addf %145, %150 : vector<288x32xf32>
      %c31_154 = arith.constant 31 : index
      %c0_155 = arith.constant 0 : index
      %152 = vector.load %arg11[%c31_154, %c0_155] : memref<352x32xbf16, #tpu.memory_space<vmem>>, vector<288x32xbf16>
      %153 = arith.index_cast %arg12 : i32 to index
      %c3_156 = arith.constant 3 : index
      %c0_157 = arith.constant 0 : index
      %c0_158 = arith.constant 0 : index
      %154 = vector.load %arg5[%153, %c3_156, %c0_157, %c0_158] : memref<2x9x32x32xbf16, #tpu.memory_space<vmem>>, vector<1x1x32x32xbf16>
      %155 = vector.shape_cast %154 : vector<1x1x32x32xbf16> to vector<32x32xbf16>
      %cst_159 = arith.constant dense<0.000000e+00> : vector<288x32xf32>
      %156 = tpu.matmul %152, %155, %cst_159 {dimension_numbers = #tpu.dot_dimension_numbers<[1], [0], [0], [1], [0, 0, 1, 1], [], []>} : vector<288x32xbf16>, vector<32x32xbf16>, vector<288x32xf32> -> vector<288x32xf32>
      %157 = arith.addf %151, %156 : vector<288x32xf32>
      %c32_160 = arith.constant 32 : index
      %c0_161 = arith.constant 0 : index
      %158 = vector.load %arg11[%c32_160, %c0_161] : memref<352x32xbf16, #tpu.memory_space<vmem>>, vector<288x32xbf16>
      %159 = arith.index_cast %arg12 : i32 to index
      %c4_162 = arith.constant 4 : index
      %c0_163 = arith.constant 0 : index
      %c0_164 = arith.constant 0 : index
      %160 = vector.load %arg5[%159, %c4_162, %c0_163, %c0_164] : memref<2x9x32x32xbf16, #tpu.memory_space<vmem>>, vector<1x1x32x32xbf16>
      %161 = vector.shape_cast %160 : vector<1x1x32x32xbf16> to vector<32x32xbf16>
      %cst_165 = arith.constant dense<0.000000e+00> : vector<288x32xf32>
      %162 = tpu.matmul %158, %161, %cst_165 {dimension_numbers = #tpu.dot_dimension_numbers<[1], [0], [0], [1], [0, 0, 1, 1], [], []>} : vector<288x32xbf16>, vector<32x32xbf16>, vector<288x32xf32> -> vector<288x32xf32>
      %163 = arith.addf %157, %162 : vector<288x32xf32>
      %c33_166 = arith.constant 33 : index
      %c0_167 = arith.constant 0 : index
      %164 = vector.load %arg11[%c33_166, %c0_167] : memref<352x32xbf16, #tpu.memory_space<vmem>>, vector<288x32xbf16>
      %165 = arith.index_cast %arg12 : i32 to index
      %c5_168 = arith.constant 5 : index
      %c0_169 = arith.constant 0 : index
      %c0_170 = arith.constant 0 : index
      %166 = vector.load %arg5[%165, %c5_168, %c0_169, %c0_170] : memref<2x9x32x32xbf16, #tpu.memory_space<vmem>>, vector<1x1x32x32xbf16>
      %167 = vector.shape_cast %166 : vector<1x1x32x32xbf16> to vector<32x32xbf16>
      %cst_171 = arith.constant dense<0.000000e+00> : vector<288x32xf32>
      %168 = tpu.matmul %164, %167, %cst_171 {dimension_numbers = #tpu.dot_dimension_numbers<[1], [0], [0], [1], [0, 0, 1, 1], [], []>} : vector<288x32xbf16>, vector<32x32xbf16>, vector<288x32xf32> -> vector<288x32xf32>
      %169 = arith.addf %163, %168 : vector<288x32xf32>
      %c49_172 = arith.constant 49 : index
      %c0_173 = arith.constant 0 : index
      %170 = vector.load %arg11[%c49_172, %c0_173] : memref<352x32xbf16, #tpu.memory_space<vmem>>, vector<288x32xbf16>
      %171 = arith.index_cast %arg12 : i32 to index
      %c6_174 = arith.constant 6 : index
      %c0_175 = arith.constant 0 : index
      %c0_176 = arith.constant 0 : index
      %172 = vector.load %arg5[%171, %c6_174, %c0_175, %c0_176] : memref<2x9x32x32xbf16, #tpu.memory_space<vmem>>, vector<1x1x32x32xbf16>
      %173 = vector.shape_cast %172 : vector<1x1x32x32xbf16> to vector<32x32xbf16>
      %cst_177 = arith.constant dense<0.000000e+00> : vector<288x32xf32>
      %174 = tpu.matmul %170, %173, %cst_177 {dimension_numbers = #tpu.dot_dimension_numbers<[1], [0], [0], [1], [0, 0, 1, 1], [], []>} : vector<288x32xbf16>, vector<32x32xbf16>, vector<288x32xf32> -> vector<288x32xf32>
      %175 = arith.addf %169, %174 : vector<288x32xf32>
      %c50_178 = arith.constant 50 : index
      %c0_179 = arith.constant 0 : index
      %176 = vector.load %arg11[%c50_178, %c0_179] : memref<352x32xbf16, #tpu.memory_space<vmem>>, vector<288x32xbf16>
      %177 = arith.index_cast %arg12 : i32 to index
      %c7_180 = arith.constant 7 : index
      %c0_181 = arith.constant 0 : index
      %c0_182 = arith.constant 0 : index
      %178 = vector.load %arg5[%177, %c7_180, %c0_181, %c0_182] : memref<2x9x32x32xbf16, #tpu.memory_space<vmem>>, vector<1x1x32x32xbf16>
      %179 = vector.shape_cast %178 : vector<1x1x32x32xbf16> to vector<32x32xbf16>
      %cst_183 = arith.constant dense<0.000000e+00> : vector<288x32xf32>
      %180 = tpu.matmul %176, %179, %cst_183 {dimension_numbers = #tpu.dot_dimension_numbers<[1], [0], [0], [1], [0, 0, 1, 1], [], []>} : vector<288x32xbf16>, vector<32x32xbf16>, vector<288x32xf32> -> vector<288x32xf32>
      %181 = arith.addf %175, %180 : vector<288x32xf32>
      %c51_184 = arith.constant 51 : index
      %c0_185 = arith.constant 0 : index
      %182 = vector.load %arg11[%c51_184, %c0_185] : memref<352x32xbf16, #tpu.memory_space<vmem>>, vector<288x32xbf16>
      %183 = arith.index_cast %arg12 : i32 to index
      %c8_186 = arith.constant 8 : index
      %c0_187 = arith.constant 0 : index
      %c0_188 = arith.constant 0 : index
      %184 = vector.load %arg5[%183, %c8_186, %c0_187, %c0_188] : memref<2x9x32x32xbf16, #tpu.memory_space<vmem>>, vector<1x1x32x32xbf16>
      %185 = vector.shape_cast %184 : vector<1x1x32x32xbf16> to vector<32x32xbf16>
      %cst_189 = arith.constant dense<0.000000e+00> : vector<288x32xf32>
      %186 = tpu.matmul %182, %185, %cst_189 {dimension_numbers = #tpu.dot_dimension_numbers<[1], [0], [0], [1], [0, 0, 1, 1], [], []>} : vector<288x32xbf16>, vector<32x32xbf16>, vector<288x32xf32> -> vector<288x32xf32>
      %187 = arith.addf %181, %186 : vector<288x32xf32>
      %188 = vector.broadcast %132 : vector<1x32xf32> to vector<288x32xf32>
      %189 = arith.addf %187, %188 : vector<288x32xf32>
      %cst_190 = arith.constant 0.000000e+00 : f32
      %190 = vector.broadcast %cst_190 : f32 to vector<288x32xf32>
      %191 = arith.maximumf %189, %190 : vector<288x32xf32>
      %192 = arith.mulf %191, %6 : vector<288x32xf32>
      %193 = arith.truncf %192 : vector<288x32xf32> to vector<288x32xbf16>
      %c32_191 = arith.constant 32 : index
      %c0_192 = arith.constant 0 : index
      %194 = vector.load %arg11[%c32_191, %c0_192] : memref<352x32xbf16, #tpu.memory_space<vmem>>, vector<288x32xbf16>
      tpu.vector_store %arg11[%c32_191, %c0_192], %193 {strides = array<i32>} : memref<352x32xbf16, #tpu.memory_space<vmem>>, vector<288x32xbf16>,
      %195 = arith.index_cast %arg12 : i32 to index
      %c0_193 = arith.constant 0 : index
      %c0_194 = arith.constant 0 : index
      %196 = vector.load %arg8[%195, %c0_193, %c0_194] : memref<2x1x32xf32, #tpu.memory_space<vmem>>, vector<1x1x32xf32>
      %197 = vector.shape_cast %196 : vector<1x1x32xf32> to vector<1x32xf32>
      %cst_195 = arith.constant 0.000000e+00 : f32
      %198 = vector.broadcast %cst_195 : f32 to vector<288x32xf32>
      %c13_196 = arith.constant 13 : index
      %c0_197 = arith.constant 0 : index
      %199 = vector.load %arg11[%c13_196, %c0_197] : memref<352x32xbf16, #tpu.memory_space<vmem>>, vector<288x32xbf16>
      %200 = arith.index_cast %arg12 : i32 to index
      %c0_198 = arith.constant 0 : index
      %c0_199 = arith.constant 0 : index
      %c0_200 = arith.constant 0 : index
      %201 = vector.load %arg7[%200, %c0_198, %c0_199, %c0_200] : memref<2x9x32x32xbf16, #tpu.memory_space<vmem>>, vector<1x1x32x32xbf16>
      %202 = vector.shape_cast %201 : vector<1x1x32x32xbf16> to vector<32x32xbf16>
      %cst_201 = arith.constant dense<0.000000e+00> : vector<288x32xf32>
      %203 = tpu.matmul %199, %202, %cst_201 {dimension_numbers = #tpu.dot_dimension_numbers<[1], [0], [0], [1], [0, 0, 1, 1], [], []>} : vector<288x32xbf16>, vector<32x32xbf16>, vector<288x32xf32> -> vector<288x32xf32>
      %204 = arith.addf %198, %203 : vector<288x32xf32>
      %c14_202 = arith.constant 14 : index
      %c0_203 = arith.constant 0 : index
      %205 = vector.load %arg11[%c14_202, %c0_203] : memref<352x32xbf16, #tpu.memory_space<vmem>>, vector<288x32xbf16>
      %206 = arith.index_cast %arg12 : i32 to index
      %c1_204 = arith.constant 1 : index
      %c0_205 = arith.constant 0 : index
      %c0_206 = arith.constant 0 : index
      %207 = vector.load %arg7[%206, %c1_204, %c0_205, %c0_206] : memref<2x9x32x32xbf16, #tpu.memory_space<vmem>>, vector<1x1x32x32xbf16>
      %208 = vector.shape_cast %207 : vector<1x1x32x32xbf16> to vector<32x32xbf16>
      %cst_207 = arith.constant dense<0.000000e+00> : vector<288x32xf32>
      %209 = tpu.matmul %205, %208, %cst_207 {dimension_numbers = #tpu.dot_dimension_numbers<[1], [0], [0], [1], [0, 0, 1, 1], [], []>} : vector<288x32xbf16>, vector<32x32xbf16>, vector<288x32xf32> -> vector<288x32xf32>
      %210 = arith.addf %204, %209 : vector<288x32xf32>
      %c15_208 = arith.constant 15 : index
      %c0_209 = arith.constant 0 : index
      %211 = vector.load %arg11[%c15_208, %c0_209] : memref<352x32xbf16, #tpu.memory_space<vmem>>, vector<288x32xbf16>
      %212 = arith.index_cast %arg12 : i32 to index
      %c2_210 = arith.constant 2 : index
      %c0_211 = arith.constant 0 : index
      %c0_212 = arith.constant 0 : index
      %213 = vector.load %arg7[%212, %c2_210, %c0_211, %c0_212] : memref<2x9x32x32xbf16, #tpu.memory_space<vmem>>, vector<1x1x32x32xbf16>
      %214 = vector.shape_cast %213 : vector<1x1x32x32xbf16> to vector<32x32xbf16>
      %cst_213 = arith.constant dense<0.000000e+00> : vector<288x32xf32>
      %215 = tpu.matmul %211, %214, %cst_213 {dimension_numbers = #tpu.dot_dimension_numbers<[1], [0], [0], [1], [0, 0, 1, 1], [], []>} : vector<288x32xbf16>, vector<32x32xbf16>, vector<288x32xf32> -> vector<288x32xf32>
      %216 = arith.addf %210, %215 : vector<288x32xf32>
      %c31_214 = arith.constant 31 : index
      %c0_215 = arith.constant 0 : index
      %217 = vector.load %arg11[%c31_214, %c0_215] : memref<352x32xbf16, #tpu.memory_space<vmem>>, vector<288x32xbf16>
      %218 = arith.index_cast %arg12 : i32 to index
      %c3_216 = arith.constant 3 : index
      %c0_217 = arith.constant 0 : index
      %c0_218 = arith.constant 0 : index
      %219 = vector.load %arg7[%218, %c3_216, %c0_217, %c0_218] : memref<2x9x32x32xbf16, #tpu.memory_space<vmem>>, vector<1x1x32x32xbf16>
      %220 = vector.shape_cast %219 : vector<1x1x32x32xbf16> to vector<32x32xbf16>
      %cst_219 = arith.constant dense<0.000000e+00> : vector<288x32xf32>
      %221 = tpu.matmul %217, %220, %cst_219 {dimension_numbers = #tpu.dot_dimension_numbers<[1], [0], [0], [1], [0, 0, 1, 1], [], []>} : vector<288x32xbf16>, vector<32x32xbf16>, vector<288x32xf32> -> vector<288x32xf32>
      %222 = arith.addf %216, %221 : vector<288x32xf32>
      %c32_220 = arith.constant 32 : index
      %c0_221 = arith.constant 0 : index
      %223 = vector.load %arg11[%c32_220, %c0_221] : memref<352x32xbf16, #tpu.memory_space<vmem>>, vector<288x32xbf16>
      %224 = arith.index_cast %arg12 : i32 to index
      %c4_222 = arith.constant 4 : index
      %c0_223 = arith.constant 0 : index
      %c0_224 = arith.constant 0 : index
      %225 = vector.load %arg7[%224, %c4_222, %c0_223, %c0_224] : memref<2x9x32x32xbf16, #tpu.memory_space<vmem>>, vector<1x1x32x32xbf16>
      %226 = vector.shape_cast %225 : vector<1x1x32x32xbf16> to vector<32x32xbf16>
      %cst_225 = arith.constant dense<0.000000e+00> : vector<288x32xf32>
      %227 = tpu.matmul %223, %226, %cst_225 {dimension_numbers = #tpu.dot_dimension_numbers<[1], [0], [0], [1], [0, 0, 1, 1], [], []>} : vector<288x32xbf16>, vector<32x32xbf16>, vector<288x32xf32> -> vector<288x32xf32>
      %228 = arith.addf %222, %227 : vector<288x32xf32>
      %c33_226 = arith.constant 33 : index
      %c0_227 = arith.constant 0 : index
      %229 = vector.load %arg11[%c33_226, %c0_227] : memref<352x32xbf16, #tpu.memory_space<vmem>>, vector<288x32xbf16>
      %230 = arith.index_cast %arg12 : i32 to index
      %c5_228 = arith.constant 5 : index
      %c0_229 = arith.constant 0 : index
      %c0_230 = arith.constant 0 : index
      %231 = vector.load %arg7[%230, %c5_228, %c0_229, %c0_230] : memref<2x9x32x32xbf16, #tpu.memory_space<vmem>>, vector<1x1x32x32xbf16>
      %232 = vector.shape_cast %231 : vector<1x1x32x32xbf16> to vector<32x32xbf16>
      %cst_231 = arith.constant dense<0.000000e+00> : vector<288x32xf32>
      %233 = tpu.matmul %229, %232, %cst_231 {dimension_numbers = #tpu.dot_dimension_numbers<[1], [0], [0], [1], [0, 0, 1, 1], [], []>} : vector<288x32xbf16>, vector<32x32xbf16>, vector<288x32xf32> -> vector<288x32xf32>
      %234 = arith.addf %228, %233 : vector<288x32xf32>
      %c49_232 = arith.constant 49 : index
      %c0_233 = arith.constant 0 : index
      %235 = vector.load %arg11[%c49_232, %c0_233] : memref<352x32xbf16, #tpu.memory_space<vmem>>, vector<288x32xbf16>
      %236 = arith.index_cast %arg12 : i32 to index
      %c6_234 = arith.constant 6 : index
      %c0_235 = arith.constant 0 : index
      %c0_236 = arith.constant 0 : index
      %237 = vector.load %arg7[%236, %c6_234, %c0_235, %c0_236] : memref<2x9x32x32xbf16, #tpu.memory_space<vmem>>, vector<1x1x32x32xbf16>
      %238 = vector.shape_cast %237 : vector<1x1x32x32xbf16> to vector<32x32xbf16>
      %cst_237 = arith.constant dense<0.000000e+00> : vector<288x32xf32>
      %239 = tpu.matmul %235, %238, %cst_237 {dimension_numbers = #tpu.dot_dimension_numbers<[1], [0], [0], [1], [0, 0, 1, 1], [], []>} : vector<288x32xbf16>, vector<32x32xbf16>, vector<288x32xf32> -> vector<288x32xf32>
      %240 = arith.addf %234, %239 : vector<288x32xf32>
      %c50_238 = arith.constant 50 : index
      %c0_239 = arith.constant 0 : index
      %241 = vector.load %arg11[%c50_238, %c0_239] : memref<352x32xbf16, #tpu.memory_space<vmem>>, vector<288x32xbf16>
      %242 = arith.index_cast %arg12 : i32 to index
      %c7_240 = arith.constant 7 : index
      %c0_241 = arith.constant 0 : index
      %c0_242 = arith.constant 0 : index
      %243 = vector.load %arg7[%242, %c7_240, %c0_241, %c0_242] : memref<2x9x32x32xbf16, #tpu.memory_space<vmem>>, vector<1x1x32x32xbf16>
      %244 = vector.shape_cast %243 : vector<1x1x32x32xbf16> to vector<32x32xbf16>
      %cst_243 = arith.constant dense<0.000000e+00> : vector<288x32xf32>
      %245 = tpu.matmul %241, %244, %cst_243 {dimension_numbers = #tpu.dot_dimension_numbers<[1], [0], [0], [1], [0, 0, 1, 1], [], []>} : vector<288x32xbf16>, vector<32x32xbf16>, vector<288x32xf32> -> vector<288x32xf32>
      %246 = arith.addf %240, %245 : vector<288x32xf32>
      %c51_244 = arith.constant 51 : index
      %c0_245 = arith.constant 0 : index
      %247 = vector.load %arg11[%c51_244, %c0_245] : memref<352x32xbf16, #tpu.memory_space<vmem>>, vector<288x32xbf16>
      %248 = arith.index_cast %arg12 : i32 to index
      %c8_246 = arith.constant 8 : index
      %c0_247 = arith.constant 0 : index
      %c0_248 = arith.constant 0 : index
      %249 = vector.load %arg7[%248, %c8_246, %c0_247, %c0_248] : memref<2x9x32x32xbf16, #tpu.memory_space<vmem>>, vector<1x1x32x32xbf16>
      %250 = vector.shape_cast %249 : vector<1x1x32x32xbf16> to vector<32x32xbf16>
      %cst_249 = arith.constant dense<0.000000e+00> : vector<288x32xf32>
      %251 = tpu.matmul %247, %250, %cst_249 {dimension_numbers = #tpu.dot_dimension_numbers<[1], [0], [0], [1], [0, 0, 1, 1], [], []>} : vector<288x32xbf16>, vector<32x32xbf16>, vector<288x32xf32> -> vector<288x32xf32>
      %252 = arith.addf %246, %251 : vector<288x32xf32>
      %253 = vector.broadcast %197 : vector<1x32xf32> to vector<288x32xf32>
      %254 = arith.addf %252, %253 : vector<288x32xf32>
      %255 = arith.addf %arg13, %254 : vector<288x32xf32>
      %cst_250 = arith.constant 0.000000e+00 : f32
      %256 = vector.broadcast %cst_250 : f32 to vector<288x32xf32>
      %257 = arith.maximumf %255, %256 : vector<288x32xf32>
      %258 = arith.mulf %257, %6 : vector<288x32xf32>
      %259 = arith.truncf %258 : vector<288x32xf32> to vector<288x32xbf16>
      %c32_251 = arith.constant 32 : index
      %c0_252 = arith.constant 0 : index
      %260 = vector.load %arg11[%c32_251, %c0_252] : memref<352x32xbf16, #tpu.memory_space<vmem>>, vector<288x32xbf16>
      tpu.vector_store %arg11[%c32_251, %c0_252], %259 {strides = array<i32>} : memref<352x32xbf16, #tpu.memory_space<vmem>>, vector<288x32xbf16>,
      scf.yield %258 : vector<288x32xf32>
    }
    %c2_i32_129 = arith.constant 2 : i32
    %c0_130 = arith.constant 0 : index
    %c0_131 = arith.constant 0 : index
    %c0_132 = arith.constant 0 : index
    %127 = vector.load %arg9[%c0_130, %c0_131, %c0_132] : memref<1x288x32xf32, #tpu.memory_space<vmem>>, vector<1x288x32xf32>
    %128 = vector.shape_cast %127 : vector<1x288x32xf32> to vector<288x32xf32>
    %129 = vector.shape_cast %126 : vector<288x32xf32> to vector<1x288x32xf32>
    tpu.vector_store %arg9[%c0_130, %c0_131, %c0_132], %129 {strides = array<i32>} : memref<1x288x32xf32, #tpu.memory_space<vmem>>, vector<1x288x32xf32>,
    return
  }
  func.func @transform_0(%arg0: i32) -> (i32, i32, i32, i32) {
    %c0_i32 = arith.constant 0 : i32
    %c0_i32_0 = arith.constant 0 : i32
    %c0_i32_1 = arith.constant 0 : i32
    %c0_i32_2 = arith.constant 0 : i32
    return %arg0, %c0_i32, %c0_i32_0, %c0_i32_1 : i32, i32, i32, i32
  }
  func.func @transform_1(%arg0: i32) -> (i32, i32) {
    %c0_i32 = arith.constant 0 : i32
    %c0_i32_0 = arith.constant 0 : i32
    %c0_i32_1 = arith.constant 0 : i32
    return %c0_i32, %c0_i32_0 : i32, i32
  }
  func.func @transform_2(%arg0: i32) -> (i32, i32, i32) {
    %c0_i32 = arith.constant 0 : i32
    %c0_i32_0 = arith.constant 0 : i32
    %c0_i32_1 = arith.constant 0 : i32
    %c0_i32_2 = arith.constant 0 : i32
    return %c0_i32, %c0_i32_0, %c0_i32_1 : i32, i32, i32
  }
  func.func @transform_3(%arg0: i32) -> (i32, i32) {
    %c0_i32 = arith.constant 0 : i32
    %c0_i32_0 = arith.constant 0 : i32
    %c0_i32_1 = arith.constant 0 : i32
    return %c0_i32, %c0_i32_0 : i32, i32
  }
  func.func @transform_4(%arg0: i32) -> (i32, i32, i32, i32) {
    %c0_i32 = arith.constant 0 : i32
    %c0_i32_0 = arith.constant 0 : i32
    %c0_i32_1 = arith.constant 0 : i32
    %c0_i32_2 = arith.constant 0 : i32
    %c0_i32_3 = arith.constant 0 : i32
    return %c0_i32, %c0_i32_0, %c0_i32_1, %c0_i32_2 : i32, i32, i32, i32
  }
  func.func @transform_5(%arg0: i32) -> (i32, i32, i32) {
    %c0_i32 = arith.constant 0 : i32
    %c0_i32_0 = arith.constant 0 : i32
    %c0_i32_1 = arith.constant 0 : i32
    %c0_i32_2 = arith.constant 0 : i32
    return %c0_i32, %c0_i32_0, %c0_i32_1 : i32, i32, i32
  }
  func.func @transform_6(%arg0: i32) -> (i32, i32, i32, i32) {
    %c0_i32 = arith.constant 0 : i32
    %c0_i32_0 = arith.constant 0 : i32
    %c0_i32_1 = arith.constant 0 : i32
    %c0_i32_2 = arith.constant 0 : i32
    %c0_i32_3 = arith.constant 0 : i32
    return %c0_i32, %c0_i32_0, %c0_i32_1, %c0_i32_2 : i32, i32, i32, i32
  }
  func.func @transform_7(%arg0: i32) -> (i32, i32, i32) {
    %c0_i32 = arith.constant 0 : i32
    %c0_i32_0 = arith.constant 0 : i32
    %c0_i32_1 = arith.constant 0 : i32
    %c0_i32_2 = arith.constant 0 : i32
    return %c0_i32, %c0_i32_0, %c0_i32_1 : i32, i32, i32
  }
  func.func @transform_8(%arg0: i32) -> (i32, i32, i32) {
    %c0_i32 = arith.constant 0 : i32
    %c0_i32_0 = arith.constant 0 : i32
    %c0_i32_1 = arith.constant 0 : i32
    return %arg0, %c0_i32, %c0_i32_0 : i32, i32, i32
  }
}

</mosaic_0001>

<bundles_post_ra>
// kernel: gb_feature_extractor_forward.1
= control target key start
LH: loop header
LB: loop body
LE: loop exit
PB: predicated region body
PF: predicated region fallthrough
CT: control target
= control target key end

     0   :  { %s15342_s27 = smov 0   ;;  %s19460_s0 = inlined_call_operand.vmem [shape: f32[2,16,16,8], index: 0, kind: input, shape index: {}]   ;;  %s19461_s1 = inlined_call_operand.vmem [shape: f32[288,32], index: 1, kind: input, shape index: {}]   ;;  %s19462_s2 = inlined_call_operand.vmem [shape: bf16[9,8,32], index: 2, kind: input, shape index: {}]   ;;  %s19463_s3 = inlined_call_operand.vmem [shape: f32[1,32], index: 3, kind: input, shape index: {}]   ;;  %s19464_s4 = inlined_call_operand.vmem [shape: bf16[2,9,32,32], index: 4, kind: input, shape index: {}]   ;;  %s19465_s5 = inlined_call_operand.vmem [shape: f32[2,1,32], index: 5, kind: input, shape index: {}]   ;;  %s19466_s6 = inlined_call_operand.vmem [shape: bf16[2,9,32,32], index: 6, kind: input, shape index: {}]   ;;  %s19467_s7 = inlined_call_operand.vmem [shape: f32[2,1,32], index: 7, kind: input, shape index: {}]   ;;  %s19468_s8 = inlined_call_operand.vmem [shape: f32[2,288,32], index: 8, kind: output, shape index: {}]  }
   0x1 LB: > { %s11512_s28 = sadd.s32 4294967295, %s15146_s27   ;;  %p11516_p0 = scmp.ge.s32.totalorder %s15146_s27, 1  ;;  %s15146_s27 = sphi %s15342_s27, %s18_s27  }
   0x2   : > { %p262_p1 = scmp.lt.s32.totalorder %s15146_s27, 3 }
   0x4   : > { %p263_p2 = pnand %p11516_p0, %p262_p1 }
   0x6   : > { %266 = sbr.rel (%p263_p2) target bundleno = 2277 (0x8e5), region = 52 }
   0xd   : > { %vm655_vm0 = vcmask 1043456   ;;  %v11625_v0 = vld [vmem:[%s19462_s2 + $0x10] sm:$0xf]  ;;  %v11550_v1 = vld [vmem:[%s19462_s2 + $0x4] sm:$0xf]  ;;  %p296_p3 = scmp.lt.s32.totalorder %s11512_s28, 1 }
   0xe   : > { %14633 = vmatprep.subr.msk.bf16.mxu0 %vm655_vm0, %v11625_v0  ;;  %v15358_v2 = vsel %vm655_vm0, %v11625_v0, 0  ;;  %14629 = vmatprep.subr.msk.bf16.mxu1 %vm655_vm0, %v11550_v1  ;;  %v657_v3 = vsel %vm655_vm0, %v11550_v1, 0  ;;  %vm312_vm1 = vcmask 64512   ;;  %v15365_v4 = vld [vmem:[%s19462_s2 + $0x14] sm:$0xf]  ;;  %v19469_v5 = vmov 0  }
   0xf   : > { %19645 = vst [vmem:[#allocation4_spill] sm:$0xff] %v15358_v2  ;;  %12854 = vmatpush3.bf16.msra.mxu0 %v15358_v2  ;;  %12702 = vmatpush3.bf16.msra.mxu1 %v657_v3  ;;  %s20169_s28 = smov (!%p296_p3, %s11512_s28), 1  ;;  %315 = vst.msk [vmem:[#allocation2 + $0x10] sm:$0xff] %vm312_vm1, %v19469_v5  ;;  %v540_v6 = vld [vmem:[%s19462_s2] sm:$0xf]  ;;  %vm563_vm2 = vcmask 1040384  }
  0x10   : > { %313 = vst.msk [vmem:[#allocation2] sm:$0xff] %vm312_vm1, %v19469_v5  ;;  %314 = vst.msk [vmem:[#allocation2 + $0x8] sm:$0xff] %vm312_vm1, %v19469_v5  ;;  %14635 = vmatprep.subr.msk.bf16.mxu0 %vm655_vm0, %v15365_v4  ;;  %14630 = vmatprep.subr.msk.bf16.mxu1 %vm655_vm0, %v540_v6  ;;  %s12167_s15 = sshll.u32 %s20169_s28, 8  ;;  %s14639_s16 = smul.u32 288, %s20169_s28  ;;  %vm382_vm3 = vcmask 64513   ;;  %vm384_vm4 = vcmask 57344  }
  0x11   : > { %316 = vst.msk [vmem:[#allocation2 + $0x18] sm:$0xff] %vm312_vm1, %v19469_v5  ;;  %317 = vst.msk [vmem:[#allocation2 + $0x20] sm:$0xff] %vm312_vm1, %v19469_v5  ;;  %s15425_s19 = scalar_lea.vmem %s19460_s0, %s12167_s15  ;;  %vm393_vm5 = vcmask 64514   ;;  %v15450_v25 = vsel %vm655_vm0, %v540_v6, 0  ;;  %vm395_vm6 = vcmask 58368   ;;  %vm404_vm7 = vcmask 64515  }
  0x12   : > { %318 = vst.msk [vmem:[#allocation2 + $0x28] sm:$0xff] %vm312_vm1, %v19469_v5  ;;  %319 = vst.msk [vmem:[#allocation2 + $0x30] sm:$0xff] %vm312_vm1, %v19469_v5  ;;  %s15430_s22 = scalar_lea.vmem %s19468_s8, %s14639_s16  ;;  %v371_v7 = vld [vmem:[%s15425_s19] sm:$0xff]  ;;  %v372_v8 = vld [vmem:[%s15425_s19 + $0x8] sm:$0xff]  ;;  %vm406_vm8 = vcmask 59392   ;;  %vm415_vm9 = vcmask 64516  }
  0x13   : > { %320 = vst.msk [vmem:[#allocation2 + $0x38] sm:$0xff] %vm312_vm1, %v19469_v5  ;;  %321 = vst.msk [vmem:[#allocation2 + $0x40] sm:$0xff] %vm312_vm1, %v19469_v5  ;;  %v11520_v9 = vld [vmem:[%s15425_s19 + $0x10] sm:$0xff]  ;;  %v373_v10 = vpack.c.bf16 %v372_v8, %v371_v7  ;;  %v11521_v11 = vld [vmem:[%s15425_s19 + $0x18] sm:$0xff]  ;;  %vm417_vm10 = vcmask 60416   ;;  %vm426_vm11 = vcmask 64517  }
  0x14   : > { %322 = vst.msk [vmem:[#allocation2 + $0x48] sm:$0xff] %vm312_vm1, %v19469_v5  ;;  %323 = vst.msk [vmem:[#allocation2 + $0x50] sm:$0xff] %vm312_vm1, %v19469_v5  ;;  %v11536_v12 = vld [vmem:[%s15425_s19 + $0x90] sm:$0xff]  ;;  %v11537_v13 = vld [vmem:[%s15425_s19 + $0x98] sm:$0xff]  ;;  %v378_v14 = vpack.c.bf16 %v11521_v11, %v11520_v9  ;;  %vm428_vm12 = vcmask 61440   ;;  %vm437_vm13 = vcmask 64518  }
  0x15   : > { %324 = vst.msk [vmem:[#allocation2 + $0x58] sm:$0xff] %vm312_vm1, %v19469_v5  ;;  %325 = vst.msk [vmem:[#allocation2 + $0x60] sm:$0xff] %vm312_vm1, %v19469_v5  ;;  %v460_v15 = vpack.c.bf16 %v11537_v13, %v11536_v12  ;;  %v11522_v16 = vld [vmem:[%s15425_s19 + $0x20] sm:$0xff]  ;;  %v11523_v17 = vld [vmem:[%s15425_s19 + $0x28] sm:$0xff]  ;;  %vm439_vm14 = vcmask 62464   ;;  %v2496_v12 = vsel %vm655_vm0, %v15365_v4, 0 }
  0x16   : > { %326 = vst.msk [vmem:[#allocation2 + $0x68] sm:$0xff] %vm312_vm1, %v19469_v5  ;;  %327 = vst.msk [vmem:[#allocation2 + $0x70] sm:$0xff] %vm312_vm1, %v19469_v5  ;;  %v11538_v18 = vld [vmem:[%s15425_s19 + $0xa0] sm:$0xff]  ;;  %v389_v21 = vpack.c.bf16 %v11523_v17, %v11522_v16  ;;  %v11539_v22 = vld [vmem:[%s15425_s19 + $0xa8] sm:$0xff]  ;;  %v380_v28 = vrot.slane %v378_v14, 7  ;;  %vm448_vm15 = vcmask 64519  }
  0x17   : > { %328 = vst.msk [vmem:[#allocation2 + $0x78] sm:$0xff] %vm312_vm1, %v19469_v5  ;;  %329 = vst.msk [vmem:[#allocation2 + $0x80] sm:$0xff] %vm312_vm1, %v19469_v5  ;;  %v15442_v19 = vld [vmem:[#allocation2 + $0x8] sm:$0xff]  ;;  %v15444_v20 = vld [vmem:[#allocation2] sm:$0x80]  ;;  %v462_v29 = vrot.slane %v460_v15, 7  ;;  %v469_v34 = vpack.c.bf16 %v11539_v22, %v11538_v18 }
  0x18   : > { %330 = vst.msk [vmem:[#allocation2 + $0x88] sm:$0xff] %vm312_vm1, %v19469_v5  ;;  %331 = vst.msk [vmem:[#allocation2 + $0x90] sm:$0xff] %vm312_vm1, %v19469_v5  ;;  %v564_v23 = vrot.slane %v15444_v20, 7  ;;  %v565_v24 = vrot.slane %v15442_v19, 7  ;;  %v11524_v26 = vld [vmem:[%s15425_s19 + $0x30] sm:$0xff]  ;;  %v11525_v27 = vld [vmem:[%s15425_s19 + $0x38] sm:$0xff] }
  0x19   : > { %332 = vst.msk [vmem:[#allocation2 + $0x98] sm:$0xff] %vm312_vm1, %v19469_v5  ;;  %333 = vst.msk [vmem:[#allocation2 + $0xa0] sm:$0xff] %vm312_vm1, %v19469_v5  ;;  %v391_v30 = vrot.slane %v389_v21, 6  ;;  %v11540_v31 = vld [vmem:[%s15425_s19 + $0xb0] sm:$0xff]  ;;  %v11541_v32 = vld [vmem:[%s15425_s19 + $0xb8] sm:$0xff]  ;;  %v400_v35 = vpack.c.bf16 %v11525_v27, %v11524_v26  ;;  %v471_v44 = vrot.slane %v469_v34, 6 }
  0x1a   : > { %334 = vst.msk [vmem:[#allocation2 + $0xa8] sm:$0xff] %vm312_vm1, %v19469_v5  ;;  %374 = vst.msk [vmem:[#allocation2 + $0x10] sm:$0xff] %vm312_vm1, %v373_v10  ;;  %v566_v33 = vsel %vm563_vm2, %v564_v23, %v565_v24  ;;  %v478_v36 = vpack.c.bf16 %v11541_v32, %v11540_v31  ;;  %v11526_v37 = vld [vmem:[%s15425_s19 + $0x40] sm:$0xff]  ;;  %v11527_v38 = vld [vmem:[%s15425_s19 + $0x48] sm:$0xff]  ;;  %s16870_s30 = smov 0  }
  0x1b   : > { %v11542_v39 = vld [vmem:[%s15425_s19 + $0xc0] sm:$0xff]  ;;  %12703 = vmatprep.mubr.msk.bf16.mxu1 %vm312_vm1, %v566_v33  ;;  %383 = vst.msk [vmem:[#allocation2 + $0x18] sm:$0xfe] %vm382_vm3, %v380_v28  ;;  %464 = vst.msk [vmem:[#allocation2 + $0x60] sm:$0xfe] %vm382_vm3, %v462_v29  ;;  %v411_v40 = vpack.c.bf16 %v11527_v38, %v11526_v37  ;;  %v11543_v41 = vld [vmem:[%s15425_s19 + $0xc8] sm:$0xff] }
  0x1c   : > { %385 = vst.msk [vmem:[#allocation2 + $0x20] sm:$0x1] %vm384_vm4, %v380_v28  ;;  %465 = vst.msk [vmem:[#allocation2 + $0x68] sm:$0x1] %vm384_vm4, %v462_v29  ;;  %v11528_v42 = vld [vmem:[%s15425_s19 + $0x50] sm:$0xff]  ;;  %v11529_v43 = vld [vmem:[%s15425_s19 + $0x58] sm:$0xff]  ;;  %v487_v47 = vpack.c.bf16 %v11543_v41, %v11542_v39 }
  0x1d   : > { %394 = vst.msk [vmem:[#allocation2 + $0x20] sm:$0xfc] %vm393_vm5, %v391_v30  ;;  %v402_v45 = vrot.slane %v400_v35, 5  ;;  %v480_v46 = vrot.slane %v478_v36, 5  ;;  %v11544_v48 = vld [vmem:[%s15425_s19 + $0xd0] sm:$0xff]  ;;  %v11545_v49 = vld [vmem:[%s15425_s19 + $0xd8] sm:$0xff]  ;;  %v422_v52 = vpack.c.bf16 %v11529_v43, %v11528_v42 }
  0x1e   : > { %396 = vst.msk [vmem:[#allocation2 + $0x28] sm:$0x3] %vm395_vm6, %v391_v30  ;;  %v11530_v50 = vld [vmem:[%s15425_s19 + $0x60] sm:$0xff]  ;;  %v413_v51 = vrot.slane %v411_v40, 4  ;;  %v496_v53 = vpack.c.bf16 %v11545_v49, %v11544_v48  ;;  %v11531_v54 = vld [vmem:[%s15425_s19 + $0x68] sm:$0xff]  ;;  %v489_v58 = vrot.slane %v487_v47, 4 }
  0x1f   : > { %v11546_v55 = vld [vmem:[%s15425_s19 + $0xe0] sm:$0xff]  ;;  %v11547_v56 = vld [vmem:[%s15425_s19 + $0xe8] sm:$0xff]  ;;  %473 = vst.msk [vmem:[#allocation2 + $0x68] sm:$0xfc] %vm393_vm5, %v471_v44  ;;  %v433_v59 = vpack.c.bf16 %v11531_v54, %v11530_v50  ;;  %v11532_v61 = vld [vmem:[%s15425_s19 + $0x70] sm:$0xff]  ;;  %v424_v0 = vrot.slane %v422_v52, 3 }
  0x20   : > { %405 = vst.msk [vmem:[#allocation2 + $0x28] sm:$0xf8] %vm404_vm7, %v402_v45  ;;  %482 = vst.msk [vmem:[#allocation2 + $0x70] sm:$0xf8] %vm404_vm7, %v480_v46  ;;  %v505_v60 = vpack.c.bf16 %v11547_v56, %v11546_v55  ;;  %v11533_v62 = vld [vmem:[%s15425_s19 + $0x78] sm:$0xff]  ;;  %v11548_v1 = vld [vmem:[%s15425_s19 + $0xf0] sm:$0xff] }
  0x21   : > { %v15478_v57 = vld [vmem:[#allocation2 + $0x10] sm:$0xff]  ;;  %474 = vst.msk [vmem:[#allocation2 + $0x70] sm:$0x3] %vm395_vm6, %v471_v44  ;;  %v11549_v3 = vld [vmem:[%s15425_s19 + $0xf8] sm:$0xff]  ;;  %v498_v6 = vrot.slane %v496_v53, 3  ;;  %v435_v7 = vrot.slane %v433_v59, 2  ;;  %v444_v9 = vpack.c.bf16 %v11533_v62, %v11532_v61 }
  0x22   : > { %407 = vst.msk [vmem:[#allocation2 + $0x30] sm:$0x7] %vm406_vm8, %v402_v45  ;;  %483 = vst.msk [vmem:[#allocation2 + $0x78] sm:$0x7] %vm406_vm8, %v480_v46  ;;  %12855 = vmatprep.mubr.msk.bf16.mxu0 %vm312_vm1, %v15478_v57  ;;  %v567_v63 = vrot.slane %v15478_v57, 7  ;;  %v507_v8 = vrot.slane %v505_v60, 2  ;;  %v514_v17 = vpack.c.bf16 %v11549_v3, %v11548_v1 }
  0x23   : > { %416 = vst.msk [vmem:[#allocation2 + $0x30] sm:$0xf0] %vm415_vm9, %v413_v51  ;;  %491 = vst.msk [vmem:[#allocation2 + $0x78] sm:$0xf0] %vm415_vm9, %v489_v58  ;;  %v11534_v10 = vld [vmem:[%s15425_s19 + $0x80] sm:$0xff]  ;;  %v11535_v11 = vld [vmem:[%s15425_s19 + $0x88] sm:$0xff] }
  0x24   : > { %418 = vst.msk [vmem:[#allocation2 + $0x38] sm:$0xf] %vm417_vm10, %v413_v51  ;;  %492 = vst.msk [vmem:[#allocation2 + $0x80] sm:$0xf] %vm417_vm10, %v489_v58  ;;  %v568_v13 = vsel %vm563_vm2, %v565_v24, %v567_v63  ;;  %vm450_vm3 = vcmask 63488   ;;  %v1580_v15 = vld [vmem:[#allocation2 + $0x18] sm:$0xff]  ;;  %v455_v18 = vpack.c.bf16 %v11535_v11, %v11534_v10 }
  0x25   : > { %427 = vst.msk [vmem:[#allocation2 + $0x38] sm:$0xe0] %vm426_vm11, %v424_v0  ;;  %v15509_v14 = vld [vmem:[%s19462_s2 + $0x18] sm:$0xf]  ;;  %12704 = vmatmul.mubr.msk.bf16.vlgmr.msra.gmra.mrb[0].mxu1 %vm312_vm1, %v568_v13  ;;  %v15512_v16 = vld [vmem:[#allocation2 + $0x20] sm:$0xff]  ;;  %v446_v4 = vrot.slane %v444_v9, 1  ;;  %12856 = vmatmul.mubr.msk.bf16.vlgmr.msra.gmra.mrb[0].mxu0 %vm312_vm1, %v1580_v15 }
  0x26   : > { %429 = vst.msk [vmem:[#allocation2 + $0x40] sm:$0x1f] %vm428_vm12, %v424_v0  ;;  %19646 = vst [vmem:[#allocation5_spill] sm:$0xff] %v15512_v16  ;;  %v15523_v21 = vld [vmem:[%s19462_s2 + $0x8] sm:$0xf]  ;;  %v15525_v22 = vshrl.u32 %v1580_v15, 16  ;;  %12740 = vmatpush3.bf16.msra.mxu1 %v15450_v25  ;;  %12892 = vmatpush3.bf16.msra.mxu0 %v2496_v12 }
  0x27   : > { %500 = vst.msk [vmem:[#allocation2 + $0x80] sm:$0xe0] %vm426_vm11, %v498_v6  ;;  %12859 = vmatprep.mubr.msk.bf16.mxu0 %vm312_vm1, %v15512_v16  ;;  %v569_v23 = vrot.slane %v1580_v15, 7  ;;  %v571_v24 = vrot.slane %v15512_v16, 7  ;;  %v516_v26 = vrot.slane %v514_v17, 1  ;;  %v15536_v28 = vshll.u32 %v1580_v15, 16  ;;  %14636 = vmatprep.subr.msk.bf16.mxu0 %vm655_vm0, %v15509_v14 }
  0x28   : > { %438 = vst.msk [vmem:[#allocation2 + $0x40] sm:$0xc0] %vm437_vm13, %v435_v7  ;;  %509 = vst.msk [vmem:[#allocation2 + $0x88] sm:$0xc0] %vm437_vm13, %v507_v8  ;;  %v19471_v27 = vrot.slane %v15525_v22, 7  ;;  %14631 = vmatprep.subr.msk.bf16.mxu1 %vm655_vm0, %v15523_v21  ;;  %v15551_v30 = vld [vmem:[#allocation2 + $0x28] sm:$0xff] }
  0x29   : > { %501 = vst.msk [vmem:[#allocation2 + $0x88] sm:$0x1f] %vm428_vm12, %v498_v6  ;;  %v570_v25 = vsel %vm563_vm2, %v567_v63, %v569_v23  ;;  %19647 = vst [vmem:[#allocation6_spill] sm:$0xff] %v15551_v30  ;;  %v572_v31 = vsel %vm563_vm2, %v569_v23, %v571_v24  ;;  %v573_v33 = vrot.slane %v15551_v30, 7  ;;  %v15583_v44 = vshll.u32 %v15478_v57, 16  ;;  %v15610_v58 = vld [vmem:[#allocation2 + $0x60] sm:$0xff] }
  0x2a   : > { %440 = vst.msk [vmem:[#allocation2 + $0x48] sm:$0x3f] %vm439_vm14, %v435_v7  ;;  %510 = vst.msk [vmem:[#allocation2 + $0x90] sm:$0x3f] %vm439_vm14, %v507_v8  ;;  %v15548_v29 = vor.u32 %v15536_v28, %v19471_v27  ;;  %12707 = vmatprep.mubr.msk.bf16.mxu1 %vm312_vm1, %v570_v25  ;;  %v15554_v32 = vld [vmem:[#allocation2 + $0x30] sm:$0xff]  ;;  %v15590_v48 = vshrl.u32 %v15478_v57, 16 }
  0x2b   : > { %449 = vst.msk [vmem:[#allocation2 + $0x48] sm:$0x80] %vm448_vm15, %v446_v4  ;;  %518 = vst.msk [vmem:[#allocation2 + $0x90] sm:$0x80] %vm448_vm15, %v516_v26  ;;  %v574_v34 = vsel %vm563_vm2, %v571_v24, %v573_v33  ;;  %v575_v36 = vrot.slane %v15554_v32, 7  ;;  %v2298_v49 = vrot.slane %v15583_v44, 1 }
  0x2c   : > { %451 = vst.msk [vmem:[#allocation2 + $0x50] sm:$0x7f] %vm450_vm3, %v446_v4  ;;  %519 = vst.msk [vmem:[#allocation2 + $0x98] sm:$0x7f] %vm450_vm3, %v516_v26  ;;  %v15562_v35 = vld [vmem:[#allocation2 + $0x38] sm:$0xff]  ;;  %v2303_v54 = vrot.slane %v15536_v28, 1 }
  0x2d   : > { %456 = vst.msk [vmem:[#allocation2 + $0x58] sm:$0xff] %vm312_vm1, %v455_v18  ;;  %19648 = vst [vmem:[#allocation7_spill] sm:$0xff] %v15554_v32  ;;  %12708 = vmatmul.mubr.msk.bf16.gmra.mrb[4].mxu1 %vm312_vm1, %v572_v31  ;;  %12860 = vmatmul.mubr.msk.bf16.gmra.mrb[4].mxu0 %vm312_vm1, %v15551_v30  ;;  %v577_v37 = vrot.slane %v15562_v35, 7  ;;  %v576_v38 = vsel %vm563_vm2, %v573_v33, %v575_v36  ;;  %v2299_v53 = vor.u32 %v2298_v49, %v15590_v48  ;;  %vm2292_vm4 = vsmask.f32 7424  ;;  %v15619_v62 = vld [vmem:[#allocation2 + $0x68] sm:$0xff] }
  0x2e   : > { %12711 = vmatprep.mubr.msk.bf16.mxu1 %vm312_vm1, %v574_v34  ;;  %19649 = vst [vmem:[#allocation8_spill] sm:$0xff] %v15562_v35  ;;  %12863 = vmatprep.mubr.msk.bf16.mxu0 %vm312_vm1, %v15554_v32  ;;  %v15606_v55 = vshll.u32 %v15512_v16, 16  ;;  %19654 = vst [vmem:[#allocation13_spill] sm:$0xff] %v15610_v58  ;;  %v15613_v59 = vshrl.u32 %v15512_v16, 16  ;;  %v15616_v60 = vshll.u32 %v15551_v30, 16  ;;  %v587_v0 = vrot.slane %v15610_v58, 7 }
  0x2f   : > { %v15569_v39 = vld [vmem:[#allocation2 + $0x40] sm:$0xff]  ;;  %v578_v40 = vsel %vm563_vm2, %v575_v36, %v577_v37  ;;  %v2304_v61 = vsel %vm2292_vm4, %v2299_v53, %v2303_v54  ;;  %19655 = vst [vmem:[#allocation14_spill] sm:$0xff] %v15619_v62  ;;  %v2307_v1 = vor.u32 %v2303_v54, %v15525_v22  ;;  %v589_v3 = vrot.slane %v15619_v62, 7  ;;  %v15643_v13 = vld [vmem:[#allocation2 + $0x70] sm:$0xff]  ;;  %v15656_v23 = vld [vmem:[#allocation2 + $0x78] sm:$0xff] }
  0x30   : > { %19650 = vst [vmem:[#allocation9_spill] sm:$0xff] %v15569_v39  ;;  %v579_v42 = vrot.slane %v15569_v39, 7  ;;  %v2311_v63 = vrot.slane %v15606_v55, 1  ;;  %v2319_v7 = vrot.slane %v15616_v60, 1  ;;  %v15633_v8 = vshll.u32 %v15554_v32, 16  ;;  %19657 = vst [vmem:[#allocation16_spill] sm:$0xff] %v15643_v13 }
  0x31   : > { %v15637_v10 = vshrl.u32 %v15551_v30, 16  ;;  %v590_v12 = vsel %vm563_vm2, %v587_v0, %v589_v3  ;;  %v15646_v15 = vshrl.u32 %v15554_v32, 16  ;;  %v15649_v4 = vshll.u32 %v15562_v35, 16  ;;  %19659 = vst [vmem:[#allocation18_spill] sm:$0xff] %v15656_v23  ;;  %v15662_v24 = vld [vmem:[%s19462_s2 + $0x1c] sm:$0xf] }
  0x32   : > { %v15576_v41 = vld [vmem:[#allocation2 + $0x48] sm:$0xff]  ;;  %v580_v45 = vsel %vm563_vm2, %v577_v37, %v579_v42  ;;  %v2315_v6 = vor.u32 %v2311_v63, %v15613_v59  ;;  %19656 = vst [vmem:[#allocation15_spill] sm:$0xff] %v15633_v8  ;;  %v15640_v11 = vsel %vm2292_vm4, %v2307_v1, %v2311_v63  ;;  %v2935_v17 = vsel %vm655_vm0, %v15509_v14, 0 }
  0x33   : > { %19651 = vst [vmem:[#allocation10_spill] sm:$0xff] %v15576_v41  ;;  %v581_v43 = vrot.slane %v15576_v41, 7  ;;  %v15586_v46 = vld [vmem:[#allocation2 + $0x50] sm:$0xff]  ;;  %19658 = vst [vmem:[#allocation17_spill] sm:$0xff] %v15649_v4  ;;  %v2327_v26 = vrot.slane %v15633_v8, 1  ;;  %v591_v14 = vrot.slane %v15643_v13, 7  ;;  %v2323_v25 = vor.u32 %v2319_v7, %v15637_v10 }
  0x34   : > { %19652 = vst [vmem:[#allocation11_spill] sm:$0xff] %v15586_v46  ;;  %v15597_v50 = vld [vmem:[#allocation2 + $0x58] sm:$0xff]  ;;  %v583_v51 = vrot.slane %v15586_v46, 7  ;;  %v15654_v18 = vsel %vm2292_vm4, %v2315_v6, %v2319_v7  ;;  %v593_v31 = vrot.slane %v15656_v23, 7  ;;  %v2335_v34 = vrot.slane %v15649_v4, 1 }
  0x35   : > { %12712 = vmatmul.mubr.msk.bf16.gmra.mrb[8].mxu1 %vm312_vm1, %v576_v38  ;;  %12864 = vmatmul.mubr.msk.bf16.gmra.mrb[8].mxu0 %vm312_vm1, %v15562_v35  ;;  %v582_v47 = vsel %vm563_vm2, %v579_v42, %v581_v43  ;;  %19653 = vst [vmem:[#allocation12_spill] sm:$0xff] %v15597_v50  ;;  %v585_v52 = vrot.slane %v15597_v50, 7  ;;  %v2331_v33 = vor.u32 %v2327_v26, %v15646_v15  ;;  %v15678_v36 = vshll.u32 %v15569_v39, 16 }
  0x36   : > { %12715 = vmatprep.mubr.msk.bf16.mxu1 %vm312_vm1, %v578_v40  ;;  %12867 = vmatprep.mubr.msk.bf16.mxu0 %vm312_vm1, %v15569_v39  ;;  %v584_v56 = vsel %vm563_vm2, %v581_v43, %v583_v51  ;;  %v592_v37 = vsel %vm563_vm2, %v589_v3, %v591_v14  ;;  %v15682_v38 = vshrl.u32 %v15562_v35, 16  ;;  %v15685_v40 = vsel %vm2292_vm4, %v2323_v25, %v2327_v26  ;;  %v15688_v43 = vld [vmem:[#allocation2 + $0x80] sm:$0xff]  ;;  %v539_v26 = vld [vmem:[#allocation2 + $0x90] sm:$0x7f] }
  0x37   : > { %v586_v57 = vsel %vm563_vm2, %v583_v51, %v585_v52  ;;  %v588_v9 = vsel %vm563_vm2, %v585_v52, %v587_v0  ;;  %19660 = vst [vmem:[#allocation19_spill] sm:$0xff] %v15678_v36  ;;  %v594_v42 = vsel %vm563_vm2, %v591_v14, %v593_v31  ;;  %19662 = vst [vmem:[#allocation21_spill] sm:$0xff] %v15688_v43  ;;  %v15699_v51 = vld [vmem:[#allocation2 + $0x88] sm:$0xff]  ;;  %v521_v52 = vld [vmem:[#allocation2] sm:$0xc0]  ;;  %v19473_v53 = vshrl.u32 %v15442_v19, 16 }
  0x38   : > { %19661 = vst [vmem:[#allocation20_spill] sm:$0xff] %v15682_v38  ;;  %v15697_v49 = vsel %vm2292_vm4, %v2331_v33, %v2335_v34  ;;  %19664 = vst [vmem:[#allocation23_spill] sm:$0xff] %v15699_v51  ;;  %v19472_v54 = vshll.u32 %v15442_v19, 16  ;;  %v597_v63 = vrot.slane %v15699_v51, 7  ;;  %v838_v0 = vshrl.u32 %v521_v52, 16 }
  0x39   : > { %v841_v1 = vshll.u32 %v521_v52, 16  ;;  %v15716_v7 = vshrl.u32 %v15576_v41, 16  ;;  %v848_v14 = vrot.slane %v19473_v53, 6  ;;  %v15734_v52 = vshll.u32 %v15597_v50, 16 }
  0x3a   : > { %v851_v25 = vrot.slane %v19472_v54, 7  ;;  %v15743_v27 = vshrl.u32 %v15699_v51, 16  ;;  %vm836_vm5 = vsmask.f32 1280  ;;  %v1002_v2 = vshll.u32 %v539_v26, 16 }
  0x3b   : > { %v2367_v53 = vrot.slane %v15734_v52, 1  ;;  %v15767_v35 = vshll.u32 %v15610_v58, 16  ;;  %v869_v32 = vrot.slane %v15536_v28, 7  ;;  %v905_v30 = vrot.slane %v15649_v4, 7 }
  0x3c   : > { %19666 = vst [vmem:[#allocation25_spill] sm:$0xff] %v15743_v27  ;;  %vm3172_vm6 = vcmask 1046528   ;;  %vm1244_vm7 = vsmask.f32 256  ;;  %vm307_vm8 = vcmask 261120  }
  0x3d   : > { %12716 = vmatmul.mubr.msk.bf16.gmra.mrb[12].mxu1 %vm312_vm1, %v580_v45  ;;  %12868 = vmatmul.mubr.msk.bf16.gmra.mrb[12].mxu0 %vm312_vm1, %v15576_v41  ;;  %v15691_v45 = vshrl.u32 %v15569_v39, 16 }
  0x3e   : > { %12719 = vmatprep.mubr.msk.bf16.mxu1 %vm312_vm1, %v582_v47  ;;  %12871 = vmatprep.mubr.msk.bf16.mxu0 %vm312_vm1, %v15586_v46  ;;  %v15694_v47 = vshll.u32 %v15576_v41, 16 }
  0x40   : > { %19663 = vst [vmem:[#allocation22_spill] sm:$0xff] %v15694_v47  ;;  %v2351_v6 = vrot.slane %v15694_v47, 1 }
  0x45   : > { %12720 = vmatmul.mubr.msk.bf16.gmra.mrb[16].mxu1 %vm312_vm1, %v584_v56  ;;  %12872 = vmatmul.mubr.msk.bf16.gmra.mrb[16].mxu0 %vm312_vm1, %v15597_v50  ;;  %v2343_v56 = vrot.slane %v15678_v36, 1 }
  0x46   : > { %12723 = vmatprep.mubr.msk.bf16.mxu1 %vm312_vm1, %v586_v57  ;;  %12893 = vmatprep.mubr.msk.bf16.mxu0 %vm312_vm1, %v2304_v61  ;;  %v595_v57 = vrot.slane %v15688_v43, 7  ;;  %v2339_v61 = vor.u32 %v2335_v34, %v15682_v38 }
  0x47   : > { %v2347_v3 = vor.u32 %v2343_v56, %v15691_v45 }
  0x48   : > { %v15730_v33 = vsel %vm2292_vm4, %v2339_v61, %v2343_v56  ;;  %v598_v34 = vsel %vm563_vm2, %v595_v57, %v597_v63  ;;  %v2355_v56 = vor.u32 %v2351_v6, %v15716_v7  ;;  %v599_v61 = vrot.slane %v539_v26, 7 }
  0x49   : > { %v15737_v5 = vsel %vm2292_vm4, %v2347_v3, %v2351_v6  ;;  %v857_v3 = vrot.slane %v15590_v48, 6  ;;  %v852_v6 = vor.u32 %v851_v25, %v848_v14 }
  0x4a   : > { %v600_v39 = vsel %vm563_vm2, %v597_v63, %v599_v61  ;;  %v15781_v63 = vshll.u32 %v15619_v62, 16 }
  0x4d   : > { %12724 = vmatmul.mubr.msk.bf16.gmra.mrb[20].mxu1 %vm312_vm1, %v588_v9  ;;  %12894 = vmatmul.mubr.msk.bf16.vlgmr.msra.gmra.mrb[0].mxu0 %vm312_vm1, %v15640_v11  ;;  %v15719_v9 = vshll.u32 %v15586_v46, 16 }
  0x4e   : > { %12727 = vmatprep.mubr.msk.bf16.mxu1 %vm312_vm1, %v590_v12  ;;  %12930 = vmatpush3.bf16.msra.mxu0 %v2935_v17  ;;  %v15722_v12 = vshrl.u32 %v15586_v46, 16  ;;  %v596_v17 = vsel %vm563_vm2, %v593_v31, %v595_v57  ;;  %v15740_v31 = vshll.u32 %v15699_v51, 16  ;;  %v999_v51 = vshrl.u32 %v539_v26, 16 }
  0x4f   : > { %12897 = vmatprep.mubr.msk.bf16.mxu0 %vm312_vm1, %v15654_v18  ;;  %14637 = vmatprep.subr.msk.bf16.mxu0 %vm655_vm0, %v15662_v24  ;;  %v2359_v57 = vrot.slane %v15719_v9, 1  ;;  %v15760_v46 = vshrl.u32 %v15597_v50, 16  ;;  %v866_v26 = vrot.slane %v15525_v22, 6 }
  0x50   : > { %19665 = vst [vmem:[#allocation24_spill] sm:$0xff] %v15740_v31  ;;  %v1001_v25 = vrot.slane %v999_v51, 6 }
  0x51   : > { %v2363_v54 = vor.u32 %v2359_v57, %v15722_v12  ;;  %v15763_v41 = vsel %vm2292_vm4, %v2355_v56, %v2359_v57  ;;  %v15778_v56 = vshrl.u32 %v15610_v58, 16  ;;  %v870_v61 = vor.u32 %v869_v32, %v866_v26 }
  0x53   : > { %v15775_v50 = vsel %vm2292_vm4, %v2363_v54, %v2367_v53  ;;  %v2371_v54 = vor.u32 %v2367_v53, %v15760_v46  ;;  %v884_v53 = vrot.slane %v15637_v10, 6 }
  0x55   : > { %12728 = vmatmul.mubr.msk.bf16.gmra.mrb[24].mxu1 %vm312_vm1, %v592_v37  ;;  %12898 = vmatmul.mubr.msk.bf16.gmra.mrb[4].mxu0 %vm312_vm1, %v15685_v40  ;;  %v840_v37 = vrot.slane %v838_v0, 6  ;;  %v992_v0 = vrot.slane %v15743_v27, 6 }
  0x56   : > { %12731 = vmatprep.mubr.msk.bf16.mxu1 %vm312_vm1, %v594_v42  ;;  %12901 = vmatprep.mubr.msk.bf16.mxu0 %vm312_vm1, %v15697_v49  ;;  %v843_v42 = vrot.slane %v841_v1, 7  ;;  %v995_v1 = vrot.slane %v15740_v31, 7 }
  0x58   : > { %v15769_v14 = vor.u32 %v995_v1, %v992_v0  ;;  %v2383_v0 = vrot.slane %v15781_v63, 1  ;;  %v15798_v1 = vshrl.u32 %v15619_v62, 16  ;;  %v15821_v62 = vshll.u32 %v15656_v23, 16 }
  0x5d   : > { %12732 = vmatmul.mubr.msk.bf16.gmra.mrb[28].mxu1 %vm312_vm1, %v596_v17  ;;  %12902 = vmatmul.mubr.msk.bf16.gmra.mrb[8].mxu0 %vm312_vm1, %v15730_v33  ;;  %v844_v17 = vor.u32 %v843_v42, %v840_v37  ;;  %v1004_v37 = vrot.slane %v1002_v2, 7  ;;  %v2375_v2 = vrot.slane %v15767_v35, 1 }
  0x5e   : > { %12735 = vmatprep.mubr.msk.bf16.mxu1 %vm312_vm1, %v598_v34  ;;  %12905 = vmatprep.mubr.msk.bf16.mxu0 %vm312_vm1, %v15737_v5  ;;  %v860_v34 = vrot.slane %v15583_v44, 7 }
  0x5f   : > { %v853_v42 = vsel %vm836_vm5, %v844_v17, %v852_v6  ;;  %v1005_v57 = vor.u32 %v1004_v37, %v1001_v25  ;;  %v15801_v17 = vshll.u32 %v15643_v13, 16  ;;  %v878_v25 = vrot.slane %v15606_v55, 7 }
  0x60   : > { %v861_v28 = vor.u32 %v860_v34, %v857_v3  ;;  %v875_v34 = vrot.slane %v15613_v59, 6  ;;  %v15807_v37 = vsel %vm2292_vm4, %v2371_v54, %v2375_v2  ;;  %v15829_v54 = vld [vmem:[%s19462_s2 + $0xc] sm:$0xf] }
  0x61   : > { %v15790_v51 = vsel %vm836_vm5, %v15769_v14, %v1005_v57  ;;  %v1363_v57 = vsel %vm655_vm0, %v15523_v21, 0 }
  0x62   : > { %v862_v3 = vsel %vm836_vm5, %v852_v6, %v861_v28  ;;  %v871_v32 = vsel %vm836_vm5, %v861_v28, %v870_v61  ;;  %v15818_v6 = vshrl.u32 %v15643_v13, 16  ;;  %v2391_v28 = vrot.slane %v15801_v17, 1 }
  0x63   : > { %v879_v21 = vor.u32 %v878_v25, %v875_v34  ;;  %v893_v34 = vrot.slane %v15646_v15, 6  ;;  %v896_v25 = vrot.slane %v15633_v8, 7  ;;  %v15876_v8 = vld [vmem:[#allocation2 + $0x98] sm:$0xff] }
  0x65   : > { %12736 = vmatmul.mubr.msk.bf16.gmra.mrb[32].mxu1 %vm312_vm1, %v600_v39  ;;  %12906 = vmatmul.mubr.msk.bf16.gmra.mrb[12].mxu0 %vm312_vm1, %v15763_v41  ;;  %v2379_v39 = vor.u32 %v15778_v56, %v2375_v2  ;;  %v2387_v2 = vor.u32 %v15798_v1, %v2383_v0  ;;  %v880_v58 = vsel %vm836_vm5, %v870_v61, %v879_v21  ;;  %v15859_v61 = vshrl.u32 %v15688_v43, 16 }
  0x66   : > { %12741 = vmatprep.mubr.msk.bf16.mxu1 %vm312_vm1, %v853_v42  ;;  %12909 = vmatprep.mubr.msk.bf16.mxu0 %vm312_vm1, %v15775_v50  ;;  %v887_v42 = vrot.slane %v15616_v60, 7 }
  0x67   : > { %v15813_v26 = vsel %vm2292_vm4, %v2379_v39, %v2383_v0  ;;  %v2395_v0 = vor.u32 %v15818_v6, %v2391_v28  ;;  %v15841_v13 = vsel %vm2292_vm4, %v2387_v2, %v2391_v28 }
  0x68   : > { %v888_v39 = vor.u32 %v887_v42, %v884_v53  ;;  %v15851_v42 = vshrl.u32 %v15656_v23, 16  ;;  %v15866_v23 = vld [vmem:[#allocation2 + $0x90] sm:$0xff] }
  0x69   : > { %19668 = vst [vmem:[#allocation27_spill] sm:$0xff] %v15866_v23  ;;  %v15874_v4 = vshll.u32 %v15866_v23, 16 }
  0x6a   : > { %v889_v53 = vsel %vm836_vm5, %v879_v21, %v888_v39  ;;  %v897_v21 = vor.u32 %v896_v25, %v893_v34  ;;  %v911_v34 = vrot.slane %v15691_v45, 6  ;;  %v914_v25 = vrot.slane %v15678_v36, 7  ;;  %v2289_v36 = vld [vmem:[#allocation2 + $0xa0] sm:$0x1] }
  0x6b   : > { %19669 = vst [vmem:[#allocation28_spill] sm:$0xff] %v15874_v4 }
  0x6d   : > { %12742 = vmatmul.mubr.msk.bf16.vlgmr.msra.gmra.mrb[0].mxu1 %vm312_vm1, %v862_v3  ;;  %12910 = vmatmul.mubr.msk.bf16.gmra.mrb[16].mxu0 %vm312_vm1, %v15807_v37  ;;  %v2399_v3 = vrot.slane %v15821_v62, 1 }
  0x6e   : > { %12745 = vmatprep.mubr.msk.bf16.mxu1 %vm312_vm1, %v871_v32  ;;  %12913 = vmatprep.mubr.msk.bf16.mxu0 %vm312_vm1, %v15813_v26  ;;  %v15845_v32 = vshll.u32 %v15688_v43, 16 }
  0x6f   : > { %12778 = vmatpush3.bf16.msra.mxu1 %v1363_v57  ;;  %v902_v57 = vrot.slane %v15682_v38, 6  ;;  %v15856_v2 = vsel %vm2292_vm4, %v2395_v0, %v2399_v3  ;;  %v2403_v0 = vor.u32 %v15851_v42, %v2399_v3  ;;  %v920_v3 = vrot.slane %v15716_v7, 6 }
  0x70   : > { %14632 = vmatprep.subr.msk.bf16.mxu1 %vm655_vm0, %v15829_v54  ;;  %19667 = vst [vmem:[#allocation26_spill] sm:$0xff] %v15856_v2  ;;  %v2407_v28 = vrot.slane %v15845_v32, 1  ;;  %v15891_v38 = vshrl.u32 %v15866_v23, 16 }
  0x71   : > { %v906_v16 = vor.u32 %v905_v30, %v902_v57  ;;  %v923_v57 = vrot.slane %v15694_v47, 7 }
  0x72   : > { %v2411_v43 = vor.u32 %v15859_v61, %v2407_v28  ;;  %19670 = vst [vmem:[#allocation29_spill] sm:$0xff] %v15891_v38 }
  0x73   : > { %v907_v30 = vsel %vm836_vm5, %v897_v21, %v906_v16 }
  0x75   : > { %12746 = vmatmul.mubr.msk.bf16.gmra.mrb[4].mxu1 %vm312_vm1, %v880_v58  ;;  %12914 = vmatmul.mubr.msk.bf16.gmra.mrb[20].mxu0 %vm312_vm1, %v15841_v13  ;;  %v2415_v58 = vrot.slane %v15740_v31, 1 }
  0x76   : > { %12749 = vmatprep.mubr.msk.bf16.mxu1 %vm312_vm1, %v889_v53  ;;  %12917 = vmatprep.mubr.msk.bf16.mxu0 %vm312_vm1, %v15856_v2  ;;  %v898_v53 = vsel %vm836_vm5, %v888_v39, %v897_v21  ;;  %v15882_v2 = vsel %vm2292_vm4, %v2403_v0, %v2407_v28  ;;  %v15894_v39 = vshll.u32 %v15876_v8, 16  ;;  %v2423_v0 = vrot.slane %v15874_v4, 1 }
  0x77   : > { %v15888_v31 = vsel %vm2292_vm4, %v2411_v43, %v2415_v58  ;;  %v2419_v28 = vor.u32 %v15743_v27, %v2415_v58  ;;  %v915_v21 = vor.u32 %v914_v25, %v911_v34  ;;  %v924_v43 = vor.u32 %v923_v57, %v920_v3 }
  0x78   : > { %19671 = vst [vmem:[#allocation30_spill] sm:$0xff] %v15894_v39  ;;  %v2427_v23 = vor.u32 %v15891_v38, %v2423_v0  ;;  %v2431_v47 = vrot.slane %v15894_v39, 1  ;;  %v15911_v4 = vshrl.u32 %v15876_v8, 16  ;;  %v932_v34 = vrot.slane %v15719_v9, 7 }
  0x79   : > { %v916_v58 = vsel %vm836_vm5, %v906_v16, %v915_v21  ;;  %v925_v25 = vsel %vm836_vm5, %v915_v21, %v924_v43  ;;  %v2437_v3 = vshll.u32 %v2289_v36, 16  ;;  %v938_v57 = vrot.slane %v15760_v46, 6 }
  0x7a   : > { %v941_v39 = vrot.slane %v15734_v52, 7  ;;  %v15919_v38 = vsel %vm2292_vm4, %v2427_v23, %v2431_v47  ;;  %v15928_v36 = vor.u32 %v15911_v4, %v2431_v47  ;;  %v947_v23 = vrot.slane %v15778_v56, 6 }
  0x7d   : > { %12750 = vmatmul.mubr.msk.bf16.gmra.mrb[8].mxu1 %vm312_vm1, %v898_v53  ;;  %12918 = vmatmul.mubr.msk.bf16.gmra.mrb[24].mxu0 %vm312_vm1, %v15882_v2  ;;  %v15907_v53 = vsel %vm2292_vm4, %v2419_v28, %v2423_v0  ;;  %v2439_v28 = vrot.slane %v2437_v3, 1  ;;  %v942_v0 = vor.u32 %v941_v39, %v938_v57  ;;  %v965_v3 = vrot.slane %v15818_v6, 6 }
  0x7e   : > { %12753 = vmatprep.mubr.msk.bf16.mxu1 %vm312_vm1, %v907_v30  ;;  %12921 = vmatprep.mubr.msk.bf16.mxu0 %vm312_vm1, %v15888_v31  ;;  %v929_v30 = vrot.slane %v15722_v12, 6  ;;  %v968_v57 = vrot.slane %v15801_v17, 7 }
  0x7f   : > { %v2440_v27 = vsel %vm2292_vm4, %v15928_v36, %v2439_v28  ;;  %v974_v28 = vrot.slane %v15851_v42, 6 }
  0x80   : > { %v933_v16 = vor.u32 %v932_v34, %v929_v30  ;;  %v956_v30 = vrot.slane %v15798_v1, 6  ;;  %v959_v34 = vrot.slane %v15781_v63, 7 }
  0x82   : > { %v934_v21 = vsel %vm836_vm5, %v924_v43, %v933_v16  ;;  %v960_v39 = vor.u32 %v959_v34, %v956_v30 }
  0x85   : > { %12754 = vmatmul.mubr.msk.bf16.gmra.mrb[12].mxu1 %vm312_vm1, %v916_v58  ;;  %12922 = vmatmul.mubr.msk.bf16.gmra.mrb[28].mxu0 %vm312_vm1, %v15907_v53  ;;  %v950_v58 = vrot.slane %v15767_v35, 7 }
  0x86   : > { %12757 = vmatprep.mubr.msk.bf16.mxu1 %vm312_vm1, %v925_v25  ;;  %12925 = vmatprep.mubr.msk.bf16.mxu0 %vm312_vm1, %v15919_v38  ;;  %v943_v25 = vsel %vm836_vm5, %v933_v16, %v942_v0 }
  0x87   : > { %v951_v47 = vor.u32 %v950_v58, %v947_v23  ;;  %v15952_v23 = vld [vmem:[#allocation2 + $0xa0] sm:$0xff]  ;;  %v15962_v58 = vld [vmem:[#allocation2 + $0xa8] sm:$0x1] }
  0x88   : > { %v3208_v34 = vrot.slane %v15962_v58, 1 }
  0x89   : > { %v952_v43 = vsel %vm836_vm5, %v942_v0, %v951_v47  ;;  %v961_v16 = vsel %vm836_vm5, %v951_v47, %v960_v39  ;;  %v969_v0 = vor.u32 %v968_v57, %v965_v3  ;;  %v983_v3 = vrot.slane %v15859_v61, 6 }
  0x8d   : > { %12758 = vmatmul.mubr.msk.bf16.gmra.mrb[16].mxu1 %vm312_vm1, %v934_v21  ;;  %12926 = vmatmul.mubr.msk.bf16.gmra.mrb[32].mxu0 %vm312_vm1, %v2440_v27  ;;  %v977_v21 = vrot.slane %v15821_v62, 7  ;;  %v3265_v27 = vsel %vm655_vm0, %v15662_v24, 0  ;;  %v3206_v24 = vrot.slane %v15952_v23, 1 }
  0x8e   : > { %12761 = vmatprep.mubr.msk.bf16.mxu1 %vm312_vm1, %v943_v25  ;;  %12931 = vmatprep.mubr.msk.bf16.mxu0 %vm312_vm1, %v15640_v11  ;;  %v15957_v11 = vld [vmem:[%s19462_s2 + $0x20] sm:$0xf]  ;;  %v19514_v25 = vrot.slane %v15876_v8, 1 }
  0x8f   : > { %v978_v30 = vor.u32 %v977_v21, %v974_v28  ;;  %v15977_v47 = vsel %vm3172_vm6, %v3206_v24, %v3208_v34 }
  0x91   : > { %v979_v57 = vsel %vm836_vm5, %v969_v0, %v978_v30 }
  0x95   : > { %12762 = vmatmul.mubr.msk.bf16.gmra.mrb[20].mxu1 %vm312_vm1, %v952_v43  ;;  %12932 = vmatmul.mubr.msk.bf16.vlgmr.msra.gmra.mrb[0].mxu0 %vm312_vm1, %v15654_v18  ;;  %v15974_v18 = vsel %vm3172_vm6, %v19514_v25, %v3206_v24  ;;  %v970_v43 = vsel %vm836_vm5, %v960_v39, %v969_v0  ;;  %v1246_v39 = vshrl.u32 %v15444_v20, 16 }
  0x96   : > { %12765 = vmatprep.mubr.msk.bf16.mxu1 %vm312_vm1, %v961_v16  ;;  %12968 = vmatpush3.bf16.msra.mxu0 %v3265_v27  ;;  %v19672_v27 = vshrl.u32 %v15442_v19, 16 }
  0x97   : > { %12935 = vmatprep.mubr.msk.bf16.mxu0 %vm312_vm1, %v15685_v40  ;;  %14638 = vmatprep.subr.msk.bf16.mxu0 %vm655_vm0, %v15957_v11  ;;  %v986_v40 = vrot.slane %v15845_v32, 7 }
  0x98   : > { %v1249_v0 = vrot.slane %v19672_v27, 7 }
  0x99   : > { %v987_v16 = vor.u32 %v986_v40, %v983_v3  ;;  %v19676_v3 = vld [vmem:[#allocation26_spill] sm:$0xff] }
  0x9b   : > { %v988_v28 = vsel %vm836_vm5, %v978_v30, %v987_v16  ;;  %v997_v21 = vsel %vm836_vm5, %v987_v16, %v15769_v14  ;;  %v1606_v14 = vrot.slane %v15590_v48, 7  ;;  %v1264_v30 = vrot.slane %v15646_v15, 7 }
  0x9d   : > { %12766 = vmatmul.mubr.msk.bf16.gmra.mrb[24].mxu1 %vm312_vm1, %v970_v43  ;;  %12936 = vmatmul.mubr.msk.bf16.gmra.mrb[4].mxu0 %vm312_vm1, %v15697_v49  ;;  %v1248_v49 = vrot.slane %v1246_v39, 7  ;;  %v16020_v48 = vsel %vm1244_vm7, %v1606_v14, %v15548_v29 }
  0x9e   : > { %12769 = vmatprep.mubr.msk.bf16.mxu1 %vm312_vm1, %v979_v57  ;;  %12939 = vmatprep.mubr.msk.bf16.mxu0 %vm312_vm1, %v15730_v33  ;;  %v19673_v33 = vshll.u32 %v15442_v19, 16  ;;  %v19678_v57 = vld [vmem:[#allocation17_spill] sm:$0xff] }
  0xa0   : > { %v1250_v20 = vor.u32 %v1249_v0, %v19673_v33  ;;  %v19680_v33 = vld [vmem:[#allocation22_spill] sm:$0xff] }
  0xa2   : > { %v1251_v24 = vsel %vm1244_vm7, %v1248_v49, %v1250_v20 }
  0xa5   : > { %12770 = vmatmul.mubr.msk.bf16.gmra.mrb[28].mxu1 %vm312_vm1, %v988_v28  ;;  %12940 = vmatmul.mubr.msk.bf16.gmra.mrb[8].mxu0 %vm312_vm1, %v15737_v5  ;;  %v16011_v5 = vor.u32 %v15583_v44, %v1606_v14  ;;  %v1654_v28 = vrot.slane %v15691_v45, 7 }
  0xa6   : > { %12773 = vmatprep.mubr.msk.bf16.mxu1 %vm312_vm1, %v997_v21  ;;  %12943 = vmatprep.mubr.msk.bf16.mxu0 %vm312_vm1, %v15763_v41  ;;  %v1258_v41 = vrot.slane %v15613_v59, 7  ;;  %v1662_v21 = vrot.slane %v15716_v7, 7 }
  0xa7   : > { %v1254_v19 = vsel %vm1244_vm7, %v1249_v0, %v16011_v5  ;;  %v19512_v0 = vshll.u32 %v15952_v23, 16 }
  0xa8   : > { %v1259_v44 = vor.u32 %v15606_v55, %v1258_v41  ;;  %v1274_v20 = vor.u32 %v19680_v33, %v1662_v21 }
  0xa9   : > { %v2870_v14 = vrot.slane %v19512_v0, 1 }
  0xad   : > { %12774 = vmatmul.mubr.msk.bf16.gmra.mrb[32].mxu1 %vm312_vm1, %v15790_v51  ;;  %12944 = vmatmul.mubr.msk.bf16.gmra.mrb[12].mxu0 %vm312_vm1, %v15775_v50  ;;  %v1261_v51 = vrot.slane %v15637_v10, 7  ;;  %v1802_v50 = vsel %vm655_vm0, %v15829_v54, 0  ;;  %v19674_v54 = vrot.slane %v15525_v22, 7  ;;  %v19677_v22 = vld [vmem:[#allocation15_spill] sm:$0xff] }
  0xae   : > { %12779 = vmatprep.mubr.msk.bf16.mxu1 %vm312_vm1, %v1251_v24  ;;  %12947 = vmatprep.mubr.msk.bf16.mxu0 %vm312_vm1, %v15807_v37  ;;  %v14945_v37 = vld [vmem:[%s19462_s2 + $0x10] sm:$0xf]  ;;  %v1265_v40 = vor.u32 %v19677_v22, %v1264_v30  ;;  %v1670_v24 = vrot.slane %v15722_v12, 7 }
  0xaf   : > { %v1262_v29 = vor.u32 %v15616_v60, %v1261_v51 }
  0xb0   : > { %v16060_v39 = vsel %vm1244_vm7, %v1261_v51, %v1265_v40  ;;  %v19513_v51 = vshrl.u32 %v15952_v23, 16 }
  0xb1   : > { %v16045_v34 = vsel %vm1244_vm7, %v1258_v41, %v1262_v29  ;;  %v16087_v41 = vsel %vm1244_vm7, %v1654_v28, %v1274_v20  ;;  %v1277_v29 = vor.u32 %v15719_v9, %v1670_v24  ;;  %v19682_v20 = vld [vmem:[#allocation6_spill] sm:$0xff] }
  0xb5   : > { %12780 = vmatmul.mubr.msk.bf16.vlgmr.msra.gmra.mrb[0].mxu1 %vm312_vm1, %v1254_v19  ;;  %12948 = vmatmul.mubr.msk.bf16.gmra.mrb[16].mxu0 %vm312_vm1, %v15813_v26  ;;  %v16041_v26 = vsel %vm1244_vm7, %v19674_v54, %v1259_v44  ;;  %v16095_v44 = vld [vmem:[#allocation2 + $0x18] sm:$0xfe] }
  0xb6   : > { %12783 = vmatprep.mubr.msk.bf16.mxu1 %vm312_vm1, %v16020_v48  ;;  %12951 = vmatprep.mubr.msk.bf16.mxu0 %vm312_vm1, %v15841_v13  ;;  %v19675_v13 = vld [vmem:[#allocation20_spill] sm:$0xff]  ;;  %v3173_v54 = vrot.slane %v16095_v44, 1 }
  0xb7   : > { %12816 = vmatpush3.bf16.msra.mxu1 %v1802_v50  ;;  %v1267_v43 = vrot.slane %v19675_v13, 7  ;;  %v2871_v50 = vsel %vm2292_vm4, %v15928_v36, %v2870_v14 }
  0xb8   : > { %14634 = vmatprep.subr.msk.bf16.mxu1 %vm655_vm0, %v14945_v37 }
  0xb9   : > { %v1268_v16 = vor.u32 %v19678_v57, %v1267_v43 }
  0xbb   : > { %v16064_v27 = vsel %vm1244_vm7, %v1264_v30, %v1268_v16  ;;  %v19681_v30 = vld [vmem:[#allocation5_spill] sm:$0xff] }
  0xbd   : > { %12784 = vmatmul.mubr.msk.bf16.gmra.mrb[4].mxu1 %vm312_vm1, %v16041_v26  ;;  %12952 = vmatmul.mubr.msk.bf16.gmra.mrb[20].mxu0 %vm312_vm1, %v19676_v3  ;;  %v1282_v3 = vrot.slane %v15778_v56, 7 }
  0xbe   : > { %12787 = vmatprep.mubr.msk.bf16.mxu1 %vm312_vm1, %v16045_v34  ;;  %12955 = vmatprep.mubr.msk.bf16.mxu0 %vm312_vm1, %v15882_v2  ;;  %v19679_v2 = vld [vmem:[#allocation19_spill] sm:$0xff] }
  0xbf   : > { %v1271_v49 = vor.u32 %v19679_v2, %v1654_v28  ;;  %v1285_v28 = vrot.slane %v15798_v1, 7 }
  0xc1   : > { %v16081_v19 = vsel %vm1244_vm7, %v1267_v43, %v1271_v49  ;;  %v3174_v43 = vrot.slane %v19681_v30, 1  ;;  %v3624_v30 = vsel %vm655_vm0, %v15957_v11, 0  ;;  %vm3483_vm0 = vsmask.f32 6400 }
  0xc3   : > { %v3175_v49 = vsel %vm3172_vm6, %v3173_v54, %v3174_v43  ;;  %v1291_v54 = vrot.slane %v15851_v42, 7 }
  0xc5   : > { %12788 = vmatmul.mubr.msk.bf16.gmra.mrb[8].mxu1 %vm312_vm1, %v16060_v39  ;;  %12956 = vmatmul.mubr.msk.bf16.gmra.mrb[24].mxu0 %vm312_vm1, %v15888_v31  ;;  %v16084_v31 = vrot.slane %v15760_v46, 7 }
  0xc6   : > { %12791 = vmatprep.mubr.msk.bf16.mxu1 %vm312_vm1, %v16064_v27  ;;  %12959 = vmatprep.mubr.msk.bf16.mxu0 %vm312_vm1, %v15907_v53  ;;  %v2876_v53 = vshll.u32 %v15962_v58, 16  ;;  %v2874_v58 = vor.u32 %v19513_v51, %v2870_v14  ;;  %v3176_v14 = vrot.slane %v19682_v20, 1  ;;  %v19685_v20 = vld [vmem:[#allocation9_spill] sm:$0xff] }
  0xc7   : > { %v1280_v36 = vor.u32 %v15734_v52, %v16084_v31 }
  0xc8   : > { %v2878_v37 = vrot.slane %v2876_v53, 1  ;;  %v19683_v53 = vld [vmem:[#allocation7_spill] sm:$0xff] }
  0xc9   : > { %v16115_v16 = vsel %vm1244_vm7, %v1670_v24, %v1280_v36  ;;  %v1286_v24 = vor.u32 %v15781_v63, %v1285_v28 }
  0xca   : > { %v2879_v40 = vsel %vm2292_vm4, %v2874_v58, %v2878_v37  ;;  %v1288_v58 = vrot.slane %v15818_v6, 7  ;;  %v3177_v37 = vsel %vm3172_vm6, %v3174_v43, %v3176_v14  ;;  %v19684_v43 = vld [vmem:[#allocation8_spill] sm:$0xff] }
  0xcb   : > { %v1287_v36 = vsel %vm1244_vm7, %v1282_v3, %v1286_v24  ;;  %v3182_v24 = vrot.slane %v19685_v20, 1  ;;  %v19689_v20 = vld [vmem:[#allocation11_spill] sm:$0xff] }
  0xcd   : > { %12792 = vmatmul.mubr.msk.bf16.gmra.mrb[12].mxu1 %vm312_vm1, %v16081_v19  ;;  %12960 = vmatmul.mubr.msk.bf16.gmra.mrb[28].mxu0 %vm312_vm1, %v15919_v38  ;;  %v16110_v38 = vsel %vm1244_vm7, %v1662_v21, %v1277_v29  ;;  %v1283_v21 = vor.u32 %v15767_v35, %v1282_v3  ;;  %v3180_v3 = vrot.slane %v19684_v43, 1  ;;  %v19688_v43 = vld [vmem:[#allocation24_spill] sm:$0xff] }
  0xce   : > { %12795 = vmatprep.mubr.msk.bf16.mxu1 %vm312_vm1, %v16087_v41  ;;  %12963 = vmatprep.mubr.msk.bf16.mxu0 %vm312_vm1, %v2871_v50  ;;  %v3178_v50 = vrot.slane %v19683_v53, 1 }
  0xcf   : > { %v1284_v29 = vsel %vm1244_vm7, %v16084_v31, %v1283_v21  ;;  %v1292_v21 = vor.u32 %v15821_v62, %v1291_v54 }
  0xd0   : > { %v3181_v53 = vsel %vm3172_vm6, %v3178_v50, %v3180_v3 }
  0xd5   : > { %12796 = vmatmul.mubr.msk.bf16.gmra.mrb[16].mxu1 %vm312_vm1, %v16110_v38  ;;  %12964 = vmatmul.mubr.msk.bf16.gmra.mrb[32].mxu0 %vm312_vm1, %v2879_v40  ;;  %v3179_v40 = vsel %vm3172_vm6, %v3176_v14, %v3178_v50  ;;  %v1294_v14 = vrot.slane %v15859_v61, 7 }
  0xd6   : > { %12799 = vmatprep.mubr.msk.bf16.mxu1 %vm312_vm1, %v16115_v16  ;;  %12969 = vmatprep.mubr.msk.bf16.mxu0 %vm312_vm1, %v3175_v49  ;;  %v1289_v49 = vor.u32 %v15801_v17, %v1288_v58 }
  0xd8   : > { %v1290_v11 = vsel %vm1244_vm7, %v1285_v28, %v1289_v49  ;;  %v19687_v28 = vld [vmem:[#allocation10_spill] sm:$0xff] }
  0xd9   : > { %v3184_v49 = vrot.slane %v19687_v28, 1 }
  0xdd   : > { %12800 = vmatmul.mubr.msk.bf16.gmra.mrb[20].mxu1 %vm312_vm1, %v1284_v29  ;;  %12970 = vmatmul.mubr.msk.bf16.vlgmr.msra.gmra.mrb[0].mxu0 %vm312_vm1, %v3177_v37  ;;  %v1293_v29 = vsel %vm1244_vm7, %v1288_v58, %v1292_v21  ;;  %v19686_v37 = vld [vmem:[#allocation25_spill] sm:$0xff]  ;;  %v3186_v58 = vrot.slane %v19689_v20, 1 }
  0xde   : > { %12803 = vmatprep.mubr.msk.bf16.mxu1 %vm312_vm1, %v1287_v36  ;;  %13006 = vmatpush3.bf16.msra.mxu0 %v3624_v30  ;;  %v1297_v36 = vrot.slane %v19686_v37, 7  ;;  %v3183_v30 = vsel %vm3172_vm6, %v3180_v3, %v3182_v24  ;;  %v1578_v21 = vld [vmem:[#allocation2 + $0x8] sm:$0x80] }
  0xdf   : > { %12973 = vmatprep.mubr.msk.bf16.mxu0 %vm312_vm1, %v3179_v40  ;;  %v1295_v40 = vor.u32 %v15845_v32, %v1294_v14  ;;  %v19690_v3 = vld [vmem:[#allocation29_spill] sm:$0xff]  ;;  %v3187_v25 = vsel %vm3172_vm6, %v3184_v49, %v3186_v58 }
  0xe0   : > { %v1298_v50 = vor.u32 %v19688_v43, %v1297_v36  ;;  %v1303_v51 = vrot.slane %v19690_v3, 7 }
  0xe1   : > { %v1296_v0 = vsel %vm1244_vm7, %v1291_v54, %v1295_v40  ;;  %v19692_v54 = vld [vmem:[#allocation12_spill] sm:$0xff] }
  0xe5   : > { %12804 = vmatmul.mubr.msk.bf16.gmra.mrb[24].mxu1 %vm312_vm1, %v1290_v11  ;;  %12974 = vmatmul.mubr.msk.bf16.gmra.mrb[4].mxu0 %vm312_vm1, %v3181_v53  ;;  %v3185_v11 = vsel %vm3172_vm6, %v3182_v24, %v3184_v49  ;;  %v1299_v53 = vsel %vm1244_vm7, %v1294_v14, %v1298_v50  ;;  %v3188_v24 = vrot.slane %v19692_v54, 1  ;;  %v19693_v14 = vld [vmem:[#allocation13_spill] sm:$0xff]  ;;  %v19697_v54 = vld [vmem:[#allocation18_spill] sm:$0xff] }
  0xe6   : > { %12807 = vmatprep.mubr.msk.bf16.mxu1 %vm312_vm1, %v1293_v29  ;;  %12977 = vmatprep.mubr.msk.bf16.mxu0 %vm312_vm1, %v3183_v30  ;;  %v1600_v29 = vshrl.u32 %v1578_v21, 16  ;;  %v19691_v30 = vld [vmem:[#allocation28_spill] sm:$0xff]  ;;  %v3190_v50 = vrot.slane %v19693_v14, 1 }
  0xe7   : > { %v16171_v28 = vor.u32 %v19691_v30, %v1303_v51 }
  0xe8   : > { %v1602_v40 = vrot.slane %v1600_v29, 7  ;;  %v3191_v21 = vsel %vm3172_vm6, %v3188_v24, %v3190_v50 }
  0xe9   : > { %v1307_v49 = vsel %vm1244_vm7, %v1297_v36, %v16171_v28 }
  0xea   : > { %v1610_v20 = vsel %vm1244_vm7, %v1602_v40, %v16011_v5  ;;  %v19696_v5 = vld [vmem:[#allocation4_spill] sm:$0xff]  ;;  %v19698_v40 = vld [vmem:[#allocation21_spill] sm:$0xff] }
  0xeb   : > { %v3198_v14 = vrot.slane %v19698_v40, 1  ;;  %v3493_v40 = vrot.slane %v15606_v55, 2 }
  0xed   : > { %12808 = vmatmul.mubr.msk.bf16.gmra.mrb[28].mxu1 %vm312_vm1, %v1296_v0  ;;  %12978 = vmatmul.mubr.msk.bf16.gmra.mrb[8].mxu0 %vm312_vm1, %v3185_v11  ;;  %v3189_v0 = vsel %vm3172_vm6, %v3186_v58, %v3188_v24  ;;  %v3196_v24 = vrot.slane %v19697_v54, 1 }
  0xee   : > { %12811 = vmatprep.mubr.msk.bf16.mxu1 %vm312_vm1, %v1299_v53  ;;  %12981 = vmatprep.mubr.msk.bf16.mxu0 %vm312_vm1, %v3187_v25  ;;  %v19694_v25 = vld [vmem:[#allocation14_spill] sm:$0xff]  ;;  %v19695_v53 = vld [vmem:[#allocation16_spill] sm:$0xff] }
  0xef   : > { %v3192_v11 = vrot.slane %v19694_v25, 1  ;;  %v3194_v29 = vrot.slane %v19695_v53, 1  ;;  %v3488_v53 = vshll.u32 %v16095_v44, 16 }
  0xf1   : > { %v3193_v36 = vsel %vm3172_vm6, %v3190_v50, %v3192_v11  ;;  %v3195_v58 = vsel %vm3172_vm6, %v3192_v11, %v3194_v29  ;;  %v3197_v50 = vsel %vm3172_vm6, %v3194_v29, %v3196_v24  ;;  %v16211_v11 = vld [vmem:[#allocation2 + $0x60] sm:$0xff]  ;;  %v16222_v29 = vld [vmem:[#allocation2 + $0x68] sm:$0xff] }
  0xf5   : > { %12812 = vmatmul.mubr.msk.bf16.gmra.mrb[32].mxu1 %vm312_vm1, %v1307_v49  ;;  %12982 = vmatmul.mubr.msk.bf16.gmra.mrb[12].mxu0 %vm312_vm1, %v3189_v0  ;;  %v3199_v49 = vsel %vm3172_vm6, %v3196_v24, %v3198_v14  ;;  %v19700_v0 = vld [vmem:[#allocation27_spill] sm:$0xff]  ;;  %v3490_v24 = vrot.slane %v3488_v53, 2  ;;  %v3501_v53 = vrot.slane %v19677_v22, 2 }
  0xf6   : > { %12817 = vmatprep.mubr.msk.bf16.mxu1 %vm312_vm1, %v1610_v20  ;;  %12985 = vmatprep.mubr.msk.bf16.mxu0 %vm312_vm1, %v3191_v21  ;;  %v3202_v20 = vrot.slane %v19700_v0, 1 }
  0xfd   : > { %12818 = vmatmul.mubr.msk.bf16.vlgmr.msra.gmra.mrb[0].mxu1 %vm312_vm1, %v16020_v48  ;;  %12986 = vmatmul.mubr.msk.bf16.gmra.mrb[16].mxu0 %vm312_vm1, %v3193_v36  ;;  %v19699_v48 = vld [vmem:[#allocation23_spill] sm:$0xff]  ;;  %v19701_v36 = vrot.slane %v15876_v8, 1 }
  0xfe   : > { %12821 = vmatprep.mubr.msk.bf16.mxu1 %vm312_vm1, %v16041_v26  ;;  %12989 = vmatprep.mubr.msk.bf16.mxu0 %vm312_vm1, %v3195_v58  ;;  %v3200_v26 = vrot.slane %v19699_v48, 1 }
  0xff   : > { %13764 = vmatpush3.bf16.msra.mxu1 %v19696_v5  ;;  %v3205_v58 = vsel %vm3172_vm6, %v3202_v20, %v19701_v36  ;;  %v1687_v5 = vshll.u32 %v16211_v11, 16  ;;  %v16252_v36 = vld [vmem:[#allocation2 + $0x80] sm:$0xff] }
 0x100   : > { %v3201_v21 = vsel %vm3172_vm6, %v3198_v14, %v3200_v26  ;;  %v3203_v25 = vsel %vm3172_vm6, %v3200_v26, %v3202_v20  ;;  %v16230_v14 = vld [vmem:[#allocation2 + $0x70] sm:$0xff]  ;;  %v1695_v26 = vshll.u32 %v16222_v29, 16 }
 0x105   : > { %12822 = vmatmul.mubr.msk.bf16.gmra.mrb[4].mxu1 %vm312_vm1, %v16045_v34  ;;  %12990 = vmatmul.mubr.msk.bf16.gmra.mrb[20].mxu0 %vm312_vm1, %v3197_v50  ;;  %v1684_v34 = vshrl.u32 %v16211_v11, 16 }
 0x106   : > { %12825 = vmatprep.mubr.msk.bf16.mxu1 %vm312_vm1, %v16060_v39  ;;  %12993 = vmatprep.mubr.msk.bf16.mxu0 %vm312_vm1, %v3199_v49  ;;  %v3485_v39 = vshrl.u32 %v16095_v44, 16  ;;  %v1692_v44 = vshrl.u32 %v16222_v29, 16 }
 0x108   : > { %v3487_v54 = vrot.slane %v3485_v39, 1  ;;  %v1694_v48 = vrot.slane %v1692_v44, 7  ;;  %v3500_v39 = vrot.slane %v15646_v15, 1  ;;  %v1716_v15 = vshrl.u32 %v16252_v36, 16 }
 0x10a   : > { %v3491_v49 = vor.u32 %v3490_v24, %v3487_v54  ;;  %v3502_v22 = vor.u32 %v3501_v53, %v3500_v39  ;;  %v3504_v54 = vrot.slane %v19675_v13, 1  ;;  %v1718_v44 = vrot.slane %v1716_v15, 7 }
 0x10b   : > { %v3509_v13 = vrot.slane %v19679_v2, 2  ;;  %v3513_v39 = vrot.slane %v19680_v33, 2  ;;  %v1742_v33 = vrot.slane %v15911_v4, 7 }
 0x10d   : > { %12826 = vmatmul.mubr.msk.bf16.gmra.mrb[8].mxu1 %vm312_vm1, %v16064_v27  ;;  %12994 = vmatmul.mubr.msk.bf16.gmra.mrb[24].mxu0 %vm312_vm1, %v3201_v21  ;;  %v1686_v27 = vrot.slane %v1684_v34, 7  ;;  %v3497_v21 = vrot.slane %v15616_v60, 2 }
 0x10e   : > { %12829 = vmatprep.mubr.msk.bf16.mxu1 %vm312_vm1, %v16081_v19  ;;  %12997 = vmatprep.mubr.msk.bf16.mxu0 %vm312_vm1, %v3203_v25  ;;  %v3492_v19 = vrot.slane %v15613_v59, 1  ;;  %v1700_v59 = vshrl.u32 %v16230_v14, 16  ;;  %v1703_v25 = vshll.u32 %v16230_v14, 16 }
 0x10f   : > { %v1689_v50 = vor.u32 %v1687_v5, %v1686_v27 }
 0x110   : > { %v3494_v55 = vor.u32 %v3493_v40, %v3492_v19 }
 0x111   : > { %v1690_v20 = vsel %vm1244_vm7, %v16084_v31, %v1689_v50  ;;  %v1719_v50 = vshll.u32 %v16252_v36, 16 }
 0x112   : > { %v3495_v34 = vsel %vm3483_vm0, %v3491_v49, %v3494_v55 }
 0x115   : > { %12830 = vmatmul.mubr.msk.bf16.gmra.mrb[12].mxu1 %vm312_vm1, %v16087_v41  ;;  %12998 = vmatmul.mubr.msk.bf16.gmra.mrb[28].mxu0 %vm312_vm1, %v3205_v58  ;;  %v3496_v41 = vrot.slane %v15637_v10, 1  ;;  %v1697_v10 = vor.u32 %v1695_v26, %v1694_v48  ;;  %v1721_v26 = vor.u32 %v1719_v50, %v1718_v44  ;;  %v3533_v50 = vrot.slane %v15801_v17, 2 }
 0x116   : > { %12833 = vmatprep.mubr.msk.bf16.mxu1 %vm312_vm1, %v16110_v38  ;;  %13001 = vmatprep.mubr.msk.bf16.mxu0 %vm312_vm1, %v15974_v18  ;;  %v1702_v38 = vrot.slane %v1700_v59, 7  ;;  %v16247_v18 = vld [vmem:[#allocation2 + $0x78] sm:$0xff]  ;;  %v16269_v59 = vld [vmem:[#allocation2 + $0x88] sm:$0xff]  ;;  %v3540_v17 = vrot.slane %v15859_v61, 1  ;;  %v3545_v61 = vrot.slane %v19688_v43, 2 }
 0x117   : > { %v1708_v60 = vshrl.u32 %v16247_v18, 16  ;;  %v3498_v31 = vor.u32 %v3497_v21, %v3496_v41  ;;  %v1698_v5 = vsel %vm1244_vm7, %v1686_v27, %v1697_v10  ;;  %v3508_v27 = vrot.slane %v15691_v45, 1 }
 0x118   : > { %v1705_v58 = vor.u32 %v1703_v25, %v1702_v38  ;;  %v1727_v2 = vshll.u32 %v16269_v59, 16  ;;  %v3516_v10 = vrot.slane %v15722_v12, 1  ;;  %v3520_v12 = vrot.slane %v15760_v46, 1 }
 0x119   : > { %v1710_v24 = vrot.slane %v1708_v60, 7  ;;  %v3499_v19 = vsel %vm3483_vm0, %v3494_v55, %v3498_v31  ;;  %v3503_v49 = vsel %vm3483_vm0, %v3498_v31, %v3502_v22  ;;  %v3510_v41 = vor.u32 %v3509_v13, %v3508_v27 }
 0x11a   : > { %v1706_v40 = vsel %vm1244_vm7, %v1694_v48, %v1705_v58  ;;  %v1724_v48 = vshrl.u32 %v16269_v59, 16  ;;  %v3517_v60 = vrot.slane %v15719_v9, 2  ;;  %v3537_v27 = vrot.slane %v15821_v62, 2 }
 0x11b   : > { %v1722_v25 = vsel %vm1244_vm7, %v1710_v24, %v1721_v26  ;;  %v3541_v13 = vrot.slane %v15845_v32, 2  ;;  %v19703_v26 = vshrl.u32 %v15952_v23, 16 }
 0x11c   : > { %v1726_v21 = vrot.slane %v1724_v48, 7  ;;  %v3518_v58 = vor.u32 %v3517_v60, %v3516_v10  ;;  %v3552_v48 = vrot.slane %v15911_v4, 1 }
 0x11d   : > { %12834 = vmatmul.mubr.msk.bf16.gmra.mrb[16].mxu1 %vm312_vm1, %v16115_v16  ;;  %13002 = vmatmul.mubr.msk.bf16.gmra.mrb[32].mxu0 %vm312_vm1, %v15977_v47  ;;  %v3505_v16 = vrot.slane %v19678_v57, 2  ;;  %v1711_v47 = vshll.u32 %v16247_v18, 16 }
 0x11e   : > { %12837 = vmatprep.mubr.msk.bf16.mxu1 %vm312_vm1, %v1690_v20  ;;  %13007 = vmatprep.mubr.msk.bf16.mxu0 %vm312_vm1, %v3495_v34  ;;  %v3512_v34 = vrot.slane %v15716_v7, 1  ;;  %v1738_v9 = vsel %vm1244_vm7, %v1726_v21, %v16171_v28 }
 0x11f   : > { %v3506_v57 = vor.u32 %v3505_v16, %v3504_v54  ;;  %v1713_v55 = vor.u32 %v1711_v47, %v1710_v24  ;;  %v3524_v54 = vrot.slane %v15778_v56, 1  ;;  %v3525_v16 = vrot.slane %v15767_v35, 2  ;;  %v19702_v24 = vld [vmem:[#allocation30_spill] sm:$0xff] }
 0x120   : > { %v3514_v31 = vor.u32 %v3513_v39, %v3512_v34  ;;  %v1745_v47 = vor.u32 %v19702_v24, %v1742_v33  ;;  %v3528_v35 = vrot.slane %v15798_v1, 1 }
 0x121   : > { %v3507_v20 = vsel %vm3483_vm0, %v3502_v22, %v3506_v57  ;;  %v1714_v45 = vsel %vm1244_vm7, %v1702_v38, %v1713_v55  ;;  %v3511_v53 = vsel %vm3483_vm0, %v3506_v57, %v3510_v41  ;;  %v1729_v38 = vor.u32 %v1727_v2, %v1726_v21 }
 0x122   : > { %v3515_v15 = vsel %vm3483_vm0, %v3510_v41, %v3514_v31  ;;  %v3521_v22 = vrot.slane %v15734_v52, 2  ;;  %v3526_v46 = vor.u32 %v3525_v16, %v3524_v54  ;;  %v1746_v52 = vsel %vm1244_vm7, %v1303_v51, %v1745_v47 }
 0x123   : > { %v1730_v7 = vsel %vm1244_vm7, %v1718_v44, %v1729_v38  ;;  %v3532_v44 = vrot.slane %v15818_v6, 1  ;;  %v3544_v57 = vrot.slane %v19686_v37, 1  ;;  %v3548_v55 = vrot.slane %v19690_v3, 1 }
 0x124   : > { %v3522_v28 = vor.u32 %v3521_v22, %v3520_v12  ;;  %v3553_v3 = vrot.slane %v19702_v24, 2  ;;  %v19704_v41 = vshll.u32 %v15952_v23, 16 }
 0x125   : > { %12838 = vmatmul.mubr.msk.bf16.gmra.mrb[20].mxu1 %vm312_vm1, %v1698_v5  ;;  %13008 = vmatmul.mubr.msk.bf16.vlgmr.msra.gmra.mrb[0].mxu0 %vm312_vm1, %v3499_v19  ;;  %v3519_v5 = vsel %vm3483_vm0, %v3514_v31, %v3518_v58  ;;  %v3529_v19 = vrot.slane %v15781_v63, 2  ;;  %v3536_v63 = vrot.slane %v15851_v42, 1  ;;  %v3542_v42 = vor.u32 %v3541_v13, %v3540_v17  ;;  %v16410_v13 = vld [vmem:[%s19461_s1 + $0x10] sm:$0xff] }
 0x126   : > { %12841 = vmatprep.mubr.msk.bf16.mxu1 %vm312_vm1, %v1706_v40  ;;  %13011 = vmatprep.mubr.msk.bf16.mxu0 %vm312_vm1, %v3503_v49  ;;  %v3523_v56 = vsel %vm3483_vm0, %v3518_v58, %v3522_v28  ;;  %v3527_v40 = vsel %vm3483_vm0, %v3522_v28, %v3526_v46  ;;  %v3534_v49 = vor.u32 %v3533_v50, %v3532_v44 }
 0x127   : > { %v3530_v51 = vor.u32 %v3529_v19, %v3528_v35  ;;  %v3554_v4 = vor.u32 %v3553_v3, %v3552_v48  ;;  %19706 = vst [vmem:[#allocation20_spill] sm:$0xff] %v16410_v13 }
 0x129   : > { %v3531_v1 = vsel %vm3483_vm0, %v3526_v46, %v3530_v51  ;;  %v3535_v6 = vsel %vm3483_vm0, %v3530_v51, %v3534_v49 }
 0x12d   : > { %12842 = vmatmul.mubr.msk.bf16.gmra.mrb[24].mxu1 %vm312_vm1, %v1714_v45  ;;  %13012 = vmatmul.mubr.msk.bf16.gmra.mrb[4].mxu0 %vm312_vm1, %v3507_v20  ;;  %v3557_v20 = vrot.slane %v19704_v41, 2  ;;  %v3480_v45 = vld [vmem:[#allocation2 + $0xa8] sm:$0x3] }
 0x12e   : > { %12845 = vmatprep.mubr.msk.bf16.mxu1 %vm312_vm1, %v1722_v25  ;;  %13015 = vmatprep.mubr.msk.bf16.mxu0 %vm312_vm1, %v3511_v53  ;;  %v3564_v21 = vshll.u32 %v3480_v45, 16  ;;  %v19705_v53 = vmov 0  }
 0x12f   : > { %308 = vst.msk [vmem:[#allocation3] sm:$0xff] %vm307_vm8, %v19705_v53  ;;  %309 = vst.msk [vmem:[#allocation3 + $0x8] sm:$0xff] %vm307_vm8, %v19705_v53 }
 0x130   : > { %v3566_v23 = vrot.slane %v3564_v21, 2  ;;  %310 = vst.msk [vmem:[#allocation3 + $0xa0] sm:$0xff] %vm307_vm8, %v19705_v53  ;;  %311 = vst.msk [vmem:[#allocation3 + $0xa8] sm:$0xff] %vm307_vm8, %v19705_v53  ;;  %v16463_v53 = vld [vmem:[%s19461_s1 + $0x20] sm:$0xff] }
 0x131   : > { %19712 = vst [vmem:[#allocation5_spill] sm:$0xff] %v16463_v53 }
 0x135   : > { %12846 = vmatmul.mubr.msk.bf16.gmra.mrb[28].mxu1 %vm312_vm1, %v1730_v7  ;;  %13016 = vmatmul.mubr.msk.bf16.gmra.mrb[8].mxu0 %vm312_vm1, %v3515_v15 }
 0x136   : > { %12849 = vmatprep.mubr.msk.bf16.mxu1 %vm312_vm1, %v1738_v9  ;;  %13019 = vmatprep.mubr.msk.bf16.mxu0 %vm312_vm1, %v3519_v5 }
 0x13d   : > { %12850 = vmatmul.mubr.msk.bf16.gmra.mrb[32].mxu1 %vm312_vm1, %v1746_v52  ;;  %13020 = vmatmul.mubr.msk.bf16.gmra.mrb[12].mxu0 %vm312_vm1, %v3523_v56  ;;  %v16402_v56 = vld [vmem:[%s19463_s3] ss:$0 sm:$0xff] }
 0x13e   : > { %12875 = vmatprep.mubr.msk.bf16.mxu1 %vm312_vm1, %v16211_v11  ;;  %13023 = vmatprep.mubr.msk.bf16.mxu0 %vm312_vm1, %v3527_v40  ;;  %v3538_v11 = vor.u32 %v3537_v27, %v3536_v63 }
 0x140   : > { %v3539_v62 = vsel %vm3483_vm0, %v3534_v49, %v3538_v11  ;;  %v3543_v32 = vsel %vm3483_vm0, %v3538_v11, %v3542_v42 }
 0x145   : > { %12876 = vmatmul.mubr.msk.bf16.vlgmr.msra.gmra.mrb[20].mxu1 %vm312_vm1, %v16222_v29  ;;  %13024 = vmatmul.mubr.msk.bf16.gmra.mrb[16].mxu0 %vm312_vm1, %v3531_v1  ;;  %v3549_v29 = vrot.slane %v19691_v30, 2 }
 0x146   : > { %12879 = vmatprep.mubr.msk.bf16.mxu1 %vm312_vm1, %v16230_v14  ;;  %13027 = vmatprep.mubr.msk.bf16.mxu0 %vm312_vm1, %v3535_v6  ;;  %v3546_v14 = vor.u32 %v3545_v61, %v3544_v57  ;;  %v16421_v57 = vld [vmem:[%s19461_s1] sm:$0xff] }
 0x147   : > { %v3550_v37 = vor.u32 %v3549_v29, %v3548_v55  ;;  %19708 = vst [vmem:[#allocation15_spill] sm:$0xff] %v16421_v57 }
 0x148   : > { %v3547_v43 = vsel %vm3483_vm0, %v3542_v42, %v3546_v14  ;;  %v16415_v42 = vld [vmem:[%s19461_s1 + $0x18] sm:$0xff] }
 0x149   : > { %v3551_v30 = vsel %vm3483_vm0, %v3546_v14, %v3550_v37  ;;  %v3555_v25 = vsel %vm3483_vm0, %v3550_v37, %v3554_v4  ;;  %19707 = vst [vmem:[#allocation26_spill] sm:$0xff] %v16415_v42 }
 0x14d   : > { %12880 = vmatmul.mubr.msk.bf16.gmra.mrb[24].mxu1 %vm312_vm1, %v16247_v18  ;;  %13028 = vmatmul.mubr.msk.bf16.gmra.mrb[20].mxu0 %vm312_vm1, %v3539_v62  ;;  %v3556_v18 = vrot.slane %v19703_v26, 1 }
 0x14e   : > { %12883 = vmatprep.mubr.msk.bf16.mxu1 %vm312_vm1, %v16252_v36  ;;  %13031 = vmatprep.mubr.msk.bf16.mxu0 %vm312_vm1, %v3543_v32  ;;  %v3561_v36 = vshrl.u32 %v3480_v45, 16  ;;  %v16426_v32 = vld [vmem:[%s19461_s1 + $0x8] sm:$0xff] }
 0x14f   : > { %v3558_v2 = vor.u32 %v3557_v20, %v3556_v18  ;;  %19709 = vst [vmem:[#allocation17_spill] sm:$0xff] %v16426_v32 }
 0x150   : > { %v3563_v34 = vrot.slane %v3561_v36, 1 }
 0x151   : > { %v3559_v39 = vsel %vm3483_vm0, %v3554_v4, %v3558_v2 }
 0x155   : > { %12884 = vmatmul.mubr.msk.bf16.gmra.mrb[28].mxu1 %vm312_vm1, %v16269_v59  ;;  %13032 = vmatmul.mubr.msk.bf16.gmra.mrb[24].mxu0 %vm312_vm1, %v3547_v43 }
 0x156   : > { %12887 = vmatprep.mubr.msk.bf16.mxu1 %vm312_vm1, %v19700_v0  ;;  %13035 = vmatprep.mubr.msk.bf16.mxu0 %vm312_vm1, %v3551_v30  ;;  %v3567_v0 = vor.u32 %v3566_v23, %v3563_v34  ;;  %v16452_v23 = vld [vmem:[%s19461_s1 + $0x30] sm:$0xff] }
 0x157   : > { %19710 = vst [vmem:[#allocation19_spill] sm:$0xff] %v16452_v23 }
 0x158   : > { %v3568_v59 = vsel %vm3483_vm0, %v3558_v2, %v3567_v0  ;;  %v16457_v0 = vld [vmem:[%s19461_s1 + $0x38] sm:$0xff] }
 0x159   : > { %19711 = vst [vmem:[#allocation22_spill] sm:$0xff] %v16457_v0 }
 0x15d   : > { %12888 = vmatmul.mubr.msk.bf16.gmra.mrb[32].mxu1 %vm312_vm1, %v15876_v8  ;;  %13036 = vmatmul.mubr.msk.bf16.gmra.mrb[28].mxu0 %vm312_vm1, %v3555_v25 }
 0x15e   : > { %13039 = vmatprep.mubr.msk.bf16.mxu0 %vm312_vm1, %v3559_v39 }
 0x165   : > { %13040 = vmatmul.mubr.msk.bf16.gmra.mrb[32].mxu0 %vm312_vm1, %v3568_v59 }
 0x1d0   : > { %v12819_v8 = vpop.f32.mrb[0].mxu1 }
 0x1d1   : > { %v1838_v10 = vpop.f32.mrb[1].mxu1 }
 0x1d2   : > { %v12820_v60 = vpop.f32.mrb[2].mxu1 }
 0x1d3   : > { %v1841_v38 = vpop.f32.mrb[3].mxu1 }
 0x1d8   : > { %v12823_v31 = vpop.f32.mrb[4].mxu1 }
 0x1d9   : > { %v1854_v58 = vpop.f32.mrb[5].mxu1 }
 0x1da   : > { %v12824_v7 = vpop.f32.mrb[6].mxu1 }
 0x1db   : > { %v1857_v33 = vpop.f32.mrb[7].mxu1 }
 0x1e0   : > { %v16375_v15 = vpop.f32.mrb[8].mxu1 }
 0x1e1   : > { %v16377_v9 = vpop.f32.mrb[9].mxu1 }
 0x1e2   : > { %v16379_v12 = vpop.f32.mrb[10].mxu1 }
 0x1e3   : > { %v16381_v22 = vpop.f32.mrb[11].mxu1 }
 0x1e8   : > { %v16383_v5 = vpop.f32.mrb[12].mxu1 }
 0x1e9   : > { %v16385_v54 = vpop.f32.mrb[13].mxu1 }
 0x1ea   : > { %v16387_v16 = vpop.f32.mrb[14].mxu1 }
 0x1eb   : > { %v16389_v24 = vpop.f32.mrb[15].mxu1 }
 0x1f0   : > { %v16391_v47 = vpop.f32.mrb[16].mxu1 }
 0x1f1   : > { %v16393_v28 = vpop.f32.mrb[17].mxu1 }
 0x1f2   : > { %v16395_v46 = vpop.f32.mrb[18].mxu1 }
 0x1f3   : > { %v16397_v52 = vpop.f32.mrb[19].mxu1 }
 0x1f8   : > { %v13009_v35 = vpop.f32.mrb[0].mxu0 }
 0x1f9   : > { %v13765_v19 = vadd.f32 %v13009_v35, %v12819_v8  ;;  %v3660_v40 = vpop.f32.mrb[1].mxu0 }
 0x1fa   : > { %v13766_v44 = vadd.f32 %v3660_v40, %v1838_v10  ;;  %v13010_v50 = vpop.f32.mrb[2].mxu0  ;;  %v16468_v10 = vld [vmem:[%s19461_s1 + $0x28] sm:$0xff] }
 0x1fb   : > { %v3847_v51 = vadd.f32 %v13765_v19, %v16402_v56  ;;  %v13767_v49 = vadd.f32 %v13010_v50, %v12820_v60  ;;  %v3663_v1 = vpop.f32.mrb[3].mxu0  ;;  %19713 = vst [vmem:[#allocation6_spill] sm:$0xff] %v16468_v10 }
 0x1fc   : > { %v3845_v63 = vadd.f32 %v13766_v44, %v16402_v56  ;;  %v13768_v27 = vadd.f32 %v3663_v1, %v1841_v38 }
 0x1fd   : > { %v3883_v6 = vmax.f32 %v3847_v51, 0.0  ;;  %v3848_v17 = vadd.f32 %v13767_v49, %v16402_v56 }
 0x1fe   : > { %v3881_v11 = vmax.f32 %v3845_v63, 0.0  ;;  %v3846_v62 = vadd.f32 %v13768_v27, %v16402_v56 }
 0x1ff   : > { %v3884_v61 = vmax.f32 %v3848_v17, 0.0  ;;  %v16429_v14 = vmul.f32 %v3883_v6, %v16410_v13   ;;  %v16498_v17 = vld [vmem:[%s19461_s1 + $0x50] sm:$0xff] }
 0x200   : > { %v3882_v55 = vmax.f32 %v3846_v62, 0.0  ;;  %v13013_v29 = vpop.f32.mrb[4].mxu0  ;;  %v16435_v3 = vmul.f32 %v3881_v11, %v16421_v57   ;;  %19714 = vst [vmem:[#allocation7_spill] sm:$0xff] %v16498_v17  ;;  %v16503_v11 = vld [vmem:[%s19461_s1 + $0x58] sm:$0xff]  ;;  %v16509_v62 = vld [vmem:[%s19461_s1 + $0x40] sm:$0xff] }
 0x201   : > { %v16432_v37 = vmul.f32 %v3884_v61, %v16415_v42   ;;  %v13769_v43 = vadd.f32 %v13013_v29, %v12823_v31  ;;  %v3676_v48 = vpop.f32.mrb[5].mxu0  ;;  %19715 = vst [vmem:[#allocation8_spill] sm:$0xff] %v16503_v11  ;;  %19716 = vst [vmem:[#allocation9_spill] sm:$0xff] %v16509_v62 }
 0x202   : > { %v16438_v30 = vmul.f32 %v3882_v55, %v16426_v32   ;;  %v13770_v26 = vadd.f32 %v3676_v48, %v1854_v58  ;;  %v13014_v18 = vpop.f32.mrb[6].mxu0  ;;  %v16514_v55 = vld [vmem:[%s19461_s1 + $0x48] sm:$0xff] }
 0x203   : > { %v3954_v41 = vpack.c.bf16 %v16432_v37, %v16429_v14  ;;  %v3851_v20 = vadd.f32 %v13769_v43, %v16402_v56  ;;  %v13771_v45 = vadd.f32 %v13014_v18, %v12824_v7  ;;  %v3679_v4 = vpop.f32.mrb[7].mxu0  ;;  %19717 = vst [vmem:[#allocation25_spill] sm:$0xff] %v16514_v55 }
 0x204   : > { %v3953_v36 = vpack.c.bf16 %v16438_v30, %v16435_v3  ;;  %v3849_v21 = vadd.f32 %v13770_v26, %v16402_v56  ;;  %v13772_v2 = vadd.f32 %v3679_v4, %v1857_v33 }
 0x205   : > { %3972 = vst.msk [vmem:[#allocation3 + $0x18] sm:$0xff] %vm307_vm8, %v3954_v41  ;;  %v3887_v25 = vmax.f32 %v3851_v20, 0.0  ;;  %v3852_v34 = vadd.f32 %v13771_v45, %v16402_v56 }
 0x206   : > { %3971 = vst.msk [vmem:[#allocation3 + $0x10] sm:$0xff] %vm307_vm8, %v3953_v36  ;;  %v3885_v39 = vmax.f32 %v3849_v21, 0.0  ;;  %v3850_v59 = vadd.f32 %v13772_v2, %v16402_v56 }
 0x207   : > { %v3888_v8 = vmax.f32 %v3852_v34, 0.0  ;;  %v16471_v31 = vmul.f32 %v3887_v25, %v16452_v23  }
 0x208   : > { %v3886_v60 = vmax.f32 %v3850_v59, 0.0  ;;  %v13017_v38 = vpop.f32.mrb[8].mxu0  ;;  %v16478_v35 = vmul.f32 %v3885_v39, %v16463_v53  }
 0x209   : > { %v16474_v58 = vmul.f32 %v3888_v8, %v16457_v0   ;;  %v13773_v7 = vadd.f32 %v13017_v38, %v16375_v15  ;;  %v3692_v33 = vpop.f32.mrb[9].mxu0  ;;  %v16549_v38 = vld [vmem:[%s19461_s1 + $0x78] sm:$0xff] }
 0x20a   : > { %v16481_v19 = vmul.f32 %v3886_v60, %v16468_v10   ;;  %v13774_v40 = vadd.f32 %v3692_v33, %v16377_v9  ;;  %v13018_v44 = vpop.f32.mrb[10].mxu0  ;;  %v16544_v60 = vld [vmem:[%s19461_s1 + $0x70] sm:$0xff]  ;;  %19719 = vst [vmem:[#allocation24_spill] sm:$0xff] %v16549_v38 }
 0x20b   : > { %v3956_v50 = vpack.c.bf16 %v16474_v58, %v16471_v31  ;;  %v3855_v51 = vadd.f32 %v13773_v7, %v16402_v56  ;;  %v13775_v49 = vadd.f32 %v13018_v44, %v16379_v12  ;;  %v3695_v1 = vpop.f32.mrb[11].mxu0  ;;  %19718 = vst [vmem:[#allocation10_spill] sm:$0xff] %v16544_v60  ;;  %v16555_v7 = vld [vmem:[%s19461_s1 + $0x60] sm:$0xff] }
 0x20c   : > { %v3955_v15 = vpack.c.bf16 %v16481_v19, %v16478_v35  ;;  %v3853_v63 = vadd.f32 %v13774_v40, %v16402_v56  ;;  %v13776_v27 = vadd.f32 %v3695_v1, %v16381_v22  ;;  %19720 = vst [vmem:[#allocation11_spill] sm:$0xff] %v16555_v7  ;;  %v16560_v40 = vld [vmem:[%s19461_s1 + $0x68] sm:$0xff] }
 0x20d   : > { %3974 = vst.msk [vmem:[#allocation3 + $0x28] sm:$0xff] %vm307_vm8, %v3956_v50  ;;  %v3891_v6 = vmax.f32 %v3855_v51, 0.0  ;;  %v3856_v9 = vadd.f32 %v13775_v49, %v16402_v56  ;;  %19721 = vst [vmem:[#allocation29_spill] sm:$0xff] %v16560_v40 }
 0x20e   : > { %3973 = vst.msk [vmem:[#allocation3 + $0x20] sm:$0xff] %vm307_vm8, %v3955_v15  ;;  %v3889_v12 = vmax.f32 %v3853_v63, 0.0  ;;  %v3854_v22 = vadd.f32 %v13776_v27, %v16402_v56 }
 0x20f   : > { %v3892_v61 = vmax.f32 %v3856_v9, 0.0  ;;  %v16517_v48 = vmul.f32 %v3891_v6, %v16498_v17  }
 0x210   : > { %v3890_v29 = vmax.f32 %v3854_v22, 0.0  ;;  %v13021_v43 = vpop.f32.mrb[12].mxu0  ;;  %v16524_v20 = vmul.f32 %v3889_v12, %v16509_v62  }
 0x211   : > { %v16520_v26 = vmul.f32 %v3892_v61, %v16503_v11   ;;  %v13777_v18 = vadd.f32 %v13021_v43, %v16383_v5  ;;  %v3708_v41 = vpop.f32.mrb[13].mxu0 }
 0x212   : > { %v16527_v45 = vmul.f32 %v3890_v29, %v16514_v55   ;;  %v13778_v4 = vadd.f32 %v3708_v41, %v16385_v54  ;;  %v13022_v36 = vpop.f32.mrb[14].mxu0 }
 0x213   : > { %v3958_v21 = vpack.c.bf16 %v16520_v26, %v16517_v48  ;;  %v3859_v2 = vadd.f32 %v13777_v18, %v16402_v56  ;;  %v13779_v25 = vadd.f32 %v13022_v36, %v16387_v16  ;;  %v3711_v34 = vpop.f32.mrb[15].mxu0 }
 0x214   : > { %v3957_v5 = vpack.c.bf16 %v16527_v45, %v16524_v20  ;;  %v3857_v39 = vadd.f32 %v13778_v4, %v16402_v56  ;;  %v13780_v59 = vadd.f32 %v3711_v34, %v16389_v24  ;;  %v16595_v34 = vld [vmem:[%s19461_s1 + $0x98] sm:$0xff] }
 0x215   : > { %3976 = vst.msk [vmem:[#allocation3 + $0x38] sm:$0xff] %vm307_vm8, %v3958_v21  ;;  %v3895_v8 = vmax.f32 %v3859_v2, 0.0  ;;  %v3860_v54 = vadd.f32 %v13779_v25, %v16402_v56  ;;  %v16590_v25 = vld [vmem:[%s19461_s1 + $0x90] sm:$0xff]  ;;  %19723 = vst [vmem:[#allocation12_spill] sm:$0xff] %v16595_v34 }
 0x216   : > { %3975 = vst.msk [vmem:[#allocation3 + $0x30] sm:$0xff] %vm307_vm8, %v3957_v5  ;;  %v3893_v16 = vmax.f32 %v3857_v39, 0.0  ;;  %v3858_v24 = vadd.f32 %v13780_v59, %v16402_v56  ;;  %19722 = vst [vmem:[#allocation28_spill] sm:$0xff] %v16590_v25  ;;  %v16601_v5 = vld [vmem:[%s19461_s1 + $0x80] sm:$0xff]  ;;  %v16606_v59 = vld [vmem:[%s19461_s1 + $0x88] sm:$0xff] }
 0x217   : > { %v3896_v33 = vmax.f32 %v3860_v54, 0.0  ;;  %v16563_v1 = vmul.f32 %v3895_v8, %v16544_v60   ;;  %19724 = vst [vmem:[#allocation13_spill] sm:$0xff] %v16601_v5  ;;  %19725 = vst [vmem:[#allocation14_spill] sm:$0xff] %v16606_v59 }
 0x218   : > { %v12877_v44 = vpop.f32.mrb[20].mxu1  ;;  %v3894_v50 = vmax.f32 %v3858_v24, 0.0  ;;  %v13025_v51 = vpop.f32.mrb[16].mxu0  ;;  %v16570_v9 = vmul.f32 %v3893_v16, %v16555_v7  }
 0x219   : > { %v2172_v49 = vpop.f32.mrb[21].mxu1  ;;  %v16566_v15 = vmul.f32 %v3896_v33, %v16549_v38   ;;  %v13781_v63 = vadd.f32 %v13025_v51, %v16391_v47  ;;  %v3724_v27 = vpop.f32.mrb[17].mxu0  ;;  %19743 = vst [vmem:[#allocation41_spill] sm:$0xff] %v16563_v1 }
 0x21a   : > { %v12878_v6 = vpop.f32.mrb[22].mxu1  ;;  %v16573_v12 = vmul.f32 %v3894_v50, %v16560_v40   ;;  %v13782_v22 = vadd.f32 %v3724_v27, %v16393_v28  ;;  %v13026_v61 = vpop.f32.mrb[18].mxu0 }
 0x21b   : > { %v2175_v29 = vpop.f32.mrb[23].mxu1  ;;  %v3960_v43 = vpack.c.bf16 %v16566_v15, %v16563_v1  ;;  %v3863_v18 = vadd.f32 %v13781_v63, %v16402_v56  ;;  %v13783_v41 = vadd.f32 %v13026_v61, %v16395_v46  ;;  %v3727_v47 = vpop.f32.mrb[19].mxu0 }
 0x21c   : > { %v3959_v4 = vpack.c.bf16 %v16573_v12, %v16570_v9  ;;  %v3861_v36 = vadd.f32 %v13782_v22, %v16402_v56  ;;  %v13784_v21 = vadd.f32 %v3727_v47, %v16397_v52 }
 0x21d   : > { %3978 = vst.msk [vmem:[#allocation3 + $0x48] sm:$0xff] %vm307_vm8, %v3960_v43  ;;  %v3899_v28 = vmax.f32 %v3863_v18, 0.0  ;;  %v3864_v2 = vadd.f32 %v13783_v41, %v16402_v56 }
 0x21e   : > { %3977 = vst.msk [vmem:[#allocation3 + $0x40] sm:$0xff] %vm307_vm8, %v3959_v4  ;;  %v3897_v46 = vmax.f32 %v3861_v36, 0.0  ;;  %v3862_v52 = vadd.f32 %v13784_v21, %v16402_v56 }
 0x21f   : > { %v3900_v39 = vmax.f32 %v3864_v2, 0.0  ;;  %v16609_v33 = vmul.f32 %v3899_v28, %v16590_v25  }
 0x220   : > { %v12881_v8 = vpop.f32.mrb[24].mxu1  ;;  %v3898_v54 = vmax.f32 %v3862_v52, 0.0  ;;  %v13029_v16 = vpop.f32.mrb[20].mxu0  ;;  %v16615_v22 = vmul.f32 %v3897_v46, %v16601_v5   ;;  %v16632_v52 = vld [vmem:[%s19461_s1 + $0xb0] sm:$0xff] }
 0x221   : > { %v2188_v24 = vpop.f32.mrb[25].mxu1  ;;  %v16612_v50 = vmul.f32 %v3900_v39, %v16595_v34   ;;  %v13785_v51 = vadd.f32 %v13029_v16, %v12877_v44  ;;  %v3740_v63 = vpop.f32.mrb[21].mxu0  ;;  %19726 = vst [vmem:[#allocation16_spill] sm:$0xff] %v16632_v52  ;;  %v16637_v39 = vld [vmem:[%s19461_s1 + $0xb8] sm:$0xff] }
 0x222   : > { %v12882_v27 = vpop.f32.mrb[26].mxu1  ;;  %v16618_v61 = vmul.f32 %v3898_v54, %v16606_v59   ;;  %v13786_v43 = vadd.f32 %v3740_v63, %v2172_v49  ;;  %v13030_v18 = vpop.f32.mrb[22].mxu0  ;;  %19727 = vst [vmem:[#allocation4_spill] sm:$0xff] %v16637_v39  ;;  %v16643_v54 = vld [vmem:[%s19461_s1 + $0xa0] sm:$0xff] }
 0x223   : > { %v2191_v41 = vpop.f32.mrb[27].mxu1  ;;  %v3962_v47 = vpack.c.bf16 %v16612_v50, %v16609_v33  ;;  %v3867_v4 = vadd.f32 %v13785_v51, %v16402_v56  ;;  %v13787_v36 = vadd.f32 %v13030_v18, %v12878_v6  ;;  %v3743_v21 = vpop.f32.mrb[23].mxu0  ;;  %19728 = vst [vmem:[#allocation18_spill] sm:$0xff] %v16643_v54  ;;  %v16648_v51 = vld [vmem:[%s19461_s1 + $0xa8] sm:$0xff] }
 0x224   : > { %v3961_v44 = vpack.c.bf16 %v16618_v61, %v16615_v22  ;;  %v3865_v28 = vadd.f32 %v13786_v43, %v16402_v56  ;;  %v13788_v2 = vadd.f32 %v3743_v21, %v2175_v29  ;;  %19729 = vst [vmem:[#allocation21_spill] sm:$0xff] %v16648_v51 }
 0x225   : > { %3980 = vst.msk [vmem:[#allocation3 + $0x58] sm:$0xff] %vm307_vm8, %v3962_v47  ;;  %v3903_v46 = vmax.f32 %v3867_v4, 0.0  ;;  %v3868_v49 = vadd.f32 %v13787_v36, %v16402_v56 }
 0x226   : > { %3979 = vst.msk [vmem:[#allocation3 + $0x50] sm:$0xff] %vm307_vm8, %v3961_v44  ;;  %v3901_v6 = vmax.f32 %v3865_v28, 0.0  ;;  %v3866_v29 = vadd.f32 %v13788_v2, %v16402_v56 }
 0x227   : > { %v3904_v16 = vmax.f32 %v3868_v49, 0.0  ;;  %v16651_v4 = vmul.f32 %v3903_v46, %v16632_v52  }
 0x228   : > { %v12885_v63 = vpop.f32.mrb[28].mxu1  ;;  %v3902_v43 = vmax.f32 %v3866_v29, 0.0  ;;  %v13033_v18 = vpop.f32.mrb[24].mxu0  ;;  %v16657_v2 = vmul.f32 %v3901_v6, %v16643_v54  }
 0x229   : > { %v2204_v47 = vpop.f32.mrb[29].mxu1  ;;  %v16654_v36 = vmul.f32 %v3904_v16, %v16637_v39   ;;  %v13789_v21 = vadd.f32 %v13033_v18, %v12881_v8  ;;  %v3756_v44 = vpop.f32.mrb[25].mxu0 }
 0x22a   : > { %v12886_v28 = vpop.f32.mrb[30].mxu1  ;;  %v16660_v49 = vmul.f32 %v3902_v43, %v16648_v51   ;;  %v13790_v59 = vadd.f32 %v3756_v44, %v2188_v24  ;;  %v13034_v5 = vpop.f32.mrb[26].mxu0  ;;  %v16674_v44 = vld [vmem:[%s19461_s1 + $0xd0] sm:$0xff] }
 0x22b   : > { %v2207_v29 = vpop.f32.mrb[31].mxu1  ;;  %v3964_v34 = vpack.c.bf16 %v16654_v36, %v16651_v4  ;;  %v3871_v46 = vadd.f32 %v13789_v21, %v16402_v56  ;;  %v13791_v52 = vadd.f32 %v13034_v5, %v12882_v27  ;;  %v3759_v16 = vpop.f32.mrb[27].mxu0  ;;  %19730 = vst [vmem:[#allocation23_spill] sm:$0xff] %v16674_v44  ;;  %v16679_v27 = vld [vmem:[%s19461_s1 + $0xd8] sm:$0xff] }
 0x22c   : > { %v3963_v8 = vpack.c.bf16 %v16660_v49, %v16657_v2  ;;  %v3869_v18 = vadd.f32 %v13790_v59, %v16402_v56  ;;  %v13792_v6 = vadd.f32 %v3759_v16, %v2191_v41  ;;  %19731 = vst [vmem:[#allocation27_spill] sm:$0xff] %v16679_v27 }
 0x22d   : > { %3982 = vst.msk [vmem:[#allocation3 + $0x68] sm:$0xff] %vm307_vm8, %v3964_v34  ;;  %v3907_v43 = vmax.f32 %v3871_v46, 0.0  ;;  %v3872_v24 = vadd.f32 %v13791_v52, %v16402_v56  ;;  %v16685_v34 = vld [vmem:[%s19461_s1 + $0xc0] sm:$0xff]  ;;  %v16690_v52 = vld [vmem:[%s19461_s1 + $0xc8] sm:$0xff] }
 0x22e   : > { %3981 = vst.msk [vmem:[#allocation3 + $0x60] sm:$0xff] %vm307_vm8, %v3963_v8  ;;  %v3905_v5 = vmax.f32 %v3869_v18, 0.0  ;;  %v3870_v59 = vadd.f32 %v13792_v6, %v16402_v56  ;;  %19732 = vst [vmem:[#allocation30_spill] sm:$0xff] %v16685_v34 }
 0x22f   : > { %v3908_v41 = vmax.f32 %v3872_v24, 0.0  ;;  %19733 = vst [vmem:[#allocation31_spill] sm:$0xff] %v16690_v52  ;;  %v16693_v18 = vmul.f32 %v3907_v43, %v16674_v44  }
 0x230   : > { %v12889_v21 = vpop.f32.mrb[32].mxu1  ;;  %v3906_v46 = vmax.f32 %v3870_v59, 0.0  ;;  %v13037_v16 = vpop.f32.mrb[28].mxu0  ;;  %v16699_v24 = vmul.f32 %v3905_v5, %v16685_v34  }
 0x231   : > { %v2220_v8 = vpop.f32.mrb[33].mxu1  ;;  %v16696_v6 = vmul.f32 %v3908_v41, %v16679_v27   ;;  %v13793_v51 = vadd.f32 %v13037_v16, %v12885_v63  ;;  %v3772_v54 = vpop.f32.mrb[29].mxu0 }
 0x232   : > { %v12890_v39 = vpop.f32.mrb[34].mxu1  ;;  %v16702_v25 = vmul.f32 %v3906_v46, %v16690_v52   ;;  %v13794_v40 = vadd.f32 %v3772_v54, %v2204_v47  ;;  %v13038_v7 = vpop.f32.mrb[30].mxu0  ;;  %v16716_v47 = vld [vmem:[%s19461_s1 + $0xf0] sm:$0xff] }
 0x233   : > { %v2223_v59 = vpop.f32.mrb[35].mxu1  ;;  %v3966_v38 = vpack.c.bf16 %v16696_v6, %v16693_v18  ;;  %v3875_v43 = vadd.f32 %v13793_v51, %v16402_v56  ;;  %v13795_v44 = vadd.f32 %v13038_v7, %v12886_v28  ;;  %v3775_v41 = vpop.f32.mrb[31].mxu0  ;;  %19734 = vst [vmem:[#allocation32_spill] sm:$0xff] %v16716_v47  ;;  %v16721_v51 = vld [vmem:[%s19461_s1 + $0xf8] sm:$0xff] }
 0x234   : > { %v3965_v63 = vpack.c.bf16 %v16702_v25, %v16699_v24  ;;  %v3873_v16 = vadd.f32 %v13794_v40, %v16402_v56  ;;  %v13796_v5 = vadd.f32 %v3775_v41, %v2207_v29  ;;  %19735 = vst [vmem:[#allocation33_spill] sm:$0xff] %v16721_v51  ;;  %v16732_v29 = vld [vmem:[%s19461_s1 + $0xe8] sm:$0xff] }
 0x235   : > { %3984 = vst.msk [vmem:[#allocation3 + $0x78] sm:$0xff] %vm307_vm8, %v3966_v38  ;;  %v3911_v46 = vmax.f32 %v3875_v43, 0.0  ;;  %v3876_v54 = vadd.f32 %v13795_v44, %v16402_v56  ;;  %v16727_v38 = vld [vmem:[%s19461_s1 + $0xe0] sm:$0xff]  ;;  %19737 = vst [vmem:[#allocation35_spill] sm:$0xff] %v16732_v29 }
 0x236   : > { %3983 = vst.msk [vmem:[#allocation3 + $0x70] sm:$0xff] %vm307_vm8, %v3965_v63  ;;  %v3909_v7 = vmax.f32 %v3873_v16, 0.0  ;;  %v3874_v40 = vadd.f32 %v13796_v5, %v16402_v56  ;;  %19736 = vst [vmem:[#allocation34_spill] sm:$0xff] %v16727_v38 }
 0x237   : > { %v3912_v28 = vmax.f32 %v3876_v54, 0.0  ;;  %v3947_v41 = vmul.f32 %v3911_v46, %v16716_v47  }
 0x238   : > { %v3910_v44 = vmax.f32 %v3874_v40, 0.0  ;;  %v13041_v43 = vpop.f32.mrb[32].mxu0  ;;  %v3945_v5 = vmul.f32 %v3909_v7, %v16727_v38  }
 0x239   : > { %v3948_v63 = vmul.f32 %v3912_v28, %v16721_v51   ;;  %v13797_v16 = vadd.f32 %v13041_v43, %v12889_v21  ;;  %v3788_v52 = vpop.f32.mrb[33].mxu0 }
 0x23a   : > { %v3946_v34 = vmul.f32 %v3910_v44, %v16732_v29   ;;  %v13798_v27 = vadd.f32 %v3788_v52, %v2220_v8  ;;  %v13042_v60 = vpop.f32.mrb[34].mxu0  ;;  %v16746_v52 = vld [vmem:[%s19461_s1 + $0x110] sm:$0xff] }
 0x23b   : > { %v3968_v54 = vpack.c.bf16 %v3948_v63, %v3947_v41  ;;  %v3879_v55 = vadd.f32 %v13797_v16, %v16402_v56  ;;  %v13799_v62 = vadd.f32 %v13042_v60, %v12890_v39  ;;  %v3791_v11 = vpop.f32.mrb[35].mxu0  ;;  %19738 = vst [vmem:[#allocation36_spill] sm:$0xff] %v16746_v52  ;;  %v16751_v60 = vld [vmem:[%s19461_s1 + $0x118] sm:$0xff] }
 0x23c   : > { %v3967_v17 = vpack.c.bf16 %v3946_v34, %v3945_v5  ;;  %v3877_v40 = vadd.f32 %v13798_v27, %v16402_v56  ;;  %v13800_v10 = vadd.f32 %v3791_v11, %v2223_v59  ;;  %19739 = vst [vmem:[#allocation37_spill] sm:$0xff] %v16751_v60 }
 0x23d   : > { %3986 = vst.msk [vmem:[#allocation3 + $0x88] sm:$0xff] %vm307_vm8, %v3968_v54  ;;  %v3915_v46 = vmax.f32 %v3879_v55, 0.0  ;;  %v3880_v21 = vadd.f32 %v13799_v62, %v16402_v56  ;;  %v16757_v55 = vld [vmem:[%s19461_s1 + $0x100] sm:$0xff] }
 0x23e   : > { %3985 = vst.msk [vmem:[#allocation3 + $0x80] sm:$0xff] %vm307_vm8, %v3967_v17  ;;  %v3913_v8 = vmax.f32 %v3877_v40, 0.0  ;;  %v3878_v11 = vadd.f32 %v13800_v10, %v16402_v56  ;;  %19740 = vst [vmem:[#allocation38_spill] sm:$0xff] %v16757_v55  ;;  %v16762_v17 = vld [vmem:[%s19461_s1 + $0x108] sm:$0xff] }
 0x23f   : > { %v3916_v62 = vmax.f32 %v3880_v21, 0.0  ;;  %19741 = vst [vmem:[#allocation39_spill] sm:$0xff] %v16762_v17  ;;  %v3951_v27 = vmul.f32 %v3915_v46, %v16746_v52  }
 0x240   : > { %v3914_v39 = vmax.f32 %v3878_v11, 0.0  ;;  %v3949_v7 = vmul.f32 %v3913_v8, %v16757_v55  }
 0x241   : > { %v3952_v59 = vmul.f32 %v3916_v62, %v16751_v60  }
 0x242   : > { %v3950_v56 = vmul.f32 %v3914_v39, %v16762_v17  }
 0x243   : > { %v3970_v10 = vpack.c.bf16 %v3952_v59, %v3951_v27 }
 0x244   : > { %v3969_v28 = vpack.c.bf16 %v3950_v56, %v3949_v7  ;;  %19742 = vst [vmem:[#allocation40_spill] sm:$0xff] %v3950_v56 }
 0x245   : > { %3988 = vst.msk [vmem:[#allocation3 + $0x98] sm:$0xff] %vm307_vm8, %v3970_v10 }
 0x246   : > { %3987 = vst.msk [vmem:[#allocation3 + $0x90] sm:$0xff] %vm307_vm8, %v3969_v28 }
 0x247 LB: >> { %19746 = vst [vmem:[#allocation42_spill] sm:$0xff] %v15150_v59  ;;  %19747 = vst [vmem:[#allocation43_spill] sm:$0xff] %v15154_v27  ;;  %v19768_v1 = vld [vmem:[#allocation41_spill] sm:$0xff]  ;;  %v16983_v44 = vld [vmem:[#allocation3 + $0x8] sm:$0xff]  ;;  %s12168_s9 = smul.u32 144, %s15294_s30  ;;  %s4031_s18 = scalar_lea.vmem %s19465_s5, %s15294_s30  ;;  %s15294_s30 = sphi %s16870_s30, %s20160_s30   ;;  %v15290_v3 = vphi %v16435_v3, %v20159_v3   ;;  %v15286_v30 = vphi %v16438_v30, %v20158_v30   ;;  %v15282_v14 = vphi %v16429_v14, %v20157_v14   ;;  %v15278_v37 = vphi %v16432_v37, %v20156_v37   ;;  %v15274_v35 = vphi %v16478_v35, %v20155_v35   ;;  %v15270_v19 = vphi %v16481_v19, %v20154_v19   ;;  %v15266_v31 = vphi %v16471_v31, %v20153_v31   ;;  %v15262_v58 = vphi %v16474_v58, %v20152_v58   ;;  %v15258_v20 = vphi %v16524_v20, %v20151_v20   ;;  %v15254_v45 = vphi %v16527_v45, %v20150_v45   ;;  %v15250_v48 = vphi %v16517_v48, %v20149_v48   ;;  %v15246_v26 = vphi %v16520_v26, %v20148_v26   ;;  %v15242_v9 = vphi %v16570_v9, %v20147_v9   ;;  %v15238_v12 = vphi %v16573_v12, %v20146_v12   ;;  %v15230_v15 = vphi %v16566_v15, %v20144_v15   ;;  %v15226_v22 = vphi %v16615_v22, %v20143_v22   ;;  %v15222_v61 = vphi %v16618_v61, %v20142_v61   ;;  %v15218_v33 = vphi %v16609_v33, %v20141_v33   ;;  %v15214_v50 = vphi %v16612_v50, %v20140_v50   ;;  %v15210_v2 = vphi %v16657_v2, %v20139_v2   ;;  %v15206_v49 = vphi %v16660_v49, %v20138_v49   ;;  %v15202_v4 = vphi %v16651_v4, %v20137_v4   ;;  %v15198_v36 = vphi %v16654_v36, %v20136_v36   ;;  %v15194_v24 = vphi %v16699_v24, %v20135_v24   ;;  %v15190_v25 = vphi %v16702_v25, %v20134_v25   ;;  %v15186_v18 = vphi %v16693_v18, %v20133_v18   ;;  %v15182_v6 = vphi %v16696_v6, %v20132_v6   ;;  %v15178_v5 = vphi %v3945_v5, %v20131_v5   ;;  %v15174_v34 = vphi %v3946_v34, %v20130_v34   ;;  %v15170_v41 = vphi %v3947_v41, %v20129_v41   ;;  %v15166_v63 = vphi %v3948_v63, %v20128_v63   ;;  %v15162_v7 = vphi %v3949_v7, %v20127_v7   ;;  %v15154_v27 = vphi %v3951_v27, %v20125_v27   ;;  %v15150_v59 = vphi %v3952_v59, %v20124_v59  }
 0x248   : >> { %19750 = vst [vmem:[#allocation44_spill] sm:$0xff] %v15162_v7  ;;  %19751 = vst [vmem:[#allocation45_spill] sm:$0xff] %v15166_v63  ;;  %v4059_v43 = vld [vmem:[#allocation3] sm:$0x80]  ;;  %v4087_v54 = vrot.slane %v16983_v44, 7  ;;  %v16996_v46 = vld [vmem:[#allocation3 + $0x10] sm:$0xff]  ;;  %s7621_s21 = scalar_lea.vmem %s19467_s7, %s15294_s30 }
 0x249   : >> { %19752 = vst [vmem:[#allocation46_spill] sm:$0xff] %v15170_v41  ;;  %19753 = vst [vmem:[#allocation47_spill] sm:$0xff] %v15174_v34  ;;  %v4086_v16 = vrot.slane %v4059_v43, 7  ;;  %s16993_s12 = scalar_lea.vmem %s19464_s4, %s12168_s9  ;;  %v16998_v21 = vld [vmem:[#allocation3 + $0x18] sm:$0xff]  ;;  %v4089_v62 = vrot.slane %v16996_v46, 7  ;;  %v17010_v59 = vld [vmem:[#allocation3 + $0x28] sm:$0xff]  ;;  %s17877_s15 = scalar_lea.vmem %s19466_s6, %s12168_s9 }
 0x24a   : >> { %19754 = vst [vmem:[#allocation48_spill] sm:$0xff] %v15178_v5  ;;  %19755 = vst [vmem:[#allocation49_spill] sm:$0xff] %v15182_v6  ;;  %v14946_v8 = vld [vmem:[%s16993_s12 + $0x10] sm:$0xff]   ;;  %v14947_v11 = vld [vmem:[%s16993_s12 + $0x18] sm:$0xff]   ;;  %v4091_v10 = vrot.slane %v16998_v21, 7  ;;  %v4095_v7 = vrot.slane %v17010_v59, 7 }
 0x24b   : >> { %v19748_v56 = vld [vmem:[#allocation40_spill] sm:$0xff]  ;;  %19756 = vst [vmem:[#allocation50_spill] sm:$0xff] %v15186_v18  ;;  %19757 = vst [vmem:[#allocation51_spill] sm:$0xff] %v15190_v25  ;;  %v4088_v40 = vsel %vm563_vm2, %v4086_v16, %v4087_v54  ;;  %13043 = vmatprep.subr.bf16.mxu0 %v14946_v8  ;;  %v4090_v28 = vsel %vm563_vm2, %v4087_v54, %v4089_v62  ;;  %v17006_v16 = vld [vmem:[#allocation3 + $0x20] sm:$0xff]  ;;  %v4788_v63 = vshrl.u32 %v4059_v43, 16  ;;  %v4375_v41 = vshrl.u32 %v16983_v44, 16 }
 0x24c   : >> { %19749 = vst [vmem:[#allocation40_spill] sm:$0xff] %v19748_v56  ;;  %19758 = vst [vmem:[#allocation52_spill] sm:$0xff] %v15194_v24  ;;  %13047 = vmatprep.mubr.msk.bf16.mxu0 %vm307_vm8, %v4088_v40  ;;  %13044 = vmatpush3.bf16.msra.mxu0 %v14946_v8  ;;  %v14948_v39 = vld [vmem:[%s16993_s12] sm:$0xff]   ;;  %v4092_v40 = vsel %vm563_vm2, %v4089_v62, %v4091_v10  ;;  %v14949_v56 = vld [vmem:[%s16993_s12 + $0x8] sm:$0xff]   ;;  %v4093_v8 = vrot.slane %v17006_v16, 7  ;;  %v4378_v6 = vshll.u32 %v16983_v44, 16 }
 0x24d   : >> { %19759 = vst [vmem:[#allocation53_spill] sm:$0xff] %v15198_v36  ;;  %19760 = vst [vmem:[#allocation54_spill] sm:$0xff] %v15202_v4  ;;  %13045 = vmatprep.subr.bf16.mxu0 %v14947_v11  ;;  %v17021_v27 = vld [vmem:[#allocation3 + $0x30] sm:$0xff]  ;;  %v17045_v25 = vld [vmem:[#allocation3 + $0x58] sm:$0xff]  ;;  %s3994_s23 = sadd.s32 1, %s15294_s30  }
 0x24e   : >> { %19761 = vst [vmem:[#allocation55_spill] sm:$0xff] %v15206_v49  ;;  %19762 = vst [vmem:[#allocation56_spill] sm:$0xff] %v15210_v2  ;;  %v4094_v54 = vsel %vm563_vm2, %v4091_v10, %v4093_v8  ;;  %v4096_v62 = vsel %vm563_vm2, %v4093_v8, %v4095_v7  ;;  %v17032_v10 = vld [vmem:[#allocation3 + $0x40] sm:$0xff]  ;;  %v17034_v8 = vld [vmem:[#allocation3 + $0x48] sm:$0xff]  ;;  %v17200_v60 = vshrl.u32 %v17045_v25, 16  ;;  %v17203_v52 = vshll.u32 %v17045_v25, 16  ;;  %s20160_s30 = smov %s3994_s23 }
 0x24f   : >> { %19763 = vst [vmem:[#allocation57_spill] sm:$0xff] %v15214_v50  ;;  %19764 = vst [vmem:[#allocation58_spill] sm:$0xff] %v15218_v33  ;;  %v17060_v49 = vld [vmem:[#allocation3 + $0x60] sm:$0xff]  ;;  %v17090_v33 = vld [vmem:[#allocation3 + $0x90] sm:$0x7f]  ;;  %p19231_p4 = scmp.ge.s32.totalorder %s3994_s23, 2  }
 0x250   : >> { %19765 = vst [vmem:[#allocation59_spill] sm:$0xff] %v15222_v61  ;;  %19766 = vst [vmem:[#allocation60_spill] sm:$0xff] %v15226_v22  ;;  %13046 = vmatpush3.bf16.msra.mxu0 %v14947_v11  ;;  %v17017_v11 = vld [vmem:[%s16993_s12 + $0x20] sm:$0xff]   ;;  %v17080_v4 = vld [vmem:[#allocation3 + $0x80] sm:$0xff] }
 0x251   : >> { %19767 = vst [vmem:[#allocation61_spill] sm:$0xff] %v15230_v15  ;;  %19769 = vst [vmem:[#allocation41_spill] sm:$0xff] %v19768_v1  ;;  %13083 = vmatprep.subr.bf16.mxu0 %v14948_v39 }
 0x252   : >> { %19770 = vst [vmem:[#allocation62_spill] sm:$0xff] %v15238_v12  ;;  %19771 = vst [vmem:[#allocation63_spill] sm:$0xff] %v15242_v9  ;;  %v4380_v9 = vrot.slane %v4378_v6, 7 }
 0x253   : >> { %19772 = vst [vmem:[#allocation64_spill] sm:$0xff] %v15246_v26  ;;  %19773 = vst [vmem:[#allocation65_spill] sm:$0xff] %v15250_v48  ;;  %13048 = vmatmul.mubr.msk.bf16.vlgmr.msra.gmra.mrb[0].mxu0 %vm307_vm8, %v4090_v28  ;;  %v17024_v28 = vld [vmem:[#allocation3 + $0x38] sm:$0xff] }
 0x254   : >> { %19774 = vst [vmem:[#allocation66_spill] sm:$0xff] %v15254_v45  ;;  %19775 = vst [vmem:[#allocation67_spill] sm:$0xff] %v15258_v20  ;;  %13084 = vmatpush3.bf16.msra.mxu0 %v14948_v39  ;;  %13051 = vmatprep.mubr.msk.bf16.mxu0 %vm307_vm8, %v4092_v40  ;;  %v4097_v39 = vrot.slane %v17021_v27, 7  ;;  %v4099_v40 = vrot.slane %v17024_v28, 7  ;;  %v17141_v20 = vshll.u32 %v17021_v27, 16 }
 0x255   : >> { %19776 = vst [vmem:[#allocation68_spill] sm:$0xff] %v15262_v58  ;;  %19777 = vst [vmem:[#allocation69_spill] sm:$0xff] %v15266_v31  ;;  %13085 = vmatprep.subr.bf16.mxu0 %v14949_v56 }
 0x256   : >> { %19778 = vst [vmem:[#allocation70_spill] sm:$0xff] %v15270_v19  ;;  %19779 = vst [vmem:[#allocation71_spill] sm:$0xff] %v15274_v35  ;;  %v4098_v34 = vsel %vm563_vm2, %v4095_v7, %v4097_v39  ;;  %v17147_v19 = vshll.u32 %v17024_v28, 16  ;;  %v17162_v35 = vshrl.u32 %v17032_v10, 16 }
 0x257   : >> { %19780 = vst [vmem:[#allocation72_spill] sm:$0xff] %v15278_v37  ;;  %19781 = vst [vmem:[#allocation73_spill] sm:$0xff] %v15282_v14  ;;  %v17171_v37 = vshrl.u32 %v17034_v8, 16 }
 0x258   : >> { %19782 = vst [vmem:[#allocation74_spill] sm:$0xff] %v15286_v30  ;;  %19783 = vst [vmem:[#allocation75_spill] sm:$0xff] %v15290_v3  ;;  %13086 = vmatpush3.bf16.msra.mxu0 %v14949_v56  ;;  %v4100_v56 = vsel %vm563_vm2, %v4097_v39, %v4099_v40  ;;  %v17043_v39 = vld [vmem:[#allocation3 + $0x50] sm:$0xff]  ;;  %v17174_v3 = vshll.u32 %v17034_v8, 16 }
 0x259   : >> { %13123 = vmatprep.subr.bf16.mxu0 %v17017_v11  ;;  %v4105_v43 = vrot.slane %v17043_v39, 7  ;;  %19784 = vst [vmem:[#allocation76_spill] sm:$0xff] %v17080_v4  ;;  %19789 = vst [vmem:[#allocation81_spill] sm:$0xff] %v17200_v60 }
 0x25b   : >> { %13052 = vmatmul.mubr.msk.bf16.gmra.mrb[4].mxu0 %vm307_vm8, %v4094_v54  ;;  %v4101_v54 = vrot.slane %v17032_v10, 7 }
 0x25c   : >> { %13055 = vmatprep.mubr.msk.bf16.mxu0 %vm307_vm8, %v4096_v62  ;;  %v4103_v62 = vrot.slane %v17034_v8, 7 }
 0x25d   : >> { %v4102_v5 = vsel %vm563_vm2, %v4099_v40, %v4101_v54  ;;  %v4107_v40 = vrot.slane %v17045_v25, 7 }
 0x25e   : >> { %v4104_v7 = vsel %vm563_vm2, %v4101_v54, %v4103_v62  ;;  %v4106_v18 = vsel %vm563_vm2, %v4103_v62, %v4105_v43  ;;  %v17072_v62 = vld [vmem:[#allocation3 + $0x78] sm:$0xff] }
 0x25f   : >> { %v4108_v44 = vsel %vm563_vm2, %v4105_v43, %v4107_v40  ;;  %v4115_v43 = vrot.slane %v17072_v62, 7  ;;  %v17243_v0 = vshrl.u32 %v17072_v62, 16 }
 0x261   : >> { %19793 = vst [vmem:[#allocation85_spill] sm:$0xff] %v17243_v0 }
 0x263   : >> { %13056 = vmatmul.mubr.msk.bf16.gmra.mrb[8].mxu0 %vm307_vm8, %v4098_v34  ;;  %v4790_v34 = vrot.slane %v4788_v63, 7  ;;  %v17062_v63 = vld [vmem:[#allocation3 + $0x68] sm:$0xff] }
 0x264   : >> { %13059 = vmatprep.mubr.msk.bf16.mxu0 %vm307_vm8, %v4100_v56  ;;  %v17049_v56 = vrot.slane %v4375_v41, 7  ;;  %v17223_v38 = vshrl.u32 %v17062_v63, 16 }
 0x266   : >> { %v4792_v24 = vor.u32 %v17049_v56, %v4378_v6  ;;  %19790 = vst [vmem:[#allocation82_spill] sm:$0xff] %v17223_v38 }
 0x268   : >> { %v17056_v54 = vsel %vm1244_vm7, %v4790_v34, %v4792_v24  ;;  %v17070_v34 = vld [vmem:[#allocation3 + $0x70] sm:$0xff] }
 0x26b   : >> { %13060 = vmatmul.mubr.msk.bf16.gmra.mrb[12].mxu0 %vm307_vm8, %v4102_v5  ;;  %v4109_v5 = vrot.slane %v17060_v49, 7 }
 0x26c   : >> { %13063 = vmatprep.mubr.msk.bf16.mxu0 %vm307_vm8, %v4104_v7  ;;  %v4111_v7 = vrot.slane %v17062_v63, 7 }
 0x26d   : >> { %v4110_v36 = vsel %vm563_vm2, %v4107_v40, %v4109_v5  ;;  %v17082_v40 = vld [vmem:[#allocation3 + $0x88] sm:$0xff] }
 0x26e   : >> { %v4112_v24 = vsel %vm563_vm2, %v4109_v5, %v4111_v7  ;;  %19785 = vst [vmem:[#allocation77_spill] sm:$0xff] %v17082_v40  ;;  %v4033_v5 = vld [vmem:[#allocation3] sm:$0xc0]  ;;  %v17263_v42 = vshrl.u32 %v17082_v40, 16 }
 0x26f   : >> { %v4367_v61 = vshrl.u32 %v4033_v5, 16  ;;  %v4370_v50 = vshll.u32 %v4033_v5, 16  ;;  %v17099_v5 = vshll.u32 %v16996_v46, 16 }
 0x270   : >> { %19797 = vst [vmem:[#allocation89_spill] sm:$0xff] %v17263_v42 }
 0x271   : >> { %v4369_v12 = vrot.slane %v4367_v61, 6  ;;  %v4372_v15 = vrot.slane %v4370_v50, 7  ;;  %v17105_v50 = vshll.u32 %v16998_v21, 16  ;;  %v4389_v6 = vrot.slane %v17099_v5, 7 }
 0x273   : >> { %13064 = vmatmul.mubr.msk.bf16.gmra.mrb[16].mxu0 %vm307_vm8, %v4106_v18  ;;  %v4113_v18 = vrot.slane %v17070_v34, 7  ;;  %19787 = vst [vmem:[#allocation79_spill] sm:$0xff] %v17105_v50 }
 0x274   : >> { %13067 = vmatprep.mubr.msk.bf16.mxu0 %vm307_vm8, %v4108_v44 }
 0x275   : >> { %v4114_v44 = vsel %vm563_vm2, %v4111_v7, %v4113_v18  ;;  %v4116_v2 = vsel %vm563_vm2, %v4113_v18, %v4115_v43  ;;  %v4377_v7 = vrot.slane %v4375_v41, 6  ;;  %v4373_v41 = vor.u32 %v4372_v15, %v4369_v12 }
 0x276   : >> { %v4398_v15 = vrot.slane %v17105_v50, 7  ;;  %v17116_v12 = vshrl.u32 %v17006_v16, 16 }
 0x278   : >> { %v19568_v17 = vrot.slane %v17116_v12, 7 }
 0x27b   : >> { %13068 = vmatmul.mubr.msk.bf16.gmra.mrb[20].mxu0 %vm307_vm8, %v4110_v36  ;;  %v4117_v36 = vrot.slane %v17080_v4, 7 }
 0x27c   : >> { %13071 = vmatprep.mubr.msk.bf16.mxu0 %vm307_vm8, %v4112_v24  ;;  %v4119_v24 = vrot.slane %v17082_v40, 7 }
 0x27d   : >> { %v4118_v22 = vsel %vm563_vm2, %v4115_v43, %v4117_v36  ;;  %v4381_v43 = vor.u32 %v4380_v9, %v4377_v7 }
 0x27e   : >> { %v4120_v18 = vsel %vm563_vm2, %v4117_v36, %v4119_v24  ;;  %v17102_v36 = vshrl.u32 %v16998_v21, 16 }
 0x280   : >> { %19786 = vst [vmem:[#allocation78_spill] sm:$0xff] %v17102_v36  ;;  %v4395_v1 = vrot.slane %v17102_v36, 6  ;;  %v4797_v58 = vrot.slane %v17102_v36, 7 }
 0x282   : >> { %v4399_v7 = vor.u32 %v4398_v15, %v4395_v1  ;;  %v14951_v1 = vld [vmem:[%s16993_s12 + $0x28] sm:$0xff]   ;;  %v5173_v31 = vor.u32 %v4797_v58, %v17105_v50 }
 0x283   : >> { %13072 = vmatmul.mubr.msk.bf16.gmra.mrb[24].mxu0 %vm307_vm8, %v4114_v44  ;;  %v17096_v44 = vshrl.u32 %v16996_v46, 16 }
 0x284   : >> { %13075 = vmatprep.mubr.msk.bf16.mxu0 %vm307_vm8, %v4116_v2  ;;  %v4121_v2 = vrot.slane %v17090_v33, 7 }
 0x285   : >> { %v4386_v61 = vrot.slane %v17096_v44, 6 }
 0x287   : >> { %v4390_v9 = vor.u32 %v4389_v6, %v4386_v61 }
 0x289   : >> { %v4391_v45 = vsel %vm836_vm5, %v4381_v43, %v4390_v9  ;;  %v4400_v6 = vsel %vm836_vm5, %v4390_v9, %v4399_v7  ;;  %v17144_v9 = vshrl.u32 %v17024_v28, 16 }
 0x28b   : >> { %13076 = vmatmul.mubr.msk.bf16.gmra.mrb[28].mxu0 %vm307_vm8, %v4118_v22  ;;  %v4122_v22 = vsel %vm563_vm2, %v4119_v24, %v4121_v2  ;;  %v17119_v24 = vshll.u32 %v17006_v16, 16  ;;  %v17122_v2 = vshrl.u32 %v17010_v59, 16 }
 0x28c   : >> { %13079 = vmatprep.mubr.msk.bf16.mxu0 %vm307_vm8, %v4120_v18  ;;  %v4382_v18 = vsel %vm836_vm5, %v4373_v41, %v4381_v43  ;;  %v17125_v41 = vshll.u32 %v17010_v59, 16  ;;  %v17138_v43 = vshrl.u32 %v17021_v27, 16 }
 0x28d   : >> { %19788 = vst [vmem:[#allocation80_spill] sm:$0xff] %v17119_v24  ;;  %v4407_v61 = vrot.slane %v17119_v24, 7 }
 0x28e   : >> { %v4416_v26 = vrot.slane %v17125_v41, 7 }
 0x293   : >> { %13080 = vmatmul.mubr.msk.bf16.gmra.mrb[32].mxu0 %vm307_vm8, %v4122_v22  ;;  %v4404_v22 = vrot.slane %v17116_v12, 6 }
 0x294   : >> { %13087 = vmatprep.mubr.msk.bf16.mxu0 %vm307_vm8, %v4382_v18  ;;  %v4413_v18 = vrot.slane %v17122_v2, 6 }
 0x295   : >> { %v4408_v15 = vor.u32 %v4407_v61, %v4404_v22  ;;  %v4422_v22 = vrot.slane %v17138_v43, 6  ;;  %v4425_v61 = vrot.slane %v17141_v20, 7 }
 0x296   : >> { %v4417_v48 = vor.u32 %v4416_v26, %v4413_v18  ;;  %v4431_v26 = vrot.slane %v17144_v9, 6  ;;  %v4434_v18 = vrot.slane %v17147_v19, 7 }
 0x298   : >> { %v4435_v30 = vor.u32 %v4434_v18, %v4431_v26  ;;  %v4449_v26 = vrot.slane %v17171_v37, 6  ;;  %v4452_v18 = vrot.slane %v17174_v3, 7 }
 0x29a   : >> { %v4453_v55 = vor.u32 %v4452_v18, %v4449_v26  ;;  %v4470_v26 = vrot.slane %v17203_v52, 7 }
 0x29b   : >> { %13088 = vmatmul.mubr.msk.bf16.vlgmr.msra.gmra.mrb[0].mxu0 %vm307_vm8, %v4391_v45  ;;  %v17150_v45 = vld [vmem:[%s16993_s12 + $0x30] sm:$0xff]  }
 0x29c   : >> { %13124 = vmatpush3.bf16.msra.mxu0 %v17017_v11  ;;  %13091 = vmatprep.mubr.msk.bf16.mxu0 %vm307_vm8, %v4400_v6  ;;  %v4409_v11 = vsel %vm836_vm5, %v4399_v7, %v4408_v15  ;;  %v4418_v6 = vsel %vm836_vm5, %v4408_v15, %v4417_v48  ;;  %v4426_v7 = vor.u32 %v4425_v61, %v4422_v22  ;;  %v19559_v15 = vrot.slane %v17096_v44, 7 }
 0x29d   : >> { %13125 = vmatprep.subr.bf16.mxu0 %v14951_v1  ;;  %v4440_v61 = vrot.slane %v17162_v35, 6 }
 0x29e   : >> { %v4427_v22 = vsel %vm836_vm5, %v4417_v48, %v4426_v7  ;;  %v4436_v14 = vsel %vm836_vm5, %v4426_v7, %v4435_v30  ;;  %v17194_v48 = vshll.u32 %v17043_v39, 16  ;;  %v5181_v7 = vor.u32 %v19568_v17, %v17119_v24 }
 0x29f   : >> { %v4467_v17 = vrot.slane %v17200_v60, 6 }
 0x2a0   : >> { %13126 = vmatpush3.bf16.msra.mxu0 %v14951_v1  ;;  %v17166_v1 = vshll.u32 %v17032_v10, 16 }
 0x2a1   : >> { %13163 = vmatprep.subr.bf16.mxu0 %v17150_v45 }
 0x2a3   : >> { %13092 = vmatmul.mubr.msk.bf16.gmra.mrb[4].mxu0 %vm307_vm8, %v4409_v11  ;;  %v17179_v11 = vsel %vm1244_vm7, %v19559_v15, %v5173_v31  ;;  %v17191_v15 = vshrl.u32 %v17043_v39, 16 }
 0x2a4   : >> { %13095 = vmatprep.mubr.msk.bf16.mxu0 %vm307_vm8, %v4418_v6  ;;  %v4443_v6 = vrot.slane %v17166_v1, 7 }
 0x2a6   : >> { %v4444_v31 = vor.u32 %v4443_v6, %v4440_v61  ;;  %v4458_v61 = vrot.slane %v17191_v15, 6  ;;  %v4461_v6 = vrot.slane %v17194_v48, 7 }
 0x2a8   : >> { %v4454_v29 = vsel %vm836_vm5, %v4444_v31, %v4453_v55  ;;  %v4462_v18 = vor.u32 %v4461_v6, %v4458_v61  ;;  %v4485_v6 = vrot.slane %v17223_v38, 6 }
 0x2aa   : >> { %v4463_v51 = vsel %vm836_vm5, %v4453_v55, %v4462_v18  ;;  %v17240_v55 = vshll.u32 %v17070_v34, 16 }
 0x2ab   : >> { %13096 = vmatmul.mubr.msk.bf16.gmra.mrb[8].mxu0 %vm307_vm8, %v4427_v22  ;;  %v4445_v22 = vsel %vm836_vm5, %v4435_v30, %v4444_v31  ;;  %v17220_v30 = vshll.u32 %v17060_v49, 16  ;;  %v17226_v31 = vshll.u32 %v17062_v63, 16 }
 0x2ac   : >> { %13099 = vmatprep.mubr.msk.bf16.mxu0 %vm307_vm8, %v4436_v14  ;;  %v17206_v14 = vsel %vm1244_vm7, %v4797_v58, %v5181_v7  ;;  %v17217_v58 = vshrl.u32 %v17060_v49, 16  ;;  %v4471_v7 = vor.u32 %v4470_v26, %v4467_v17  ;;  %v17237_v26 = vshrl.u32 %v17070_v34, 16 }
 0x2ad   : >> { %19791 = vst [vmem:[#allocation83_spill] sm:$0xff] %v17226_v31  ;;  %v4488_v47 = vrot.slane %v17226_v31, 7 }
 0x2ae   : >> { %v4472_v61 = vsel %vm836_vm5, %v4462_v18, %v4471_v7  ;;  %19792 = vst [vmem:[#allocation84_spill] sm:$0xff] %v17237_v26  ;;  %v17246_v18 = vshll.u32 %v17072_v62, 16 }
 0x2af   : >> { %v4489_v53 = vor.u32 %v4488_v47, %v4485_v6  ;;  %v17257_v6 = vshrl.u32 %v17080_v4, 16 }
 0x2b0   : >> { %19794 = vst [vmem:[#allocation86_spill] sm:$0xff] %v17246_v18  ;;  %v4506_v32 = vrot.slane %v17246_v18, 7 }
 0x2b1   : >> { %19795 = vst [vmem:[#allocation87_spill] sm:$0xff] %v17257_v6 }
 0x2b3   : >> { %13100 = vmatmul.mubr.msk.bf16.gmra.mrb[12].mxu0 %vm307_vm8, %v4445_v22  ;;  %v4476_v22 = vrot.slane %v17217_v58, 6 }
 0x2b4   : >> { %13103 = vmatprep.mubr.msk.bf16.mxu0 %vm307_vm8, %v4454_v29  ;;  %v4479_v29 = vrot.slane %v17220_v30, 7 }
 0x2b6   : >> { %v4480_v17 = vor.u32 %v4479_v29, %v4476_v22  ;;  %v4503_v29 = vrot.slane %v17243_v0, 6 }
 0x2b8   : >> { %v4481_v23 = vsel %vm836_vm5, %v4471_v7, %v4480_v17  ;;  %v4490_v22 = vsel %vm836_vm5, %v4480_v17, %v4489_v53  ;;  %v17260_v7 = vshll.u32 %v17080_v4, 16  ;;  %v4507_v57 = vor.u32 %v4506_v32, %v4503_v29 }
 0x2b9   : >> { %v17266_v17 = vshll.u32 %v17082_v40, 16  ;;  %v4528_v29 = vshrl.u32 %v17090_v33, 16 }
 0x2ba   : >> { %19796 = vst [vmem:[#allocation88_spill] sm:$0xff] %v17260_v7 }
 0x2bb   : >> { %13104 = vmatmul.mubr.msk.bf16.gmra.mrb[16].mxu0 %vm307_vm8, %v4463_v51  ;;  %v4494_v51 = vrot.slane %v17237_v26, 6  ;;  %19798 = vst [vmem:[#allocation90_spill] sm:$0xff] %v17266_v17  ;;  %v4524_v36 = vrot.slane %v17266_v17, 7  ;;  %v4530_v40 = vrot.slane %v4528_v29, 6  ;;  %v4812_v29 = vrot.slane %v17162_v35, 7 }
 0x2bc   : >> { %13107 = vmatprep.mubr.msk.bf16.mxu0 %vm307_vm8, %v4472_v61  ;;  %v4497_v61 = vrot.slane %v17240_v55, 7 }
 0x2be   : >> { %v4498_v47 = vor.u32 %v4497_v61, %v4494_v51  ;;  %v4521_v61 = vrot.slane %v17263_v42, 6 }
 0x2c0   : >> { %v4499_v13 = vsel %vm836_vm5, %v4489_v53, %v4498_v47  ;;  %v4508_v51 = vsel %vm836_vm5, %v4498_v47, %v4507_v57  ;;  %v4531_v53 = vshll.u32 %v17090_v33, 16  ;;  %v4525_v24 = vor.u32 %v4524_v36, %v4521_v61 }
 0x2c2   : >> { %v4533_v4 = vrot.slane %v4531_v53, 7 }
 0x2c3   : >> { %13108 = vmatmul.mubr.msk.bf16.gmra.mrb[20].mxu0 %vm307_vm8, %v4481_v23  ;;  %v4512_v23 = vrot.slane %v17257_v6, 6 }
 0x2c4   : >> { %13111 = vmatprep.mubr.msk.bf16.mxu0 %vm307_vm8, %v4490_v22  ;;  %v4515_v22 = vrot.slane %v17260_v7, 7 }
 0x2c6   : >> { %v4516_v32 = vor.u32 %v4515_v22, %v4512_v23  ;;  %v14953_v22 = vld [vmem:[%s16993_s12 + $0x38] sm:$0xff]  }
 0x2c8   : >> { %v4517_v50 = vsel %vm836_vm5, %v4507_v57, %v4516_v32  ;;  %v4526_v47 = vsel %vm836_vm5, %v4516_v32, %v4525_v24  ;;  %v19799_v57 = vrot.slane %v17096_v44, 7 }
 0x2ca   : >> { %v17289_v33 = vor.u32 %v19799_v57, %v17099_v5 }
 0x2cb   : >> { %13112 = vmatmul.mubr.msk.bf16.gmra.mrb[24].mxu0 %vm307_vm8, %v4499_v13  ;;  %v4534_v13 = vor.u32 %v4533_v4, %v4530_v40  ;;  %v4806_v40 = vrot.slane %v17138_v43, 7 }
 0x2cc   : >> { %13115 = vmatprep.mubr.msk.bf16.mxu0 %vm307_vm8, %v4508_v51  ;;  %v4796_v36 = vsel %vm1244_vm7, %v17049_v56, %v17289_v33  ;;  %v19800_v56 = vrot.slane %v17116_v12, 7  ;;  %v4809_v51 = vrot.slane %v17144_v9, 7 }
 0x2cd   : >> { %v4535_v23 = vsel %vm836_vm5, %v4525_v24, %v4534_v13  ;;  %v4813_v13 = vor.u32 %v4812_v29, %v17166_v1 }
 0x2ce   : >> { %v4810_v61 = vor.u32 %v4809_v51, %v17147_v19 }
 0x2cf   : >> { %v4814_v57 = vsel %vm1244_vm7, %v4809_v51, %v4813_v13 }
 0x2d0   : >> { %v17323_v53 = vsel %vm1244_vm7, %v4806_v40, %v4810_v61  ;;  %v4827_v61 = vrot.slane %v17223_v38, 7 }
 0x2d2   : >> { %v4828_v13 = vor.u32 %v4827_v61, %v17226_v31  ;;  %v4836_v31 = vrot.slane %v17257_v6, 7 }
 0x2d3   : >> { %13116 = vmatmul.mubr.msk.bf16.gmra.mrb[28].mxu0 %vm307_vm8, %v4517_v50  ;;  %v4803_v50 = vrot.slane %v17122_v2, 7 }
 0x2d4   : >> { %13119 = vmatprep.mubr.msk.bf16.mxu0 %vm307_vm8, %v4526_v47  ;;  %v4815_v47 = vrot.slane %v17171_v37, 7 }
 0x2d5   : >> { %v4804_v4 = vor.u32 %v4803_v50, %v17125_v41 }
 0x2d7   : >> { %v17308_v24 = vsel %vm1244_vm7, %v19800_v56, %v4804_v4 }
 0x2db   : >> { %13120 = vmatmul.mubr.msk.bf16.gmra.mrb[32].mxu0 %vm307_vm8, %v4535_v23  ;;  %v4816_v23 = vor.u32 %v4815_v47, %v17174_v3 }
 0x2dc   : >> { %13127 = vmatprep.mubr.msk.bf16.mxu0 %vm307_vm8, %v17056_v54  ;;  %v17302_v54 = vld [vmem:[%s16993_s12 + $0x40] sm:$0xff]  }
 0x2e3   : >> { %13128 = vmatmul.mubr.msk.bf16.vlgmr.msra.gmra.mrb[0].mxu0 %vm307_vm8, %v4796_v36  ;;  %v4818_v36 = vrot.slane %v17191_v15, 7 }
 0x2e4   : >> { %13164 = vmatpush3.bf16.msra.mxu0 %v17150_v45  ;;  %13131 = vmatprep.mubr.msk.bf16.mxu0 %vm307_vm8, %v17179_v11  ;;  %v4807_v45 = vor.u32 %v4806_v40, %v17141_v20 }
 0x2e5   : >> { %13165 = vmatprep.subr.bf16.mxu0 %v14953_v22  ;;  %v4819_v4 = vor.u32 %v4818_v36, %v17194_v48 }
 0x2e6   : >> { %v17319_v32 = vsel %vm1244_vm7, %v4803_v50, %v4807_v45  ;;  %v4817_v50 = vsel %vm1244_vm7, %v4812_v29, %v4816_v23  ;;  %v4824_v45 = vrot.slane %v17217_v58, 7 }
 0x2e7   : >> { %v4820_v56 = vsel %vm1244_vm7, %v4815_v47, %v4819_v4  ;;  %v4833_v4 = vrot.slane %v17243_v0, 7 }
 0x2e8   : >> { %13166 = vmatpush3.bf16.msra.mxu0 %v14953_v22  ;;  %v4821_v22 = vrot.slane %v17200_v60, 7  ;;  %v4825_v29 = vor.u32 %v4824_v45, %v17220_v30  ;;  %v4830_v60 = vrot.slane %v17237_v26, 7  ;;  %v4829_v47 = vsel %vm1244_vm7, %v4824_v45, %v4828_v13  ;;  %v17360_v26 = vld [vmem:[#allocation3 + $0x90] sm:$0xff] }
 0x2e9   : >> { %13203 = vmatprep.subr.bf16.mxu0 %v17302_v54  ;;  %v4837_v45 = vor.u32 %v4836_v31, %v17260_v7  ;;  %v17366_v13 = vshrl.u32 %v17360_v26, 16 }
 0x2ea   : >> { %v4822_v40 = vor.u32 %v4821_v22, %v17203_v52  ;;  %v4826_v23 = vsel %vm1244_vm7, %v4821_v22, %v4825_v29  ;;  %v4839_v29 = vrot.slane %v17263_v42, 7 }
 0x2eb   : >> { %13132 = vmatmul.mubr.msk.bf16.gmra.mrb[4].mxu0 %vm307_vm8, %v17206_v14  ;;  %v4838_v6 = vsel %vm1244_vm7, %v4833_v4, %v4837_v45  ;;  %v14955_v45 = vld [vmem:[%s16993_s12 + $0x48] sm:$0xff]  }
 0x2ec   : >> { %13135 = vmatprep.mubr.msk.bf16.mxu0 %vm307_vm8, %v17308_v24  ;;  %v4823_v51 = vsel %vm1244_vm7, %v4818_v36, %v4822_v40  ;;  %v4831_v36 = vor.u32 %v4830_v60, %v17240_v55  ;;  %v4834_v40 = vor.u32 %v4833_v4, %v17246_v18 }
 0x2ee   : >> { %v4832_v38 = vsel %vm1244_vm7, %v4827_v61, %v4831_v36  ;;  %v4835_v22 = vsel %vm1244_vm7, %v4830_v60, %v4834_v40  ;;  %v4840_v61 = vor.u32 %v4839_v29, %v17266_v17  ;;  %v5129_v36 = vld [vmem:[#allocation3 + $0x8] sm:$0x80]  ;;  %v4845_v60 = vrot.slane %v17366_v13, 7 }
 0x2ef   : >> { %v17372_v40 = vshll.u32 %v17360_v26, 16  ;;  %v5156_v0 = vshrl.u32 %v5129_v36, 16  ;;  %v19809_v36 = vld [vmem:[#allocation84_spill] sm:$0xff] }
 0x2f0   : >> { %v4841_v42 = vsel %vm1244_vm7, %v4836_v31, %v4840_v61  ;;  %v19808_v61 = vld [vmem:[#allocation82_spill] sm:$0xff] }
 0x2f1   : >> { %v4848_v7 = vor.u32 %v17372_v40, %v4845_v60  ;;  %v5158_v18 = vrot.slane %v5156_v0, 7  ;;  %v14956_v0 = vld [vmem:[%s16993_s12 + $0x50] sm:$0xff]  }
 0x2f3   : >> { %13136 = vmatmul.mubr.msk.bf16.gmra.mrb[8].mxu0 %vm307_vm8, %v17319_v32  ;;  %v4849_v17 = vsel %vm1244_vm7, %v4839_v29, %v4848_v7  ;;  %v5166_v4 = vsel %vm1244_vm7, %v5158_v18, %v17289_v33  ;;  %v5974_v29 = vrot.slane %v17240_v55, 1 }
 0x2f4   : >> { %13139 = vmatprep.mubr.msk.bf16.mxu0 %vm307_vm8, %v17323_v53 }
 0x2fb   : >> { %13140 = vmatmul.mubr.msk.bf16.gmra.mrb[12].mxu0 %vm307_vm8, %v4814_v57 }
 0x2fc   : >> { %13143 = vmatprep.mubr.msk.bf16.mxu0 %vm307_vm8, %v4817_v50 }
 0x303   : >> { %13144 = vmatmul.mubr.msk.bf16.gmra.mrb[16].mxu0 %vm307_vm8, %v4820_v56 }
 0x304   : >> { %13147 = vmatprep.mubr.msk.bf16.mxu0 %vm307_vm8, %v4823_v51 }
 0x30b   : >> { %13148 = vmatmul.mubr.msk.bf16.gmra.mrb[20].mxu0 %vm307_vm8, %v4826_v23 }
 0x30c   : >> { %13151 = vmatprep.mubr.msk.bf16.mxu0 %vm307_vm8, %v4829_v47 }
 0x313   : >> { %13152 = vmatmul.mubr.msk.bf16.gmra.mrb[24].mxu0 %vm307_vm8, %v4832_v38 }
 0x314   : >> { %13155 = vmatprep.mubr.msk.bf16.mxu0 %vm307_vm8, %v4835_v22 }
 0x31b   : >> { %13156 = vmatmul.mubr.msk.bf16.gmra.mrb[28].mxu0 %vm307_vm8, %v4838_v6 }
 0x31c   : >> { %13159 = vmatprep.mubr.msk.bf16.mxu0 %vm307_vm8, %v4841_v42 }
 0x323   : >> { %13160 = vmatmul.mubr.msk.bf16.gmra.mrb[32].mxu0 %vm307_vm8, %v4849_v17 }
 0x324   : >> { %13167 = vmatprep.mubr.msk.bf16.mxu0 %vm307_vm8, %v5166_v4  ;;  %v19810_v4 = vld [vmem:[#allocation86_spill] sm:$0xff] }
 0x32b   : >> { %13168 = vmatmul.mubr.msk.bf16.vlgmr.msra.gmra.mrb[0].mxu0 %vm307_vm8, %v17179_v11  ;;  %v17403_v11 = vld [vmem:[#allocation3 + $0x98] sm:$0xff] }
 0x32c   : >> { %13204 = vmatpush3.bf16.msra.mxu0 %v17302_v54  ;;  %13171 = vmatprep.mubr.msk.bf16.mxu0 %vm307_vm8, %v17206_v14  ;;  %v17408_v14 = vshrl.u32 %v17403_v11, 16  ;;  %v17412_v18 = vshll.u32 %v17403_v11, 16 }
 0x32d   : >> { %13205 = vmatprep.subr.bf16.mxu0 %v14955_v45 }
 0x32e   : >> { %v5298_v31 = vrot.slane %v17408_v14, 7 }
 0x330   : >> { %13206 = vmatpush3.bf16.msra.mxu0 %v14955_v45  ;;  %v5982_v45 = vrot.slane %v19810_v4, 1 }
 0x331   : >> { %13243 = vmatprep.subr.bf16.mxu0 %v14956_v0 }
 0x333   : >> { %13172 = vmatmul.mubr.msk.bf16.gmra.mrb[4].mxu0 %vm307_vm8, %v17308_v24 }
 0x334   : >> { %13175 = vmatprep.mubr.msk.bf16.mxu0 %vm307_vm8, %v17319_v32 }
 0x33b   : >> { %13176 = vmatmul.mubr.msk.bf16.gmra.mrb[8].mxu0 %vm307_vm8, %v17323_v53 }
 0x33c   : >> { %13179 = vmatprep.mubr.msk.bf16.mxu0 %vm307_vm8, %v4814_v57 }
 0x343   : >> { %13180 = vmatmul.mubr.msk.bf16.gmra.mrb[12].mxu0 %vm307_vm8, %v4817_v50  ;;  %v5942_v50 = vrot.slane %v17194_v48, 1 }
 0x344   : >> { %13183 = vmatprep.mubr.msk.bf16.mxu0 %vm307_vm8, %v4820_v56 }
 0x345   : >> { %v5946_v56 = vor.u32 %v5942_v50, %v17191_v15 }
 0x34b   : >> { %13184 = vmatmul.mubr.msk.bf16.gmra.mrb[16].mxu0 %vm307_vm8, %v4823_v51  ;;  %v5958_v51 = vrot.slane %v17220_v30, 1 }
 0x34c   : >> { %13187 = vmatprep.mubr.msk.bf16.mxu0 %vm307_vm8, %v4826_v23  ;;  %v19806_v23 = vld [vmem:[#allocation81_spill] sm:$0xff] }
 0x353   : >> { %13188 = vmatmul.mubr.msk.bf16.gmra.mrb[20].mxu0 %vm307_vm8, %v4829_v47  ;;  %v5962_v47 = vor.u32 %v5958_v51, %v17217_v58 }
 0x354   : >> { %13191 = vmatprep.mubr.msk.bf16.mxu0 %vm307_vm8, %v4832_v38  ;;  %v5301_v38 = vor.u32 %v17412_v18, %v5298_v31  ;;  %v19811_v31 = vld [vmem:[#allocation88_spill] sm:$0xff] }
 0x356   : >> { %v5302_v7 = vsel %vm1244_vm7, %v4845_v60, %v5301_v38  ;;  %v5978_v60 = vor.u32 %v5974_v29, %v19809_v36  ;;  %v5990_v38 = vrot.slane %v19811_v31, 1 }
 0x35b   : >> { %13192 = vmatmul.mubr.msk.bf16.gmra.mrb[24].mxu0 %vm307_vm8, %v4835_v22  ;;  %v19807_v22 = vld [vmem:[#allocation83_spill] sm:$0xff] }
 0x35c   : >> { %13195 = vmatprep.mubr.msk.bf16.mxu0 %vm307_vm8, %v4838_v6  ;;  %v14957_v6 = vld [vmem:[%s16993_s12 + $0x58] sm:$0xff]  }
 0x363   : >> { %13196 = vmatmul.mubr.msk.bf16.gmra.mrb[28].mxu0 %vm307_vm8, %v4841_v42  ;;  %v14958_v42 = vld [vmem:[%s16993_s12 + $0x60] sm:$0xff]  }
 0x364   : >> { %13199 = vmatprep.mubr.msk.bf16.mxu0 %vm307_vm8, %v4849_v17  ;;  %v5910_v17 = vrot.slane %v17141_v20, 1  ;;  %v5926_v20 = vrot.slane %v17166_v1, 1 }
 0x366   : >> { %v5914_v54 = vor.u32 %v5910_v17, %v17138_v43  ;;  %v5934_v43 = vrot.slane %v17174_v3, 1 }
 0x368   : >> { %v5938_v1 = vor.u32 %v5934_v43, %v17171_v37  ;;  %v5966_v37 = vrot.slane %v19807_v22, 1 }
 0x36a   : >> { %v5970_v30 = vor.u32 %v5966_v37, %v19808_v61  ;;  %v14961_v61 = vld [vmem:[%s16993_s12 + $0x78] sm:$0xff]  }
 0x36b   : >> { %13200 = vmatmul.mubr.msk.bf16.gmra.mrb[32].mxu0 %vm307_vm8, %v5302_v7  ;;  %v19812_v7 = vld [vmem:[#allocation85_spill] sm:$0xff] }
 0x36c   : >> { %13207 = vmatprep.mubr.msk.bf16.mxu0 %vm307_vm8, %v16996_v46  ;;  %v19802_v46 = vld [vmem:[#allocation77_spill] sm:$0xff]  ;;  %v5975_v58 = vsel %vm2292_vm4, %v5970_v30, %v5974_v29  ;;  %v5986_v55 = vor.u32 %v5982_v45, %v19812_v7 }
 0x373   : >> { %13208 = vmatmul.mubr.msk.bf16.vlgmr.msra.gmra.mrb[0].mxu0 %vm307_vm8, %v16998_v21 }
 0x374   : >> { %13244 = vmatpush3.bf16.msra.mxu0 %v14956_v0  ;;  %13211 = vmatprep.mubr.msk.bf16.mxu0 %vm307_vm8, %v17006_v16  ;;  %v5983_v0 = vsel %vm2292_vm4, %v5978_v60, %v5982_v45  ;;  %v17585_v60 = vld [vmem:[#allocation3 + $0x48] sm:$0xff] }
 0x375   : >> { %13245 = vmatprep.subr.bf16.mxu0 %v14957_v6 }
 0x378   : >> { %13246 = vmatpush3.bf16.msra.mxu0 %v14957_v6  ;;  %v19813_v6 = vld [vmem:[#allocation87_spill] sm:$0xff] }
 0x379   : >> { %13283 = vmatprep.subr.bf16.mxu0 %v14958_v42 }
 0x37b   : >> { %13212 = vmatmul.mubr.msk.bf16.gmra.mrb[4].mxu0 %vm307_vm8, %v17010_v59  ;;  %v5881_v59 = vrot.slane %v17099_v5, 1  ;;  %v14959_v5 = vld [vmem:[%s16993_s12 + $0x68] sm:$0xff]  }
 0x37c   : >> { %13215 = vmatprep.mubr.msk.bf16.mxu0 %vm307_vm8, %v17021_v27  ;;  %v19801_v27 = vld [vmem:[#allocation76_spill] sm:$0xff] }
 0x383   : >> { %13216 = vmatmul.mubr.msk.bf16.gmra.mrb[8].mxu0 %vm307_vm8, %v17024_v28  ;;  %v19804_v28 = vld [vmem:[#allocation80_spill] sm:$0xff] }
 0x384   : >> { %13219 = vmatprep.mubr.msk.bf16.mxu0 %vm307_vm8, %v17032_v10  ;;  %v5894_v10 = vrot.slane %v19804_v28, 1 }
 0x38b   : >> { %13220 = vmatmul.mubr.msk.bf16.gmra.mrb[12].mxu0 %vm307_vm8, %v17034_v8  ;;  %v19805_v8 = vld [vmem:[#allocation78_spill] sm:$0xff] }
 0x38c   : >> { %13223 = vmatprep.mubr.msk.bf16.mxu0 %vm307_vm8, %v17043_v39 }
 0x393   : >> { %13224 = vmatmul.mubr.msk.bf16.gmra.mrb[16].mxu0 %vm307_vm8, %v17045_v25  ;;  %v5882_v25 = vor.u32 %v5881_v59, %v17096_v44 }
 0x394   : >> { %13227 = vmatprep.mubr.msk.bf16.mxu0 %vm307_vm8, %v17060_v49  ;;  %v19803_v49 = vld [vmem:[#allocation79_spill] sm:$0xff] }
 0x395   : >> { %v5886_v21 = vrot.slane %v19803_v49, 1  ;;  %v6303_v49 = vld [vmem:[#allocation3 + $0x18] sm:$0xff] }
 0x397   : >> { %v5887_v16 = vsel %vm2292_vm4, %v5882_v25, %v5886_v21  ;;  %v5890_v39 = vor.u32 %v5886_v21, %v19805_v8  ;;  %v17523_v21 = vrot.slane %v17372_v40, 1  ;;  %v6014_v8 = vrot.slane %v17412_v18, 1 }
 0x39b   : >> { %13228 = vmatmul.mubr.msk.bf16.gmra.mrb[20].mxu0 %vm307_vm8, %v17062_v63  ;;  %v5898_v63 = vor.u32 %v5894_v10, %v17116_v12  ;;  %v5918_v12 = vrot.slane %v17147_v19, 1  ;;  %v5930_v19 = vor.u32 %v5926_v20, %v17162_v35  ;;  %v5943_v35 = vsel %vm2292_vm4, %v5938_v1, %v5942_v50 }
 0x39c   : >> { %13231 = vmatprep.mubr.msk.bf16.mxu0 %vm307_vm8, %v17070_v34  ;;  %v5902_v34 = vrot.slane %v17125_v41, 1  ;;  %v17476_v41 = vld [vmem:[%s16993_s12 + $0x70] sm:$0xff]  }
 0x39d   : >> { %v5919_v32 = vsel %vm2292_vm4, %v5914_v54, %v5918_v12  ;;  %v5935_v57 = vsel %vm2292_vm4, %v5930_v19, %v5934_v43  ;;  %v17548_v19 = vld [vmem:[#allocation3 + $0x30] sm:$0xff] }
 0x39e   : >> { %v5903_v44 = vsel %vm2292_vm4, %v5898_v63, %v5902_v34  ;;  %v5906_v33 = vor.u32 %v5902_v34, %v17122_v2  ;;  %v5922_v2 = vor.u32 %v5918_v12, %v17144_v9  ;;  %v5950_v9 = vrot.slane %v17203_v52, 1  ;;  %v17530_v34 = vld [vmem:[#allocation3 + $0x20] sm:$0xff] }
 0x39f   : >> { %v5967_v52 = vsel %vm2292_vm4, %v5962_v47, %v5966_v37  ;;  %v6332_v63 = vshll.u32 %v6303_v49, 16  ;;  %v6337_v54 = vshll.u32 %v17530_v34, 16  ;;  %v17542_v12 = vor.u32 %v6014_v8, %v17408_v14 }
 0x3a0   : >> { %v5911_v24 = vsel %vm2292_vm4, %v5906_v33, %v5910_v17  ;;  %v5927_v53 = vsel %vm2292_vm4, %v5922_v2, %v5926_v20  ;;  %v5951_v3 = vsel %vm2292_vm4, %v5946_v56, %v5950_v9  ;;  %v5954_v48 = vor.u32 %v5950_v9, %v19806_v23 }
 0x3a1   : >> { %v6330_v17 = vshrl.u32 %v6303_v49, 16  ;;  %v6334_v33 = vrot.slane %v6332_v63, 1  ;;  %v6339_v2 = vrot.slane %v6337_v54, 1  ;;  %v6353_v56 = vshll.u32 %v17548_v19, 16  ;;  %v17615_v49 = vld [vmem:[#allocation3 + $0x60] sm:$0xff] }
 0x3a2   : >> { %v5959_v15 = vsel %vm2292_vm4, %v5954_v48, %v5958_v51  ;;  %v17569_v48 = vld [vmem:[#allocation3 + $0x40] sm:$0xff]  ;;  %v6357_v37 = vshrl.u32 %v17548_v19, 16  ;;  %v6401_v63 = vshll.u32 %v17615_v49, 16 }
 0x3a3   : >> { %13232 = vmatmul.mubr.msk.bf16.gmra.mrb[24].mxu0 %vm307_vm8, %v17072_v62  ;;  %v5895_v62 = vsel %vm2292_vm4, %v5890_v39, %v5894_v10  ;;  %v6010_v10 = vor.u32 %v17523_v21, %v17366_v13  ;;  %v5868_v39 = vld [vmem:[#allocation3 + $0xa0] sm:$0x1]  ;;  %v6335_v20 = vor.u32 %v6334_v33, %v6330_v17  ;;  %v6355_v23 = vrot.slane %v6353_v56, 1  ;;  %v17629_v17 = vld [vmem:[#allocation3 + $0x68] sm:$0xff] }
 0x3a4   : >> { %13235 = vmatprep.mubr.msk.bf16.mxu0 %vm307_vm8, %v19801_v27  ;;  %v19814_v27 = vld [vmem:[#allocation90_spill] sm:$0xff]  ;;  %v6369_v29 = vshll.u32 %v17569_v48, 16 }
 0x3a5   : >> { %v5998_v59 = vrot.slane %v19814_v27, 1  ;;  %v6340_v50 = vsel %vm2292_vm4, %v6335_v20, %v6339_v2  ;;  %v6359_v36 = vor.u32 %v6357_v37, %v6355_v23  ;;  %v17635_v20 = vld [vmem:[#allocation3 + $0x70] sm:$0xff] }
 0x3a6   : >> { %v6371_v45 = vrot.slane %v6369_v29, 1 }
 0x3ab   : >> { %13236 = vmatmul.mubr.msk.bf16.gmra.mrb[28].mxu0 %vm307_vm8, %v19802_v46  ;;  %v5991_v46 = vsel %vm2292_vm4, %v5986_v55, %v5990_v38  ;;  %v6381_v55 = vshrl.u32 %v17585_v60, 16 }
 0x3ac   : >> { %13239 = vmatprep.mubr.msk.bf16.mxu0 %vm307_vm8, %v17360_v26 }
 0x3b3   : >> { %13240 = vmatmul.mubr.msk.bf16.gmra.mrb[32].mxu0 %vm307_vm8, %v17403_v11 }
 0x3b4   : >> { %13247 = vmatprep.mubr.msk.bf16.mxu0 %vm307_vm8, %v5887_v16  ;;  %v19815_v16 = vld [vmem:[#allocation89_spill] sm:$0xff] }
 0x3b5   : >> { %v6002_v28 = vor.u32 %v5998_v59, %v19815_v16 }
 0x3bb   : >> { %13248 = vmatmul.mubr.msk.bf16.vlgmr.msra.gmra.mrb[0].mxu0 %vm307_vm8, %v5895_v62  ;;  %v6007_v62 = vsel %vm2292_vm4, %v6002_v28, %v17523_v21 }
 0x3bc   : >> { %13284 = vmatpush3.bf16.msra.mxu0 %v14958_v42  ;;  %13251 = vmatprep.mubr.msk.bf16.mxu0 %vm307_vm8, %v5903_v44  ;;  %v5994_v42 = vor.u32 %v5990_v38, %v19813_v6  ;;  %v6020_v44 = vshll.u32 %v5868_v39, 16  ;;  %v6373_v38 = vshrl.u32 %v17569_v48, 16 }
 0x3bd   : >> { %13285 = vmatprep.subr.bf16.mxu0 %v14959_v5 }
 0x3be   : >> { %v5999_v25 = vsel %vm2292_vm4, %v5994_v42, %v5998_v59  ;;  %v6375_v27 = vor.u32 %v6373_v38, %v6371_v45  ;;  %v17609_v59 = vld [vmem:[#allocation3 + $0x58] sm:$0xff] }
 0x3bf   : >> { %v6393_v16 = vshll.u32 %v17609_v59, 16  ;;  %v6397_v39 = vshrl.u32 %v17609_v59, 16 }
 0x3c0   : >> { %13286 = vmatpush3.bf16.msra.mxu0 %v14959_v5  ;;  %v17535_v5 = vsel %vm2292_vm4, %v6010_v10, %v6014_v8 }
 0x3c1   : >> { %13323 = vmatprep.subr.bf16.mxu0 %v17476_v41 }
 0x3c3   : >> { %13252 = vmatmul.mubr.msk.bf16.gmra.mrb[4].mxu0 %vm307_vm8, %v5911_v24  ;;  %v6022_v24 = vrot.slane %v6020_v44, 1 }
 0x3c4   : >> { %13255 = vmatprep.mubr.msk.bf16.mxu0 %vm307_vm8, %v5919_v32  ;;  %v17544_v32 = vld [vmem:[#allocation3 + $0x28] sm:$0xff] }
 0x3c5   : >> { %v6345_v43 = vshll.u32 %v17544_v32, 16  ;;  %v6349_v1 = vshrl.u32 %v17544_v32, 16 }
 0x3c7   : >> { %v6347_v9 = vrot.slane %v6345_v43, 1 }
 0x3c9   : >> { %v6351_v51 = vor.u32 %v6349_v1, %v6347_v9 }
 0x3cb   : >> { %13256 = vmatmul.mubr.msk.bf16.gmra.mrb[8].mxu0 %vm307_vm8, %v5927_v53  ;;  %v6023_v53 = vsel %vm2292_vm4, %v17542_v12, %v6022_v24  ;;  %v6403_v24 = vrot.slane %v6401_v63, 1 }
 0x3cc   : >> { %13259 = vmatprep.mubr.msk.bf16.mxu0 %vm307_vm8, %v5935_v57  ;;  %v6341_v57 = vshrl.u32 %v17530_v34, 16 }
 0x3d3   : >> { %13260 = vmatmul.mubr.msk.bf16.gmra.mrb[12].mxu0 %vm307_vm8, %v5943_v35  ;;  %v6343_v35 = vor.u32 %v6341_v57, %v6339_v2  ;;  %v6409_v2 = vshll.u32 %v17629_v17, 16 }
 0x3d4   : >> { %13263 = vmatprep.mubr.msk.bf16.mxu0 %vm307_vm8, %v5951_v3  ;;  %v17563_v3 = vld [vmem:[#allocation3 + $0x38] sm:$0xff] }
 0x3d5   : >> { %v6361_v47 = vshll.u32 %v17563_v3, 16  ;;  %v6348_v22 = vsel %vm2292_vm4, %v6343_v35, %v6347_v9  ;;  %v6413_v35 = vshrl.u32 %v17629_v17, 16 }
 0x3d7   : >> { %v6363_v30 = vrot.slane %v6361_v47, 1 }
 0x3d9   : >> { %v6364_v31 = vsel %vm2292_vm4, %v6359_v36, %v6363_v30  ;;  %v17655_v36 = vld [vmem:[#allocation3 + $0x80] sm:$0xff] }
 0x3db   : >> { %13264 = vmatmul.mubr.msk.bf16.gmra.mrb[16].mxu0 %vm307_vm8, %v5959_v15  ;;  %v6356_v15 = vsel %vm2292_vm4, %v6351_v51, %v6355_v23  ;;  %v6417_v51 = vshll.u32 %v17635_v20, 16  ;;  %v6411_v23 = vrot.slane %v6409_v2, 1 }
 0x3dc   : >> { %13267 = vmatprep.mubr.msk.bf16.mxu0 %vm307_vm8, %v5967_v52  ;;  %v6365_v52 = vshrl.u32 %v17563_v3, 16 }
 0x3de   : >> { %v6367_v4 = vor.u32 %v6365_v52, %v6363_v30  ;;  %v6419_v30 = vrot.slane %v6417_v51, 1 }
 0x3e0   : >> { %v6372_v7 = vsel %vm2292_vm4, %v6367_v4, %v6371_v45 }
 0x3e3   : >> { %13268 = vmatmul.mubr.msk.bf16.gmra.mrb[20].mxu0 %vm307_vm8, %v5975_v58  ;;  %v17592_v58 = vld [vmem:[%s16993_s12 + $0x80] sm:$0xff]  }
 0x3e4   : >> { %13271 = vmatprep.mubr.msk.bf16.mxu0 %vm307_vm8, %v5983_v0  ;;  %v17594_v0 = vld [vmem:[#allocation3 + $0x50] sm:$0xff] }
 0x3e5   : >> { %v6385_v6 = vshll.u32 %v17594_v0, 16  ;;  %v6389_v10 = vshrl.u32 %v17594_v0, 16 }
 0x3eb   : >> { %13272 = vmatmul.mubr.msk.bf16.gmra.mrb[24].mxu0 %vm307_vm8, %v5991_v46 }
 0x3ec   : >> { %13275 = vmatprep.mubr.msk.bf16.mxu0 %vm307_vm8, %v5999_v25  ;;  %v6387_v25 = vrot.slane %v6385_v6, 1 }
 0x3ee   : >> { %v6391_v44 = vor.u32 %v6389_v10, %v6387_v25 }
 0x3f3   : >> { %13276 = vmatmul.mubr.msk.bf16.gmra.mrb[28].mxu0 %vm307_vm8, %v6007_v62  ;;  %v6395_v62 = vrot.slane %v6393_v16, 1 }
 0x3f4   : >> { %13279 = vmatprep.mubr.msk.bf16.mxu0 %vm307_vm8, %v17535_v5 }
 0x3f5   : >> { %v6399_v33 = vor.u32 %v6397_v39, %v6395_v62 }
 0x3f7   : >> { %v6404_v9 = vsel %vm2292_vm4, %v6399_v33, %v6403_v24 }
 0x3fb   : >> { %13280 = vmatmul.mubr.msk.bf16.gmra.mrb[32].mxu0 %vm307_vm8, %v6023_v53  ;;  %v6396_v53 = vsel %vm2292_vm4, %v6391_v44, %v6395_v62 }
 0x3fc   : >> { %13287 = vmatprep.mubr.msk.bf16.mxu0 %vm307_vm8, %v6340_v50  ;;  %v6405_v50 = vshrl.u32 %v17615_v49, 16 }
 0x403   : >> { %13288 = vmatmul.mubr.msk.bf16.vlgmr.msra.gmra.mrb[0].mxu0 %vm307_vm8, %v6348_v22  ;;  %v6407_v22 = vor.u32 %v6405_v50, %v6403_v24  ;;  %v6437_v24 = vshrl.u32 %v17655_v36, 16 }
 0x404   : >> { %13324 = vmatpush3.bf16.msra.mxu0 %v17476_v41  ;;  %13291 = vmatprep.mubr.msk.bf16.mxu0 %vm307_vm8, %v6356_v15  ;;  %v6377_v41 = vshll.u32 %v17585_v60, 16  ;;  %v17649_v15 = vld [vmem:[#allocation3 + $0x78] sm:$0xff] }
 0x405   : >> { %13325 = vmatprep.subr.bf16.mxu0 %v14961_v61  ;;  %v6425_v4 = vshll.u32 %v17649_v15, 16  ;;  %v6412_v45 = vsel %vm2292_vm4, %v6407_v22, %v6411_v23 }
 0x406   : >> { %v6379_v42 = vrot.slane %v6377_v41, 1 }
 0x408   : >> { %13326 = vmatpush3.bf16.msra.mxu0 %v14961_v61  ;;  %v6383_v46 = vor.u32 %v6381_v55, %v6379_v42  ;;  %v6380_v28 = vsel %vm2292_vm4, %v6375_v27, %v6379_v42  ;;  %v6415_v61 = vor.u32 %v6413_v35, %v6411_v23  ;;  %v6429_v42 = vshrl.u32 %v17649_v15, 16 }
 0x409   : >> { %13363 = vmatprep.subr.bf16.mxu0 %v17592_v58  ;;  %v6433_v27 = vshll.u32 %v17655_v36, 16 }
 0x40a   : >> { %v6388_v8 = vsel %vm2292_vm4, %v6383_v46, %v6387_v25  ;;  %v6427_v46 = vrot.slane %v6425_v4, 1 }
 0x40b   : >> { %13292 = vmatmul.mubr.msk.bf16.gmra.mrb[4].mxu0 %vm307_vm8, %v6364_v31  ;;  %v6421_v31 = vshrl.u32 %v17635_v20, 16  ;;  %v6435_v62 = vrot.slane %v6433_v27, 1 }
 0x40c   : >> { %13295 = vmatprep.mubr.msk.bf16.mxu0 %vm307_vm8, %v6372_v7  ;;  %v6420_v7 = vsel %vm2292_vm4, %v6415_v61, %v6419_v30 }
 0x40d   : >> { %v6423_v25 = vor.u32 %v6421_v31, %v6419_v30  ;;  %v6439_v22 = vor.u32 %v6437_v24, %v6435_v62  ;;  %v17688_v30 = vld [vmem:[#allocation3 + $0xa0] sm:$0xff] }
 0x40f   : >> { %v6428_v33 = vsel %vm2292_vm4, %v6423_v25, %v6427_v46 }
 0x413   : >> { %13296 = vmatmul.mubr.msk.bf16.gmra.mrb[8].mxu0 %vm307_vm8, %v6380_v28  ;;  %v17669_v28 = vld [vmem:[#allocation3 + $0x88] sm:$0xff] }
 0x414   : >> { %13299 = vmatprep.mubr.msk.bf16.mxu0 %vm307_vm8, %v6388_v8  ;;  %v6431_v8 = vor.u32 %v6429_v42, %v6427_v46  ;;  %v6441_v44 = vshll.u32 %v17669_v28, 16  ;;  %v19604_v46 = vshll.u32 %v17688_v30, 16 }
 0x416   : >> { %v6443_v23 = vrot.slane %v6441_v44, 1  ;;  %v6467_v25 = vrot.slane %v19604_v46, 1 }
 0x41b   : >> { %13300 = vmatmul.mubr.msk.bf16.gmra.mrb[12].mxu0 %vm307_vm8, %v6396_v53  ;;  %v6436_v53 = vsel %vm2292_vm4, %v6431_v8, %v6435_v62  ;;  %v17698_v8 = vld [vmem:[#allocation3 + $0xa8] sm:$0x1]  ;;  %v6469_v62 = vshrl.u32 %v17688_v30, 16 }
 0x41c   : >> { %13303 = vmatprep.mubr.msk.bf16.mxu0 %vm307_vm8, %v6404_v9  ;;  %v6445_v9 = vshrl.u32 %v17669_v28, 16 }
 0x41e   : >> { %v6447_v61 = vor.u32 %v6445_v9, %v6443_v23 }
 0x423   : >> { %13304 = vmatmul.mubr.msk.bf16.gmra.mrb[16].mxu0 %vm307_vm8, %v6412_v45  ;;  %v6444_v45 = vsel %vm2292_vm4, %v6439_v22, %v6443_v23  ;;  %v6471_v23 = vor.u32 %v6469_v62, %v6467_v25 }
 0x424   : >> { %13307 = vmatprep.mubr.msk.bf16.mxu0 %vm307_vm8, %v6420_v7  ;;  %v6452_v7 = vsel %vm2292_vm4, %v6447_v61, %v17523_v21  ;;  %v17704_v21 = vld [vmem:[#allocation3 + $0x18] sm:$0xfe] }
 0x425   : >> { %v6783_v61 = vrot.slane %v17704_v21, 1 }
 0x42b   : >> { %13308 = vmatmul.mubr.msk.bf16.gmra.mrb[20].mxu0 %vm307_vm8, %v6428_v33  ;;  %v6473_v33 = vshll.u32 %v17698_v8, 16 }
 0x42c   : >> { %13311 = vmatprep.mubr.msk.bf16.mxu0 %vm307_vm8, %v6436_v53  ;;  %v6468_v53 = vsel %vm2292_vm4, %v17542_v12, %v6467_v25 }
 0x42d   : >> { %v6475_v22 = vrot.slane %v6473_v33, 1  ;;  %v14963_v33 = vld [vmem:[%s16993_s12 + $0x88] sm:$0xff]  }
 0x433   : >> { %13312 = vmatmul.mubr.msk.bf16.gmra.mrb[24].mxu0 %vm307_vm8, %v6444_v45  ;;  %v6784_v45 = vrot.slane %v17530_v34, 1  ;;  %v7123_v34 = vrot.slane %v6357_v37, 1 }
 0x434   : >> { %13315 = vmatprep.mubr.msk.bf16.mxu0 %vm307_vm8, %v6452_v7  ;;  %v6476_v7 = vsel %vm2292_vm4, %v6471_v23, %v6475_v22  ;;  %v6790_v23 = vrot.slane %v17563_v3, 1  ;;  %v6792_v22 = vrot.slane %v17569_v48, 1  ;;  %v7135_v3 = vrot.slane %v6381_v55, 1 }
 0x435   : >> { %v6785_v12 = vsel %vm3172_vm6, %v6783_v61, %v6784_v45  ;;  %v7139_v48 = vrot.slane %v6389_v10, 1 }
 0x43b   : >> { %13316 = vmatmul.mubr.msk.bf16.gmra.mrb[28].mxu0 %vm307_vm8, %v17535_v5  ;;  %v6786_v5 = vrot.slane %v17544_v32, 1  ;;  %v7127_v32 = vrot.slane %v6365_v52, 1 }
 0x43c   : >> { %13319 = vmatprep.mubr.msk.bf16.mxu0 %vm307_vm8, %v6468_v53  ;;  %v6788_v53 = vrot.slane %v17548_v19, 1  ;;  %v7131_v19 = vrot.slane %v6373_v38, 1 }
 0x43d   : >> { %v6787_v46 = vsel %vm3172_vm6, %v6784_v45, %v6786_v5 }
 0x43e   : >> { %v6789_v25 = vsel %vm3172_vm6, %v6786_v5, %v6788_v53  ;;  %v6791_v61 = vsel %vm3172_vm6, %v6788_v53, %v6790_v23  ;;  %v6798_v5 = vrot.slane %v17609_v59, 1  ;;  %v6800_v53 = vrot.slane %v17615_v49, 1 }
 0x43f   : >> { %v7151_v59 = vrot.slane %v6413_v35, 1  ;;  %v7155_v49 = vrot.slane %v6421_v31, 1 }
 0x443   : >> { %13320 = vmatmul.mubr.msk.bf16.gmra.mrb[32].mxu0 %vm307_vm8, %v6476_v7  ;;  %v6793_v7 = vsel %vm3172_vm6, %v6790_v23, %v6792_v22  ;;  %v6802_v23 = vrot.slane %v17629_v17, 1  ;;  %v7159_v17 = vrot.slane %v6429_v42, 1 }
 0x444   : >> { %13327 = vmatprep.mubr.msk.bf16.mxu0 %vm307_vm8, %v6785_v12 }
 0x44b   : >> { %13328 = vmatmul.mubr.msk.bf16.vlgmr.msra.gmra.mrb[0].mxu0 %vm307_vm8, %v6787_v46  ;;  %v6794_v46 = vrot.slane %v17585_v60, 1  ;;  %v7143_v60 = vrot.slane %v6397_v39, 1 }
 0x44c   : >> { %13364 = vmatpush3.bf16.msra.mxu0 %v17592_v58  ;;  %13331 = vmatprep.mubr.msk.bf16.mxu0 %vm307_vm8, %v6789_v25  ;;  %v6796_v58 = vrot.slane %v17594_v0, 1  ;;  %v7147_v0 = vrot.slane %v6405_v50, 1 }
 0x44d   : >> { %13365 = vmatprep.subr.bf16.mxu0 %v14963_v33  ;;  %v6795_v45 = vsel %vm3172_vm6, %v6792_v22, %v6794_v46  ;;  %v6804_v22 = vrot.slane %v17635_v20, 1  ;;  %v7163_v20 = vrot.slane %v6437_v24, 1  ;;  %v7171_v24 = vrot.slane %v17366_v13, 1 }
 0x44e   : >> { %v6797_v12 = vsel %vm3172_vm6, %v6794_v46, %v6796_v58  ;;  %v6799_v25 = vsel %vm3172_vm6, %v6796_v58, %v6798_v5  ;;  %v6806_v46 = vrot.slane %v17649_v15, 1  ;;  %v6808_v58 = vrot.slane %v17655_v36, 1 }
 0x44f   : >> { %v7167_v15 = vrot.slane %v6445_v9, 1  ;;  %v7172_v36 = vrot.slane %v17372_v40, 2  ;;  %v7176_v9 = vrot.slane %v17412_v18, 2  ;;  %v19816_v13 = vshll.u32 %v17688_v30, 16 }
 0x450   : >> { %13366 = vmatpush3.bf16.msra.mxu0 %v14963_v33  ;;  %v6801_v33 = vsel %vm3172_vm6, %v6798_v5, %v6800_v53  ;;  %v6810_v5 = vrot.slane %v17669_v28, 1 }
 0x451   : >> { %v7180_v40 = vrot.slane %v19816_v13, 2  ;;  %v19823_v13 = vld [vmem:[#allocation5_spill] sm:$0xff] }
 0x453   : >> { %13332 = vmatmul.mubr.msk.bf16.gmra.mrb[4].mxu0 %vm307_vm8, %v6791_v61  ;;  %v6803_v61 = vsel %vm3172_vm6, %v6800_v53, %v6802_v23  ;;  %v6812_v53 = vrot.slane %v17360_v26, 1 }
 0x454   : >> { %13335 = vmatprep.mubr.msk.bf16.mxu0 %vm307_vm8, %v6793_v7  ;;  %v6805_v7 = vsel %vm3172_vm6, %v6802_v23, %v6804_v22  ;;  %v6814_v23 = vrot.slane %v17403_v11, 1  ;;  %v6818_v11 = vrot.slane %v17698_v8, 1 }
 0x45b   : >> { %13336 = vmatmul.mubr.msk.bf16.gmra.mrb[8].mxu0 %vm307_vm8, %v6795_v45  ;;  %v6807_v45 = vsel %vm3172_vm6, %v6804_v22, %v6806_v46  ;;  %v6816_v22 = vrot.slane %v17688_v30, 1 }
 0x45c   : >> { %13339 = vmatprep.mubr.msk.bf16.mxu0 %vm307_vm8, %v6797_v12  ;;  %v6809_v12 = vsel %vm3172_vm6, %v6806_v46, %v6808_v58  ;;  %v6815_v46 = vsel %vm3172_vm6, %v6812_v53, %v6814_v23 }
 0x45d   : >> { %v6817_v26 = vsel %vm3172_vm6, %v6814_v23, %v6816_v22  ;;  %v7120_v23 = vrot.slane %v6345_v43, 2  ;;  %v7128_v43 = vrot.slane %v6361_v47, 2  ;;  %v7136_v47 = vrot.slane %v6377_v41, 2 }
 0x45e   : >> { %v7144_v41 = vrot.slane %v6393_v16, 2  ;;  %v7152_v16 = vrot.slane %v6409_v2, 2  ;;  %v7160_v2 = vrot.slane %v6425_v4, 2  ;;  %v7168_v4 = vrot.slane %v6441_v44, 2 }
 0x45f   : >> { %v7129_v37 = vor.u32 %v7128_v43, %v7127_v32  ;;  %v7137_v38 = vor.u32 %v7136_v47, %v7135_v3  ;;  %v7179_v44 = vrot.slane %v6469_v62, 1  ;;  %v14964_v43 = vld [vmem:[%s17877_s15 + $0x10] sm:$0xff]   ;;  %v17892_v3 = vld [vmem:[%s17877_s15] sm:$0xff]  }
 0x460   : >> { %v7145_v10 = vor.u32 %v7144_v41, %v7143_v60  ;;  %v7153_v50 = vor.u32 %v7152_v16, %v7151_v59  ;;  %v7161_v31 = vor.u32 %v7160_v2, %v7159_v17  ;;  %13403 = vmatprep.subr.bf16.mxu1 %v14964_v43  ;;  %v17899_v47 = vld [vmem:[%s4031_s18] ss:$0 sm:$0xff]  ;;  %v19818_v59 = vld [vmem:[#allocation26_spill] sm:$0xff]  ;;  %v14969_v16 = vld [vmem:[%s17877_s15 + $0x28] sm:$0xff]  }
 0x461   : >> { %13404 = vmatpush3.bf16.msra.mxu1 %v14964_v43 }
 0x463   : >> { %13340 = vmatmul.mubr.msk.bf16.gmra.mrb[12].mxu0 %vm307_vm8, %v6799_v25  ;;  %v6811_v25 = vsel %vm3172_vm6, %v6808_v58, %v6810_v5 }
 0x464   : >> { %13343 = vmatprep.mubr.msk.bf16.mxu0 %vm307_vm8, %v6801_v33  ;;  %v6813_v33 = vsel %vm3172_vm6, %v6810_v5, %v6812_v53  ;;  %v7116_v5 = vrot.slane %v6337_v54, 2  ;;  %v7119_v53 = vrot.slane %v6349_v1, 1  ;;  %v7124_v54 = vrot.slane %v6353_v56, 2 }
 0x465   : >> { %v7132_v56 = vrot.slane %v6369_v29, 2  ;;  %v7140_v29 = vrot.slane %v6385_v6, 2  ;;  %v7148_v6 = vrot.slane %v6401_v63, 2  ;;  %v7156_v63 = vrot.slane %v6417_v51, 2 }
 0x466   : >> { %v7121_v8 = vor.u32 %v7120_v23, %v7119_v53  ;;  %v7164_v51 = vrot.slane %v6433_v27, 2  ;;  %v7169_v27 = vor.u32 %v7168_v4, %v7167_v15  ;;  %v7173_v53 = vor.u32 %v7172_v36, %v7171_v24 }
 0x467   : >> { %v7175_v23 = vrot.slane %v17408_v14, 1  ;;  %v7181_v14 = vor.u32 %v7180_v40, %v7179_v44 }
 0x468   : >> { %v7174_v28 = vsel %vm3483_vm0, %v7169_v27, %v7173_v53 }
 0x46b   : >> { %13344 = vmatmul.mubr.msk.bf16.gmra.mrb[16].mxu0 %vm307_vm8, %v6803_v61  ;;  %v7108_v61 = vshrl.u32 %v17704_v21, 16 }
 0x46c   : >> { %13347 = vmatprep.mubr.msk.bf16.mxu0 %vm307_vm8, %v6805_v7  ;;  %v7111_v7 = vshll.u32 %v17704_v21, 16 }
 0x46e   : >> { %v7113_v58 = vrot.slane %v7111_v7, 2  ;;  %v7133_v7 = vor.u32 %v7132_v56, %v7131_v19  ;;  %v17881_v19 = vld [vmem:[#allocation3 + $0x8] sm:$0xff]  ;;  %v17883_v56 = vld [vmem:[#allocation3] sm:$0x80] }
 0x470   : >> { %v7134_v52 = vsel %vm3483_vm0, %v7129_v37, %v7133_v7 }
 0x473   : >> { %13348 = vmatmul.mubr.msk.bf16.gmra.mrb[20].mxu0 %vm307_vm8, %v6807_v45  ;;  %v7110_v45 = vrot.slane %v7108_v61, 1  ;;  %v7125_v61 = vor.u32 %v7124_v54, %v7123_v34  ;;  %v7177_v34 = vor.u32 %v7176_v9, %v7175_v23  ;;  %v19821_v23 = vld [vmem:[#allocation19_spill] sm:$0xff] }
 0x474   : >> { %13351 = vmatprep.mubr.msk.bf16.mxu0 %vm307_vm8, %v6809_v12  ;;  %v7115_v12 = vrot.slane %v6341_v57, 1 }
 0x475   : >> { %v7178_v18 = vsel %vm3483_vm0, %v7173_v53, %v7177_v34  ;;  %v7182_v32 = vsel %vm3483_vm0, %v7177_v34, %v7181_v14 }
 0x476   : >> { %v7117_v21 = vor.u32 %v7116_v5, %v7115_v12  ;;  %v7157_v5 = vor.u32 %v7156_v63, %v7155_v49  ;;  %v19819_v63 = vld [vmem:[#allocation15_spill] sm:$0xff] }
 0x478   : >> { %v7122_v1 = vsel %vm3483_vm0, %v7117_v21, %v7121_v8  ;;  %v7158_v35 = vsel %vm3483_vm0, %v7153_v50, %v7157_v5 }
 0x47b   : >> { %13352 = vmatmul.mubr.msk.bf16.gmra.mrb[24].mxu0 %vm307_vm8, %v6811_v25  ;;  %v7114_v25 = vor.u32 %v7113_v58, %v7110_v45  ;;  %v7138_v45 = vsel %vm3483_vm0, %v7133_v7, %v7137_v38  ;;  %v7149_v58 = vor.u32 %v7148_v6, %v7147_v0  ;;  %v7675_v7 = vrot.slane %v17881_v19, 7 }
 0x47c   : >> { %13355 = vmatprep.mubr.msk.bf16.mxu0 %vm307_vm8, %v6813_v33  ;;  %v6819_v33 = vsel %vm3172_vm6, %v6816_v22, %v6818_v11  ;;  %v7126_v22 = vsel %vm3483_vm0, %v7121_v8, %v7125_v61 }
 0x47d   : >> { %v7118_v57 = vsel %vm3483_vm0, %v7114_v25, %v7117_v21  ;;  %v7150_v39 = vsel %vm3483_vm0, %v7145_v10, %v7149_v58  ;;  %v7154_v11 = vsel %vm3483_vm0, %v7149_v58, %v7153_v50  ;;  %v7165_v25 = vor.u32 %v7164_v51, %v7163_v20  ;;  %v19817_v58 = vld [vmem:[#allocation20_spill] sm:$0xff] }
 0x47e   : >> { %v7162_v21 = vsel %vm3483_vm0, %v7157_v5, %v7161_v31  ;;  %v19820_v5 = vld [vmem:[#allocation17_spill] sm:$0xff] }
 0x47f   : >> { %v7166_v42 = vsel %vm3483_vm0, %v7161_v31, %v7165_v25 }
 0x483   : >> { %13356 = vmatmul.mubr.msk.bf16.gmra.mrb[28].mxu0 %vm307_vm8, %v6815_v46  ;;  %v7130_v46 = vsel %vm3483_vm0, %v7125_v61, %v7129_v37  ;;  %v7674_v37 = vrot.slane %v17883_v56, 7 }
 0x484   : >> { %13359 = vmatprep.mubr.msk.bf16.mxu0 %vm307_vm8, %v6817_v26  ;;  %v7141_v26 = vor.u32 %v7140_v29, %v7139_v48 }
 0x486   : >> { %v7142_v55 = vsel %vm3483_vm0, %v7137_v38, %v7141_v26  ;;  %v7146_v12 = vsel %vm3483_vm0, %v7141_v26, %v7145_v10 }
 0x48b   : >> { %13360 = vmatmul.mubr.msk.bf16.gmra.mrb[32].mxu0 %vm307_vm8, %v6819_v33  ;;  %v7170_v33 = vsel %vm3483_vm0, %v7165_v25, %v7169_v27 }
 0x48c   : >> { %13367 = vmatprep.mubr.msk.bf16.mxu0 %vm307_vm8, %v7118_v57  ;;  %v7099_v57 = vld [vmem:[#allocation3 + $0xa8] sm:$0x3] }
 0x48d   : >> { %v7184_v54 = vshrl.u32 %v7099_v57, 16  ;;  %v7187_v8 = vshll.u32 %v7099_v57, 16  ;;  %v19824_v57 = vld [vmem:[#allocation6_spill] sm:$0xff] }
 0x48f   : >> { %v7186_v61 = vrot.slane %v7184_v54, 1 }
 0x493   : >> { %13368 = vmatmul.mubr.msk.bf16.vlgmr.msra.gmra.mrb[0].mxu0 %vm307_vm8, %v7122_v1  ;;  %v7189_v1 = vrot.slane %v7187_v8, 2 }
 0x494   : >> { %13371 = vmatprep.mubr.msk.bf16.mxu0 %vm307_vm8, %v7126_v22  ;;  %v14965_v22 = vld [vmem:[%s17877_s15 + $0x18] sm:$0xff]  }
 0x495   : >> { %v7190_v30 = vor.u32 %v7189_v1, %v7186_v61  ;;  %13405 = vmatprep.subr.bf16.mxu1 %v14965_v22 }
 0x496   : >> { %13406 = vmatpush3.bf16.msra.mxu1 %v14965_v22 }
 0x497   : >> { %v7191_v62 = vsel %vm3483_vm0, %v7181_v14, %v7190_v30  ;;  %13443 = vmatprep.subr.bf16.mxu1 %v17892_v3 }
 0x49b   : >> { %13372 = vmatmul.mubr.msk.bf16.gmra.mrb[4].mxu0 %vm307_vm8, %v7130_v46  ;;  %v7676_v46 = vsel %vm563_vm2, %v7674_v37, %v7675_v7 }
 0x49c   : >> { %13375 = vmatprep.mubr.msk.bf16.mxu0 %vm307_vm8, %v7134_v52  ;;  %13407 = vmatprep.mubr.msk.bf16.mxu1 %vm307_vm8, %v7676_v46 }
 0x4a3   : >> { %13376 = vmatmul.mubr.msk.bf16.gmra.mrb[8].mxu0 %vm307_vm8, %v7138_v45 }
 0x4a4   : >> { %13379 = vmatprep.mubr.msk.bf16.mxu0 %vm307_vm8, %v7142_v55 }
 0x4ab   : >> { %13380 = vmatmul.mubr.msk.bf16.gmra.mrb[12].mxu0 %vm307_vm8, %v7146_v12 }
 0x4ac   : >> { %13383 = vmatprep.mubr.msk.bf16.mxu0 %vm307_vm8, %v7150_v39 }
 0x4b3   : >> { %13384 = vmatmul.mubr.msk.bf16.gmra.mrb[16].mxu0 %vm307_vm8, %v7154_v11 }
 0x4b4   : >> { %13387 = vmatprep.mubr.msk.bf16.mxu0 %vm307_vm8, %v7158_v35 }
 0x4bb   : >> { %13388 = vmatmul.mubr.msk.bf16.gmra.mrb[20].mxu0 %vm307_vm8, %v7162_v21 }
 0x4bc   : >> { %13391 = vmatprep.mubr.msk.bf16.mxu0 %vm307_vm8, %v7166_v42 }
 0x4c3   : >> { %13392 = vmatmul.mubr.msk.bf16.gmra.mrb[24].mxu0 %vm307_vm8, %v7170_v33 }
 0x4c4   : >> { %13395 = vmatprep.mubr.msk.bf16.mxu0 %vm307_vm8, %v7174_v28  ;;  %v19822_v28 = vld [vmem:[#allocation22_spill] sm:$0xff] }
 0x4cb   : >> { %13396 = vmatmul.mubr.msk.bf16.gmra.mrb[28].mxu0 %vm307_vm8, %v7178_v18 }
 0x4cc   : >> { %13399 = vmatprep.mubr.msk.bf16.mxu0 %vm307_vm8, %v7182_v32 }
 0x4d3   : >> { %13400 = vmatmul.mubr.msk.bf16.gmra.mrb[32].mxu0 %vm307_vm8, %v7191_v62 }
 0x566   : >> { %v13369_v52 = vpop.f32.mrb[0].mxu0 }
 0x567   : >> { %v7479_v48 = vadd.f32 %v13369_v52, %v17899_v47  ;;  %v7292_v29 = vpop.f32.mrb[1].mxu0 }
 0x568   : >> { %v7477_v38 = vadd.f32 %v17899_v47, %v7292_v29  ;;  %v13370_v26 = vpop.f32.mrb[2].mxu0 }
 0x569   : >> { %v7515_v45 = vmax.f32 %v7479_v48, 0.0  ;;  %v7480_v60 = vadd.f32 %v13370_v26, %v17899_v47  ;;  %v7295_v41 = vpop.f32.mrb[3].mxu0  ;;  %v14967_v26 = vld [vmem:[%s17877_s15 + $0x8] sm:$0xff]  }
 0x56a   : >> { %v7513_v55 = vmax.f32 %v7477_v38, 0.0  ;;  %v7478_v0 = vadd.f32 %v17899_v47, %v7295_v41 }
 0x56b   : >> { %v7516_v6 = vmax.f32 %v7480_v60, 0.0  ;;  %v7551_v12 = vmul.f32 %v7515_v45, %v19817_v58 }
 0x56c   : >> { %v7514_v10 = vmax.f32 %v7478_v0, 0.0  ;;  %v7549_v50 = vmul.f32 %v7513_v55, %v19819_v63  ;;  %v19825_v55 = vld [vmem:[#allocation7_spill] sm:$0xff] }
 0x56d   : >> { %v7552_v49 = vmul.f32 %v7516_v6, %v19818_v59  ;;  %v19826_v6 = vld [vmem:[#allocation8_spill] sm:$0xff] }
 0x56e   : >> { %v7550_v2 = vmul.f32 %v7514_v10, %v19820_v5  ;;  %v13373_v35 = vpop.f32.mrb[4].mxu0 }
 0x56f   : >> { %v7586_v20 = vpack.c.bf16 %v7552_v49, %v7551_v12  ;;  %v7483_v51 = vadd.f32 %v13373_v35, %v17899_v47  ;;  %v7308_v31 = vpop.f32.mrb[5].mxu0  ;;  %v19827_v12 = vld [vmem:[#allocation9_spill] sm:$0xff]  ;;  %v17945_v35 = vld [vmem:[%s17877_s15 + $0x20] sm:$0xff]  }
 0x570   : >> { %v7585_v25 = vpack.c.bf16 %v7550_v2, %v7549_v50  ;;  %v7481_v21 = vadd.f32 %v17899_v47, %v7308_v31  ;;  %v13374_v15 = vpop.f32.mrb[6].mxu0  ;;  %v19828_v49 = vld [vmem:[#allocation25_spill] sm:$0xff] }
 0x571   : >> { %7604 = vst.msk [vmem:[#allocation3 + $0x18] sm:$0xff] %vm307_vm8, %v7586_v20  ;;  %v7519_v4 = vmax.f32 %v7483_v51, 0.0  ;;  %v7484_v42 = vadd.f32 %v13374_v15, %v17899_v47  ;;  %v7311_v24 = vpop.f32.mrb[7].mxu0 }
 0x572   : >> { %7603 = vst.msk [vmem:[#allocation3 + $0x10] sm:$0xff] %vm307_vm8, %v7585_v25  ;;  %v7517_v36 = vmax.f32 %v7481_v21, 0.0  ;;  %v7482_v27 = vadd.f32 %v17899_v47, %v7311_v24 }
 0x573   : >> { %v7520_v53 = vmax.f32 %v7484_v42, 0.0  ;;  %v7555_v9 = vmul.f32 %v7519_v4, %v19821_v23 }
 0x574   : >> { %v7518_v33 = vmax.f32 %v7482_v27, 0.0  ;;  %v7553_v40 = vmul.f32 %v7517_v36, %v19823_v13 }
 0x575   : >> { %v7556_v44 = vmul.f32 %v7520_v53, %v19822_v28 }
 0x576   : >> { %v7554_v34 = vmul.f32 %v7518_v33, %v19824_v57  ;;  %v13377_v54 = vpop.f32.mrb[8].mxu0 }
 0x577   : >> { %v7588_v8 = vpack.c.bf16 %v7556_v44, %v7555_v9  ;;  %v7487_v14 = vadd.f32 %v13377_v54, %v17899_v47  ;;  %v7324_v18 = vpop.f32.mrb[9].mxu0  ;;  %v8375_v54 = vshrl.u32 %v17883_v56, 16  ;;  %v19606_v56 = vshll.u32 %v17881_v19, 16 }
 0x578   : >> { %v7587_v61 = vpack.c.bf16 %v7554_v34, %v7553_v40  ;;  %v7485_v1 = vadd.f32 %v17899_v47, %v7324_v18  ;;  %v13378_v32 = vpop.f32.mrb[10].mxu0  ;;  %v17921_v30 = vld [vmem:[#allocation3 + $0x18] sm:$0xff]  ;;  %v19830_v18 = vld [vmem:[#allocation24_spill] sm:$0xff] }
 0x579   : >> { %7606 = vst.msk [vmem:[#allocation3 + $0x28] sm:$0xff] %vm307_vm8, %v7588_v8  ;;  %v7523_v62 = vmax.f32 %v7487_v14, 0.0  ;;  %v7488_v43 = vadd.f32 %v13378_v32, %v17899_v47  ;;  %v7327_v22 = vpop.f32.mrb[11].mxu0  ;;  %v17925_v37 = vld [vmem:[#allocation3 + $0x10] sm:$0xff]  ;;  %v7679_v46 = vrot.slane %v17921_v30, 7  ;;  %v19829_v8 = vld [vmem:[#allocation10_spill] sm:$0xff] }
 0x57a   : >> { %7605 = vst.msk [vmem:[#allocation3 + $0x20] sm:$0xff] %vm307_vm8, %v7587_v61  ;;  %v7521_v52 = vmax.f32 %v7485_v1, 0.0  ;;  %v7486_v48 = vadd.f32 %v17899_v47, %v7327_v22  ;;  %v7677_v29 = vrot.slane %v17925_v37, 7  ;;  %v19605_v1 = vshrl.u32 %v17881_v19, 16  ;;  %v19832_v22 = vld [vmem:[#allocation29_spill] sm:$0xff] }
 0x57b   : >> { %v7524_v38 = vmax.f32 %v7488_v43, 0.0  ;;  %v7559_v0 = vmul.f32 %v7523_v62, %v19825_v55  ;;  %v19831_v62 = vld [vmem:[#allocation11_spill] sm:$0xff] }
 0x57c   : >> { %v7522_v45 = vmax.f32 %v7486_v48, 0.0  ;;  %v7678_v60 = vsel %vm563_vm2, %v7675_v7, %v7677_v29  ;;  %v7680_v41 = vsel %vm563_vm2, %v7677_v29, %v7679_v46  ;;  %v7557_v59 = vmul.f32 %v7521_v52, %v19827_v12 }
 0x57d   : >> { %v7560_v58 = vmul.f32 %v7524_v38, %v19826_v6  ;;  %13408 = vmatmul.mubr.msk.bf16.vlgmr.msra.gmra.mrb[0].mxu1 %vm307_vm8, %v7678_v60  ;;  %v17976_v6 = vrot.slane %v19605_v1, 7 }
 0x57e   : >> { %v7558_v63 = vmul.f32 %v7522_v45, %v19828_v49  ;;  %v13381_v50 = vpop.f32.mrb[12].mxu0  ;;  %13411 = vmatprep.mubr.msk.bf16.mxu1 %vm307_vm8, %v7680_v41  ;;  %13444 = vmatpush3.bf16.msra.mxu1 %v17892_v3 }
 0x57f   : >> { %v7590_v5 = vpack.c.bf16 %v7560_v58, %v7559_v0  ;;  %v7491_v7 = vadd.f32 %v13381_v50, %v17899_v47  ;;  %v7340_v2 = vpop.f32.mrb[13].mxu0  ;;  %13445 = vmatprep.subr.bf16.mxu1 %v14967_v26  ;;  %v8377_v50 = vrot.slane %v8375_v54, 7  ;;  %v19836_v54 = vld [vmem:[#allocation14_spill] sm:$0xff] }
 0x580   : >> { %v7589_v20 = vpack.c.bf16 %v7558_v63, %v7557_v59  ;;  %v7489_v31 = vadd.f32 %v17899_v47, %v7340_v2  ;;  %v13382_v25 = vpop.f32.mrb[14].mxu0  ;;  %v17948_v15 = vld [vmem:[#allocation3 + $0x28] sm:$0xff] }
 0x581   : >> { %7608 = vst.msk [vmem:[#allocation3 + $0x38] sm:$0xff] %vm307_vm8, %v7590_v5  ;;  %v7527_v4 = vmax.f32 %v7491_v7, 0.0  ;;  %v7492_v42 = vadd.f32 %v13382_v25, %v17899_v47  ;;  %v7343_v24 = vpop.f32.mrb[15].mxu0  ;;  %v17952_v3 = vld [vmem:[#allocation3 + $0x20] sm:$0xff]  ;;  %v7683_v36 = vrot.slane %v17948_v15, 7 }
 0x582   : >> { %7607 = vst.msk [vmem:[#allocation3 + $0x30] sm:$0xff] %vm307_vm8, %v7589_v20  ;;  %v7525_v27 = vmax.f32 %v7489_v31, 0.0  ;;  %v7490_v53 = vadd.f32 %v17899_v47, %v7343_v24  ;;  %v7681_v33 = vrot.slane %v17952_v3, 7  ;;  %13446 = vmatpush3.bf16.msra.mxu1 %v14967_v26  ;;  %v8379_v20 = vor.u32 %v17976_v6, %v19606_v56  ;;  %v19833_v24 = vld [vmem:[#allocation28_spill] sm:$0xff]  ;;  %v19847_v56 = vld [vmem:[#allocation33_spill] sm:$0xff] }
 0x583   : >> { %v7528_v9 = vmax.f32 %v7492_v42, 0.0  ;;  %13483 = vmatprep.subr.bf16.mxu1 %v17945_v35  ;;  %v7563_v14 = vmul.f32 %v7527_v4, %v19829_v8 }
 0x584   : >> { %v7526_v44 = vmax.f32 %v7490_v53, 0.0  ;;  %v7682_v40 = vsel %vm563_vm2, %v7679_v46, %v7681_v33  ;;  %v7684_v34 = vsel %vm563_vm2, %v7681_v33, %v7683_v36  ;;  %v7561_v43 = vmul.f32 %v7525_v27, %v19831_v62  ;;  %v19834_v33 = vld [vmem:[#allocation12_spill] sm:$0xff] }
 0x585   : >> { %v7564_v61 = vmul.f32 %v7528_v9, %v19830_v18  ;;  %13412 = vmatmul.mubr.msk.bf16.gmra.mrb[4].mxu1 %vm307_vm8, %v7682_v40  ;;  %v19835_v40 = vld [vmem:[#allocation13_spill] sm:$0xff] }
 0x586   : >> { %v7562_v48 = vmul.f32 %v7526_v44, %v19832_v22  ;;  %v13385_v29 = vpop.f32.mrb[16].mxu0  ;;  %13415 = vmatprep.mubr.msk.bf16.mxu1 %vm307_vm8, %v7684_v34 }
 0x587   : >> { %v7592_v46 = vpack.c.bf16 %v7564_v61, %v7563_v14  ;;  %v7495_v38 = vadd.f32 %v13385_v29, %v17899_v47  ;;  %v7356_v26 = vpop.f32.mrb[17].mxu0  ;;  %v17998_v61 = vsel %vm1244_vm7, %v8377_v50, %v8379_v20 }
 0x588   : >> { %v7591_v45 = vpack.c.bf16 %v7562_v48, %v7561_v43  ;;  %v7493_v60 = vadd.f32 %v17899_v47, %v7356_v26  ;;  %v13386_v41 = vpop.f32.mrb[18].mxu0  ;;  %v17972_v0 = vld [vmem:[#allocation3 + $0x38] sm:$0xff] }
 0x589   : >> { %7610 = vst.msk [vmem:[#allocation3 + $0x48] sm:$0xff] %vm307_vm8, %v7592_v46  ;;  %v7531_v58 = vmax.f32 %v7495_v38, 0.0  ;;  %v7496_v12 = vadd.f32 %v13386_v41, %v17899_v47  ;;  %v7359_v59 = vpop.f32.mrb[19].mxu0  ;;  %v17980_v49 = vld [vmem:[#allocation3 + $0x30] sm:$0xff]  ;;  %v7687_v63 = vrot.slane %v17972_v0, 7 }
 0x58a   : >> { %7609 = vst.msk [vmem:[#allocation3 + $0x40] sm:$0xff] %vm307_vm8, %v7591_v45  ;;  %v7529_v5 = vmax.f32 %v7493_v60, 0.0  ;;  %v7494_v7 = vadd.f32 %v17899_v47, %v7359_v59  ;;  %v7685_v2 = vrot.slane %v17980_v49, 7 }
 0x58b   : >> { %v7532_v31 = vmax.f32 %v7496_v12, 0.0  ;;  %v7567_v27 = vmul.f32 %v7531_v58, %v19833_v24 }
 0x58c   : >> { %v7530_v25 = vmax.f32 %v7494_v7, 0.0  ;;  %v7686_v4 = vsel %vm563_vm2, %v7683_v36, %v7685_v2  ;;  %v7688_v42 = vsel %vm563_vm2, %v7685_v2, %v7687_v63  ;;  %v7565_v34 = vmul.f32 %v7529_v5, %v19835_v40 }
 0x58d   : >> { %v7568_v9 = vmul.f32 %v7532_v31, %v19834_v33  ;;  %13416 = vmatmul.mubr.msk.bf16.gmra.mrb[8].mxu1 %vm307_vm8, %v7686_v4  ;;  %v19837_v31 = vld [vmem:[#allocation16_spill] sm:$0xff] }
 0x58e   : >> { %v7566_v14 = vmul.f32 %v7530_v25, %v19836_v54  ;;  %v13389_v18 = vpop.f32.mrb[20].mxu0  ;;  %13419 = vmatprep.mubr.msk.bf16.mxu1 %vm307_vm8, %v7688_v42  ;;  %v19838_v4 = vld [vmem:[#allocation4_spill] sm:$0xff]  ;;  %v19849_v42 = vld [vmem:[#allocation35_spill] sm:$0xff] }
 0x58f   : >> { %v7594_v43 = vpack.c.bf16 %v7568_v9, %v7567_v27  ;;  %v7499_v36 = vadd.f32 %v13389_v18, %v17899_v47  ;;  %v7372_v22 = vpop.f32.mrb[21].mxu0  ;;  %v19839_v27 = vld [vmem:[#allocation18_spill] sm:$0xff]  ;;  %v19840_v9 = vld [vmem:[#allocation21_spill] sm:$0xff]  ;;  %v19607_v18 = vshrl.u32 %v17952_v3, 16 }
 0x590   : >> { %v7593_v48 = vpack.c.bf16 %v7566_v14, %v7565_v34  ;;  %v7497_v29 = vadd.f32 %v17899_v47, %v7372_v22  ;;  %v13390_v46 = vpop.f32.mrb[22].mxu0  ;;  %v18002_v38 = vld [vmem:[#allocation3 + $0x48] sm:$0xff] }
 0x591   : >> { %7612 = vst.msk [vmem:[#allocation3 + $0x58] sm:$0xff] %vm307_vm8, %v7594_v43  ;;  %v7535_v26 = vmax.f32 %v7499_v36, 0.0  ;;  %v7500_v45 = vadd.f32 %v13390_v46, %v17899_v47  ;;  %v7375_v60 = vpop.f32.mrb[23].mxu0  ;;  %v18006_v41 = vld [vmem:[#allocation3 + $0x40] sm:$0xff]  ;;  %v7691_v58 = vrot.slane %v18002_v38, 7 }
 0x592   : >> { %7611 = vst.msk [vmem:[#allocation3 + $0x50] sm:$0xff] %vm307_vm8, %v7593_v48  ;;  %v7533_v12 = vmax.f32 %v7497_v29, 0.0  ;;  %v7498_v59 = vadd.f32 %v17899_v47, %v7375_v60  ;;  %v7689_v50 = vrot.slane %v18006_v41, 7 }
 0x593   : >> { %v7536_v5 = vmax.f32 %v7500_v45, 0.0  ;;  %v7571_v25 = vmul.f32 %v7535_v26, %v19837_v31  ;;  %v18035_v31 = vrot.slane %v19607_v18, 7 }
 0x594   : >> { %v7534_v7 = vmax.f32 %v7498_v59, 0.0  ;;  %v7690_v2 = vsel %vm563_vm2, %v7687_v63, %v7689_v50  ;;  %v7692_v20 = vsel %vm563_vm2, %v7689_v50, %v7691_v58  ;;  %v7569_v33 = vmul.f32 %v7533_v12, %v19839_v27 }
 0x595   : >> { %v7572_v24 = vmul.f32 %v7536_v5, %v19838_v4  ;;  %13420 = vmatmul.mubr.msk.bf16.gmra.mrb[12].mxu1 %vm307_vm8, %v7690_v2  ;;  %v7623_v4 = vld [vmem:[#allocation3] sm:$0xc0] }
 0x596   : >> { %v7570_v34 = vmul.f32 %v7534_v7, %v19840_v9  ;;  %v13393_v14 = vpop.f32.mrb[24].mxu0  ;;  %13423 = vmatprep.mubr.msk.bf16.mxu1 %vm307_vm8, %v7692_v20  ;;  %v19608_v9 = vshll.u32 %v17952_v3, 16 }
 0x597   : >> { %v7596_v36 = vpack.c.bf16 %v7572_v24, %v7571_v25  ;;  %v7503_v63 = vadd.f32 %v13393_v14, %v17899_v47  ;;  %v7388_v22 = vpop.f32.mrb[25].mxu0 }
 0x598   : >> { %v7595_v48 = vpack.c.bf16 %v7570_v34, %v7569_v33  ;;  %v7501_v29 = vadd.f32 %v17899_v47, %v7388_v22  ;;  %v13394_v26 = vpop.f32.mrb[26].mxu0  ;;  %v18023_v45 = vld [vmem:[#allocation3 + $0x58] sm:$0xff]  ;;  %v19841_v34 = vld [vmem:[#allocation23_spill] sm:$0xff]  ;;  %v19843_v22 = vld [vmem:[#allocation30_spill] sm:$0xff] }
 0x599   : >> { %7614 = vst.msk [vmem:[#allocation3 + $0x68] sm:$0xff] %vm307_vm8, %v7596_v36  ;;  %v7539_v60 = vmax.f32 %v7503_v63, 0.0  ;;  %v7504_v12 = vadd.f32 %v13394_v26, %v17899_v47  ;;  %v7391_v59 = vpop.f32.mrb[27].mxu0  ;;  %v18027_v50 = vld [vmem:[#allocation3 + $0x50] sm:$0xff]  ;;  %v7695_v5 = vrot.slane %v18023_v45, 7  ;;  %v19842_v36 = vld [vmem:[#allocation27_spill] sm:$0xff] }
 0x59a   : >> { %7613 = vst.msk [vmem:[#allocation3 + $0x60] sm:$0xff] %vm307_vm8, %v7595_v48  ;;  %v7537_v7 = vmax.f32 %v7501_v29, 0.0  ;;  %v7502_v2 = vadd.f32 %v17899_v47, %v7391_v59  ;;  %v7693_v20 = vrot.slane %v18027_v50, 7  ;;  %v19844_v26 = vld [vmem:[#allocation31_spill] sm:$0xff] }
 0x59b   : >> { %v7540_v25 = vmax.f32 %v7504_v12, 0.0  ;;  %v7575_v14 = vmul.f32 %v7539_v60, %v19841_v34  ;;  %v7955_v12 = vshrl.u32 %v7623_v4, 16 }
 0x59c   : >> { %v7538_v24 = vmax.f32 %v7502_v2, 0.0  ;;  %v7694_v27 = vsel %vm563_vm2, %v7691_v58, %v7693_v20  ;;  %v7696_v33 = vsel %vm563_vm2, %v7693_v20, %v7695_v5  ;;  %v7573_v48 = vmul.f32 %v7537_v7, %v19843_v22 }
 0x59d   : >> { %v7576_v63 = vmul.f32 %v7540_v25, %v19842_v36  ;;  %13424 = vmatmul.mubr.msk.bf16.gmra.mrb[16].mxu1 %vm307_vm8, %v7694_v27  ;;  %v18049_v58 = vor.u32 %v18035_v31, %v19608_v9  ;;  %v7958_v25 = vshll.u32 %v7623_v4, 16  ;;  %v19609_v27 = vshrl.u32 %v17948_v15, 16 }
 0x59e   : >> { %v7574_v59 = vmul.f32 %v7538_v24, %v19844_v26  ;;  %v13397_v18 = vpop.f32.mrb[28].mxu0  ;;  %13427 = vmatprep.mubr.msk.bf16.mxu1 %vm307_vm8, %v7696_v33 }
 0x59f   : >> { %v7598_v2 = vpack.c.bf16 %v7576_v63, %v7575_v14  ;;  %v7507_v60 = vadd.f32 %v13397_v18, %v17899_v47  ;;  %v7404_v20 = vpop.f32.mrb[29].mxu0 }
 0x5a0   : >> { %v7597_v34 = vpack.c.bf16 %v7574_v59, %v7573_v48  ;;  %v7505_v7 = vadd.f32 %v17899_v47, %v7404_v20  ;;  %v13398_v24 = vpop.f32.mrb[30].mxu0  ;;  %v18054_v36 = vld [vmem:[#allocation3 + $0x68] sm:$0xff]  ;;  %v7957_v59 = vrot.slane %v7955_v12, 6  ;;  %v7960_v20 = vrot.slane %v7958_v25, 7 }
 0x5a1   : >> { %19845 = vst [vmem:[#allocation76_spill] sm:$0xff] %v18054_v36  ;;  %7616 = vst.msk [vmem:[#allocation3 + $0x78] sm:$0xff] %vm307_vm8, %v7598_v2  ;;  %v7543_v33 = vmax.f32 %v7507_v60, 0.0  ;;  %v7508_v22 = vadd.f32 %v13398_v24, %v17899_v47  ;;  %v7407_v26 = vpop.f32.mrb[31].mxu0  ;;  %v18058_v9 = vld [vmem:[#allocation3 + $0x60] sm:$0xff]  ;;  %v7699_v18 = vrot.slane %v18054_v36, 7 }
 0x5a2   : >> { %7615 = vst.msk [vmem:[#allocation3 + $0x70] sm:$0xff] %vm307_vm8, %v7597_v34  ;;  %v7541_v4 = vmax.f32 %v7505_v7, 0.0  ;;  %v7506_v14 = vadd.f32 %v17899_v47, %v7407_v26  ;;  %v7697_v63 = vrot.slane %v18058_v9, 7  ;;  %v18066_v2 = vrot.slane %v19609_v27, 7  ;;  %v19846_v34 = vld [vmem:[#allocation32_spill] sm:$0xff] }
 0x5a3   : >> { %v7544_v48 = vmax.f32 %v7508_v22, 0.0  ;;  %v7579_v7 = vmul.f32 %v7543_v33, %v19846_v34  ;;  %v19610_v25 = vshll.u32 %v17948_v15, 16  ;;  %v19848_v22 = vld [vmem:[#allocation34_spill] sm:$0xff]  ;;  %v19851_v33 = vshll.u32 %v17881_v19, 16 }
 0x5a4   : >> { %v7542_v60 = vmax.f32 %v7506_v14, 0.0  ;;  %v7698_v24 = vsel %vm563_vm2, %v7695_v5, %v7697_v63  ;;  %v7700_v46 = vsel %vm563_vm2, %v7697_v63, %v7699_v18  ;;  %v7577_v27 = vmul.f32 %v7541_v4, %v19848_v22 }
 0x5a5   : >> { %v7580_v26 = vmul.f32 %v7544_v48, %v19847_v56  ;;  %13428 = vmatmul.mubr.msk.bf16.gmra.mrb[20].mxu1 %vm307_vm8, %v7698_v24  ;;  %v19850_v5 = vshrl.u32 %v17881_v19, 16  ;;  %v7968_v34 = vrot.slane %v19851_v33, 7  ;;  %v7961_v12 = vor.u32 %v7960_v20, %v7957_v59 }
 0x5a6   : >> { %v7578_v14 = vmul.f32 %v7542_v60, %v19849_v42  ;;  %v13401_v54 = vpop.f32.mrb[32].mxu0  ;;  %13431 = vmatprep.mubr.msk.bf16.mxu1 %vm307_vm8, %v7700_v46  ;;  %v8391_v4 = vor.u32 %v18066_v2, %v19610_v25  ;;  %v18171_v44 = vshll.u32 %v18058_v9, 16 }
 0x5a7   : >> { %v7965_v63 = vrot.slane %v19850_v5, 6  ;;  %v7600_v48 = vpack.c.bf16 %v7580_v26, %v7579_v7  ;;  %v7511_v24 = vadd.f32 %v13401_v54, %v17899_v47  ;;  %v7420_v1 = vpop.f32.mrb[33].mxu0  ;;  %v19853_v5 = vshrl.u32 %v17925_v37, 16 }
 0x5a8   : >> { %v7599_v22 = vpack.c.bf16 %v7578_v14, %v7577_v27  ;;  %v7509_v60 = vadd.f32 %v17899_v47, %v7420_v1  ;;  %v13402_v42 = vpop.f32.mrb[34].mxu0  ;;  %v18088_v46 = vld [vmem:[#allocation3 + $0x78] sm:$0xff]  ;;  %v19855_v1 = vshll.u32 %v17925_v37, 16  ;;  %19866 = vst [vmem:[#allocation81_spill] sm:$0xff] %v18171_v44 }
 0x5a9   : >> { %19852 = vst [vmem:[#allocation77_spill] sm:$0xff] %v18088_v46  ;;  %v7974_v43 = vrot.slane %v19853_v5, 6  ;;  %7618 = vst.msk [vmem:[#allocation3 + $0x88] sm:$0xff] %vm307_vm8, %v7600_v48  ;;  %v7547_v54 = vmax.f32 %v7511_v24, 0.0  ;;  %v7512_v59 = vadd.f32 %v13402_v42, %v17899_v47  ;;  %v7423_v20 = vpop.f32.mrb[35].mxu0  ;;  %v18095_v7 = vld [vmem:[#allocation3 + $0x70] sm:$0xff]  ;;  %v18103_v25 = vor.u32 %v7968_v34, %v7965_v63 }
 0x5aa   : >> { %19854 = vst [vmem:[#allocation79_spill] sm:$0xff] %v18095_v7  ;;  %v7703_v27 = vrot.slane %v18088_v46, 7  ;;  %v7977_v26 = vrot.slane %v19855_v1, 7  ;;  %7617 = vst.msk [vmem:[#allocation3 + $0x80] sm:$0xff] %vm307_vm8, %v7599_v22  ;;  %v7545_v14 = vmax.f32 %v7509_v60, 0.0  ;;  %v7510_v33 = vadd.f32 %v17899_v47, %v7423_v20  ;;  %v19856_v47 = vld [vmem:[#allocation36_spill] sm:$0xff] }
 0x5ab   : >> { %v7701_v5 = vrot.slane %v18095_v7, 7  ;;  %v7548_v48 = vmax.f32 %v7512_v59, 0.0  ;;  %v18112_v22 = vsel %vm836_vm5, %v7961_v12, %v18103_v25  ;;  %v7583_v60 = vmul.f32 %v7547_v54, %v19856_v47  ;;  %v19857_v63 = vld [vmem:[#allocation37_spill] sm:$0xff] }
 0x5ac   : >> { %v7546_v56 = vmax.f32 %v7510_v33, 0.0  ;;  %v18117_v59 = vor.u32 %v7977_v26, %v7974_v43  ;;  %v19858_v20 = vshrl.u32 %v17921_v30, 16  ;;  %v19859_v33 = vld [vmem:[#allocation38_spill] sm:$0xff]  ;;  %v19611_v12 = vshrl.u32 %v18006_v41, 16 }
 0x5ad   : >> { %v7702_v29 = vsel %vm563_vm2, %v7699_v18, %v7701_v5  ;;  %v7704_v1 = vsel %vm563_vm2, %v7701_v5, %v7703_v27  ;;  %v7584_v34 = vmul.f32 %v7548_v48, %v19857_v63  ;;  %v7581_v24 = vmul.f32 %v7545_v14, %v19859_v33  ;;  %v19860_v18 = vld [vmem:[#allocation39_spill] sm:$0xff] }
 0x5ae   : >> { %13432 = vmatmul.mubr.msk.bf16.gmra.mrb[24].mxu1 %vm307_vm8, %v7702_v29  ;;  %v7983_v19 = vrot.slane %v19858_v20, 6  ;;  %v7582_v53 = vmul.f32 %v7546_v56, %v19860_v18  ;;  %v18127_v54 = vsel %vm1244_vm7, %v18035_v31, %v8391_v4  ;;  %v19861_v29 = vshll.u32 %v17921_v30, 16 }
 0x5af   : >> { %13435 = vmatprep.mubr.msk.bf16.mxu1 %vm307_vm8, %v7704_v1  ;;  %v7602_v5 = vpack.c.bf16 %v7584_v34, %v7583_v60  ;;  %v19862_v26 = vshrl.u32 %v17980_v49, 16  ;;  %v19863_v63 = vshrl.u32 %v17972_v0, 16  ;;  %v19612_v1 = vshll.u32 %v17980_v49, 16 }
 0x5b0   : >> { %v7986_v43 = vrot.slane %v19861_v29, 7  ;;  %v7601_v20 = vpack.c.bf16 %v7582_v53, %v7581_v24  ;;  %v18135_v56 = vld [vmem:[#allocation3 + $0x88] sm:$0xff]  ;;  %v19613_v33 = vshll.u32 %v17972_v0, 16  ;;  %v18159_v34 = vshrl.u32 %v18095_v7, 16 }
 0x5b1   : >> { %v8393_v48 = vrot.slane %v19862_v26, 7  ;;  %v8396_v14 = vrot.slane %v19863_v63, 7  ;;  %19864 = vst [vmem:[#allocation80_spill] sm:$0xff] %v18135_v56  ;;  %7620 = vst.msk [vmem:[#allocation3 + $0x98] sm:$0xff] %vm307_vm8, %v7602_v5  ;;  %v18141_v4 = vld [vmem:[#allocation3 + $0x80] sm:$0xff]  ;;  %v7707_v60 = vrot.slane %v18135_v56, 7 }
 0x5b2   : >> { %19865 = vst [vmem:[#allocation78_spill] sm:$0xff] %v18141_v4  ;;  %7619 = vst.msk [vmem:[#allocation3 + $0x90] sm:$0xff] %vm307_vm8, %v7601_v20  ;;  %v7705_v24 = vrot.slane %v18141_v4, 7  ;;  %v18151_v26 = vshrl.u32 %v18058_v9, 16  ;;  %v8399_v5 = vrot.slane %v19611_v12, 7  ;;  %v18156_v63 = vshrl.u32 %v18054_v36, 16 }
 0x5b3   : >> { %v8394_v18 = vor.u32 %v8393_v48, %v19612_v1  ;;  %v8397_v20 = vor.u32 %v8396_v14, %v19613_v33  ;;  %v18174_v42 = vshll.u32 %v18054_v36, 16  ;;  %v19869_v31 = vshrl.u32 %v18027_v50, 16 }
 0x5b4   : >> { %v7706_v29 = vsel %vm563_vm2, %v7703_v27, %v7705_v24  ;;  %v7708_v53 = vsel %vm563_vm2, %v7705_v24, %v7707_v60  ;;  %v19867_v24 = vshll.u32 %v18006_v41, 16  ;;  %v19870_v47 = vshrl.u32 %v18023_v45, 16 }
 0x5b5   : >> { %v18178_v1 = vsel %vm1244_vm7, %v18066_v2, %v8394_v18  ;;  %v18181_v27 = vsel %vm1244_vm7, %v8393_v48, %v8397_v20  ;;  %v8405_v40 = vrot.slane %v19869_v31, 7  ;;  %v18193_v2 = vshrl.u32 %v18088_v46, 16 }
 0x5b6   : >> { %13436 = vmatmul.mubr.msk.bf16.gmra.mrb[28].mxu1 %vm307_vm8, %v7706_v29  ;;  %v8400_v33 = vor.u32 %v8399_v5, %v19867_v24  ;;  %v19868_v29 = vshrl.u32 %v18002_v38, 16  ;;  %v8408_v52 = vrot.slane %v19870_v47, 7  ;;  %v8411_v48 = vrot.slane %v18151_v26, 7 }
 0x5b7   : >> { %13439 = vmatprep.mubr.msk.bf16.mxu1 %vm307_vm8, %v7708_v53  ;;  %v8414_v18 = vrot.slane %v18156_v63, 7  ;;  %v8417_v53 = vrot.slane %v18159_v34, 7  ;;  %v19871_v24 = vshll.u32 %v18002_v38, 16  ;;  %v19872_v31 = vshll.u32 %v18027_v50, 16 }
 0x5b8   : >> { %v8402_v12 = vrot.slane %v19868_v29, 7  ;;  %v18199_v20 = vsel %vm1244_vm7, %v8396_v14, %v8400_v33  ;;  %v19873_v47 = vshll.u32 %v18023_v45, 16  ;;  %v18210_v21 = vshrl.u32 %v18141_v4, 16 }
 0x5b9   : >> { %v8406_v62 = vor.u32 %v8405_v40, %v19872_v31  ;;  %v18207_v8 = vld [vmem:[#allocation3 + $0x90] sm:$0x7f]  ;;  %v18213_v51 = vshrl.u32 %v18135_v56, 16  ;;  %v8412_v14 = vor.u32 %v8411_v48, %v18171_v44  ;;  %v8415_v33 = vor.u32 %v8414_v18, %v18174_v42 }
 0x5ba   : >> { %v8403_v29 = vor.u32 %v8402_v12, %v19871_v24  ;;  %v8409_v32 = vor.u32 %v8408_v52, %v19873_v47  ;;  %v7709_v24 = vrot.slane %v18207_v8, 7  ;;  %v7987_v10 = vor.u32 %v7986_v43, %v7983_v19 }
 0x5bb   : >> { %v18219_v31 = vshll.u32 %v18095_v7, 16  ;;  %v18225_v55 = vsel %vm1244_vm7, %v8402_v12, %v8406_v62  ;;  %v18231_v13 = vsel %vm1244_vm7, %v8408_v52, %v8412_v14  ;;  %v18234_v28 = vsel %vm1244_vm7, %v8411_v48, %v8415_v33 }
 0x5bc   : >> { %v18222_v47 = vsel %vm1244_vm7, %v8399_v5, %v8403_v29  ;;  %v18228_v57 = vsel %vm1244_vm7, %v8405_v40, %v8409_v32  ;;  %v7710_v19 = vsel %vm563_vm2, %v7707_v60, %v7709_v24  ;;  %v18238_v43 = vshll.u32 %v18088_v46, 16 }
 0x5bd   : >> { %v18241_v5 = vshll.u32 %v18135_v56, 16  ;;  %v8418_v62 = vor.u32 %v8417_v53, %v18219_v31  ;;  %v18246_v32 = vshll.u32 %v18141_v4, 16  ;;  %v8420_v52 = vrot.slane %v18193_v2, 7 }
 0x5be   : >> { %13440 = vmatmul.mubr.msk.bf16.gmra.mrb[32].mxu1 %vm307_vm8, %v7710_v19  ;;  %v8423_v40 = vrot.slane %v18210_v21, 7  ;;  %v19614_v12 = vrot.slane %v18213_v51, 7  ;;  %v7979_v33 = vsel %vm836_vm5, %v18103_v25, %v18117_v59  ;;  %v7988_v24 = vsel %vm836_vm5, %v18117_v59, %v7987_v10 }
 0x5bf   : >> { %13447 = vmatprep.mubr.msk.bf16.mxu1 %vm307_vm8, %v18112_v22  ;;  %v18254_v60 = vsel %vm1244_vm7, %v8414_v18, %v8418_v62  ;;  %v8421_v48 = vor.u32 %v8420_v52, %v18238_v43  ;;  %v19874_v22 = vshrl.u32 %v17952_v3, 16  ;;  %v19876_v25 = vshrl.u32 %v17948_v15, 16 }
 0x5c0   : >> { %v8424_v29 = vor.u32 %v8423_v40, %v18246_v32  ;;  %v8427_v14 = vor.u32 %v19614_v12, %v18241_v5  ;;  %v19875_v12 = vshll.u32 %v17952_v3, 16  ;;  %v19877_v59 = vshll.u32 %v17948_v15, 16 }
 0x5c1   : >> { %v7992_v18 = vrot.slane %v19874_v22, 6  ;;  %v18269_v19 = vsel %vm1244_vm7, %v8417_v53, %v8421_v48  ;;  %v8001_v11 = vrot.slane %v19876_v25, 6  ;;  %v18288_v53 = vld [vmem:[%s17877_s15 + $0x30] sm:$0xff]   ;;  %v19878_v3 = vshrl.u32 %v17980_v49, 16 }
 0x5c2   : >> { %v18272_v62 = vsel %vm1244_vm7, %v8420_v52, %v8424_v29  ;;  %v18275_v23 = vsel %vm1244_vm7, %v8423_v40, %v8427_v14  ;;  %v7995_v17 = vrot.slane %v19875_v12, 7  ;;  %v8004_v39 = vrot.slane %v19877_v59, 7 }
 0x5c3   : >> { %v8010_v12 = vrot.slane %v19878_v3, 6  ;;  %v19879_v48 = vshll.u32 %v17980_v49, 16  ;;  %v19880_v15 = vshrl.u32 %v17972_v0, 16  ;;  %v19882_v49 = vshrl.u32 %v18006_v41, 16  ;;  %v9436_v3 = vld [vmem:[#allocation3 + $0x18] sm:$0xff] }
 0x5c4   : >> { %v7996_v52 = vor.u32 %v7995_v17, %v7992_v18  ;;  %v8005_v40 = vor.u32 %v8004_v39, %v8001_v11  ;;  %v19883_v18 = vshll.u32 %v18006_v41, 16  ;;  %v19885_v59 = vshll.u32 %v18002_v38, 16  ;;  %v18319_v41 = vld [vmem:[#allocation3 + $0x98] sm:$0xff] }
 0x5c5   : >> { %v8013_v29 = vrot.slane %v19879_v48, 7  ;;  %v8019_v14 = vrot.slane %v19880_v15, 6  ;;  %v18314_v15 = vld [vmem:[#allocation3 + $0x20] sm:$0xff]  ;;  %19888 = vst [vmem:[#allocation84_spill] sm:$0xff] %v18319_v41  ;;  %v9582_v46 = vrot.slane %v18241_v5, 1 }
 0x5c6   : >> { %13448 = vmatmul.mubr.msk.bf16.vlgmr.msra.gmra.mrb[0].mxu1 %vm307_vm8, %v7979_v33  ;;  %v19881_v33 = vshll.u32 %v17972_v0, 16  ;;  %v8006_v39 = vsel %vm836_vm5, %v7996_v52, %v8005_v40  ;;  %v8031_v0 = vrot.slane %v19883_v18, 7  ;;  %19887 = vst [vmem:[#allocation82_spill] sm:$0xff] %v18314_v15  ;;  %v19617_v18 = vrot.slane %v18171_v44, 1 }
 0x5c7   : >> { %13451 = vmatprep.mubr.msk.bf16.mxu1 %vm307_vm8, %v7988_v24  ;;  %13484 = vmatpush3.bf16.msra.mxu1 %v17945_v35  ;;  %v7997_v35 = vsel %vm836_vm5, %v7987_v10, %v7996_v52  ;;  %v8014_v11 = vor.u32 %v8013_v29, %v8010_v12  ;;  %v8028_v24 = vrot.slane %v19882_v49, 6  ;;  %v8040_v10 = vrot.slane %v19885_v59, 7  ;;  %v18312_v52 = vld [vmem:[#allocation3 + $0x90] sm:$0xff] }
 0x5c8   : >> { %13485 = vmatprep.subr.bf16.mxu1 %v14969_v16  ;;  %v8022_v22 = vrot.slane %v19881_v33, 7  ;;  %19886 = vst [vmem:[#allocation83_spill] sm:$0xff] %v18312_v52  ;;  %v9468_v33 = vshll.u32 %v9436_v3, 16  ;;  %v9558_v59 = vrot.slane %v18219_v31, 1  ;;  %v19894_v56 = vshll.u32 %v18314_v15, 16 }
 0x5c9   : >> { %v8015_v48 = vsel %vm836_vm5, %v8005_v40, %v8014_v11  ;;  %v8032_v29 = vor.u32 %v8031_v0, %v8028_v24  ;;  %v19891_v40 = vshrl.u32 %v18023_v45, 16  ;;  %v18333_v24 = vshll.u32 %v18312_v52, 16 }
 0x5ca   : >> { %v8023_v17 = vor.u32 %v8022_v22, %v8019_v14  ;;  %v19889_v22 = vshrl.u32 %v18027_v50, 16  ;;  %v18360_v4 = vrot.slane %v19894_v56, 1  ;;  %v19900_v56 = vshll.u32 %v18023_v45, 16 }
 0x5cb   : >> { %13486 = vmatpush3.bf16.msra.mxu1 %v14969_v16  ;;  %v19884_v16 = vshrl.u32 %v18002_v38, 16  ;;  %v19890_v38 = vshll.u32 %v18027_v50, 16  ;;  %v8055_v49 = vrot.slane %v19891_v40, 6  ;;  %v18339_v50 = vshll.u32 %v18319_v41, 16 }
 0x5cc   : >> { %13523 = vmatprep.subr.bf16.mxu1 %v18288_v53  ;;  %v8024_v12 = vsel %vm836_vm5, %v8014_v11, %v8023_v17  ;;  %v18330_v11 = vshrl.u32 %v18312_v52, 16  ;;  %v9472_v40 = vshrl.u32 %v9436_v3, 16  ;;  %v9562_v52 = vor.u32 %v9558_v59, %v18159_v34  ;;  %19895 = vst [vmem:[#allocation85_spill] sm:$0xff] %v18360_v4 }
 0x5cd   : >> { %v8037_v25 = vrot.slane %v19884_v16, 6  ;;  %v9550_v16 = vrot.slane %v18174_v42, 1  ;;  %v8058_v7 = vrot.slane %v19900_v56, 7  ;;  %v8064_v56 = vrot.slane %v18151_v26, 6 }
 0x5ce   : >> { %13452 = vmatmul.mubr.msk.bf16.gmra.mrb[4].mxu1 %vm307_vm8, %v7997_v35  ;;  %v8046_v35 = vrot.slane %v19889_v22, 6  ;;  %v18349_v22 = vrot.slane %v9468_v33, 1 }
 0x5cf   : >> { %13455 = vmatprep.mubr.msk.bf16.mxu1 %vm307_vm8, %v8006_v39  ;;  %v18317_v14 = vor.u32 %v8040_v10, %v8037_v25  ;;  %v8049_v39 = vrot.slane %v19890_v38, 7  ;;  %v9546_v25 = vor.u32 %v19617_v18, %v18151_v26  ;;  %v9566_v10 = vrot.slane %v18238_v43, 1 }
 0x5d0   : >> { %19892 = vst [vmem:[#allocation86_spill] sm:$0xff] %v18349_v22  ;;  %v9554_v38 = vor.u32 %v9550_v16, %v18156_v63  ;;  %v8100_v26 = vrot.slane %v18210_v21, 6 }
 0x5d1   : >> { %v18354_v0 = vsel %vm2292_vm4, %v9546_v25, %v9550_v16  ;;  %v9570_v18 = vor.u32 %v9566_v10, %v18193_v2  ;;  %v18368_v3 = vsel %vm2292_vm4, %v9562_v52, %v9566_v10  ;;  %v18374_v25 = vrot.slane %v18333_v24, 1 }
 0x5d2   : >> { %19893 = vst [vmem:[#allocation88_spill] sm:$0xff] %v18354_v0  ;;  %19897 = vst [vmem:[#allocation90_spill] sm:$0xff] %v18368_v3  ;;  %v9598_v0 = vrot.slane %v18339_v50, 1  ;;  %v8033_v52 = vsel %vm836_vm5, %v8023_v17, %v8032_v29  ;;  %v8042_v45 = vsel %vm836_vm5, %v8032_v29, %v18317_v14  ;;  %v8073_v29 = vrot.slane %v18156_v63, 6 }
 0x5d3   : >> { %19899 = vst [vmem:[#allocation91_spill] sm:$0xff] %v18374_v25  ;;  %v8116_v63 = vshrl.u32 %v18207_v8, 16 }
 0x5d6   : >> { %13456 = vmatmul.mubr.msk.bf16.gmra.mrb[8].mxu1 %vm307_vm8, %v8015_v48  ;;  %v18347_v48 = vshrl.u32 %v18319_v41, 16  ;;  %v18363_v41 = vsel %vm2292_vm4, %v9554_v38, %v9558_v59  ;;  %v9586_v38 = vor.u32 %v9582_v46, %v18213_v51 }
 0x5d7   : >> { %13459 = vmatprep.mubr.msk.bf16.mxu1 %vm307_vm8, %v8024_v12  ;;  %v9574_v12 = vrot.slane %v18246_v32, 1  ;;  %19896 = vst [vmem:[#allocation87_spill] sm:$0xff] %v18363_v41  ;;  %v9918_v41 = vor.u32 %v9472_v40, %v18349_v22  ;;  %v8050_v40 = vor.u32 %v8049_v39, %v8046_v35  ;;  %v8103_v35 = vrot.slane %v18246_v32, 7 }
 0x5d8   : >> { %v18388_v10 = vor.u32 %v9598_v0, %v18347_v48  ;;  %v18426_v32 = vrot.slane %v8116_v63, 6 }
 0x5d9   : >> { %v9578_v33 = vor.u32 %v9574_v12, %v18210_v21  ;;  %v18371_v16 = vsel %vm2292_vm4, %v9570_v18, %v9574_v12  ;;  %v9594_v18 = vor.u32 %v18374_v25, %v18330_v11  ;;  %v18395_v12 = vsel %vm2292_vm4, %v9586_v38, %v18374_v25 }
 0x5da   : >> { %19898 = vst [vmem:[#allocation89_spill] sm:$0xff] %v18371_v16  ;;  %19902 = vst [vmem:[#allocation93_spill] sm:$0xff] %v18388_v10  ;;  %v8076_v38 = vrot.slane %v18174_v42, 7  ;;  %v8082_v25 = vrot.slane %v18159_v34, 6  ;;  %v8091_v10 = vrot.slane %v18193_v2, 6  ;;  %v8119_v42 = vshll.u32 %v18207_v8, 16 }
 0x5db   : >> { %v18380_v59 = vsel %vm2292_vm4, %v9578_v33, %v9582_v46  ;;  %19903 = vst [vmem:[#allocation94_spill] sm:$0xff] %v18395_v12  ;;  %v18399_v46 = vsel %vm2292_vm4, %v9918_v41, %v18360_v4  ;;  %v18403_v17 = vsel %vm2292_vm4, %v9594_v18, %v9598_v0  ;;  %v8059_v33 = vor.u32 %v8058_v7, %v8055_v49  ;;  %v18430_v8 = vld [vmem:[#allocation3 + $0x28] sm:$0xff] }
 0x5dc   : >> { %19901 = vst [vmem:[#allocation92_spill] sm:$0xff] %v18380_v59  ;;  %19904 = vst [vmem:[#allocation95_spill] sm:$0xff] %v18399_v46  ;;  %v8085_v41 = vrot.slane %v18219_v31, 7  ;;  %v8109_v0 = vrot.slane %v18213_v51, 6  ;;  %v8112_v7 = vrot.slane %v18241_v5, 7  ;;  %v8051_v34 = vsel %vm836_vm5, %v18317_v14, %v8050_v40  ;;  %v18432_v14 = vld [vmem:[#allocation3 + $0x30] sm:$0xff] }
 0x5dd   : >> { %19905 = vst [vmem:[#allocation96_spill] sm:$0xff] %v18403_v17  ;;  %v8060_v31 = vsel %vm836_vm5, %v8050_v40, %v8059_v33  ;;  %v8077_v39 = vor.u32 %v8076_v38, %v8073_v29  ;;  %v8104_v21 = vor.u32 %v8103_v35, %v8100_v26  ;;  %v18428_v18 = vrot.slane %v8119_v42, 7  ;;  %19906 = vst [vmem:[#allocation97_spill] sm:$0xff] %v18430_v8  ;;  %v18442_v29 = vld [vmem:[#allocation3 + $0x40] sm:$0xff]  ;;  %v18479_v26 = vld [vmem:[#allocation3 + $0x78] sm:$0xff] }
 0x5de   : >> { %13460 = vmatmul.mubr.msk.bf16.gmra.mrb[12].mxu1 %vm307_vm8, %v8033_v52  ;;  %v8067_v52 = vrot.slane %v18171_v44, 7  ;;  %v18423_v5 = vor.u32 %v8112_v7, %v8109_v0  ;;  %v18454_v0 = vld [vmem:[#allocation3 + $0x48] sm:$0xff]  ;;  %v18456_v7 = vld [vmem:[#allocation3 + $0x50] sm:$0xff]  ;;  %v18500_v59 = vld [vmem:[#allocation3 + $0xa0] sm:$0xff]  ;;  %v19907_v35 = vshrl.u32 %v18314_v15, 16  ;;  %v19909_v16 = vshll.u32 %v18430_v8, 16 }
 0x5df   : >> { %13463 = vmatprep.mubr.msk.bf16.mxu1 %vm307_vm8, %v8042_v45  ;;  %v8094_v45 = vrot.slane %v18238_v43, 7  ;;  %v8086_v43 = vor.u32 %v8085_v41, %v8082_v25  ;;  %v18493_v12 = vld [vmem:[#allocation3 + $0x88] sm:$0xff]  ;;  %v19911_v63 = vshll.u32 %v18432_v14, 16 }
 0x5e0   : >> { %v8068_v2 = vor.u32 %v8067_v52, %v8064_v56  ;;  %v18440_v52 = vld [vmem:[#allocation3 + $0x38] sm:$0xff]  ;;  %v18449_v41 = vsel %vm836_vm5, %v8104_v21, %v18423_v5  ;;  %v10696_v42 = vrot.slane %v19907_v35, 1  ;;  %v10701_v3 = vrot.slane %v19909_v16, 2 }
 0x5e1   : >> { %v8095_v49 = vor.u32 %v8094_v45, %v8091_v10  ;;  %v8087_v25 = vsel %vm836_vm5, %v8077_v39, %v8086_v43  ;;  %v19627_v45 = vshrl.u32 %v18430_v8, 16  ;;  %v10705_v44 = vrot.slane %v19911_v63, 2 }
 0x5e2   : >> { %v8069_v40 = vsel %vm836_vm5, %v8059_v33, %v8068_v2  ;;  %v8078_v56 = vsel %vm836_vm5, %v8068_v2, %v8077_v39  ;;  %v18472_v33 = vld [vmem:[#allocation3 + $0x70] sm:$0xff]  ;;  %v18481_v39 = vld [vmem:[#allocation3 + $0x80] sm:$0xff]  ;;  %v19908_v2 = vshll.u32 %v18314_v15, 16  ;;  %v19913_v35 = vshrl.u32 %v18440_v52, 16 }
 0x5e3   : >> { %v18438_v10 = vsel %vm836_vm5, %v8086_v43, %v8095_v49  ;;  %v18445_v38 = vsel %vm836_vm5, %v8095_v49, %v8104_v21  ;;  %v18470_v21 = vld [vmem:[#allocation3 + $0x68] sm:$0xff]  ;;  %v19910_v49 = vshrl.u32 %v18432_v14, 16  ;;  %v19915_v43 = vshrl.u32 %v18442_v29, 16 }
 0x5e4   : >> { %v10697_v17 = vrot.slane %v19908_v2, 2  ;;  %v10708_v15 = vrot.slane %v19913_v35, 1  ;;  %v19914_v2 = vshll.u32 %v18440_v52, 16  ;;  %v19918_v63 = vshrl.u32 %v18454_v0, 16 }
 0x5e5   : >> { %v10712_v22 = vrot.slane %v19915_v43, 1  ;;  %v19921_v43 = vshrl.u32 %v18456_v7, 16 }
 0x5e6   : >> { %13464 = vmatmul.mubr.msk.bf16.gmra.mrb[16].mxu1 %vm307_vm8, %v8051_v34  ;;  %v18462_v34 = vld [vmem:[#allocation3 + $0x58] sm:$0xff]  ;;  %v18514_v46 = vor.u32 %v10697_v17, %v10696_v42  ;;  %v10709_v8 = vrot.slane %v19914_v2, 2  ;;  %v10716_v42 = vrot.slane %v19918_v63, 1 }
 0x5e7   : >> { %13467 = vmatprep.mubr.msk.bf16.mxu1 %vm307_vm8, %v8060_v31  ;;  %v18464_v31 = vld [vmem:[#allocation3 + $0x60] sm:$0xff]  ;;  %v10720_v2 = vrot.slane %v19921_v43, 1 }
 0x5e8   : >> { %19912 = vst [vmem:[#allocation98_spill] sm:$0xff] %v18514_v46  ;;  %v10710_v17 = vor.u32 %v10709_v8, %v10708_v15  ;;  %v19928_v43 = vshll.u32 %v18464_v31, 16 }
 0x5ee   : >> { %13468 = vmatmul.mubr.msk.bf16.gmra.mrb[20].mxu1 %vm307_vm8, %v8069_v40  ;;  %v10700_v40 = vrot.slane %v19627_v45, 1  ;;  %v10704_v45 = vrot.slane %v19910_v49, 1  ;;  %v19916_v49 = vshll.u32 %v18442_v29, 16 }
 0x5ef   : >> { %13471 = vmatprep.mubr.msk.bf16.mxu1 %vm307_vm8, %v8078_v56 }
 0x5f0   : >> { %v10702_v4 = vor.u32 %v10701_v3, %v10700_v40  ;;  %v10706_v56 = vor.u32 %v10705_v44, %v10704_v45  ;;  %v10713_v36 = vrot.slane %v19916_v49, 2  ;;  %v19919_v40 = vshll.u32 %v18454_v0, 16 }
 0x5f1   : >> { %v19923_v49 = vshll.u32 %v18456_v7, 16 }
 0x5f2   : >> { %v18528_v3 = vsel %vm3483_vm0, %v18514_v46, %v10702_v4  ;;  %v10717_v35 = vrot.slane %v19919_v40, 2  ;;  %v18538_v45 = vsel %vm3483_vm0, %v10702_v4, %v10706_v56  ;;  %v18543_v15 = vsel %vm3483_vm0, %v10706_v56, %v10710_v17 }
 0x5f3   : >> { %19917 = vst [vmem:[#allocation99_spill] sm:$0xff] %v18528_v3  ;;  %19920 = vst [vmem:[#allocation100_spill] sm:$0xff] %v18538_v45  ;;  %v10721_v63 = vrot.slane %v19923_v49, 2  ;;  %v19924_v40 = vshrl.u32 %v18462_v34, 16  ;;  %v19926_v4 = vshll.u32 %v18462_v34, 16  ;;  %v10729_v56 = vrot.slane %v19928_v43, 2 }
 0x5f4   : >> { %19922 = vst [vmem:[#allocation101_spill] sm:$0xff] %v18543_v15  ;;  %v10718_v8 = vor.u32 %v10717_v35, %v10716_v42  ;;  %v19930_v49 = vshrl.u32 %v18470_v21, 16 }
 0x5f5   : >> { %v10724_v16 = vrot.slane %v19924_v40, 1  ;;  %v10725_v44 = vrot.slane %v19926_v4, 2  ;;  %v10722_v35 = vor.u32 %v10721_v63, %v10720_v2  ;;  %v19931_v40 = vshll.u32 %v18470_v21, 16 }
 0x5f6   : >> { %13472 = vmatmul.mubr.msk.bf16.gmra.mrb[24].mxu1 %vm307_vm8, %v8087_v25  ;;  %v10714_v25 = vor.u32 %v10713_v36, %v10712_v22  ;;  %v19927_v36 = vshrl.u32 %v18464_v31, 16  ;;  %v10732_v15 = vrot.slane %v19930_v49, 1  ;;  %v19932_v4 = vshrl.u32 %v18472_v33, 16 }
 0x5f7   : >> { %13475 = vmatprep.mubr.msk.bf16.mxu1 %vm307_vm8, %v18438_v10  ;;  %v18570_v43 = vsel %vm3483_vm0, %v10718_v8, %v10722_v35  ;;  %v19934_v2 = vshrl.u32 %v18479_v26, 16  ;;  %v19935_v49 = vshll.u32 %v18479_v26, 16 }
 0x5f8   : >> { %v18550_v10 = vsel %vm3483_vm0, %v10710_v17, %v10714_v25  ;;  %v10728_v22 = vrot.slane %v19927_v36, 1  ;;  %v18559_v42 = vsel %vm3483_vm0, %v10714_v25, %v10718_v8  ;;  %v10733_v17 = vrot.slane %v19931_v40, 2 }
 0x5f9   : >> { %19925 = vst [vmem:[#allocation102_spill] sm:$0xff] %v18550_v10  ;;  %19929 = vst [vmem:[#allocation103_spill] sm:$0xff] %v18559_v42  ;;  %v10726_v10 = vor.u32 %v10725_v44, %v10724_v16  ;;  %v10736_v3 = vrot.slane %v19932_v4, 1  ;;  %v19933_v36 = vshll.u32 %v18472_v33, 16  ;;  %v10740_v63 = vrot.slane %v19934_v2, 1 }
 0x5fa   : >> { %v10730_v45 = vor.u32 %v10729_v56, %v10728_v22  ;;  %v10734_v25 = vor.u32 %v10733_v17, %v10732_v15  ;;  %v10741_v42 = vrot.slane %v19935_v49, 2  ;;  %v19936_v22 = vshrl.u32 %v18481_v39, 16 }
 0x5fb   : >> { %v10737_v46 = vrot.slane %v19933_v36, 2  ;;  %v18577_v40 = vsel %vm3483_vm0, %v10722_v35, %v10726_v10  ;;  %v19938_v17 = vshll.u32 %v18481_v39, 16  ;;  %v19939_v35 = vshrl.u32 %v18493_v12, 16 }
 0x5fc   : >> { %v18580_v16 = vsel %vm3483_vm0, %v10726_v10, %v10730_v45  ;;  %v10744_v56 = vrot.slane %v19936_v22, 1  ;;  %v18587_v15 = vsel %vm3483_vm0, %v10730_v45, %v10734_v25  ;;  %v10742_v8 = vor.u32 %v10741_v42, %v10740_v63 }
 0x5fd   : >> { %v10738_v44 = vor.u32 %v10737_v46, %v10736_v3  ;;  %19937 = vst [vmem:[#allocation104_spill] sm:$0xff] %v18587_v15  ;;  %v10745_v4 = vrot.slane %v19938_v17, 2  ;;  %v10748_v36 = vrot.slane %v19939_v35, 1  ;;  %v19941_v3 = vshll.u32 %v18493_v12, 16 }
 0x5fe   : >> { %13476 = vmatmul.mubr.msk.bf16.gmra.mrb[28].mxu1 %vm307_vm8, %v18445_v38  ;;  %v10752_v38 = vrot.slane %v18330_v11, 1  ;;  %v10753_v45 = vrot.slane %v18333_v24, 2  ;;  %v10756_v63 = vrot.slane %v18347_v48, 1  ;;  %v10757_v49 = vrot.slane %v18339_v50, 2 }
 0x5ff   : >> { %13479 = vmatprep.mubr.msk.bf16.mxu1 %vm307_vm8, %v18449_v41  ;;  %v18596_v46 = vsel %vm3483_vm0, %v10734_v25, %v10738_v44  ;;  %v10749_v10 = vrot.slane %v19941_v3, 2  ;;  %v18603_v42 = vsel %vm3483_vm0, %v10738_v44, %v10742_v8  ;;  %v10746_v2 = vor.u32 %v10745_v4, %v10744_v56 }
 0x600   : >> { %19940 = vst [vmem:[#allocation105_spill] sm:$0xff] %v18596_v46  ;;  %v10754_v41 = vor.u32 %v10753_v45, %v10752_v38  ;;  %v19942_v25 = vshrl.u32 %v18500_v59, 16  ;;  %v19943_v35 = vshll.u32 %v18500_v59, 16  ;;  %v10758_v15 = vor.u32 %v10757_v49, %v10756_v63 }
 0x601   : >> { %v10750_v22 = vor.u32 %v10749_v10, %v10748_v36  ;;  %v18612_v46 = vsel %vm3483_vm0, %v10742_v8, %v10746_v2  ;;  %v19944_v10 = vor.u32 %v18428_v18, %v18426_v32  ;;  %v19945_v38 = vshrl.u32 %v17925_v37, 16 }
 0x602   : >> { %v10760_v17 = vrot.slane %v19942_v25, 1  ;;  %v10761_v3 = vrot.slane %v19943_v35, 2  ;;  %v18623_v36 = vsel %vm3483_vm0, %v10754_v41, %v10758_v15  ;;  %v19946_v63 = vshrl.u32 %v17921_v30, 16 }
 0x603   : >> { %v18615_v44 = vsel %vm3483_vm0, %v10746_v2, %v10750_v22  ;;  %v18618_v56 = vsel %vm3483_vm0, %v10750_v22, %v10754_v41  ;;  %v8123_v8 = vsel %vm836_vm5, %v18423_v5, %v19944_v10  ;;  %v8381_v45 = vrot.slane %v19945_v38, 7  ;;  %v14971_v41 = vld [vmem:[%s17877_s15 + $0x38] sm:$0xff]   ;;  %v19952_v38 = vld [vmem:[#allocation77_spill] sm:$0xff] }
 0x604   : >> { %v18620_v4 = vor.u32 %v10761_v3, %v10760_v17  ;;  %v8384_v49 = vrot.slane %v19946_v63, 7  ;;  %v19947_v32 = vshll.u32 %v17925_v37, 16  ;;  %v19948_v5 = vshll.u32 %v17921_v30, 16  ;;  %v8716_v37 = vld [vmem:[#allocation3 + $0x8] sm:$0x80]  ;;  %v9435_v63 = vld [vmem:[#allocation3 + $0x10] sm:$0xff] }
 0x605   : >> { %v19949_v35 = vrot.slane %v18213_v51, 7  ;;  %v14975_v51 = vld [vmem:[%s17877_s15 + $0x58] sm:$0xff]  }
 0x606   : >> { %v18634_v2 = vsel %vm3483_vm0, %v10758_v15, %v18620_v4  ;;  %13480 = vmatmul.mubr.msk.bf16.gmra.mrb[32].mxu1 %vm307_vm8, %v8123_v8  ;;  %v8382_v18 = vor.u32 %v8381_v45, %v19947_v32  ;;  %v8385_v22 = vor.u32 %v8384_v49, %v19948_v5  ;;  %v8389_v30 = vsel %vm1244_vm7, %v8384_v49, %v18049_v58  ;;  %v14974_v8 = vld [vmem:[%s17877_s15 + $0x50] sm:$0xff]   ;;  %v19954_v32 = vld [vmem:[#allocation80_spill] sm:$0xff] }
 0x607   : >> { %13487 = vmatprep.mubr.msk.bf16.mxu1 %vm307_vm8, %v17998_v61  ;;  %v14972_v61 = vld [vmem:[%s17877_s15 + $0x40] sm:$0xff]   ;;  %v8742_v58 = vshrl.u32 %v8716_v37, 16  ;;  %v9463_v49 = vshll.u32 %v9435_v63, 16  ;;  %v9461_v5 = vshrl.u32 %v9435_v63, 16  ;;  %v19972_v63 = vshll.u32 %v18456_v7, 16 }
 0x608   : >> { %v8383_v25 = vsel %vm1244_vm7, %v17976_v6, %v8382_v18  ;;  %v8386_v15 = vsel %vm1244_vm7, %v8381_v45, %v8385_v22  ;;  %v8432_v6 = vrot.slane %v18330_v11, 7  ;;  %v14973_v11 = vld [vmem:[%s17877_s15 + $0x48] sm:$0xff]  }
 0x609   : >> { %v8744_v17 = vrot.slane %v8742_v58, 7  ;;  %v19953_v45 = vld [vmem:[#allocation78_spill] sm:$0xff]  ;;  %v19961_v58 = vld [vmem:[#allocation97_spill] sm:$0xff] }
 0x60b   : >> { %v8752_v10 = vsel %vm1244_vm7, %v8744_v17, %v8382_v18  ;;  %v9465_v18 = vrot.slane %v9463_v49, 1  ;;  %v9526_v49 = vrot.slane %v19972_v63, 1 }
 0x60d   : >> { %v9466_v22 = vor.u32 %v9465_v18, %v9461_v5  ;;  %v19974_v5 = vshrl.u32 %v18454_v0, 16 }
 0x60e   : >> { %13488 = vmatmul.mubr.msk.bf16.vlgmr.msra.gmra.mrb[0].mxu1 %vm307_vm8, %v8383_v25  ;;  %v19957_v25 = vld [vmem:[#allocation86_spill] sm:$0xff] }
 0x60f   : >> { %13491 = vmatprep.mubr.msk.bf16.mxu1 %vm307_vm8, %v8386_v15  ;;  %13524 = vmatpush3.bf16.msra.mxu1 %v18288_v53  ;;  %v8435_v53 = vor.u32 %v18333_v24, %v8432_v6  ;;  %v14991_v24 = vld [vmem:[#allocation3 + $0x58] sm:$0xff] }
 0x610   : >> { %13525 = vmatprep.subr.bf16.mxu1 %v14971_v41 }
 0x611   : >> { %v8436_v3 = vsel %vm1244_vm7, %v19949_v35, %v8435_v53  ;;  %v19962_v53 = vshll.u32 %v19961_v58, 16  ;;  %v14977_v35 = vld [vmem:[%s17877_s15 + $0x68] sm:$0xff]  }
 0x613   : >> { %13526 = vmatpush3.bf16.msra.mxu1 %v14971_v41  ;;  %v19956_v41 = vld [vmem:[#allocation84_spill] sm:$0xff]  ;;  %v9486_v17 = vrot.slane %v19962_v53, 1 }
 0x614   : >> { %13563 = vmatprep.subr.bf16.mxu1 %v14972_v61 }
 0x616   : >> { %13492 = vmatmul.mubr.msk.bf16.gmra.mrb[4].mxu1 %vm307_vm8, %v8389_v30 }
 0x617   : >> { %13495 = vmatprep.mubr.msk.bf16.mxu1 %vm307_vm8, %v18127_v54 }
 0x61e   : >> { %13496 = vmatmul.mubr.msk.bf16.gmra.mrb[8].mxu1 %vm307_vm8, %v18178_v1 }
 0x61f   : >> { %13499 = vmatprep.mubr.msk.bf16.mxu1 %vm307_vm8, %v18181_v27 }
 0x626   : >> { %13500 = vmatmul.mubr.msk.bf16.gmra.mrb[12].mxu1 %vm307_vm8, %v18199_v20 }
 0x627   : >> { %13503 = vmatprep.mubr.msk.bf16.mxu1 %vm307_vm8, %v18222_v47 }
 0x62e   : >> { %13504 = vmatmul.mubr.msk.bf16.gmra.mrb[16].mxu1 %vm307_vm8, %v18225_v55 }
 0x62f   : >> { %13507 = vmatprep.mubr.msk.bf16.mxu1 %vm307_vm8, %v18228_v57 }
 0x636   : >> { %13508 = vmatmul.mubr.msk.bf16.gmra.mrb[20].mxu1 %vm307_vm8, %v18231_v13 }
 0x637   : >> { %13511 = vmatprep.mubr.msk.bf16.mxu1 %vm307_vm8, %v18234_v28 }
 0x63e   : >> { %13512 = vmatmul.mubr.msk.bf16.gmra.mrb[24].mxu1 %vm307_vm8, %v18254_v60 }
 0x63f   : >> { %13515 = vmatprep.mubr.msk.bf16.mxu1 %vm307_vm8, %v18269_v19 }
 0x646   : >> { %13516 = vmatmul.mubr.msk.bf16.gmra.mrb[28].mxu1 %vm307_vm8, %v18272_v62 }
 0x647   : >> { %13519 = vmatprep.mubr.msk.bf16.mxu1 %vm307_vm8, %v18275_v23 }
 0x64e   : >> { %13520 = vmatmul.mubr.msk.bf16.gmra.mrb[32].mxu1 %vm307_vm8, %v8436_v3 }
 0x64f   : >> { %13527 = vmatprep.mubr.msk.bf16.mxu1 %vm307_vm8, %v8752_v10 }
 0x656   : >> { %13528 = vmatmul.mubr.msk.bf16.vlgmr.msra.gmra.mrb[0].mxu1 %vm307_vm8, %v8386_v15  ;;  %v9471_v15 = vsel %vm2292_vm4, %v9466_v22, %v19957_v25  ;;  %v19975_v25 = vshll.u32 %v18462_v34, 16 }
 0x657   : >> { %13531 = vmatprep.mubr.msk.bf16.mxu1 %vm307_vm8, %v8389_v30  ;;  %13564 = vmatpush3.bf16.msra.mxu1 %v14972_v61  ;;  %v19958_v61 = vld [vmem:[#allocation85_spill] sm:$0xff]  ;;  %v19959_v30 = vld [vmem:[#allocation82_spill] sm:$0xff] }
 0x658   : >> { %13565 = vmatprep.subr.bf16.mxu1 %v14973_v11  ;;  %v19960_v37 = vshrl.u32 %v19959_v30, 16 }
 0x65b   : >> { %13566 = vmatpush3.bf16.msra.mxu1 %v14973_v11  ;;  %v19964_v11 = vshll.u32 %v18432_v14, 16 }
 0x65c   : >> { %13603 = vmatprep.subr.bf16.mxu1 %v14974_v8 }
 0x65e   : >> { %13532 = vmatmul.mubr.msk.bf16.gmra.mrb[4].mxu1 %vm307_vm8, %v18127_v54  ;;  %v14983_v54 = vld [vmem:[#allocation3 + $0x18] sm:$0xff] }
 0x65f   : >> { %13535 = vmatprep.mubr.msk.bf16.mxu1 %vm307_vm8, %v18178_v1  ;;  %v14984_v1 = vld [vmem:[#allocation3 + $0x20] sm:$0xff] }
 0x666   : >> { %13536 = vmatmul.mubr.msk.bf16.gmra.mrb[8].mxu1 %vm307_vm8, %v18181_v27  ;;  %v14985_v27 = vld [vmem:[#allocation3 + $0x28] sm:$0xff] }
 0x667   : >> { %13539 = vmatprep.mubr.msk.bf16.mxu1 %vm307_vm8, %v18199_v20  ;;  %v14986_v20 = vld [vmem:[#allocation3 + $0x30] sm:$0xff] }
 0x66e   : >> { %13540 = vmatmul.mubr.msk.bf16.gmra.mrb[12].mxu1 %vm307_vm8, %v18222_v47  ;;  %v14987_v47 = vld [vmem:[#allocation3 + $0x38] sm:$0xff] }
 0x66f   : >> { %13543 = vmatprep.mubr.msk.bf16.mxu1 %vm307_vm8, %v18225_v55  ;;  %v8884_v55 = vrot.slane %v18347_v48, 7  ;;  %v19951_v48 = vld [vmem:[#allocation79_spill] sm:$0xff] }
 0x676   : >> { %13544 = vmatmul.mubr.msk.bf16.gmra.mrb[16].mxu1 %vm307_vm8, %v18228_v57  ;;  %v14982_v57 = vld [vmem:[#allocation3 + $0x10] sm:$0xff] }
 0x677   : >> { %13547 = vmatprep.mubr.msk.bf16.mxu1 %vm307_vm8, %v18231_v13  ;;  %v8887_v13 = vor.u32 %v18339_v50, %v8884_v55  ;;  %v19950_v50 = vld [vmem:[#allocation76_spill] sm:$0xff]  ;;  %v14978_v55 = vld [vmem:[%s17877_s15 + $0x70] sm:$0xff]  }
 0x67e   : >> { %13548 = vmatmul.mubr.msk.bf16.gmra.mrb[20].mxu1 %vm307_vm8, %v18234_v28  ;;  %v8888_v28 = vsel %vm1244_vm7, %v8432_v6, %v8887_v13  ;;  %v9482_v6 = vor.u32 %v19960_v37, %v19958_v61  ;;  %v19965_v13 = vshrl.u32 %v18432_v14, 16 }
 0x67f   : >> { %13551 = vmatprep.mubr.msk.bf16.mxu1 %vm307_vm8, %v18254_v60  ;;  %v14988_v60 = vld [vmem:[#allocation3 + $0x40] sm:$0xff] }
 0x680   : >> { %v9487_v10 = vsel %vm2292_vm4, %v9482_v6, %v9486_v17  ;;  %v19976_v6 = vshrl.u32 %v18462_v34, 16 }
 0x686   : >> { %13552 = vmatmul.mubr.msk.bf16.gmra.mrb[24].mxu1 %vm307_vm8, %v18269_v19  ;;  %v14989_v19 = vld [vmem:[#allocation3 + $0x48] sm:$0xff] }
 0x687   : >> { %13555 = vmatprep.mubr.msk.bf16.mxu1 %vm307_vm8, %v18272_v62  ;;  %v14990_v62 = vld [vmem:[#allocation3 + $0x50] sm:$0xff] }
 0x68e   : >> { %13556 = vmatmul.mubr.msk.bf16.gmra.mrb[28].mxu1 %vm307_vm8, %v18275_v23  ;;  %v14976_v23 = vld [vmem:[%s17877_s15 + $0x60] sm:$0xff]  }
 0x68f   : >> { %13559 = vmatprep.mubr.msk.bf16.mxu1 %vm307_vm8, %v8436_v3  ;;  %v19963_v3 = vld [vmem:[#allocation95_spill] sm:$0xff] }
 0x696   : >> { %13560 = vmatmul.mubr.msk.bf16.gmra.mrb[32].mxu1 %vm307_vm8, %v8888_v28 }
 0x697   : >> { %13567 = vmatprep.mubr.msk.bf16.mxu1 %vm307_vm8, %v14982_v57  ;;  %v19966_v57 = vshrl.u32 %v19961_v58, 16 }
 0x69e   : >> { %13568 = vmatmul.mubr.msk.bf16.vlgmr.msra.gmra.mrb[0].mxu1 %vm307_vm8, %v14983_v54  ;;  %v19967_v54 = vshll.u32 %v18440_v52, 16 }
 0x69f   : >> { %13571 = vmatprep.mubr.msk.bf16.mxu1 %vm307_vm8, %v14984_v1  ;;  %13604 = vmatpush3.bf16.msra.mxu1 %v14974_v8  ;;  %v9494_v8 = vrot.slane %v19964_v11, 1 }
 0x6a0   : >> { %13605 = vmatprep.subr.bf16.mxu1 %v14975_v51  ;;  %v9502_v1 = vrot.slane %v19967_v54, 1  ;;  %v9453_v54 = vld [vmem:[#allocation3 + $0xa0] sm:$0x1] }
 0x6a1   : >> { %v9498_v28 = vor.u32 %v19965_v13, %v9494_v8  ;;  %v19980_v13 = vld [vmem:[#allocation87_spill] sm:$0xff] }
 0x6a3   : >> { %13606 = vmatpush3.bf16.msra.mxu1 %v14975_v51  ;;  %v9490_v51 = vor.u32 %v19966_v57, %v9486_v17  ;;  %v19977_v17 = vld [vmem:[#allocation81_spill] sm:$0xff] }
 0x6a4   : >> { %13643 = vmatprep.subr.bf16.mxu1 %v14976_v23  ;;  %v19982_v57 = vld [vmem:[#allocation89_spill] sm:$0xff] }
 0x6a6   : >> { %13572 = vmatmul.mubr.msk.bf16.gmra.mrb[4].mxu1 %vm307_vm8, %v14985_v27  ;;  %v9495_v27 = vsel %vm2292_vm4, %v9490_v51, %v9494_v8  ;;  %v19979_v8 = vld [vmem:[#allocation88_spill] sm:$0xff] }
 0x6a7   : >> { %13575 = vmatprep.mubr.msk.bf16.mxu1 %vm307_vm8, %v14986_v20  ;;  %v9503_v20 = vsel %vm2292_vm4, %v9498_v28, %v9502_v1  ;;  %v19981_v28 = vld [vmem:[#allocation90_spill] sm:$0xff]  ;;  %v19983_v51 = vld [vmem:[#allocation92_spill] sm:$0xff] }
 0x6ae   : >> { %13576 = vmatmul.mubr.msk.bf16.gmra.mrb[8].mxu1 %vm307_vm8, %v14987_v47 }
 0x6af   : >> { %13579 = vmatprep.mubr.msk.bf16.mxu1 %vm307_vm8, %v14988_v60  ;;  %v19969_v60 = vshrl.u32 %v18442_v29, 16 }
 0x6b6   : >> { %13580 = vmatmul.mubr.msk.bf16.gmra.mrb[12].mxu1 %vm307_vm8, %v14989_v19 }
 0x6b7   : >> { %13583 = vmatprep.mubr.msk.bf16.mxu1 %vm307_vm8, %v14990_v62  ;;  %v19970_v62 = vshrl.u32 %v18440_v52, 16 }
 0x6be   : >> { %13584 = vmatmul.mubr.msk.bf16.gmra.mrb[16].mxu1 %vm307_vm8, %v14991_v24  ;;  %v9506_v24 = vor.u32 %v19970_v62, %v9502_v1  ;;  %v9604_v1 = vshll.u32 %v9453_v54, 16 }
 0x6bf   : >> { %13587 = vmatprep.mubr.msk.bf16.mxu1 %vm307_vm8, %v18058_v9  ;;  %v19955_v9 = vld [vmem:[#allocation83_spill] sm:$0xff] }
 0x6c6   : >> { %13588 = vmatmul.mubr.msk.bf16.gmra.mrb[20].mxu1 %vm307_vm8, %v19950_v50  ;;  %v19971_v50 = vshll.u32 %v18454_v0, 16 }
 0x6c7   : >> { %13591 = vmatprep.mubr.msk.bf16.mxu1 %vm307_vm8, %v19951_v48 }
 0x6c8   : >> { %v9518_v48 = vrot.slane %v19971_v50, 1  ;;  %v14980_v50 = vld [vmem:[%s17877_s15 + $0x80] sm:$0xff]  }
 0x6ca   : >> { %v9522_v22 = vor.u32 %v19974_v5, %v9518_v48 }
 0x6cc   : >> { %v9527_v61 = vsel %vm2292_vm4, %v9522_v22, %v9526_v49  ;;  %v19992_v22 = vshll.u32 %v18479_v26, 16 }
 0x6ce   : >> { %13592 = vmatmul.mubr.msk.bf16.gmra.mrb[24].mxu1 %vm307_vm8, %v19952_v38 }
 0x6cf   : >> { %13595 = vmatprep.mubr.msk.bf16.mxu1 %vm307_vm8, %v19953_v45 }
 0x6d6   : >> { %13596 = vmatmul.mubr.msk.bf16.gmra.mrb[28].mxu1 %vm307_vm8, %v19954_v32  ;;  %v19973_v32 = vshrl.u32 %v18456_v7, 16 }
 0x6d7   : >> { %13599 = vmatprep.mubr.msk.bf16.mxu1 %vm307_vm8, %v19955_v9 }
 0x6d8   : >> { %v9530_v18 = vor.u32 %v19973_v32, %v9526_v49  ;;  %v19991_v49 = vshrl.u32 %v18470_v21, 16 }
 0x6de   : >> { %13600 = vmatmul.mubr.msk.bf16.gmra.mrb[32].mxu1 %vm307_vm8, %v19956_v41 }
 0x6df   : >> { %13607 = vmatprep.mubr.msk.bf16.mxu1 %vm307_vm8, %v9471_v15  ;;  %v9534_v15 = vrot.slane %v19975_v25, 1  ;;  %v10010_v25 = vrot.slane %v19992_v22, 1  ;;  %v10372_v22 = vrot.slane %v18440_v52, 1 }
 0x6e1   : >> { %v9535_v37 = vsel %vm2292_vm4, %v9530_v18, %v9534_v15  ;;  %v9538_v53 = vor.u32 %v19976_v6, %v9534_v15  ;;  %v19993_v15 = vshrl.u32 %v18472_v33, 16 }
 0x6e6   : >> { %13608 = vmatmul.mubr.msk.bf16.vlgmr.msra.gmra.mrb[0].mxu1 %vm307_vm8, %v19963_v3 }
 0x6e7   : >> { %13611 = vmatprep.mubr.msk.bf16.mxu1 %vm307_vm8, %v9487_v10  ;;  %13644 = vmatpush3.bf16.msra.mxu1 %v14976_v23  ;;  %v19968_v23 = vshll.u32 %v18442_v29, 16 }
 0x6e8   : >> { %13645 = vmatprep.subr.bf16.mxu1 %v14977_v35 }
 0x6e9   : >> { %v9510_v47 = vrot.slane %v19968_v23, 1  ;;  %v19984_v23 = vld [vmem:[#allocation94_spill] sm:$0xff] }
 0x6eb   : >> { %13646 = vmatpush3.bf16.msra.mxu1 %v14977_v35  ;;  %v9514_v19 = vor.u32 %v19969_v60, %v9510_v47  ;;  %v9511_v38 = vsel %vm2292_vm4, %v9506_v24, %v9510_v47  ;;  %v19978_v35 = vrot.slane %v19977_v17, 1  ;;  %v19985_v47 = vld [vmem:[#allocation96_spill] sm:$0xff]  ;;  %v9606_v60 = vrot.slane %v9604_v1, 1 }
 0x6ec   : >> { %13683 = vmatprep.subr.bf16.mxu1 %v14978_v55  ;;  %v14979_v24 = vld [vmem:[%s17877_s15 + $0x78] sm:$0xff]  }
 0x6ed   : >> { %v9519_v45 = vsel %vm2292_vm4, %v9514_v19, %v9518_v48  ;;  %v9543_v11 = vsel %vm2292_vm4, %v9538_v53, %v19978_v35  ;;  %v19986_v19 = vld [vmem:[#allocation93_spill] sm:$0xff] }
 0x6ee   : >> { %13612 = vmatmul.mubr.msk.bf16.gmra.mrb[4].mxu1 %vm307_vm8, %v9495_v27  ;;  %v9607_v62 = vsel %vm2292_vm4, %v19986_v19, %v9606_v60 }
 0x6ef   : >> { %13615 = vmatprep.mubr.msk.bf16.mxu1 %vm307_vm8, %v9503_v20 }
 0x6f6   : >> { %13616 = vmatmul.mubr.msk.bf16.gmra.mrb[8].mxu1 %vm307_vm8, %v9511_v38 }
 0x6f7   : >> { %13619 = vmatprep.mubr.msk.bf16.mxu1 %vm307_vm8, %v9519_v45 }
 0x6fe   : >> { %13620 = vmatmul.mubr.msk.bf16.gmra.mrb[12].mxu1 %vm307_vm8, %v9527_v61 }
 0x6ff   : >> { %13623 = vmatprep.mubr.msk.bf16.mxu1 %vm307_vm8, %v9535_v37 }
 0x706   : >> { %13624 = vmatmul.mubr.msk.bf16.gmra.mrb[16].mxu1 %vm307_vm8, %v9543_v11 }
 0x707   : >> { %13627 = vmatprep.mubr.msk.bf16.mxu1 %vm307_vm8, %v19979_v8  ;;  %v19996_v8 = vshll.u32 %v18493_v12, 16 }
 0x70e   : >> { %13628 = vmatmul.mubr.msk.bf16.gmra.mrb[20].mxu1 %vm307_vm8, %v19980_v13  ;;  %v10026_v13 = vrot.slane %v19996_v8, 1  ;;  %v10394_v8 = vrot.slane %v19955_v9, 1 }
 0x70f   : >> { %13631 = vmatprep.mubr.msk.bf16.mxu1 %vm307_vm8, %v19981_v28  ;;  %v19997_v28 = vshrl.u32 %v18481_v39, 16 }
 0x716   : >> { %13632 = vmatmul.mubr.msk.bf16.gmra.mrb[24].mxu1 %vm307_vm8, %v19982_v57 }
 0x717   : >> { %13635 = vmatprep.mubr.msk.bf16.mxu1 %vm307_vm8, %v19983_v51  ;;  %v19998_v51 = vshrl.u32 %v18493_v12, 16 }
 0x719   : >> { %v10030_v54 = vor.u32 %v19998_v51, %v10026_v13 }
 0x71e   : >> { %13636 = vmatmul.mubr.msk.bf16.gmra.mrb[28].mxu1 %vm307_vm8, %v19984_v23  ;;  %v19999_v23 = vld [vmem:[#allocation91_spill] sm:$0xff] }
 0x71f   : >> { %13639 = vmatprep.mubr.msk.bf16.mxu1 %vm307_vm8, %v19985_v47  ;;  %v10035_v60 = vsel %vm2292_vm4, %v10030_v54, %v19999_v23 }
 0x726   : >> { %13640 = vmatmul.mubr.msk.bf16.gmra.mrb[32].mxu1 %vm307_vm8, %v9607_v62  ;;  %v18876_v62 = vld [vmem:[#allocation3 + $0xa8] sm:$0x1] }
 0x727   : >> { %13647 = vmatprep.mubr.msk.bf16.mxu1 %vm307_vm8, %v19963_v3  ;;  %v19987_v3 = vshll.u32 %v18464_v31, 16  ;;  %v10400_v54 = vrot.slane %v18876_v62, 1 }
 0x729   : >> { %v9986_v48 = vrot.slane %v19987_v3, 1 }
 0x72e   : >> { %13648 = vmatmul.mubr.msk.bf16.vlgmr.msra.gmra.mrb[0].mxu1 %vm307_vm8, %v9487_v10  ;;  %v9987_v10 = vsel %vm2292_vm4, %v9538_v53, %v9986_v48  ;;  %v19995_v53 = vshrl.u32 %v18479_v26, 16 }
 0x72f   : >> { %13651 = vmatprep.mubr.msk.bf16.mxu1 %vm307_vm8, %v9495_v27  ;;  %13684 = vmatpush3.bf16.msra.mxu1 %v14978_v55  ;;  %v19988_v55 = vshll.u32 %v18470_v21, 16 }
 0x730   : >> { %13685 = vmatprep.subr.bf16.mxu1 %v14979_v24  ;;  %v10014_v17 = vor.u32 %v19995_v53, %v10010_v25  ;;  %v10386_v53 = vrot.slane %v18472_v33, 1 }
 0x731   : >> { %v9994_v27 = vrot.slane %v19988_v55, 1  ;;  %v20001_v55 = vshrl.u32 %v18500_v59, 16 }
 0x733   : >> { %13686 = vmatpush3.bf16.msra.mxu1 %v14979_v24  ;;  %v9998_v32 = vor.u32 %v19991_v49, %v9994_v27  ;;  %v20000_v24 = vshll.u32 %v18500_v59, 16 }
 0x734   : >> { %13723 = vmatprep.subr.bf16.mxu1 %v14980_v50 }
 0x735   : >> { %v10050_v3 = vrot.slane %v20000_v24, 1 }
 0x736   : >> { %13652 = vmatmul.mubr.msk.bf16.gmra.mrb[4].mxu1 %vm307_vm8, %v9503_v20  ;;  %v19989_v20 = vshrl.u32 %v18464_v31, 16 }
 0x737   : >> { %13655 = vmatprep.mubr.msk.bf16.mxu1 %vm307_vm8, %v9511_v38  ;;  %v19990_v38 = vshll.u32 %v18472_v33, 16  ;;  %v10392_v33 = vrot.slane %v18493_v12, 1 }
 0x738   : >> { %v9990_v63 = vor.u32 %v19989_v20, %v9986_v48  ;;  %v10056_v48 = vshll.u32 %v18876_v62, 16  ;;  %v20006_v62 = vld [vmem:[#allocation102_spill] sm:$0xff] }
 0x73a   : >> { %v9995_v18 = vsel %vm2292_vm4, %v9990_v63, %v9994_v27  ;;  %v10054_v27 = vor.u32 %v20001_v55, %v10050_v3  ;;  %v10058_v20 = vrot.slane %v10056_v48, 1  ;;  %v18888_v63 = vld [vmem:[#allocation3 + $0x18] sm:$0xfe]  ;;  %v20004_v48 = vld [vmem:[#allocation100_spill] sm:$0xff]  ;;  %v20007_v55 = vld [vmem:[#allocation103_spill] sm:$0xff] }
 0x73b   : >> { %v10365_v49 = vrot.slane %v18888_v63, 1  ;;  %v10692_v51 = vshll.u32 %v18888_v63, 16 }
 0x73d   : >> { %v10694_v23 = vrot.slane %v10692_v51, 2 }
 0x73e   : >> { %13656 = vmatmul.mubr.msk.bf16.gmra.mrb[8].mxu1 %vm307_vm8, %v9519_v45  ;;  %v10002_v45 = vrot.slane %v19990_v38, 1  ;;  %v10366_v38 = vrot.slane %v19959_v30, 1 }
 0x73f   : >> { %13659 = vmatprep.mubr.msk.bf16.mxu1 %vm307_vm8, %v9527_v61 }
 0x740   : >> { %v10003_v5 = vsel %vm2292_vm4, %v9998_v32, %v10002_v45  ;;  %v10006_v61 = vor.u32 %v19993_v15, %v10002_v45  ;;  %v10059_v45 = vsel %vm2292_vm4, %v10054_v27, %v10058_v20  ;;  %v10370_v32 = vrot.slane %v18432_v14, 1  ;;  %v20008_v27 = vld [vmem:[#allocation104_spill] sm:$0xff]  ;;  %v20009_v20 = vld [vmem:[#allocation105_spill] sm:$0xff] }
 0x741   : >> { %v10376_v15 = vrot.slane %v18454_v0, 1 }
 0x742   : >> { %v10011_v35 = vsel %vm2292_vm4, %v10006_v61, %v10010_v25  ;;  %v10374_v25 = vrot.slane %v18442_v29, 1  ;;  %v10378_v61 = vrot.slane %v18456_v7, 1  ;;  %v10380_v29 = vrot.slane %v18462_v34, 1 }
 0x743   : >> { %v10384_v7 = vrot.slane %v18470_v21, 1 }
 0x744   : >> { %v10375_v14 = vsel %vm3172_vm6, %v10372_v22, %v10374_v25  ;;  %v10379_v52 = vsel %vm3172_vm6, %v10376_v15, %v10378_v61 }
 0x745   : >> { %v10387_v34 = vsel %vm3172_vm6, %v10384_v7, %v10386_v53 }
 0x746   : >> { %13660 = vmatmul.mubr.msk.bf16.gmra.mrb[12].mxu1 %vm307_vm8, %v9535_v37  ;;  %v19994_v37 = vshll.u32 %v18481_v39, 16 }
 0x747   : >> { %13663 = vmatprep.mubr.msk.bf16.mxu1 %vm307_vm8, %v9987_v10  ;;  %v10051_v10 = vsel %vm2292_vm4, %v19986_v19, %v10050_v3  ;;  %v10368_v19 = vrot.slane %v19961_v58, 1  ;;  %v10373_v58 = vsel %vm3172_vm6, %v10370_v32, %v10372_v22  ;;  %v20003_v3 = vld [vmem:[#allocation99_spill] sm:$0xff] }
 0x748   : >> { %v10018_v6 = vrot.slane %v19994_v37, 1  ;;  %v10382_v37 = vrot.slane %v18464_v31, 1  ;;  %v10388_v31 = vrot.slane %v18479_v26, 1  ;;  %v10395_v26 = vsel %vm3172_vm6, %v10392_v33, %v10394_v8 }
 0x749   : >> { %v10371_v30 = vsel %vm3172_vm6, %v10368_v19, %v10370_v32 }
 0x74a   : >> { %v10019_v11 = vsel %vm2292_vm4, %v10014_v17, %v10018_v6  ;;  %v10022_v57 = vor.u32 %v19997_v28, %v10018_v6  ;;  %v10381_v6 = vsel %vm3172_vm6, %v10378_v61, %v10380_v29  ;;  %v10383_v0 = vsel %vm3172_vm6, %v10380_v29, %v10382_v37 }
 0x74b   : >> { %v10385_v17 = vsel %vm3172_vm6, %v10382_v37, %v10384_v7  ;;  %v10398_v28 = vrot.slane %v18500_v59, 1  ;;  %v20002_v59 = vld [vmem:[#allocation98_spill] sm:$0xff]  ;;  %v20014_v37 = vld [vmem:[#allocation20_spill] sm:$0xff]  ;;  %v20017_v7 = vld [vmem:[#allocation26_spill] sm:$0xff] }
 0x74c   : >> { %v10027_v1 = vsel %vm2292_vm4, %v10022_v57, %v10026_v13  ;;  %v10689_v57 = vshrl.u32 %v18888_v63, 16 }
 0x74e   : >> { %13664 = vmatmul.mubr.msk.bf16.gmra.mrb[16].mxu1 %vm307_vm8, %v9995_v18  ;;  %v14981_v18 = vld [vmem:[%s17877_s15 + $0x88] sm:$0xff]  }
 0x74f   : >> { %13667 = vmatprep.mubr.msk.bf16.mxu1 %vm307_vm8, %v10003_v5  ;;  %v10369_v5 = vsel %vm3172_vm6, %v10366_v38, %v10368_v19 }
 0x756   : >> { %13668 = vmatmul.mubr.msk.bf16.gmra.mrb[20].mxu1 %vm307_vm8, %v10011_v35  ;;  %v10390_v35 = vrot.slane %v18481_v39, 1  ;;  %v10396_v39 = vrot.slane %v19956_v41, 1  ;;  %v10401_v41 = vsel %vm3172_vm6, %v10398_v28, %v10400_v54 }
 0x757   : >> { %13671 = vmatprep.mubr.msk.bf16.mxu1 %vm307_vm8, %v10019_v11  ;;  %v10389_v11 = vsel %vm3172_vm6, %v10386_v53, %v10388_v31 }
 0x758   : >> { %v10391_v21 = vsel %vm3172_vm6, %v10388_v31, %v10390_v35  ;;  %v10393_v13 = vsel %vm3172_vm6, %v10390_v35, %v10392_v33  ;;  %v10397_v12 = vsel %vm3172_vm6, %v10394_v8, %v10396_v39  ;;  %v10399_v9 = vsel %vm3172_vm6, %v10396_v39, %v10398_v28  ;;  %v20020_v31 = vld [vmem:[#allocation15_spill] sm:$0xff]  ;;  %v20023_v35 = vld [vmem:[#allocation17_spill] sm:$0xff] }
 0x75e   : >> { %13672 = vmatmul.mubr.msk.bf16.gmra.mrb[24].mxu1 %vm307_vm8, %v10027_v1  ;;  %v10691_v1 = vrot.slane %v10689_v57, 1 }
 0x75f   : >> { %13675 = vmatprep.mubr.msk.bf16.mxu1 %vm307_vm8, %v10035_v60 }
 0x760   : >> { %v10695_v60 = vor.u32 %v10694_v23, %v10691_v1  ;;  %v20028_v23 = vld [vmem:[#allocation68_spill] sm:$0xff] }
 0x762   : >> { %v10699_v24 = vsel %vm3483_vm0, %v10695_v60, %v20002_v59  ;;  %v20029_v59 = vld [vmem:[#allocation70_spill] sm:$0xff] }
 0x766   : >> { %13676 = vmatmul.mubr.msk.bf16.gmra.mrb[28].mxu1 %vm307_vm8, %v19985_v47  ;;  %v10367_v47 = vsel %vm3172_vm6, %v10365_v49, %v10366_v38 }
 0x767   : >> { %13679 = vmatprep.mubr.msk.bf16.mxu1 %vm307_vm8, %v10051_v10  ;;  %v20005_v10 = vld [vmem:[#allocation101_spill] sm:$0xff] }
 0x76e   : >> { %13680 = vmatmul.mubr.msk.bf16.gmra.mrb[32].mxu1 %vm307_vm8, %v10059_v45 }
 0x76f   : >> { %13687 = vmatprep.mubr.msk.bf16.mxu1 %vm307_vm8, %v10367_v47 }
 0x776   : >> { %13688 = vmatmul.mubr.msk.bf16.vlgmr.msra.gmra.mrb[0].mxu1 %vm307_vm8, %v10369_v5 }
 0x777   : >> { %13691 = vmatprep.mubr.msk.bf16.mxu1 %vm307_vm8, %v10371_v30  ;;  %13724 = vmatpush3.bf16.msra.mxu1 %v14980_v50  ;;  %v10377_v50 = vsel %vm3172_vm6, %v10374_v25, %v10376_v15  ;;  %v20012_v25 = vld [vmem:[#allocation72_spill] sm:$0xff]  ;;  %v20013_v15 = vld [vmem:[#allocation74_spill] sm:$0xff] }
 0x778   : >> { %13725 = vmatprep.subr.bf16.mxu1 %v14981_v18 }
 0x77b   : >> { %13726 = vmatpush3.bf16.msra.mxu1 %v14981_v18  ;;  %v20011_v18 = vld [vmem:[#allocation75_spill] sm:$0xff] }
 0x77e   : >> { %13692 = vmatmul.mubr.msk.bf16.gmra.mrb[4].mxu1 %vm307_vm8, %v10373_v58 }
 0x77f   : >> { %13695 = vmatprep.mubr.msk.bf16.mxu1 %vm307_vm8, %v10375_v14 }
 0x786   : >> { %13696 = vmatmul.mubr.msk.bf16.gmra.mrb[8].mxu1 %vm307_vm8, %v10377_v50 }
 0x787   : >> { %13699 = vmatprep.mubr.msk.bf16.mxu1 %vm307_vm8, %v10379_v52 }
 0x78e   : >> { %13700 = vmatmul.mubr.msk.bf16.gmra.mrb[12].mxu1 %vm307_vm8, %v10381_v6 }
 0x78f   : >> { %13703 = vmatprep.mubr.msk.bf16.mxu1 %vm307_vm8, %v10383_v0 }
 0x796   : >> { %13704 = vmatmul.mubr.msk.bf16.gmra.mrb[16].mxu1 %vm307_vm8, %v10385_v17 }
 0x797   : >> { %13707 = vmatprep.mubr.msk.bf16.mxu1 %vm307_vm8, %v10387_v34 }
 0x79e   : >> { %13708 = vmatmul.mubr.msk.bf16.gmra.mrb[20].mxu1 %vm307_vm8, %v10389_v11 }
 0x79f   : >> { %13711 = vmatprep.mubr.msk.bf16.mxu1 %vm307_vm8, %v10391_v21 }
 0x7a6   : >> { %13712 = vmatmul.mubr.msk.bf16.gmra.mrb[24].mxu1 %vm307_vm8, %v10393_v13 }
 0x7a7   : >> { %13715 = vmatprep.mubr.msk.bf16.mxu1 %vm307_vm8, %v10395_v26  ;;  %v20026_v26 = vld [vmem:[#allocation69_spill] sm:$0xff] }
 0x7ae   : >> { %13716 = vmatmul.mubr.msk.bf16.gmra.mrb[28].mxu1 %vm307_vm8, %v10397_v12  ;;  %v20027_v12 = vld [vmem:[#allocation71_spill] sm:$0xff] }
 0x7af   : >> { %13719 = vmatprep.mubr.msk.bf16.mxu1 %vm307_vm8, %v10399_v9 }
 0x7b6   : >> { %13720 = vmatmul.mubr.msk.bf16.gmra.mrb[32].mxu1 %vm307_vm8, %v10401_v41 }
 0x7b7   : >> { %13727 = vmatprep.mubr.msk.bf16.mxu1 %vm307_vm8, %v10699_v24 }
 0x7be   : >> { %13728 = vmatmul.mubr.msk.bf16.vlgmr.msra.gmra.mrb[0].mxu1 %vm307_vm8, %v20003_v3 }
 0x7bf   : >> { %13731 = vmatprep.mubr.msk.bf16.mxu1 %vm307_vm8, %v20004_v48 }
 0x7c6   : >> { %13732 = vmatmul.mubr.msk.bf16.gmra.mrb[4].mxu1 %vm307_vm8, %v20005_v10 }
 0x7c7   : >> { %13735 = vmatprep.mubr.msk.bf16.mxu1 %vm307_vm8, %v20006_v62  ;;  %v20030_v62 = vld [vmem:[#allocation19_spill] sm:$0xff] }
 0x7ce   : >> { %13736 = vmatmul.mubr.msk.bf16.gmra.mrb[8].mxu1 %vm307_vm8, %v20007_v55 }
 0x7cf   : >> { %13739 = vmatprep.mubr.msk.bf16.mxu1 %vm307_vm8, %v18570_v43  ;;  %v10681_v43 = vld [vmem:[#allocation3 + $0xa8] sm:$0x3] }
 0x7d6   : >> { %13740 = vmatmul.mubr.msk.bf16.gmra.mrb[12].mxu1 %vm307_vm8, %v18577_v40  ;;  %v10765_v40 = vshrl.u32 %v10681_v43, 16 }
 0x7d7   : >> { %13743 = vmatprep.mubr.msk.bf16.mxu1 %vm307_vm8, %v18580_v16  ;;  %v10768_v16 = vshll.u32 %v10681_v43, 16 }
 0x7d8   : >> { %v10767_v63 = vrot.slane %v10765_v40, 1 }
 0x7d9   : >> { %v10770_v38 = vrot.slane %v10768_v16, 2  ;;  %v20034_v16 = vld [vmem:[#allocation5_spill] sm:$0xff] }
 0x7de   : >> { %13744 = vmatmul.mubr.msk.bf16.gmra.mrb[16].mxu1 %vm307_vm8, %v20008_v27  ;;  %v20032_v27 = vld [vmem:[#allocation22_spill] sm:$0xff] }
 0x7df   : >> { %13747 = vmatprep.mubr.msk.bf16.mxu1 %vm307_vm8, %v20009_v20 }
 0x7e6   : >> { %13748 = vmatmul.mubr.msk.bf16.gmra.mrb[20].mxu1 %vm307_vm8, %v18603_v42  ;;  %v10771_v42 = vor.u32 %v10770_v38, %v10767_v63  ;;  %v20037_v63 = vld [vmem:[#allocation6_spill] sm:$0xff] }
 0x7e7   : >> { %13751 = vmatprep.mubr.msk.bf16.mxu1 %vm307_vm8, %v18612_v46 }
 0x7e8   : >> { %v10772_v46 = vsel %vm3483_vm0, %v18620_v4, %v10771_v42 }
 0x7ee   : >> { %13752 = vmatmul.mubr.msk.bf16.gmra.mrb[24].mxu1 %vm307_vm8, %v18615_v44  ;;  %v18992_v44 = vld [vmem:[%s7621_s21] ss:$0 sm:$0xff] }
 0x7ef   : >> { %13755 = vmatprep.mubr.msk.bf16.mxu1 %vm307_vm8, %v18618_v56 }
 0x7f6   : >> { %13756 = vmatmul.mubr.msk.bf16.gmra.mrb[28].mxu1 %vm307_vm8, %v18623_v36 }
 0x7f7   : >> { %13759 = vmatprep.mubr.msk.bf16.mxu1 %vm307_vm8, %v18634_v2  ;;  %v20010_v2 = vld [vmem:[#allocation73_spill] sm:$0xff] }
 0x7fe   : >> { %13760 = vmatmul.mubr.msk.bf16.gmra.mrb[32].mxu1 %vm307_vm8, %v10772_v46 }
 0x891   : >> { %v13729_v56 = vpop.f32.mrb[0].mxu1 }
 0x892   : >> { %v11060_v45 = vadd.f32 %v13729_v56, %v18992_v44  ;;  %v10873_v49 = vpop.f32.mrb[1].mxu1 }
 0x893   : >> { %v11058_v36 = vadd.f32 %v18992_v44, %v10873_v49  ;;  %v13730_v47 = vpop.f32.mrb[2].mxu1  ;;  %v20040_v49 = vld [vmem:[#allocation65_spill] sm:$0xff] }
 0x894   : >> { %v11096_v19 = vadd.f32 %v20010_v2, %v11060_v45  ;;  %v11061_v32 = vadd.f32 %v13730_v47, %v18992_v44  ;;  %v10876_v4 = vpop.f32.mrb[3].mxu1 }
 0x895   : >> { %v11094_v5 = vadd.f32 %v20011_v18, %v11058_v36  ;;  %v11059_v30 = vadd.f32 %v18992_v44, %v10876_v4  ;;  %v20041_v4 = vld [vmem:[#allocation67_spill] sm:$0xff] }
 0x896   : >> { %v11132_v22 = vmax.f32 %v11096_v19, 0.0  ;;  %v11097_v58 = vadd.f32 %v20012_v25, %v11061_v32 }
 0x897   : >> { %v11130_v14 = vmax.f32 %v11094_v5, 0.0  ;;  %v11095_v61 = vadd.f32 %v20013_v15, %v11059_v30 }
 0x898   : >> { %v11133_v50 = vmax.f32 %v11097_v58, 0.0  ;;  %v19003_v6 = vmul.f32 %v11132_v22, %v20014_v37  }
 0x899   : >> { %v11131_v52 = vmax.f32 %v11095_v61, 0.0  ;;  %v13733_v29 = vpop.f32.mrb[4].mxu1  ;;  %v19010_v3 = vmul.f32 %v11130_v14, %v20020_v31  }
 0x89a   : >> { %20015 = vst [vmem:[#allocation106_spill] sm:$0xff] %v19003_v6  ;;  %v20016_v0 = vmov %v19003_v6  ;;  %v19006_v37 = vmul.f32 %v11133_v50, %v20017_v7   ;;  %v11064_v17 = vadd.f32 %v13733_v29, %v18992_v44  ;;  %v10889_v34 = vpop.f32.mrb[5].mxu1 }
 0x89b   : >> { %20021 = vst [vmem:[#allocation108_spill] sm:$0xff] %v19010_v3  ;;  %v20022_v11 = vmov %v19010_v3  ;;  %v19013_v30 = vmul.f32 %v11131_v52, %v20023_v35   ;;  %v11062_v33 = vadd.f32 %v18992_v44, %v10889_v34  ;;  %v13734_v8 = vpop.f32.mrb[6].mxu1  ;;  %v20044_v52 = vld [vmem:[#allocation7_spill] sm:$0xff]  ;;  %v20048_v34 = vld [vmem:[#allocation9_spill] sm:$0xff] }
 0x89c   : >> { %20018 = vst [vmem:[#allocation107_spill] sm:$0xff] %v19006_v37  ;;  %v20019_v53 = vmov %v19006_v37  ;;  %v11100_v39 = vadd.f32 %v20026_v26, %v11064_v17  ;;  %v11065_v28 = vadd.f32 %v13734_v8, %v18992_v44  ;;  %v10892_v57 = vpop.f32.mrb[7].mxu1  ;;  %v20046_v37 = vld [vmem:[#allocation8_spill] sm:$0xff] }
 0x89d   : >> { %20024 = vst [vmem:[#allocation109_spill] sm:$0xff] %v19013_v30  ;;  %v20025_v21 = vmov %v19013_v30  ;;  %v11203_v13 = vpack.c.bf16 %v20019_v53, %v20016_v0  ;;  %v11098_v9 = vadd.f32 %v20027_v12, %v11062_v33  ;;  %v11063_v54 = vadd.f32 %v18992_v44, %v10892_v57  ;;  %v20042_v30 = vld [vmem:[#allocation64_spill] sm:$0xff] }
 0x89e   : >> { %v11202_v51 = vpack.c.bf16 %v20025_v21, %v20022_v11  ;;  %v11136_v1 = vmax.f32 %v11100_v39, 0.0  ;;  %v11101_v41 = vadd.f32 %v20028_v23, %v11065_v28  ;;  %v20052_v28 = vld [vmem:[#allocation41_spill] sm:$0xff] }
 0x89f   : >> { %11221 = vst.msk [vmem:[#allocation3 + $0x18] sm:$0xff] %vm307_vm8, %v11203_v13  ;;  %v11134_v60 = vmax.f32 %v11098_v9, 0.0  ;;  %v11099_v24 = vadd.f32 %v20029_v59, %v11063_v54  ;;  %v20053_v9 = vld [vmem:[#allocation63_spill] sm:$0xff] }
 0x8a0   : >> { %11220 = vst.msk [vmem:[#allocation3 + $0x10] sm:$0xff] %vm307_vm8, %v11202_v51  ;;  %v11137_v3 = vmax.f32 %v11101_v41, 0.0  ;;  %v19029_v31 = vmul.f32 %v11136_v1, %v20030_v62   ;;  %v20054_v41 = vld [vmem:[#allocation61_spill] sm:$0xff] }
 0x8a1   : >> { %v11135_v48 = vmax.f32 %v11099_v24, 0.0  ;;  %v13737_v10 = vpop.f32.mrb[8].mxu1  ;;  %v19036_v35 = vmul.f32 %v11134_v60, %v20034_v16   ;;  %v20055_v24 = vld [vmem:[#allocation62_spill] sm:$0xff] }
 0x8a2   : >> { %v20031_v55 = vmov %v19029_v31  ;;  %v19032_v58 = vmul.f32 %v11137_v3, %v20032_v27   ;;  %v11068_v20 = vadd.f32 %v13737_v10, %v18992_v44  ;;  %v10905_v40 = vpop.f32.mrb[9].mxu1  ;;  %v20050_v31 = vld [vmem:[#allocation25_spill] sm:$0xff]  ;;  %v20056_v27 = vld [vmem:[#allocation10_spill] sm:$0xff] }
 0x8a3   : >> { %20035 = vst [vmem:[#allocation110_spill] sm:$0xff] %v19036_v35  ;;  %v20036_v38 = vmov %v19036_v35  ;;  %v19039_v19 = vmul.f32 %v11135_v48, %v20037_v63   ;;  %v11066_v46 = vadd.f32 %v18992_v44, %v10905_v40  ;;  %v13738_v56 = vpop.f32.mrb[10].mxu1  ;;  %11244 = vst.msk [vmem:[%s15430_s22 + $0x30] sm:$0xff] (%p19231_p4), %vm307_vm8, %v20031_v55 }
 0x8a4   : >> { %v20033_v43 = vmov %v19032_v58  ;;  %v11104_v36 = vadd.f32 %v20040_v49, %v11068_v20  ;;  %v11069_v47 = vadd.f32 %v13738_v56, %v18992_v44  ;;  %v10908_v2 = vpop.f32.mrb[11].mxu1  ;;  %v20043_v58 = vld [vmem:[#allocation66_spill] sm:$0xff] }
 0x8a5   : >> { %20038 = vst [vmem:[#allocation111_spill] sm:$0xff] %v19039_v19  ;;  %v20039_v42 = vmov %v19039_v19  ;;  %v11205_v45 = vpack.c.bf16 %v20033_v43, %v20031_v55  ;;  %v11102_v18 = vadd.f32 %v20041_v4, %v11066_v46  ;;  %v11067_v5 = vadd.f32 %v18992_v44, %v10908_v2  ;;  %v20059_v46 = vld [vmem:[#allocation11_spill] sm:$0xff]  ;;  %11245 = vst.msk [vmem:[%s15430_s22 + $0x38] sm:$0xff] (%p19231_p4), %vm307_vm8, %v20033_v43 }
 0x8a6   : >> { %v11204_v32 = vpack.c.bf16 %v20039_v42, %v20036_v38  ;;  %v11140_v19 = vmax.f32 %v11104_v36, 0.0  ;;  %v11105_v22 = vadd.f32 %v20042_v30, %v11069_v47  ;;  %v20064_v30 = vld [vmem:[#allocation60_spill] sm:$0xff] }
 0x8a7   : >> { %11223 = vst.msk [vmem:[#allocation3 + $0x28] sm:$0xff] %vm307_vm8, %v11205_v45  ;;  %v11138_v25 = vmax.f32 %v11102_v18, 0.0  ;;  %v11103_v14 = vadd.f32 %v20043_v58, %v11067_v5 }
 0x8a8   : >> { %11222 = vst.msk [vmem:[#allocation3 + $0x20] sm:$0xff] %vm307_vm8, %v11204_v32  ;;  %v11141_v15 = vmax.f32 %v11105_v22, 0.0  ;;  %v19055_v48 = vmul.f32 %v11140_v19, %v20044_v52   ;;  %v20063_v32 = vld [vmem:[#allocation58_spill] sm:$0xff] }
 0x8a9   : >> { %v11139_v61 = vmax.f32 %v11103_v14, 0.0  ;;  %v13741_v50 = vpop.f32.mrb[12].mxu1  ;;  %v19062_v20 = vmul.f32 %v11138_v25, %v20048_v34   ;;  %v20065_v14 = vld [vmem:[#allocation57_spill] sm:$0xff] }
 0x8aa   : >> { %v20045_v29 = vmov %v19055_v48  ;;  %v19058_v26 = vmul.f32 %v11141_v15, %v20046_v37   ;;  %v11072_v6 = vadd.f32 %v13741_v50, %v18992_v44  ;;  %v10921_v7 = vpop.f32.mrb[13].mxu1  ;;  %v20066_v50 = vld [vmem:[#allocation59_spill] sm:$0xff]  ;;  %v20067_v34 = vld [vmem:[#allocation28_spill] sm:$0xff] }
 0x8ab   : >> { %v20049_v8 = vmov %v19062_v20  ;;  %v19065_v45 = vmul.f32 %v11139_v61, %v20050_v31   ;;  %v11070_v35 = vadd.f32 %v18992_v44, %v10921_v7  ;;  %v13742_v33 = vpop.f32.mrb[14].mxu1  ;;  %v20057_v20 = vld [vmem:[#allocation24_spill] sm:$0xff]  ;;  %11248 = vst.msk [vmem:[%s15430_s22 + $0x50] sm:$0xff] (%p19231_p4), %vm307_vm8, %v20045_v29 }
 0x8ac   : >> { %v20047_v17 = vmov %v19058_v26  ;;  %v11108_v57 = vadd.f32 %v20052_v28, %v11072_v6  ;;  %v11073_v51 = vadd.f32 %v13742_v33, %v18992_v44  ;;  %v10924_v26 = vpop.f32.mrb[15].mxu1  ;;  %v20069_v31 = vld [vmem:[#allocation12_spill] sm:$0xff]  ;;  %11246 = vst.msk [vmem:[%s15430_s22 + $0x40] sm:$0xff] (%p19231_p4), %vm307_vm8, %v20049_v8 }
 0x8ad   : >> { %v20051_v13 = vmov %v19065_v45  ;;  %v11207_v39 = vpack.c.bf16 %v20047_v17, %v20045_v29  ;;  %v11106_v54 = vadd.f32 %v20053_v9, %v11070_v35  ;;  %v11071_v1 = vadd.f32 %v18992_v44, %v10924_v26  ;;  %v20061_v45 = vld [vmem:[#allocation29_spill] sm:$0xff]  ;;  %v20073_v26 = vld [vmem:[#allocation14_spill] sm:$0xff]  ;;  %11249 = vst.msk [vmem:[%s15430_s22 + $0x58] sm:$0xff] (%p19231_p4), %vm307_vm8, %v20047_v17 }
 0x8ae   : >> { %v11206_v12 = vpack.c.bf16 %v20051_v13, %v20049_v8  ;;  %v11144_v23 = vmax.f32 %v11108_v57, 0.0  ;;  %v11109_v60 = vadd.f32 %v20054_v41, %v11073_v51  ;;  %v20071_v51 = vld [vmem:[#allocation13_spill] sm:$0xff]  ;;  %11247 = vst.msk [vmem:[%s15430_s22 + $0x48] sm:$0xff] (%p19231_p4), %vm307_vm8, %v20051_v13 }
 0x8af   : >> { %11225 = vst.msk [vmem:[#allocation3 + $0x38] sm:$0xff] %vm307_vm8, %v11207_v39  ;;  %v11142_v59 = vmax.f32 %v11106_v54, 0.0  ;;  %v11107_v3 = vadd.f32 %v20055_v24, %v11071_v1 }
 0x8b0   : >> { %11224 = vst.msk [vmem:[#allocation3 + $0x30] sm:$0xff] %vm307_vm8, %v11206_v12  ;;  %v11145_v48 = vmax.f32 %v11109_v60, 0.0  ;;  %v19081_v1 = vmul.f32 %v11144_v23, %v20056_v27   ;;  %v20075_v60 = vld [vmem:[#allocation54_spill] sm:$0xff] }
 0x8b1   : >> { %v11143_v10 = vmax.f32 %v11107_v3, 0.0  ;;  %v13745_v62 = vpop.f32.mrb[16].mxu1  ;;  %v19088_v9 = vmul.f32 %v11142_v59, %v20059_v46   ;;  %v20078_v46 = vld [vmem:[#allocation55_spill] sm:$0xff] }
 0x8b2   : >> { %v19084_v15 = vmul.f32 %v11145_v48, %v20057_v20   ;;  %v11076_v16 = vadd.f32 %v13745_v62, %v18992_v44  ;;  %v10937_v63 = vpop.f32.mrb[17].mxu1  ;;  %v20076_v48 = vld [vmem:[#allocation56_spill] sm:$0xff]  ;;  %v20077_v20 = vld [vmem:[#allocation53_spill] sm:$0xff]  ;;  %20145 = vst [vmem:[#allocation41_spill] sm:$0xff] %v19081_v1  ;;  %11252 = vst.msk [vmem:[%s15430_s22 + $0x70] sm:$0xff] (%p19231_p4), %vm307_vm8, %v19081_v1 }
 0x8b3   : >> { %v20060_v56 = vmov %v19088_v9  ;;  %v19091_v12 = vmul.f32 %v11143_v10, %v20061_v45   ;;  %v11074_v49 = vadd.f32 %v18992_v44, %v10937_v63  ;;  %v13746_v36 = vpop.f32.mrb[18].mxu1 }
 0x8b4   : >> { %v20058_v40 = vmov %v19084_v15  ;;  %v11112_v4 = vadd.f32 %v20063_v32, %v11076_v16  ;;  %v11077_v18 = vadd.f32 %v13746_v36, %v18992_v44  ;;  %v10940_v5 = vpop.f32.mrb[19].mxu1  ;;  %v20079_v32 = vld [vmem:[#allocation16_spill] sm:$0xff]  ;;  %11250 = vst.msk [vmem:[%s15430_s22 + $0x60] sm:$0xff] (%p19231_p4), %vm307_vm8, %v20060_v56 }
 0x8b5   : >> { %v20062_v47 = vmov %v19091_v12  ;;  %v11209_v2 = vpack.c.bf16 %v20058_v40, %v19081_v1  ;;  %v11110_v22 = vadd.f32 %v20064_v30, %v11074_v49  ;;  %v11075_v25 = vadd.f32 %v18992_v44, %v10940_v5  ;;  %11253 = vst.msk [vmem:[%s15430_s22 + $0x78] sm:$0xff] (%p19231_p4), %vm307_vm8, %v20058_v40 }
 0x8b6   : >> { %v11208_v19 = vpack.c.bf16 %v20062_v47, %v20060_v56  ;;  %v11148_v58 = vmax.f32 %v11112_v4, 0.0  ;;  %v11113_v15 = vadd.f32 %v20065_v14, %v11077_v18  ;;  %v20081_v18 = vld [vmem:[#allocation4_spill] sm:$0xff]  ;;  %11251 = vst.msk [vmem:[%s15430_s22 + $0x68] sm:$0xff] (%p19231_p4), %vm307_vm8, %v20062_v47 }
 0x8b7   : >> { %11227 = vst.msk [vmem:[#allocation3 + $0x48] sm:$0xff] %vm307_vm8, %v11209_v2  ;;  %v11146_v61 = vmax.f32 %v11110_v22, 0.0  ;;  %v11111_v52 = vadd.f32 %v20066_v50, %v11075_v25  ;;  %v20085_v25 = vld [vmem:[#allocation21_spill] sm:$0xff] }
 0x8b8   : >> { %11226 = vst.msk [vmem:[#allocation3 + $0x40] sm:$0xff] %vm307_vm8, %v11208_v19  ;;  %v11149_v37 = vmax.f32 %v11113_v15, 0.0  ;;  %v19107_v33 = vmul.f32 %v11148_v58, %v20067_v34  }
 0x8b9   : >> { %v11147_v6 = vmax.f32 %v11111_v52, 0.0  ;;  %v13749_v7 = vpop.f32.mrb[20].mxu1  ;;  %v19114_v22 = vmul.f32 %v11146_v61, %v20071_v51  }
 0x8ba   : >> { %v20068_v39 = vmov %v19107_v33  ;;  %v19110_v50 = vmul.f32 %v11149_v37, %v20069_v31   ;;  %v11080_v35 = vadd.f32 %v13749_v7, %v18992_v44  ;;  %v10953_v57 = vpop.f32.mrb[21].mxu1  ;;  %v20088_v7 = vld [vmem:[#allocation52_spill] sm:$0xff] }
 0x8bb   : >> { %v20072_v54 = vmov %v19114_v22  ;;  %v19117_v61 = vmul.f32 %v11147_v6, %v20073_v26   ;;  %v11078_v12 = vadd.f32 %v18992_v44, %v10953_v57  ;;  %v13750_v9 = vpop.f32.mrb[22].mxu1  ;;  %v20083_v22 = vld [vmem:[#allocation18_spill] sm:$0xff]  ;;  %v20089_v26 = vld [vmem:[#allocation49_spill] sm:$0xff]  ;;  %11256 = vst.msk [vmem:[%s15430_s22 + $0x90] sm:$0xff] (%p19231_p4), %vm307_vm8, %v20068_v39 }
 0x8bc   : >> { %v20070_v28 = vmov %v19110_v50  ;;  %v11116_v33 = vadd.f32 %v20075_v60, %v11080_v35  ;;  %v11081_v59 = vadd.f32 %v13750_v9, %v18992_v44  ;;  %v10956_v24 = vpop.f32.mrb[23].mxu1  ;;  %11254 = vst.msk [vmem:[%s15430_s22 + $0x80] sm:$0xff] (%p19231_p4), %vm307_vm8, %v20072_v54 }
 0x8bd   : >> { %v20074_v23 = vmov %v19117_v61  ;;  %v11211_v41 = vpack.c.bf16 %v20070_v28, %v20068_v39  ;;  %v11114_v10 = vadd.f32 %v20076_v48, %v11078_v12  ;;  %v11079_v62 = vadd.f32 %v18992_v44, %v10956_v24  ;;  %v20087_v61 = vld [vmem:[#allocation50_spill] sm:$0xff]  ;;  %v20091_v48 = vld [vmem:[#allocation23_spill] sm:$0xff]  ;;  %11257 = vst.msk [vmem:[%s15430_s22 + $0x98] sm:$0xff] (%p19231_p4), %vm307_vm8, %v20070_v28 }
 0x8be   : >> { %v11210_v3 = vpack.c.bf16 %v20074_v23, %v20072_v54  ;;  %v11152_v27 = vmax.f32 %v11116_v33, 0.0  ;;  %v11117_v16 = vadd.f32 %v20077_v20, %v11081_v59  ;;  %11255 = vst.msk [vmem:[%s15430_s22 + $0x88] sm:$0xff] (%p19231_p4), %vm307_vm8, %v20074_v23 }
 0x8bf   : >> { %11229 = vst.msk [vmem:[#allocation3 + $0x58] sm:$0xff] %vm307_vm8, %v11211_v41  ;;  %v11150_v63 = vmax.f32 %v11114_v10, 0.0  ;;  %v11115_v45 = vadd.f32 %v20078_v46, %v11079_v62  ;;  %v20090_v41 = vld [vmem:[#allocation51_spill] sm:$0xff]  ;;  %v20093_v62 = vld [vmem:[#allocation27_spill] sm:$0xff] }
 0x8c0   : >> { %11228 = vst.msk [vmem:[#allocation3 + $0x50] sm:$0xff] %vm307_vm8, %v11210_v3  ;;  %v11153_v49 = vmax.f32 %v11117_v16, 0.0  ;;  %v19133_v4 = vmul.f32 %v11152_v27, %v20079_v32  }
 0x8c1   : >> { %v11151_v36 = vmax.f32 %v11115_v45, 0.0  ;;  %v13753_v2 = vpop.f32.mrb[24].mxu1  ;;  %v20096_v45 = vld [vmem:[#allocation31_spill] sm:$0xff] }
 0x8c2   : >> { %v20080_v52 = vmov %v19133_v4  ;;  %v19136_v5 = vmul.f32 %v11153_v49, %v20081_v18   ;;  %v11084_v19 = vadd.f32 %v13753_v2, %v18992_v44  ;;  %v10969_v30 = vpop.f32.mrb[25].mxu1  ;;  %v19140_v2 = vmul.f32 %v11150_v63, %v20083_v22   ;;  %v20095_v63 = vld [vmem:[#allocation30_spill] sm:$0xff] }
 0x8c3   : >> { %v19143_v49 = vmul.f32 %v11151_v36, %v20085_v25   ;;  %v11082_v58 = vadd.f32 %v18992_v44, %v10969_v30  ;;  %v13754_v14 = vpop.f32.mrb[26].mxu1  ;;  %11260 = vst.msk [vmem:[%s15430_s22 + $0xb0] sm:$0xff] (%p19231_p4), %vm307_vm8, %v20080_v52 }
 0x8c4   : >> { %v20082_v57 = vmov %v19136_v5  ;;  %v20084_v51 = vmov %v19140_v2  ;;  %v11120_v4 = vadd.f32 %v20087_v61, %v11084_v19  ;;  %v11085_v50 = vadd.f32 %v13754_v14, %v18992_v44  ;;  %v10972_v37 = vpop.f32.mrb[27].mxu1  ;;  %v20098_v5 = vld [vmem:[#allocation46_spill] sm:$0xff]  ;;  %v20100_v61 = vld [vmem:[#allocation45_spill] sm:$0xff] }
 0x8c5   : >> { %v20086_v60 = vmov %v19143_v49  ;;  %v11213_v15 = vpack.c.bf16 %v20082_v57, %v20080_v52  ;;  %v11118_v34 = vadd.f32 %v20088_v7, %v11082_v58  ;;  %v11083_v31 = vadd.f32 %v18992_v44, %v10972_v37  ;;  %v20099_v58 = vld [vmem:[#allocation48_spill] sm:$0xff]  ;;  %v20101_v37 = vld [vmem:[#allocation47_spill] sm:$0xff]  ;;  %11258 = vst.msk [vmem:[%s15430_s22 + $0xa0] sm:$0xff] (%p19231_p4), %vm307_vm8, %v20084_v51  ;;  %11261 = vst.msk [vmem:[%s15430_s22 + $0xb8] sm:$0xff] (%p19231_p4), %vm307_vm8, %v20082_v57 }
 0x8c6   : >> { %v11212_v6 = vpack.c.bf16 %v20086_v60, %v20084_v51  ;;  %v11156_v35 = vmax.f32 %v11120_v4, 0.0  ;;  %v11121_v12 = vadd.f32 %v20089_v26, %v11085_v50  ;;  %v20104_v26 = vld [vmem:[#allocation33_spill] sm:$0xff]  ;;  %11259 = vst.msk [vmem:[%s15430_s22 + $0xa8] sm:$0xff] (%p19231_p4), %vm307_vm8, %v20086_v60 }
 0x8c7   : >> { %11231 = vst.msk [vmem:[#allocation3 + $0x68] sm:$0xff] %vm307_vm8, %v11213_v15  ;;  %v11154_v9 = vmax.f32 %v11118_v34, 0.0  ;;  %v11119_v33 = vadd.f32 %v20090_v41, %v11083_v31 }
 0x8c8   : >> { %11230 = vst.msk [vmem:[#allocation3 + $0x60] sm:$0xff] %vm307_vm8, %v11212_v6  ;;  %v11157_v59 = vmax.f32 %v11121_v12, 0.0  ;;  %v19159_v18 = vmul.f32 %v11156_v35, %v20091_v48   ;;  %v20102_v35 = vld [vmem:[#allocation32_spill] sm:$0xff] }
 0x8c9   : >> { %v11155_v24 = vmax.f32 %v11119_v33, 0.0  ;;  %v13757_v3 = vpop.f32.mrb[28].mxu1  ;;  %v19166_v46 = vmul.f32 %v11154_v9, %v20095_v63   ;;  %v20106_v33 = vld [vmem:[#allocation34_spill] sm:$0xff] }
 0x8ca   : >> { %v20092_v10 = vmov %v19159_v18  ;;  %v19162_v6 = vmul.f32 %v11157_v59, %v20093_v62   ;;  %v11088_v27 = vadd.f32 %v13757_v3, %v18992_v44  ;;  %v10985_v20 = vpop.f32.mrb[29].mxu1  ;;  %v20108_v59 = vld [vmem:[#allocation35_spill] sm:$0xff] }
 0x8cb   : >> { %v19169_v25 = vmul.f32 %v11155_v24, %v20096_v45   ;;  %v11086_v49 = vadd.f32 %v18992_v44, %v10985_v20  ;;  %v13758_v36 = vpop.f32.mrb[30].mxu1  ;;  %11262 = vst.msk [vmem:[%s15430_s22 + $0xc0] sm:$0xff] (%p19231_p4), %vm307_vm8, %v19166_v46  ;;  %11264 = vst.msk [vmem:[%s15430_s22 + $0xd0] sm:$0xff] (%p19231_p4), %vm307_vm8, %v20092_v10 }
 0x8cc   : >> { %v20094_v16 = vmov %v19162_v6  ;;  %v11124_v18 = vadd.f32 %v20098_v5, %v11088_v27  ;;  %v11089_v19 = vadd.f32 %v13758_v36, %v18992_v44  ;;  %v10988_v30 = vpop.f32.mrb[31].mxu1  ;;  %v20110_v27 = vld [vmem:[#allocation43_spill] sm:$0xff] }
 0x8cd   : >> { %v20097_v32 = vmov %v19169_v25  ;;  %v11215_v2 = vpack.c.bf16 %v20094_v16, %v20092_v10  ;;  %v11122_v14 = vadd.f32 %v20099_v58, %v11086_v49  ;;  %v11087_v15 = vadd.f32 %v18992_v44, %v10988_v30  ;;  %v20111_v49 = vld [vmem:[#allocation44_spill] sm:$0xff]  ;;  %11265 = vst.msk [vmem:[%s15430_s22 + $0xd8] sm:$0xff] (%p19231_p4), %vm307_vm8, %v20094_v16 }
 0x8ce   : >> { %v11214_v22 = vpack.c.bf16 %v20097_v32, %v19166_v46  ;;  %v11160_v25 = vmax.f32 %v11124_v18, 0.0  ;;  %v11125_v4 = vadd.f32 %v20100_v61, %v11089_v19  ;;  %v20112_v18 = vld [vmem:[#allocation42_spill] sm:$0xff]  ;;  %11263 = vst.msk [vmem:[%s15430_s22 + $0xc8] sm:$0xff] (%p19231_p4), %vm307_vm8, %v20097_v32 }
 0x8cf   : >> { %11233 = vst.msk [vmem:[#allocation3 + $0x78] sm:$0xff] %vm307_vm8, %v11215_v2  ;;  %v11158_v50 = vmax.f32 %v11122_v14, 0.0  ;;  %v11123_v6 = vadd.f32 %v20101_v37, %v11087_v15  ;;  %v20116_v61 = vld [vmem:[#allocation37_spill] sm:$0xff] }
 0x8d0   : >> { %11232 = vst.msk [vmem:[#allocation3 + $0x70] sm:$0xff] %vm307_vm8, %v11214_v22  ;;  %v11161_v7 = vmax.f32 %v11125_v4, 0.0  ;;  %v19185_v41 = vmul.f32 %v11160_v25, %v20102_v35   ;;  %v20113_v22 = vld [vmem:[#allocation40_spill] sm:$0xff]  ;;  %v20119_v4 = vld [vmem:[#allocation38_spill] sm:$0xff] }
 0x8d1   : >> { %v11159_v34 = vmax.f32 %v11123_v6, 0.0  ;;  %v13761_v31 = vpop.f32.mrb[32].mxu1  ;;  %v19192_v5 = vmul.f32 %v11158_v50, %v20106_v33   ;;  %v20114_v25 = vld [vmem:[#allocation36_spill] sm:$0xff]  ;;  %v20121_v50 = vld [vmem:[#allocation39_spill] sm:$0xff]  ;;  %v20141_v33 = vmov %v20068_v39  ;;  %v20155_v35 = vld [vmem:[#allocation110_spill] sm:$0xff] }
 0x8d2   : >> { %v20103_v62 = vmov %v19185_v41  ;;  %v19188_v63 = vmul.f32 %v11161_v7, %v20104_v26   ;;  %v11092_v12 = vadd.f32 %v13761_v31, %v18992_v44  ;;  %v11001_v9 = vpop.f32.mrb[33].mxu1  ;;  %v20148_v26 = vmov %v20047_v17  ;;  %v20165_v35 = vld [vmem:[#allocation110_spill] sm:$0xff] (%p19231_p4) }
 0x8d3   : >> { %v20107_v21 = vmov %v19192_v5  ;;  %v19195_v34 = vmul.f32 %v11159_v34, %v20108_v59   ;;  %v11090_v24 = vadd.f32 %v18992_v44, %v11001_v9  ;;  %v13762_v3 = vpop.f32.mrb[34].mxu1  ;;  %v20147_v9 = vmov %v20060_v56  ;;  %11242 = vst.msk [vmem:[%s15430_s22 + $0x20] sm:$0xff] (%p19231_p4), %vm307_vm8, %v20165_v35  ;;  %v20166_v26 = vld [vmem:[#allocation111_spill] sm:$0xff] (%p19231_p4)  ;;  %11268 = vst.msk [vmem:[%s15430_s22 + $0xf0] sm:$0xff] (%p19231_p4), %vm307_vm8, %v20103_v62 }
 0x8d4   : >> { %v20105_v11 = vmov %v19188_v63  ;;  %v11128_v41 = vadd.f32 %v20110_v27, %v11092_v12  ;;  %v11093_v20 = vadd.f32 %v13762_v3, %v18992_v44  ;;  %v11004_v63 = vpop.f32.mrb[35].mxu1  ;;  %v20146_v12 = vmov %v20062_v47  ;;  %v20159_v3 = vld [vmem:[#allocation108_spill] sm:$0xff]  ;;  %11243 = vst.msk [vmem:[%s15430_s22 + $0x28] sm:$0xff] (%p19231_p4), %vm307_vm8, %v20166_v26  ;;  %11266 = vst.msk [vmem:[%s15430_s22 + $0xe0] sm:$0xff] (%p19231_p4), %vm307_vm8, %v20107_v21 }
 0x8d5   : >> { %v20109_v0 = vmov %v19195_v34  ;;  %v11217_v48 = vpack.c.bf16 %v20105_v11, %v20103_v62  ;;  %v11126_v36 = vadd.f32 %v20111_v49, %v11090_v24  ;;  %v11091_v2 = vadd.f32 %v18992_v44, %v11004_v63  ;;  %v20162_v3 = vld [vmem:[#allocation109_spill] sm:$0xff] (%p19231_p4)  ;;  %11269 = vst.msk [vmem:[%s15430_s22 + $0xf8] sm:$0xff] (%p19231_p4), %vm307_vm8, %v20105_v11 }
 0x8d6   : >> { %v11216_v45 = vpack.c.bf16 %v20109_v0, %v20107_v21  ;;  %v11164_v5 = vmax.f32 %v11128_v41, 0.0  ;;  %v11129_v19 = vadd.f32 %v20112_v18, %v11093_v20  ;;  %v20128_v63 = vmov %v20105_v11  ;;  %11239 = vst.msk [vmem:[%s15430_s22 + $0x8] sm:$0xff] (%p19231_p4), %vm307_vm8, %v20162_v3  ;;  %11267 = vst.msk [vmem:[%s15430_s22 + $0xe8] sm:$0xff] (%p19231_p4), %vm307_vm8, %v20109_v0 }
 0x8d7   : >> { %11235 = vst.msk [vmem:[#allocation3 + $0x88] sm:$0xff] %vm307_vm8, %v11217_v48  ;;  %v11162_v30 = vmax.f32 %v11126_v36, 0.0  ;;  %v11127_v58 = vadd.f32 %v20113_v22, %v11091_v2  ;;  %v20129_v41 = vmov %v20103_v62  ;;  %v20133_v18 = vmov %v20092_v10 }
 0x8d8   : >> { %11234 = vst.msk [vmem:[#allocation3 + $0x80] sm:$0xff] %vm307_vm8, %v11216_v45  ;;  %v11165_v14 = vmax.f32 %v11129_v19, 0.0  ;;  %v19211_v27 = vmul.f32 %v11164_v5, %v20114_v25   ;;  %v20131_v5 = vmov %v20107_v21  ;;  %v20134_v25 = vmov %v20097_v32  ;;  %v20154_v19 = vld [vmem:[#allocation111_spill] sm:$0xff] }
 0x8d9   : >> { %v11163_v15 = vmax.f32 %v11127_v58, 0.0  ;;  %v19217_v7 = vmul.f32 %v11162_v30, %v20119_v4   ;;  %v20135_v24 = vmov %v19166_v46  ;;  %v20136_v36 = vmov %v20082_v57  ;;  %v20158_v30 = vld [vmem:[#allocation109_spill] sm:$0xff] }
 0x8da   : >> { %v20115_v53 = vmov %v19211_v27  ;;  %v19214_v59 = vmul.f32 %v11165_v14, %v20116_v61   ;;  %v20137_v4 = vmov %v20080_v52  ;;  %v20138_v49 = vmov %v20086_v60  ;;  %v20157_v14 = vld [vmem:[#allocation106_spill] sm:$0xff]  ;;  %3993 = sbr.rel (!%p19231_p4) target bundleno = 583 (0x247), region = 132 }
 0x8db   : >> { %v20120_v44 = vmov %v19217_v7  ;;  %v19220_v37 = vmul.f32 %v11163_v15, %v20121_v50   ;;  %v20125_v27 = vmov %v20115_v53  ;;  %v20139_v2 = vmov %v20084_v51  ;;  %11272 = vst.msk [vmem:[%s15430_s22 + $0x110] sm:$0xff] (%p19231_p4), %vm307_vm8, %v20115_v53 }
 0x8dc   : >> { %20117 = vst [vmem:[#allocation112_spill] sm:$0xff] %v19214_v59  ;;  %v20118_v38 = vmov %v19214_v59  ;;  %v20127_v7 = vmov %v20120_v44  ;;  %v20140_v50 = vmov %v20070_v28  ;;  %v20142_v61 = vmov %v20074_v23  ;;  %11270 = vst.msk [vmem:[%s15430_s22 + $0x100] sm:$0xff] (%p19231_p4), %vm307_vm8, %v20120_v44 }
 0x8dd   : >> { %v20122_v42 = vmov %v19220_v37  ;;  %v11219_v6 = vpack.c.bf16 %v20118_v38, %v20115_v53  ;;  %v20124_v59 = vmov %v20118_v38  ;;  %v20143_v22 = vmov %v20072_v54  ;;  %v20156_v37 = vld [vmem:[#allocation107_spill] sm:$0xff]  ;;  %v20161_v38 = vld [vmem:[#allocation108_spill] sm:$0xff] (%p19231_p4)  ;;  %v20163_v7 = vld [vmem:[#allocation106_spill] sm:$0xff] (%p19231_p4) }
 0x8de   : >> { %v11218_v34 = vpack.c.bf16 %v20122_v42, %v20120_v44  ;;  %20126 = vst [vmem:[#allocation40_spill] sm:$0xff] %v20122_v42  ;;  %v20144_v15 = vmov %v20058_v40  ;;  %v20149_v48 = vmov %v20045_v29  ;;  %v20150_v45 = vmov %v20051_v13  ;;  %11238 = vst.msk [vmem:[%s15430_s22] sm:$0xff] (%p19231_p4), %vm307_vm8, %v20161_v38 }
 0x8df   : >> { %11237 = vst.msk [vmem:[#allocation3 + $0x98] sm:$0xff] %vm307_vm8, %v11219_v6  ;;  %v20132_v6 = vmov %v20094_v16  ;;  %v20151_v20 = vmov %v20049_v8  ;;  %v20152_v58 = vmov %v20033_v43  ;;  %v20153_v31 = vmov %v20031_v55  ;;  %11240 = vst.msk [vmem:[%s15430_s22 + $0x10] sm:$0xff] (%p19231_p4), %vm307_vm8, %v20163_v7 }
 0x8e0   : >> { %11236 = vst.msk [vmem:[#allocation3 + $0x90] sm:$0xff] %vm307_vm8, %v11218_v34  ;;  %v20130_v34 = vmov %v20109_v0  ;;  %v20164_v31 = vld [vmem:[#allocation107_spill] sm:$0xff] (%p19231_p4)  ;;  %11271 = vst.msk [vmem:[%s15430_s22 + $0x108] sm:$0xff] (%p19231_p4), %vm307_vm8, %v20122_v42 }
 0x8e1   : > { %11241 = vst.msk [vmem:[%s15430_s22 + $0x18] sm:$0xff] %vm307_vm8, %v20164_v31 }
 0x8e3   : > { %v20167_v55 = vld [vmem:[#allocation112_spill] sm:$0xff] }
 0x8e4   : > { %11273 = vst.msk [vmem:[%s15430_s22 + $0x118] sm:$0xff] %vm307_vm8, %v20167_v55 }
 0x8e5 PF: > { %s18_s27 = sadd.s32 1, %s15146_s27  }
 0x8e6   : > { %p15_p5 = scmp.ge.s32.totalorder %s18_s27, 4  }
 0x8e8   :  { %17 = sbr.rel (!%p15_p5) target bundleno = 1 (0x1), region = 143 }

</bundles_post_ra>
